<compile_context>
chip_gen: v7x
topology: tpu7x:2x2x1
jax: 0.10.0
libtpu: 0.0.40
codegen_flags: <defaults>
</compile_context>

<pallas_src>
import jax
import jax.numpy as jnp
from jax.experimental import pallas as pl
from jax.experimental.pallas import tpu as pltpu

EPS = 1e-5


def decoder_block(x_nchw, params):
    (w1, b1, g1, be1, w2, b2, g2, be2, wt, bt) = params
    # b1/b2 are mathematically cancelled by training-mode BatchNorm.
    del b1, b2

    x = jnp.transpose(x_nchw, (0, 2, 3, 1)).astype(jnp.float32)  # NCHW -> NHWC
    N, H, W, Cin = x.shape
    Cmid = w1.shape[-1]
    Cout = wt.shape[-1]
    H1, W1 = H - 2, W - 2
    H2, W2 = H - 4, W - 4
    rows1, rows2 = H1 * W1, H2 * W2

    # Weight flattening to matmul layouts (tiny, one-time).  bf16 at the MXU
    # input boundary; accumulation stays f32 inside the kernels.
    #   w (3,3,Ci,Co)      -> (9*Ci, Co)    matching kh/kw/ci im2col order
    #   wt (2,2,Cmid,Cout) -> (Cmid, 4*Cout), tap index (kh*2+kw) major in cols
    w1f = w1.reshape(9 * Cin, Cmid).astype(jnp.bfloat16)
    w2f = w2.reshape(9 * Cmid, Cmid).astype(jnp.bfloat16)
    wtf = jnp.transpose(wt, (2, 0, 1, 3)).reshape(Cmid, 4 * Cout).astype(jnp.bfloat16)
    btf = jnp.tile(bt.reshape(1, Cout), (1, 4)).astype(jnp.float32)

    cparams = pltpu.CompilerParams(dimension_semantics=("parallel",))

    # ------------- pass A: conv1 (3x3 VALID, im2col -> matmul) + stats ------
    def conv1_kernel(x_ref, w_ref, acc_ref, st_ref):
        xi = x_ref[0]                                        # (H, W, Cin) f32
        cols = [xi[kh:kh + H1, kw:kw + W1, :].reshape(rows1, Cin)
                for kh in range(3) for kw in range(3)]
        patches = jnp.concatenate(cols, axis=-1).astype(jnp.bfloat16)
        acc = jnp.dot(patches, w_ref[...], preferred_element_type=jnp.float32)
        acc_ref[0] = acc
        s = jnp.sum(acc, axis=0, keepdims=True)              # per-tile partials
        ss = jnp.sum(acc * acc, axis=0, keepdims=True)
        st_ref[0] = jnp.concatenate([s, ss], axis=0)

    acc1, st1 = pl.pallas_call(
        conv1_kernel,
        grid=(N,),
        in_specs=[pl.BlockSpec((1, H, W, Cin), lambda n: (n, 0, 0, 0)),
                  pl.BlockSpec((9 * Cin, Cmid), lambda n: (0, 0))],
        out_specs=[pl.BlockSpec((1, rows1, Cmid), lambda n: (n, 0, 0)),
                   pl.BlockSpec((1, 2, Cmid), lambda n: (n, 0, 0))],
        out_shape=[jax.ShapeDtypeStruct((N, rows1, Cmid), jnp.float32),
                   jax.ShapeDtypeStruct((N, 2, Cmid), jnp.float32)],
        compiler_params=cparams,
    )(x, w1f)

    def fold_bn(st, g, be, count):
        # Finalize batch stats from per-tile partials and fold BN into a
        # per-channel (scale, shift) pair.  Tiny (Cmid,) math, runs in XLA.
        s = jnp.sum(st[:, 0, :], axis=0)
        ss = jnp.sum(st[:, 1, :], axis=0)
        mu = s / count
        var = jnp.maximum(ss / count - mu * mu, 0.0)
        scale = g.reshape(-1) * jax.lax.rsqrt(var + EPS)
        shift = be.reshape(-1) - mu * scale
        return (scale.reshape(1, Cmid).astype(jnp.float32),
                shift.reshape(1, Cmid).astype(jnp.float32))

    scale1, shift1 = fold_bn(st1, g1, be1, N * rows1)

    # ------------- pass B: BN1+ReLU -> conv2 + stats -------------------------
    def conv2_kernel(a_ref, sc_ref, sh_ref, w_ref, acc_ref, st_ref):
        h1 = jnp.maximum(a_ref[0] * sc_ref[...] + sh_ref[...], 0.0)  # f32
        h1 = h1.reshape(H1, W1, Cmid)
        cols = [h1[kh:kh + H2, kw:kw + W2, :].reshape(rows2, Cmid)
                for kh in range(3) for kw in range(3)]
        patches = jnp.concatenate(cols, axis=-1).astype(jnp.bfloat16)
        acc = jnp.dot(patches, w_ref[...], preferred_element_type=jnp.float32)
        acc_ref[0] = acc
        s = jnp.sum(acc, axis=0, keepdims=True)
        ss = jnp.sum(acc * acc, axis=0, keepdims=True)
        st_ref[0] = jnp.concatenate([s, ss], axis=0)

    acc2, st2 = pl.pallas_call(
        conv2_kernel,
        grid=(N,),
        in_specs=[pl.BlockSpec((1, rows1, Cmid), lambda n: (n, 0, 0)),
                  pl.BlockSpec((1, Cmid), lambda n: (0, 0)),
                  pl.BlockSpec((1, Cmid), lambda n: (0, 0)),
                  pl.BlockSpec((9 * Cmid, Cmid), lambda n: (0, 0))],
        out_specs=[pl.BlockSpec((1, rows2, Cmid), lambda n: (n, 0, 0)),
                   pl.BlockSpec((1, 2, Cmid), lambda n: (n, 0, 0))],
        out_shape=[jax.ShapeDtypeStruct((N, rows2, Cmid), jnp.float32),
                   jax.ShapeDtypeStruct((N, 2, Cmid), jnp.float32)],
        compiler_params=cparams,
    )(acc1, scale1, shift1, w2f)

    scale2, shift2 = fold_bn(st2, g2, be2, N * rows2)

    # ------------- pass C: BN2+ReLU -> fused 4-tap ConvTranspose ------------
    # ConvTranspose2d(k=2, s=2): stride == kernel, the four taps are disjoint,
    # so they fuse into one matmul against (Cmid, 4*Cout) and one lane-dense
    # (rows2, 4*Cout) store per image.
    def convt_kernel(a_ref, sc_ref, sh_ref, w_ref, b_ref, o_ref):
        h2 = jnp.maximum(a_ref[0] * sc_ref[...] + sh_ref[...], 0.0)  # f32
        o_ref[0] = jnp.dot(h2.astype(jnp.bfloat16), w_ref[...],
                           preferred_element_type=jnp.float32) + b_ref[...]

    out_flat = pl.pallas_call(
        convt_kernel,
        grid=(N,),
        in_specs=[pl.BlockSpec((1, rows2, Cmid), lambda n: (n, 0, 0)),
                  pl.BlockSpec((1, Cmid), lambda n: (0, 0)),
                  pl.BlockSpec((1, Cmid), lambda n: (0, 0)),
                  pl.BlockSpec((Cmid, 4 * Cout), lambda n: (0, 0)),
                  pl.BlockSpec((1, 4 * Cout), lambda n: (0, 0))],
        out_specs=pl.BlockSpec((1, rows2, 4 * Cout), lambda n: (n, 0, 0)),
        out_shape=jax.ShapeDtypeStruct((N, rows2, 4 * Cout), jnp.float32),
        compiler_params=cparams,
    )(acc2, scale2, shift2, wtf, btf)

    # Single fused transpose: out_flat[(n,i,j),(kh,kw,c)] -> y[n,c,2i+kh,2j+kw]
    out6 = out_flat.reshape(N, H2, W2, 2, 2, Cout)
    y = jnp.transpose(out6, (0, 5, 1, 3, 2, 4)).reshape(N, Cout, 2 * H2, 2 * W2)
    return y


# -------------------------- pure-JAX reference ------------------------------
def _reference(x_nchw, params):
    (w1, b1, g1, be1, w2, b2, g2, be2, wt, bt) = params
    x = jnp.transpose(x_nchw, (0, 2, 3, 1)).astype(jnp.float32)

    def conv3(x, w, b):
        y = jax.lax.conv_general_dilated(
            x, w, (1, 1), 'VALID',
            dimension_numbers=('NHWC', 'HWIO', 'NHWC'))
        return y + b.reshape(1, 1, 1, -1)

    def bn_relu(y, g, be):
        mu = y.mean(axis=(0, 1, 2), keepdims=True)
        var = ((y - mu) ** 2).mean(axis=(0, 1, 2), keepdims=True)
        z = (y - mu) * jax.lax.rsqrt(var + EPS)
        z = z * g.reshape(1, 1, 1, -1) + be.reshape(1, 1, 1, -1)
        return jnp.maximum(z, 0.0)

    h = bn_relu(conv3(x, w1, b1), g1, be1)
    h = bn_relu(conv3(h, w2, b2), g2, be2)

    N, H, W, Cmid = h.shape
    Cout = wt.shape[-1]
    out = jnp.zeros((N, 2 * H, 2 * W, Cout), jnp.float32)
    for kh in range(2):
        for kw in range(2):
            tap = jnp.einsum('nhwc,co->nhwo', h, wt[kh, kw]) + bt
            out = out.at[:, kh::2, kw::2, :].set(tap)
    return jnp.transpose(out, (0, 3, 1, 2))


if __name__ == "__main__":
    # small shapes: batch=2, in_channels=4, mid_channels=8, out_channels=4,
    # spatial 16x16  ->  output (2, 4, 24, 24)
    N, Cin, Cmid, Cout, H, W = 2, 4, 8, 4, 16, 16

    key = jax.random.PRNGKey(0)
    ks = jax.random.split(key, 11)
    w1 = 0.1 * jax.random.normal(ks[0], (3, 3, Cin, Cmid), jnp.float32)
    b1 = 0.1 * jax.random.normal(ks[1], (1, Cmid), jnp.float32)
    g1 = 1.0 + 0.1 * jax.random.normal(ks[2], (1, Cmid), jnp.float32)
    be1 = 0.1 * jax.random.normal(ks[3], (1, Cmid), jnp.float32)
    w2 = 0.1 * jax.random.normal(ks[4], (3, 3, Cmid, Cmid), jnp.float32)
    b2 = 0.1 * jax.random.normal(ks[5], (1, Cmid), jnp.float32)
    g2 = 1.0 + 0.1 * jax.random.normal(ks[6], (1, Cmid), jnp.float32)
    be2 = 0.1 * jax.random.normal(ks[7], (1, Cmid), jnp.float32)
    wt = 0.1 * jax.random.normal(ks[8], (2, 2, Cmid, Cout), jnp.float32)
    bt = 0.1 * jax.random.normal(ks[9], (1, Cout), jnp.float32)
    params = (w1, b1, g1, be1, w2, b2, g2, be2, wt, bt)

    x = jax.random.normal(ks[10], (N, Cin, H, W), jnp.float32)  # NCHW input

    decoder_jit = jax.jit(decoder_block)
    out = jax.block_until_ready(decoder_jit(x, params))
    ref = jax.block_until_ready(_reference(x, params))

    assert out.shape == (N, Cout, 2 * (H - 4), 2 * (W - 4)), out.shape
    # bf16 MXU inputs (f32 accumulation) vs. the pure-f32 reference: tolerance
    # loosened from 1e-4 accordingly.
    assert jnp.allclose(out, ref, atol=3e-2, rtol=3e-2), float(
        jnp.max(jnp.abs(out - ref)))
    print("KERNEL_OK")
</pallas_src>

<mosaic_0001>
module attributes {stable_mosaic.version = 11 : i64} {
  func.func @conv1_kernel(%arg0: i32, %arg1: memref<1x16x16x4xf32, #tpu.memory_space<vmem>>, %arg2: memref<36x8xbf16, #tpu.memory_space<vmem>>, %arg3: memref<1x196x8xf32, #tpu.memory_space<vmem>>, %arg4: memref<1x2x8xf32, #tpu.memory_space<vmem>>) attributes {dimension_semantics = [#tpu.dimension_semantics<parallel>], iteration_bounds = array<i64: 2>, scalar_prefetch = 0 : i64, scratch_operands = 0 : i64, tpu.core_type = #tpu.core_type<tc>, window_params = [{transform_indices = @transform_0, window_bounds = array<i64: 1, 16, 16, 4>}, {pipeline_mode = #tpu.pipeline_mode<synchronous>, transform_indices = @transform_1, window_bounds = array<i64: 36, 8>}, {transform_indices = @transform_2, window_bounds = array<i64: 1, 196, 8>}, {transform_indices = @transform_3, window_bounds = array<i64: 1, 2, 8>}]} {
    %c0 = arith.constant 0 : index
    %c0_0 = arith.constant 0 : index
    %c0_1 = arith.constant 0 : index
    %c0_2 = arith.constant 0 : index
    %0 = vector.load %arg1[%c0, %c0_0, %c0_1, %c0_2] : memref<1x16x16x4xf32, #tpu.memory_space<vmem>>, vector<1x16x16x4xf32>
    %1 = vector.shape_cast %0 : vector<1x16x16x4xf32> to vector<16x16x4xf32>
    %2 = vector.extract_strided_slice %1 {offsets = [0, 0, 0], sizes = [14, 14, 4], strides = [1, 1, 1]} : vector<16x16x4xf32> to vector<14x14x4xf32>
    %3 = vector.shape_cast %2 : vector<14x14x4xf32> to vector<196x4xf32>
    %4 = vector.extract_strided_slice %1 {offsets = [0, 1, 0], sizes = [14, 14, 4], strides = [1, 1, 1]} : vector<16x16x4xf32> to vector<14x14x4xf32>
    %5 = vector.shape_cast %4 : vector<14x14x4xf32> to vector<196x4xf32>
    %6 = vector.extract_strided_slice %1 {offsets = [0, 2, 0], sizes = [14, 14, 4], strides = [1, 1, 1]} : vector<16x16x4xf32> to vector<14x14x4xf32>
    %7 = vector.shape_cast %6 : vector<14x14x4xf32> to vector<196x4xf32>
    %8 = vector.extract_strided_slice %1 {offsets = [1, 0, 0], sizes = [14, 14, 4], strides = [1, 1, 1]} : vector<16x16x4xf32> to vector<14x14x4xf32>
    %9 = vector.shape_cast %8 : vector<14x14x4xf32> to vector<196x4xf32>
    %10 = vector.extract_strided_slice %1 {offsets = [1, 1, 0], sizes = [14, 14, 4], strides = [1, 1, 1]} : vector<16x16x4xf32> to vector<14x14x4xf32>
    %11 = vector.shape_cast %10 : vector<14x14x4xf32> to vector<196x4xf32>
    %12 = vector.extract_strided_slice %1 {offsets = [1, 2, 0], sizes = [14, 14, 4], strides = [1, 1, 1]} : vector<16x16x4xf32> to vector<14x14x4xf32>
    %13 = vector.shape_cast %12 : vector<14x14x4xf32> to vector<196x4xf32>
    %14 = vector.extract_strided_slice %1 {offsets = [2, 0, 0], sizes = [14, 14, 4], strides = [1, 1, 1]} : vector<16x16x4xf32> to vector<14x14x4xf32>
    %15 = vector.shape_cast %14 : vector<14x14x4xf32> to vector<196x4xf32>
    %16 = vector.extract_strided_slice %1 {offsets = [2, 1, 0], sizes = [14, 14, 4], strides = [1, 1, 1]} : vector<16x16x4xf32> to vector<14x14x4xf32>
    %17 = vector.shape_cast %16 : vector<14x14x4xf32> to vector<196x4xf32>
    %18 = vector.extract_strided_slice %1 {offsets = [2, 2, 0], sizes = [14, 14, 4], strides = [1, 1, 1]} : vector<16x16x4xf32> to vector<14x14x4xf32>
    %19 = vector.shape_cast %18 : vector<14x14x4xf32> to vector<196x4xf32>
    %20 = tpu.concatenate %3, %5, %7, %9, %11, %13, %15, %17, %19 in 1 : vector<196x4xf32>, vector<196x4xf32>, vector<196x4xf32>, vector<196x4xf32>, vector<196x4xf32>, vector<196x4xf32>, vector<196x4xf32>, vector<196x4xf32>, vector<196x4xf32> -> vector<196x36xf32>
    %21 = arith.truncf %20 : vector<196x36xf32> to vector<196x36xbf16>
    %c0_3 = arith.constant 0 : index
    %c0_4 = arith.constant 0 : index
    %22 = vector.load %arg2[%c0_3, %c0_4] : memref<36x8xbf16, #tpu.memory_space<vmem>>, vector<36x8xbf16>
    %cst = arith.constant dense<0.000000e+00> : vector<196x8xf32>
    %23 = tpu.matmul %21, %22, %cst {dimension_numbers = #tpu.dot_dimension_numbers<[1], [0], [0], [1], [0, 0, 1, 1], [], []>} : vector<196x36xbf16>, vector<36x8xbf16>, vector<196x8xf32> -> vector<196x8xf32>
    %c0_5 = arith.constant 0 : index
    %c0_6 = arith.constant 0 : index
    %c0_7 = arith.constant 0 : index
    %24 = vector.load %arg3[%c0_5, %c0_6, %c0_7] : memref<1x196x8xf32, #tpu.memory_space<vmem>>, vector<1x196x8xf32>
    %25 = vector.shape_cast %24 : vector<1x196x8xf32> to vector<196x8xf32>
    %26 = vector.shape_cast %23 : vector<196x8xf32> to vector<1x196x8xf32>
    tpu.vector_store %arg3[%c0_5, %c0_6, %c0_7], %26 {strides = array<i32>} : memref<1x196x8xf32, #tpu.memory_space<vmem>>, vector<1x196x8xf32>,
    %cst_8 = arith.constant dense<0.000000e+00> : vector<8xf32>
    %27 = vector.multi_reduction <add>, %23, %cst_8 [0] : vector<196x8xf32> to vector<8xf32>
    %28 = vector.shape_cast %27 : vector<8xf32> to vector<1x8xf32>
    %29 = arith.mulf %23, %23 : vector<196x8xf32>
    %cst_9 = arith.constant dense<0.000000e+00> : vector<8xf32>
    %30 = vector.multi_reduction <add>, %29, %cst_9 [0] : vector<196x8xf32> to vector<8xf32>
    %31 = vector.shape_cast %30 : vector<8xf32> to vector<1x8xf32>
    %32 = tpu.concatenate %28, %31 in 0 : vector<1x8xf32>, vector<1x8xf32> -> vector<2x8xf32>
    %c0_10 = arith.constant 0 : index
    %c0_11 = arith.constant 0 : index
    %c0_12 = arith.constant 0 : index
    %33 = vector.load %arg4[%c0_10, %c0_11, %c0_12] : memref<1x2x8xf32, #tpu.memory_space<vmem>>, vector<1x2x8xf32>
    %34 = vector.shape_cast %33 : vector<1x2x8xf32> to vector<2x8xf32>
    %35 = vector.shape_cast %32 : vector<2x8xf32> to vector<1x2x8xf32>
    tpu.vector_store %arg4[%c0_10, %c0_11, %c0_12], %35 {strides = array<i32>} : memref<1x2x8xf32, #tpu.memory_space<vmem>>, vector<1x2x8xf32>,
    return
  }
  func.func @transform_0(%arg0: i32) -> (i32, i32, i32, i32) {
    %c0_i32 = arith.constant 0 : i32
    %c0_i32_0 = arith.constant 0 : i32
    %c0_i32_1 = arith.constant 0 : i32
    %c0_i32_2 = arith.constant 0 : i32
    return %arg0, %c0_i32, %c0_i32_0, %c0_i32_1 : i32, i32, i32, i32
  }
  func.func @transform_1(%arg0: i32) -> (i32, i32) {
    %c0_i32 = arith.constant 0 : i32
    %c0_i32_0 = arith.constant 0 : i32
    %c0_i32_1 = arith.constant 0 : i32
    return %c0_i32, %c0_i32_0 : i32, i32
  }
  func.func @transform_2(%arg0: i32) -> (i32, i32, i32) {
    %c0_i32 = arith.constant 0 : i32
    %c0_i32_0 = arith.constant 0 : i32
    %c0_i32_1 = arith.constant 0 : i32
    return %arg0, %c0_i32, %c0_i32_0 : i32, i32, i32
  }
  func.func @transform_3(%arg0: i32) -> (i32, i32, i32) {
    %c0_i32 = arith.constant 0 : i32
    %c0_i32_0 = arith.constant 0 : i32
    %c0_i32_1 = arith.constant 0 : i32
    return %arg0, %c0_i32, %c0_i32_0 : i32, i32, i32
  }
}

module attributes {stable_mosaic.version = 11 : i64} {
  func.func @conv2_kernel(%arg0: i32, %arg1: memref<1x196x8xf32, #tpu.memory_space<vmem>>, %arg2: memref<1x8xf32, #tpu.memory_space<vmem>>, %arg3: memref<1x8xf32, #tpu.memory_space<vmem>>, %arg4: memref<72x8xbf16, #tpu.memory_space<vmem>>, %arg5: memref<1x144x8xf32, #tpu.memory_space<vmem>>, %arg6: memref<1x2x8xf32, #tpu.memory_space<vmem>>) attributes {dimension_semantics = [#tpu.dimension_semantics<parallel>], iteration_bounds = array<i64: 2>, scalar_prefetch = 0 : i64, scratch_operands = 0 : i64, tpu.core_type = #tpu.core_type<tc>, window_params = [{transform_indices = @transform_0, window_bounds = array<i64: 1, 196, 8>}, {pipeline_mode = #tpu.pipeline_mode<synchronous>, transform_indices = @transform_1, window_bounds = array<i64: 1, 8>}, {pipeline_mode = #tpu.pipeline_mode<synchronous>, transform_indices = @transform_2, window_bounds = array<i64: 1, 8>}, {pipeline_mode = #tpu.pipeline_mode<synchronous>, transform_indices = @transform_3, window_bounds = array<i64: 72, 8>}, {transform_indices = @transform_4, window_bounds = array<i64: 1, 144, 8>}, {transform_indices = @transform_5, window_bounds = array<i64: 1, 2, 8>}]} {
    %c0 = arith.constant 0 : index
    %c0_0 = arith.constant 0 : index
    %c0_1 = arith.constant 0 : index
    %0 = vector.load %arg1[%c0, %c0_0, %c0_1] : memref<1x196x8xf32, #tpu.memory_space<vmem>>, vector<1x196x8xf32>
    %1 = vector.shape_cast %0 : vector<1x196x8xf32> to vector<196x8xf32>
    %c0_2 = arith.constant 0 : index
    %c0_3 = arith.constant 0 : index
    %2 = vector.load %arg2[%c0_2, %c0_3] : memref<1x8xf32, #tpu.memory_space<vmem>>, vector<1x8xf32>
    %3 = vector.broadcast %2 : vector<1x8xf32> to vector<196x8xf32>
    %4 = arith.mulf %1, %3 : vector<196x8xf32>
    %c0_4 = arith.constant 0 : index
    %c0_5 = arith.constant 0 : index
    %5 = vector.load %arg3[%c0_4, %c0_5] : memref<1x8xf32, #tpu.memory_space<vmem>>, vector<1x8xf32>
    %6 = vector.broadcast %5 : vector<1x8xf32> to vector<196x8xf32>
    %7 = arith.addf %4, %6 : vector<196x8xf32>
    %cst = arith.constant 0.000000e+00 : f32
    %8 = vector.broadcast %cst : f32 to vector<196x8xf32>
    %9 = arith.maximumf %7, %8 : vector<196x8xf32>
    %10 = vector.shape_cast %9 : vector<196x8xf32> to vector<14x14x8xf32>
    %11 = vector.extract_strided_slice %10 {offsets = [0, 0, 0], sizes = [12, 12, 8], strides = [1, 1, 1]} : vector<14x14x8xf32> to vector<12x12x8xf32>
    %12 = vector.shape_cast %11 : vector<12x12x8xf32> to vector<144x8xf32>
    %13 = vector.extract_strided_slice %10 {offsets = [0, 1, 0], sizes = [12, 12, 8], strides = [1, 1, 1]} : vector<14x14x8xf32> to vector<12x12x8xf32>
    %14 = vector.shape_cast %13 : vector<12x12x8xf32> to vector<144x8xf32>
    %15 = vector.extract_strided_slice %10 {offsets = [0, 2, 0], sizes = [12, 12, 8], strides = [1, 1, 1]} : vector<14x14x8xf32> to vector<12x12x8xf32>
    %16 = vector.shape_cast %15 : vector<12x12x8xf32> to vector<144x8xf32>
    %17 = vector.extract_strided_slice %10 {offsets = [1, 0, 0], sizes = [12, 12, 8], strides = [1, 1, 1]} : vector<14x14x8xf32> to vector<12x12x8xf32>
    %18 = vector.shape_cast %17 : vector<12x12x8xf32> to vector<144x8xf32>
    %19 = vector.extract_strided_slice %10 {offsets = [1, 1, 0], sizes = [12, 12, 8], strides = [1, 1, 1]} : vector<14x14x8xf32> to vector<12x12x8xf32>
    %20 = vector.shape_cast %19 : vector<12x12x8xf32> to vector<144x8xf32>
    %21 = vector.extract_strided_slice %10 {offsets = [1, 2, 0], sizes = [12, 12, 8], strides = [1, 1, 1]} : vector<14x14x8xf32> to vector<12x12x8xf32>
    %22 = vector.shape_cast %21 : vector<12x12x8xf32> to vector<144x8xf32>
    %23 = vector.extract_strided_slice %10 {offsets = [2, 0, 0], sizes = [12, 12, 8], strides = [1, 1, 1]} : vector<14x14x8xf32> to vector<12x12x8xf32>
    %24 = vector.shape_cast %23 : vector<12x12x8xf32> to vector<144x8xf32>
    %25 = vector.extract_strided_slice %10 {offsets = [2, 1, 0], sizes = [12, 12, 8], strides = [1, 1, 1]} : vector<14x14x8xf32> to vector<12x12x8xf32>
    %26 = vector.shape_cast %25 : vector<12x12x8xf32> to vector<144x8xf32>
    %27 = vector.extract_strided_slice %10 {offsets = [2, 2, 0], sizes = [12, 12, 8], strides = [1, 1, 1]} : vector<14x14x8xf32> to vector<12x12x8xf32>
    %28 = vector.shape_cast %27 : vector<12x12x8xf32> to vector<144x8xf32>
    %29 = tpu.concatenate %12, %14, %16, %18, %20, %22, %24, %26, %28 in 1 : vector<144x8xf32>, vector<144x8xf32>, vector<144x8xf32>, vector<144x8xf32>, vector<144x8xf32>, vector<144x8xf32>, vector<144x8xf32>, vector<144x8xf32>, vector<144x8xf32> -> vector<144x72xf32>
    %30 = arith.truncf %29 : vector<144x72xf32> to vector<144x72xbf16>
    %c0_6 = arith.constant 0 : index
    %c0_7 = arith.constant 0 : index
    %31 = vector.load %arg4[%c0_6, %c0_7] : memref<72x8xbf16, #tpu.memory_space<vmem>>, vector<72x8xbf16>
    %cst_8 = arith.constant dense<0.000000e+00> : vector<144x8xf32>
    %32 = tpu.matmul %30, %31, %cst_8 {dimension_numbers = #tpu.dot_dimension_numbers<[1], [0], [0], [1], [0, 0, 1, 1], [], []>} : vector<144x72xbf16>, vector<72x8xbf16>, vector<144x8xf32> -> vector<144x8xf32>
    %c0_9 = arith.constant 0 : index
    %c0_10 = arith.constant 0 : index
    %c0_11 = arith.constant 0 : index
    %33 = vector.load %arg5[%c0_9, %c0_10, %c0_11] : memref<1x144x8xf32, #tpu.memory_space<vmem>>, vector<1x144x8xf32>
    %34 = vector.shape_cast %33 : vector<1x144x8xf32> to vector<144x8xf32>
    %35 = vector.shape_cast %32 : vector<144x8xf32> to vector<1x144x8xf32>
    tpu.vector_store %arg5[%c0_9, %c0_10, %c0_11], %35 {strides = array<i32>} : memref<1x144x8xf32, #tpu.memory_space<vmem>>, vector<1x144x8xf32>,
    %cst_12 = arith.constant dense<0.000000e+00> : vector<8xf32>
    %36 = vector.multi_reduction <add>, %32, %cst_12 [0] : vector<144x8xf32> to vector<8xf32>
    %37 = vector.shape_cast %36 : vector<8xf32> to vector<1x8xf32>
    %38 = arith.mulf %32, %32 : vector<144x8xf32>
    %cst_13 = arith.constant dense<0.000000e+00> : vector<8xf32>
    %39 = vector.multi_reduction <add>, %38, %cst_13 [0] : vector<144x8xf32> to vector<8xf32>
    %40 = vector.shape_cast %39 : vector<8xf32> to vector<1x8xf32>
    %41 = tpu.concatenate %37, %40 in 0 : vector<1x8xf32>, vector<1x8xf32> -> vector<2x8xf32>
    %c0_14 = arith.constant 0 : index
    %c0_15 = arith.constant 0 : index
    %c0_16 = arith.constant 0 : index
    %42 = vector.load %arg6[%c0_14, %c0_15, %c0_16] : memref<1x2x8xf32, #tpu.memory_space<vmem>>, vector<1x2x8xf32>
    %43 = vector.shape_cast %42 : vector<1x2x8xf32> to vector<2x8xf32>
    %44 = vector.shape_cast %41 : vector<2x8xf32> to vector<1x2x8xf32>
    tpu.vector_store %arg6[%c0_14, %c0_15, %c0_16], %44 {strides = array<i32>} : memref<1x2x8xf32, #tpu.memory_space<vmem>>, vector<1x2x8xf32>,
    return
  }
  func.func @transform_0(%arg0: i32) -> (i32, i32, i32) {
    %c0_i32 = arith.constant 0 : i32
    %c0_i32_0 = arith.constant 0 : i32
    %c0_i32_1 = arith.constant 0 : i32
    return %arg0, %c0_i32, %c0_i32_0 : i32, i32, i32
  }
  func.func @transform_1(%arg0: i32) -> (i32, i32) {
    %c0_i32 = arith.constant 0 : i32
    %c0_i32_0 = arith.constant 0 : i32
    %c0_i32_1 = arith.constant 0 : i32
    return %c0_i32, %c0_i32_0 : i32, i32
  }
  func.func @transform_2(%arg0: i32) -> (i32, i32) {
    %c0_i32 = arith.constant 0 : i32
    %c0_i32_0 = arith.constant 0 : i32
    %c0_i32_1 = arith.constant 0 : i32
    return %c0_i32, %c0_i32_0 : i32, i32
  }
  func.func @transform_3(%arg0: i32) -> (i32, i32) {
    %c0_i32 = arith.constant 0 : i32
    %c0_i32_0 = arith.constant 0 : i32
    %c0_i32_1 = arith.constant 0 : i32
    return %c0_i32, %c0_i32_0 : i32, i32
  }
  func.func @transform_4(%arg0: i32) -> (i32, i32, i32) {
    %c0_i32 = arith.constant 0 : i32
    %c0_i32_0 = arith.constant 0 : i32
    %c0_i32_1 = arith.constant 0 : i32
    return %arg0, %c0_i32, %c0_i32_0 : i32, i32, i32
  }
  func.func @transform_5(%arg0: i32) -> (i32, i32, i32) {
    %c0_i32 = arith.constant 0 : i32
    %c0_i32_0 = arith.constant 0 : i32
    %c0_i32_1 = arith.constant 0 : i32
    return %arg0, %c0_i32, %c0_i32_0 : i32, i32, i32
  }
}

module attributes {stable_mosaic.version = 11 : i64} {
  func.func @convt_kernel(%arg0: i32, %arg1: memref<1x144x8xf32, #tpu.memory_space<vmem>>, %arg2: memref<1x8xf32, #tpu.memory_space<vmem>>, %arg3: memref<1x8xf32, #tpu.memory_space<vmem>>, %arg4: memref<8x16xbf16, #tpu.memory_space<vmem>>, %arg5: memref<1x16xf32, #tpu.memory_space<vmem>>, %arg6: memref<1x144x16xf32, #tpu.memory_space<vmem>>) attributes {dimension_semantics = [#tpu.dimension_semantics<parallel>], iteration_bounds = array<i64: 2>, scalar_prefetch = 0 : i64, scratch_operands = 0 : i64, tpu.core_type = #tpu.core_type<tc>, window_params = [{transform_indices = @transform_0, window_bounds = array<i64: 1, 144, 8>}, {pipeline_mode = #tpu.pipeline_mode<synchronous>, transform_indices = @transform_1, window_bounds = array<i64: 1, 8>}, {pipeline_mode = #tpu.pipeline_mode<synchronous>, transform_indices = @transform_2, window_bounds = array<i64: 1, 8>}, {pipeline_mode = #tpu.pipeline_mode<synchronous>, transform_indices = @transform_3, window_bounds = array<i64: 8, 16>}, {pipeline_mode = #tpu.pipeline_mode<synchronous>, transform_indices = @transform_4, window_bounds = array<i64: 1, 16>}, {transform_indices = @transform_5, window_bounds = array<i64: 1, 144, 16>}]} {
    %c0 = arith.constant 0 : index
    %c0_0 = arith.constant 0 : index
    %c0_1 = arith.constant 0 : index
    %0 = vector.load %arg1[%c0, %c0_0, %c0_1] : memref<1x144x8xf32, #tpu.memory_space<vmem>>, vector<1x144x8xf32>
    %1 = vector.shape_cast %0 : vector<1x144x8xf32> to vector<144x8xf32>
    %c0_2 = arith.constant 0 : index
    %c0_3 = arith.constant 0 : index
    %2 = vector.load %arg2[%c0_2, %c0_3] : memref<1x8xf32, #tpu.memory_space<vmem>>, vector<1x8xf32>
    %3 = vector.broadcast %2 : vector<1x8xf32> to vector<144x8xf32>
    %4 = arith.mulf %1, %3 : vector<144x8xf32>
    %c0_4 = arith.constant 0 : index
    %c0_5 = arith.constant 0 : index
    %5 = vector.load %arg3[%c0_4, %c0_5] : memref<1x8xf32, #tpu.memory_space<vmem>>, vector<1x8xf32>
    %6 = vector.broadcast %5 : vector<1x8xf32> to vector<144x8xf32>
    %7 = arith.addf %4, %6 : vector<144x8xf32>
    %cst = arith.constant 0.000000e+00 : f32
    %8 = vector.broadcast %cst : f32 to vector<144x8xf32>
    %9 = arith.maximumf %7, %8 : vector<144x8xf32>
    %10 = arith.truncf %9 : vector<144x8xf32> to vector<144x8xbf16>
    %c0_6 = arith.constant 0 : index
    %c0_7 = arith.constant 0 : index
    %11 = vector.load %arg4[%c0_6, %c0_7] : memref<8x16xbf16, #tpu.memory_space<vmem>>, vector<8x16xbf16>
    %cst_8 = arith.constant dense<0.000000e+00> : vector<144x16xf32>
    %12 = tpu.matmul %10, %11, %cst_8 {dimension_numbers = #tpu.dot_dimension_numbers<[1], [0], [0], [1], [0, 0, 1, 1], [], []>} : vector<144x8xbf16>, vector<8x16xbf16>, vector<144x16xf32> -> vector<144x16xf32>
    %c0_9 = arith.constant 0 : index
    %c0_10 = arith.constant 0 : index
    %13 = vector.load %arg5[%c0_9, %c0_10] : memref<1x16xf32, #tpu.memory_space<vmem>>, vector<1x16xf32>
    %14 = vector.broadcast %13 : vector<1x16xf32> to vector<144x16xf32>
    %15 = arith.addf %12, %14 : vector<144x16xf32>
    %c0_11 = arith.constant 0 : index
    %c0_12 = arith.constant 0 : index
    %c0_13 = arith.constant 0 : index
    %16 = vector.load %arg6[%c0_11, %c0_12, %c0_13] : memref<1x144x16xf32, #tpu.memory_space<vmem>>, vector<1x144x16xf32>
    %17 = vector.shape_cast %16 : vector<1x144x16xf32> to vector<144x16xf32>
    %18 = vector.shape_cast %15 : vector<144x16xf32> to vector<1x144x16xf32>
    tpu.vector_store %arg6[%c0_11, %c0_12, %c0_13], %18 {strides = array<i32>} : memref<1x144x16xf32, #tpu.memory_space<vmem>>, vector<1x144x16xf32>,
    return
  }
  func.func @transform_0(%arg0: i32) -> (i32, i32, i32) {
    %c0_i32 = arith.constant 0 : i32
    %c0_i32_0 = arith.constant 0 : i32
    %c0_i32_1 = arith.constant 0 : i32
    return %arg0, %c0_i32, %c0_i32_0 : i32, i32, i32
  }
  func.func @transform_1(%arg0: i32) -> (i32, i32) {
    %c0_i32 = arith.constant 0 : i32
    %c0_i32_0 = arith.constant 0 : i32
    %c0_i32_1 = arith.constant 0 : i32
    return %c0_i32, %c0_i32_0 : i32, i32
  }
  func.func @transform_2(%arg0: i32) -> (i32, i32) {
    %c0_i32 = arith.constant 0 : i32
    %c0_i32_0 = arith.constant 0 : i32
    %c0_i32_1 = arith.constant 0 : i32
    return %c0_i32, %c0_i32_0 : i32, i32
  }
  func.func @transform_3(%arg0: i32) -> (i32, i32) {
    %c0_i32 = arith.constant 0 : i32
    %c0_i32_0 = arith.constant 0 : i32
    %c0_i32_1 = arith.constant 0 : i32
    return %c0_i32, %c0_i32_0 : i32, i32
  }
  func.func @transform_4(%arg0: i32) -> (i32, i32) {
    %c0_i32 = arith.constant 0 : i32
    %c0_i32_0 = arith.constant 0 : i32
    %c0_i32_1 = arith.constant 0 : i32
    return %c0_i32, %c0_i32_0 : i32, i32
  }
  func.func @transform_5(%arg0: i32) -> (i32, i32, i32) {
    %c0_i32 = arith.constant 0 : i32
    %c0_i32_0 = arith.constant 0 : i32
    %c0_i32_1 = arith.constant 0 : i32
    return %arg0, %c0_i32, %c0_i32_0 : i32, i32, i32
  }
}

</mosaic_0001>

<bundles_post_ra>
// kernel: decoder_block.5
= control target key start
LH: loop header
LB: loop body
LE: loop exit
PB: predicated region body
PF: predicated region fallthrough
CT: control target
= control target key end

     0   :  { %s662_s18 = smov 0   ;;  %s845_s0 = inlined_call_operand.vmem [shape: f32[2,144,8], index: 0, kind: input, shape index: {}]   ;;  %s846_s1 = inlined_call_operand.vmem [shape: f32[1,8], index: 1, kind: input, shape index: {}]   ;;  %s847_s2 = inlined_call_operand.vmem [shape: f32[1,8], index: 2, kind: input, shape index: {}]   ;;  %s848_s3 = inlined_call_operand.vmem [shape: bf16[8,16], index: 3, kind: input, shape index: {}]   ;;  %s849_s4 = inlined_call_operand.vmem [shape: f32[1,16], index: 4, kind: input, shape index: {}]   ;;  %s850_s5 = inlined_call_operand.vmem [shape: f32[2,144,16], index: 5, kind: output, shape index: {}]  }
   0x1 LB: > { %s540_s19 = sadd.s32 4294967295, %s628_s18   ;;  %p544_p0 = scmp.ge.s32.totalorder %s628_s18, 1  ;;  %s628_s18 = sphi %s662_s18, %s15_s18  }
   0x2   : > { %p187_p1 = scmp.lt.s32.totalorder %s628_s18, 3 }
   0x4   : > { %p188_p2 = pnand %p544_p0, %p187_p1 }
   0x5   : > { %v321_v0 = vld [vmem:[%s848_s3] sm:$0xf] (!%p188_p2)  ;;  %vm357_vm0 = vcmask (!%p188_p2), 1043456   ;;  %p215_p3 = scmp.lt.s32.totalorder (!%p188_p2), %s540_s19, 1  ;;  %v630_v1 = vmov (!%p188_p2), 0.0   ;;  %vm631_vm1 = vmmov (!%p188_p2), 0  }
   0x6   : > { %191 = sbr.rel (%p188_p2) target bundleno = 275 (0x113), region = 40  ;;  %571 = vmatprep.subr.bf16.mxu0 (!%p188_p2), %v630_v1  ;;  %v359_v2 = vsel (!%p188_p2), %vm357_vm0, %v321_v0, 0  ;;  %573 = vmatprep.mubr.msk.bf16.mxu0 (!%p188_p2), %vm631_vm1, %v630_v1  ;;  %v685_v3 = vld [vmem:[%s846_s1] ss:$0 sm:$0xff] (!%p188_p2)  ;;  %vm329_vm2 = vcmask (!%p188_p2), 64512   ;;  %vm466_vm3 = vcmask (!%p188_p2), 130048  }
   0x7   : > { %572 = vmatpush3.bf16.msra.mxu0 (!%p188_p2), %v359_v2  ;;  %609 = vmatprep.subr.bf16.mxu1 (!%p188_p2), %v630_v1  ;;  %v697_v4 = vld [vmem:[%s847_s2] ss:$0 sm:$0xff] (!%p188_p2) }
   0x8   : > { %610 = vmatpush3.bf16.msra.mxu1 (!%p188_p2), %v359_v2  ;;  %593 = vmatprep.mubr.msk.bf16.mxu1 (!%p188_p2), %vm631_vm1, %v630_v1 }
   0xd   : > { %s852_s19 = smov (!%p215_p3, %s540_s19), 1 }
   0xe   : > { %s611_s22 = smul.u32 144, %s852_s19 }
  0x10   : > { %s692_s27 = scalar_lea.vmem %s845_s0, %s611_s22  ;;  %s786_s9 = scalar_lea.vmem %s850_s5, %s611_s22 }
  0x11   : > { %v226_v5 = vld [vmem:[%s692_s27] sm:$0xff]  ;;  %v227_v6 = vld [vmem:[%s692_s27 + $0x8] sm:$0xff]  ;;  %v236_v7 = vld [vmem:[%s692_s27 + $0x50] sm:$0xff] }
  0x12   : > { %v251_v8 = vmul.f32 %v685_v3, %v226_v5  ;;  %v252_v9 = vmul.f32 %v685_v3, %v227_v6  ;;  %v237_v10 = vld [vmem:[%s692_s27 + $0x58] sm:$0xff]  ;;  %v261_v11 = vmul.f32 %v685_v3, %v236_v7  ;;  %v228_v12 = vld [vmem:[%s692_s27 + $0x10] sm:$0xff]  ;;  %v238_v17 = vld [vmem:[%s692_s27 + $0x60] sm:$0xff] }
  0x13   : > { %v229_v13 = vld [vmem:[%s692_s27 + $0x18] sm:$0xff]  ;;  %v262_v14 = vmul.f32 %v685_v3, %v237_v10  ;;  %v253_v15 = vmul.f32 %v685_v3, %v228_v12  ;;  %v239_v18 = vld [vmem:[%s692_s27 + $0x68] sm:$0xff]  ;;  %v263_v22 = vmul.f32 %v685_v3, %v238_v17  ;;  %v230_v33 = vld [vmem:[%s692_s27 + $0x20] sm:$0xff] }
  0x14   : > { %v254_v16 = vmul.f32 %v685_v3, %v229_v13  ;;  %v276_v19 = vadd.f32 %v697_v4, %v251_v8  ;;  %v277_v20 = vadd.f32 %v697_v4, %v252_v9  ;;  %v286_v21 = vadd.f32 %v697_v4, %v261_v11  ;;  %v231_v34 = vld [vmem:[%s692_s27 + $0x28] sm:$0xff]  ;;  %v240_v36 = vld [vmem:[%s692_s27 + $0x70] sm:$0xff]  ;;  %v241_v37 = vld [vmem:[%s692_s27 + $0x78] sm:$0xff] }
  0x15   : > { %v287_v23 = vadd.f32 %v697_v4, %v262_v14  ;;  %v278_v24 = vadd.f32 %v697_v4, %v253_v15  ;;  %v264_v25 = vmul.f32 %v685_v3, %v239_v18  ;;  %v288_v31 = vadd.f32 %v697_v4, %v263_v22  ;;  %v232_v53 = vld [vmem:[%s692_s27 + $0x30] sm:$0xff]  ;;  %v233_v54 = vld [vmem:[%s692_s27 + $0x38] sm:$0xff]  ;;  %v242_v55 = vld [vmem:[%s692_s27 + $0x80] sm:$0xff] }
  0x16   : > { %v294_v26 = vmax.f32 %v276_v19, 0.0  ;;  %v295_v27 = vmax.f32 %v277_v20, 0.0  ;;  %v304_v28 = vmax.f32 %v286_v21, 0.0  ;;  %v279_v29 = vadd.f32 %v697_v4, %v254_v16  ;;  %v243_v56 = vld [vmem:[%s692_s27 + $0x88] sm:$0xff]  ;;  %v234_v10 = vld [vmem:[%s692_s27 + $0x40] sm:$0xff] }
  0x17   : > { %v305_v30 = vmax.f32 %v287_v23, 0.0  ;;  %v289_v32 = vadd.f32 %v697_v4, %v264_v25  ;;  %v296_v39 = vmax.f32 %v278_v24, 0.0  ;;  %v255_v41 = vmul.f32 %v685_v3, %v230_v33  ;;  %v235_v11 = vld [vmem:[%s692_s27 + $0x48] sm:$0xff]  ;;  %v779_v24 = vld [vmem:[%s849_s4] ss:$0 sm:$0xff] }
  0x18   : > { %v312_v35 = vpack.c.bf16 %v295_v27, %v294_v26  ;;  %v297_v40 = vmax.f32 %v279_v29, 0.0  ;;  %v256_v42 = vmul.f32 %v685_v3, %v231_v34  ;;  %v306_v43 = vmax.f32 %v288_v31, 0.0 }
  0x19   : > { %v317_v38 = vpack.c.bf16 %v305_v30, %v304_v28  ;;  %v307_v44 = vmax.f32 %v289_v32, 0.0  ;;  %v265_v45 = vmul.f32 %v685_v3, %v240_v36  ;;  %v266_v46 = vmul.f32 %v685_v3, %v241_v37 }
  0x1a   : > { %574 = vmatmul.mubr.msk.bf16.vlgmr.msra.gmra.mrb[0].mxu0 %vm329_vm2, %v312_v35  ;;  %v313_v47 = vpack.c.bf16 %v297_v40, %v296_v39  ;;  %v280_v48 = vadd.f32 %v697_v4, %v255_v41  ;;  %v281_v49 = vadd.f32 %v697_v4, %v256_v42  ;;  %v257_v59 = vmul.f32 %v685_v3, %v232_v53 }
  0x1b   : > { %594 = vmatmul.mubr.msk.bf16.vlgmr.msra.gmra.mrb[0].mxu1 %vm329_vm2, %v317_v38  ;;  %577 = vmatprep.mubr.msk.bf16.mxu0 %vm631_vm1, %v630_v1  ;;  %v318_v50 = vpack.c.bf16 %v307_v44, %v306_v43  ;;  %v290_v51 = vadd.f32 %v697_v4, %v265_v45  ;;  %v291_v52 = vadd.f32 %v697_v4, %v266_v46 }
  0x1c   : > { %597 = vmatprep.mubr.msk.bf16.mxu1 %vm631_vm1, %v630_v1  ;;  %v298_v57 = vmax.f32 %v280_v48, 0.0  ;;  %v299_v58 = vmax.f32 %v281_v49, 0.0  ;;  %v258_v60 = vmul.f32 %v685_v3, %v233_v54  ;;  %v267_v63 = vmul.f32 %v685_v3, %v242_v55 }
  0x1d   : > { %v308_v61 = vmax.f32 %v290_v51, 0.0  ;;  %v309_v62 = vmax.f32 %v291_v52, 0.0  ;;  %v268_v0 = vmul.f32 %v685_v3, %v243_v56  ;;  %v282_v5 = vadd.f32 %v697_v4, %v257_v59 }
  0x1e   : > { %v314_v2 = vpack.c.bf16 %v299_v58, %v298_v57  ;;  %v283_v6 = vadd.f32 %v697_v4, %v258_v60  ;;  %v292_v8 = vadd.f32 %v697_v4, %v267_v63  ;;  %v259_v14 = vmul.f32 %v685_v3, %v234_v10 }
  0x1f   : > { %v319_v7 = vpack.c.bf16 %v309_v62, %v308_v61  ;;  %v293_v9 = vadd.f32 %v697_v4, %v268_v0  ;;  %v300_v12 = vmax.f32 %v282_v5, 0.0  ;;  %v260_v15 = vmul.f32 %v685_v3, %v235_v11 }
  0x20   : > { %v301_v13 = vmax.f32 %v283_v6, 0.0  ;;  %v310_v16 = vmax.f32 %v292_v8, 0.0  ;;  %v284_v19 = vadd.f32 %v697_v4, %v259_v14 }
  0x21   : > { %v311_v17 = vmax.f32 %v293_v9, 0.0  ;;  %v285_v20 = vadd.f32 %v697_v4, %v260_v15 }
  0x22   : > { %578 = vmatmul.mubr.msk.bf16.gmra.mrb[4].mxu0 %vm329_vm2, %v313_v47  ;;  %v315_v18 = vpack.c.bf16 %v301_v13, %v300_v12  ;;  %v302_v3 = vmax.f32 %v284_v19, 0.0 }
  0x23   : > { %598 = vmatmul.mubr.msk.bf16.gmra.mrb[4].mxu1 %vm329_vm2, %v318_v50  ;;  %581 = vmatprep.mubr.msk.bf16.mxu0 %vm631_vm1, %v630_v1  ;;  %v320_v21 = vpack.c.bf16 %v311_v17, %v310_v16  ;;  %v303_v22 = vmax.f32 %v285_v20, 0.0 }
  0x24   : > { %601 = vmatprep.mubr.msk.bf16.mxu1 %vm631_vm1, %v630_v1 }
  0x25   : > { %v316_v23 = vpack.c.bf16 %v303_v22, %v302_v3 }
  0x2a   : > { %582 = vmatmul.mubr.msk.bf16.gmra.mrb[8].mxu0 %vm329_vm2, %v314_v2 }
  0x2b   : > { %602 = vmatmul.mubr.msk.bf16.gmra.mrb[8].mxu1 %vm329_vm2, %v319_v7  ;;  %585 = vmatprep.mubr.msk.bf16.mxu0 %vm631_vm1, %v630_v1 }
  0x2c   : > { %605 = vmatprep.mubr.msk.bf16.mxu1 %vm631_vm1, %v630_v1 }
  0x32   : > { %586 = vmatmul.mubr.msk.bf16.gmra.mrb[12].mxu0 %vm329_vm2, %v315_v18 }
  0x33   : > { %606 = vmatmul.mubr.msk.bf16.gmra.mrb[12].mxu1 %vm329_vm2, %v320_v21  ;;  %589 = vmatprep.mubr.msk.bf16.mxu0 %vm631_vm1, %v630_v1 }
  0x3a   : > { %590 = vmatmul.mubr.msk.bf16.gmra.mrb[16].mxu0 %vm329_vm2, %v316_v23 }
  0xed   : > { %v395_v4 = vpop.f32.mrb[0].mxu0 }
  0xee   : > { %v396_v1 = vadd.f32 %v779_v24, %v395_v4  ;;  %v575_v25 = vpop.f32.mrb[1].mxu0  ;;  %v435_v26 = vpop.f32.mrb[0].mxu1 }
  0xef   : > { %v398_v27 = vpop.f32.mrb[2].mxu0  ;;  %v436_v28 = vadd.f32 %v779_v24, %v435_v26  ;;  %v595_v29 = vpop.f32.mrb[1].mxu1 }
  0xf0   : > { %467 = vst.msk [vmem:[%s786_s9] sm:$0xff] %vm466_vm3, %v396_v1  ;;  %v399_v30 = vadd.f32 %v779_v24, %v398_v27  ;;  %v576_v31 = vpop.f32.mrb[3].mxu0  ;;  %v438_v32 = vpop.f32.mrb[2].mxu1 }
  0xf1   : > { %477 = vst.msk [vmem:[%s786_s9 + $0x50] sm:$0xff] %vm466_vm3, %v436_v28  ;;  %v439_v33 = vadd.f32 %v779_v24, %v438_v32  ;;  %v596_v34 = vpop.f32.mrb[3].mxu1 }
  0xf2   : > { %468 = vst.msk [vmem:[%s786_s9 + $0x8] sm:$0xff] %vm466_vm3, %v399_v30 }
  0xf3   : > { %478 = vst.msk [vmem:[%s786_s9 + $0x58] sm:$0xff] %vm466_vm3, %v439_v33 }
  0xf5   : > { %v403_v35 = vpop.f32.mrb[4].mxu0 }
  0xf6   : > { %v404_v36 = vadd.f32 %v779_v24, %v403_v35  ;;  %v579_v37 = vpop.f32.mrb[5].mxu0  ;;  %v443_v38 = vpop.f32.mrb[4].mxu1 }
  0xf7   : > { %v406_v39 = vpop.f32.mrb[6].mxu0  ;;  %v444_v40 = vadd.f32 %v779_v24, %v443_v38  ;;  %v599_v41 = vpop.f32.mrb[5].mxu1 }
  0xf8   : > { %469 = vst.msk [vmem:[%s786_s9 + $0x10] sm:$0xff] %vm466_vm3, %v404_v36  ;;  %v407_v42 = vadd.f32 %v779_v24, %v406_v39  ;;  %v580_v43 = vpop.f32.mrb[7].mxu0  ;;  %v446_v44 = vpop.f32.mrb[6].mxu1 }
  0xf9   : > { %479 = vst.msk [vmem:[%s786_s9 + $0x60] sm:$0xff] %vm466_vm3, %v444_v40  ;;  %v447_v45 = vadd.f32 %v779_v24, %v446_v44  ;;  %v600_v46 = vpop.f32.mrb[7].mxu1 }
  0xfa   : > { %470 = vst.msk [vmem:[%s786_s9 + $0x18] sm:$0xff] %vm466_vm3, %v407_v42 }
  0xfb   : > { %480 = vst.msk [vmem:[%s786_s9 + $0x68] sm:$0xff] %vm466_vm3, %v447_v45 }
  0xfd   : > { %v411_v47 = vpop.f32.mrb[8].mxu0 }
  0xfe   : > { %v412_v48 = vadd.f32 %v779_v24, %v411_v47  ;;  %v583_v49 = vpop.f32.mrb[9].mxu0  ;;  %v451_v50 = vpop.f32.mrb[8].mxu1 }
  0xff   : > { %v414_v51 = vpop.f32.mrb[10].mxu0  ;;  %v452_v52 = vadd.f32 %v779_v24, %v451_v50  ;;  %v603_v53 = vpop.f32.mrb[9].mxu1 }
 0x100   : > { %471 = vst.msk [vmem:[%s786_s9 + $0x20] sm:$0xff] %vm466_vm3, %v412_v48  ;;  %v415_v54 = vadd.f32 %v779_v24, %v414_v51  ;;  %v584_v55 = vpop.f32.mrb[11].mxu0  ;;  %v454_v56 = vpop.f32.mrb[10].mxu1 }
 0x101   : > { %481 = vst.msk [vmem:[%s786_s9 + $0x70] sm:$0xff] %vm466_vm3, %v452_v52  ;;  %v455_v57 = vadd.f32 %v779_v24, %v454_v56  ;;  %v604_v58 = vpop.f32.mrb[11].mxu1 }
 0x102   : > { %472 = vst.msk [vmem:[%s786_s9 + $0x28] sm:$0xff] %vm466_vm3, %v415_v54 }
 0x103   : > { %482 = vst.msk [vmem:[%s786_s9 + $0x78] sm:$0xff] %vm466_vm3, %v455_v57 }
 0x105   : > { %v419_v59 = vpop.f32.mrb[12].mxu0 }
 0x106   : > { %v420_v60 = vadd.f32 %v779_v24, %v419_v59  ;;  %v587_v61 = vpop.f32.mrb[13].mxu0  ;;  %v459_v62 = vpop.f32.mrb[12].mxu1 }
 0x107   : > { %v422_v63 = vpop.f32.mrb[14].mxu0  ;;  %v460_v0 = vadd.f32 %v779_v24, %v459_v62  ;;  %v607_v2 = vpop.f32.mrb[13].mxu1 }
 0x108   : > { %473 = vst.msk [vmem:[%s786_s9 + $0x30] sm:$0xff] %vm466_vm3, %v420_v60  ;;  %v423_v5 = vadd.f32 %v779_v24, %v422_v63  ;;  %v588_v6 = vpop.f32.mrb[15].mxu0  ;;  %v462_v7 = vpop.f32.mrb[14].mxu1 }
 0x109   : > { %483 = vst.msk [vmem:[%s786_s9 + $0x80] sm:$0xff] %vm466_vm3, %v460_v0  ;;  %v463_v8 = vadd.f32 %v779_v24, %v462_v7  ;;  %v608_v9 = vpop.f32.mrb[15].mxu1 }
 0x10a   : > { %474 = vst.msk [vmem:[%s786_s9 + $0x38] sm:$0xff] %vm466_vm3, %v423_v5 }
 0x10b   : > { %484 = vst.msk [vmem:[%s786_s9 + $0x88] sm:$0xff] %vm466_vm3, %v463_v8 }
 0x10d   : > { %v427_v10 = vpop.f32.mrb[16].mxu0 }
 0x10e   : > { %v428_v11 = vadd.f32 %v779_v24, %v427_v10  ;;  %v591_v12 = vpop.f32.mrb[17].mxu0 }
 0x10f   : > { %v430_v13 = vpop.f32.mrb[18].mxu0 }
 0x110   : > { %475 = vst.msk [vmem:[%s786_s9 + $0x40] sm:$0xff] %vm466_vm3, %v428_v11  ;;  %v431_v14 = vadd.f32 %v779_v24, %v430_v13  ;;  %v592_v15 = vpop.f32.mrb[19].mxu0 }
 0x112   : > { %476 = vst.msk [vmem:[%s786_s9 + $0x48] sm:$0xff] %vm466_vm3, %v431_v14 }
 0x113 PF: > { %s15_s18 = sadd.s32 1, %s628_s18  }
 0x114   : > { %p12_p4 = scmp.ge.s32.totalorder %s15_s18, 4  }
 0x116   :  { %14 = sbr.rel (!%p12_p4) target bundleno = 1 (0x1), region = 70 }

// kernel: decoder_block.4
= control target key start
LH: loop header
LB: loop body
LE: loop exit
PB: predicated region body
PF: predicated region fallthrough
CT: control target
= control target key end

     0   :  { %s3728_s18 = smov 0   ;;  %s5591_s0 = inlined_call_operand.vmem [shape: f32[2,196,8], index: 0, kind: input, shape index: {}]   ;;  %s5592_s1 = inlined_call_operand.vmem [shape: f32[1,8], index: 1, kind: input, shape index: {}]   ;;  %s5593_s2 = inlined_call_operand.vmem [shape: f32[1,8], index: 2, kind: input, shape index: {}]   ;;  %s5594_s3 = inlined_call_operand.vmem [shape: bf16[72,8], index: 3, kind: input, shape index: {}]   ;;  %s5595_s4 = inlined_call_operand.vmem [shape: f32[2,144,8], index: 4, kind: output, shape index: {0}]   ;;  %s5596_s5 = inlined_call_operand.vmem [shape: f32[2,2,8], index: 5, kind: output, shape index: {1}]  }
   0x1 LB: > { %s3181_s19 = sadd.s32 4294967295, %s3685_s18   ;;  %p3185_p0 = scmp.ge.s32.totalorder %s3685_s18, 1  ;;  %s3685_s18 = sphi %s3728_s18, %s16_s18  }
   0x2   : > { %p190_p1 = scmp.lt.s32.totalorder %s3685_s18, 3 }
   0x4   : > { %p191_p2 = pnand %p3185_p0, %p190_p1 }
   0x6   : > { %194 = sbr.rel (%p191_p2) target bundleno = 615 (0x267), region = 36 }
   0xd   : > { %p222_p3 = scmp.lt.s32.totalorder %s3181_s19, 1  ;;  %v380_v0 = vlaneseq  ;;  %v3687_v1 = vmov 1983009808   ;;  %v3741_v3 = vld [vmem:[%s5592_s1] ss:$0 sm:$0xff]  ;;  %vm792_vm0 = vcmask 1040384  }
   0xe   : > { %v378_v2 = vunpack.c.l.s4 %v3687_v1  ;;  %v3752_v6 = vld [vmem:[%s5593_s2] ss:$0 sm:$0xff]  ;;  %vm793_vm1 = vcmask 1042434   ;;  %vm795_vm2 = vcmask 1044484   ;;  %vm797_vm3 = vcmask 1046534   ;;  %s3688_s28 = smov 24  }
   0xf   : > { %s5688_s19 = smov (!%p222_p3, %s3181_s19), 1  ;;  %v381_v5 = vshrl.u32 %v380_v0, 7  ;;  %s3689_s29 = smov 16   ;;  %vm794_vm4 = vmor %vm792_vm0, %vm793_vm1  ;;  %vm2640_vm7 = vcmask 64512   ;;  %vm2659_vm8 = vcmask 130048   ;;  %vm2678_vm9 = vcmask 195584  }
  0x10   : > { %s3291_s22 = smul.u32 200, %s5688_s19  ;;  %v379_v4 = vunpack.c.0.s8 %v378_v2  ;;  %vm3967_vm5 = vmor %vm794_vm4, %vm795_vm2  ;;  %s3690_s30 = smov 48   ;;  %vm2697_vm10 = vcmask 261120   ;;  %vm2716_vm11 = vcmask 326656   ;;  %vm2735_vm12 = vcmask 392192  }
  0x11   : > { %s3691_s6 = smov 40   ;;  %vm3993_vm6 = vmor %vm3967_vm5, %vm797_vm3  ;;  %s3692_s7 = smov 64   ;;  %vm2754_vm13 = vcmask 457728   ;;  %vm2865_vm14 = vcmask 1043456   ;;  %vm2773_vm15 = vcmask 523264   ;;  %vm3697_vm1 = vmmov 0  }
  0x12   : > { %s3747_s25 = scalar_lea.vmem %s5591_s0, %s3291_s22  ;;  %v3763_v16 = vsub.s32 %v379_v4, %v381_v5  ;;  %s3693_s8 = smov 8   ;;  %vm2837_vm2 = vcmask 588800   ;;  %vm3093_vm3 = vcmask 58368  }
  0x13   : > { %v238_v7 = vld [vmem:[%s3747_s25 + $0x8] sm:$0xff]  ;;  %v239_v8 = vld [vmem:[%s3747_s25 + $0x10] sm:$0xff]  ;;  %v240_v9 = vld [vmem:[%s3747_s25 + $0x18] sm:$0xff]  ;;  %s3694_s9 = smov 56   ;;  %s3695_s10 = smov 32  }
  0x14   : > { %v270_v10 = vmul.f32 %v3741_v3, %v238_v7  ;;  %v271_v11 = vmul.f32 %v3741_v3, %v239_v8  ;;  %v272_v12 = vmul.f32 %v3741_v3, %v240_v9  ;;  %v237_v13 = vld [vmem:[%s3747_s25] sm:$0xff]  ;;  %v242_v15 = vld [vmem:[%s3747_s25 + $0x28] sm:$0xff]  ;;  %v243_v20 = vld [vmem:[%s3747_s25 + $0x30] sm:$0xff]  ;;  %s3292_s27 = smul.u32 144, %s5688_s19 }
  0x15   : > { %v241_v14 = vld [vmem:[%s3747_s25 + $0x20] sm:$0xff]  ;;  %v269_v17 = vmul.f32 %v3741_v3, %v237_v13  ;;  %v274_v19 = vmul.f32 %v3741_v3, %v242_v15  ;;  %v244_v21 = vld [vmem:[%s3747_s25 + $0x38] sm:$0xff]  ;;  %v275_v25 = vmul.f32 %v3741_v3, %v243_v20 }
  0x16   : > { %v273_v18 = vmul.f32 %v3741_v3, %v241_v14  ;;  %v302_v22 = vadd.f32 %v3752_v6, %v270_v10  ;;  %v303_v23 = vadd.f32 %v3752_v6, %v271_v11  ;;  %v304_v24 = vadd.f32 %v3752_v6, %v272_v12 }
  0x17   : > { %v301_v26 = vadd.f32 %v3752_v6, %v269_v17  ;;  %v306_v28 = vadd.f32 %v3752_v6, %v274_v19  ;;  %v276_v29 = vmul.f32 %v3741_v3, %v244_v21  ;;  %v3779_v33 = vadd.f32 %v3752_v6, %v275_v25 }
  0x18   : > { %v305_v27 = vadd.f32 %v3752_v6, %v273_v18  ;;  %v327_v30 = vmax.f32 %v302_v22, 0.0  ;;  %v328_v31 = vmax.f32 %v303_v23, 0.0  ;;  %v329_v32 = vmax.f32 %v304_v24, 0.0 }
  0x19   : > { %v326_v34 = vmax.f32 %v301_v26, 0.0  ;;  %v3781_v36 = vmax.f32 %v306_v28, 0.0  ;;  %v3784_v37 = vadd.f32 %v3752_v6, %v276_v29 }
  0x1a   : > { %v330_v35 = vmax.f32 %v305_v27, 0.0  ;;  %v393_v38 = vcombine.high %v327_v30, %v327_v30  ;;  %v3787_v39 = vrot.slane %v327_v30, %v3763_v16  ;;  %v410_v40 = vcombine.high %v328_v31, %v328_v31 }
  0x1b   : > { %v3790_v41 = vrot.slane %v328_v31, %v3763_v16  ;;  %v427_v42 = vcombine.high %v329_v32, %v329_v32  ;;  %v3793_v43 = vrot.slane %v329_v32, %v3763_v16  ;;  %v376_v44 = vcombine.high %v326_v34, %v326_v34 }
  0x1c   : > { %v3796_v45 = vrot.slane %v326_v34, %v3763_v16  ;;  %v3799_v46 = vrot.slane %v393_v38, %v3763_v16  ;;  %v3803_v47 = vcombine.high %v3787_v39, %v3787_v39  ;;  %v3806_v48 = vrot.slane %v410_v40, %v3763_v16 }
  0x1d   : > { %v3810_v49 = vcombine.high %v3790_v41, %v3790_v41  ;;  %v3813_v50 = vrot.slane %v427_v42, %v3763_v16  ;;  %v3816_v51 = vrot.slane %v376_v44, %v3763_v16  ;;  %v444_v53 = vcombine.high %v330_v35, %v330_v35 }
  0x1e   : > { %5619 = vst [vmem:[#allocation2_spill] sm:$0xff] %v3796_v45  ;;  %v3820_v52 = vcombine.high %v3796_v45, %v3796_v45  ;;  %v3824_v54 = vcombine.high %v3799_v46, %v3799_v46  ;;  %v3828_v55 = vcombine.high %v3806_v48, %v3806_v48  ;;  %v1082_v56 = vcombine.low %v3787_v39, %v3803_v47 }
  0x1f   : > { %5620 = vst [vmem:[#allocation3_spill] sm:$0xff] %v3816_v51  ;;  %v1099_v57 = vcombine.low %v3810_v49, %v3806_v48  ;;  %v3836_v58 = vcombine.high %v3813_v50, %v3813_v50  ;;  %v3840_v59 = vcombine.high %v3816_v51, %v3816_v51  ;;  %v1766_v61 = vcombine.low %v3803_v47, %v3799_v46 }
  0x20   : > { %5621 = vst [vmem:[#allocation4_spill] sm:$0xff] %v3820_v52  ;;  %v1749_v60 = vcombine.low %v3820_v52, %v3816_v51  ;;  %v1083_v62 = vcombine.low %v3824_v54, %v3790_v41  ;;  %v3849_v63 = vrot.slane %v1082_v56, %v3763_v16  ;;  %v1100_v0 = vcombine.low %v3828_v55, %v3793_v43 }
  0x21   : > { %5622 = vst [vmem:[#allocation5_spill] sm:$0xff] %v3840_v59  ;;  %v3854_v1 = vrot.slane %v1099_v57, %v3763_v16  ;;  %v1116_v2 = vcombine.low %v3813_v50, %v3836_v58  ;;  %v1750_v5 = vcombine.low %v3840_v59, %v3787_v39  ;;  %v1767_v10 = vcombine.low %v3790_v41, %v3810_v49 }
  0x22   : > { %5623 = vst [vmem:[#allocation6_spill] sm:$0xff] %v3849_v63  ;;  %v1757_v7 = vrot.slane %v1749_v60, %v3763_v16  ;;  %v3863_v8 = vrot.slane %v1083_v62, %v3763_v16  ;;  %v3866_v9 = vrot.slane %v1100_v0, %v3763_v16  ;;  %v1774_v11 = vrot.slane %v1766_v61, %v3763_v16 }
  0x23   : > { %5624 = vst [vmem:[#allocation7_spill] sm:$0xff] %v3854_v1  ;;  %v1124_v12 = vrot.slane %v1116_v2, %v3763_v16  ;;  %v1764_v13 = vrot.slane %v1750_v5, %v3763_v16  ;;  %v3874_v14 = vrot.slane %v330_v35, %v3763_v16  ;;  %v3877_v15 = vrot.slane %v444_v53, %v3763_v16 }
  0x24   : > { %5625 = vst [vmem:[#allocation8_spill] sm:$0xff] %v3863_v8  ;;  %5626 = vst [vmem:[#allocation9_spill] sm:$0xff] %v3866_v9  ;;  %v2109_v18 = vcombine.low %v3863_v8, %v3854_v1  ;;  %v1781_v20 = vrot.slane %v1767_v10, %v3763_v16  ;;  %v461_v26 = vcombine.high %v3781_v36, %v3781_v36 }
  0x25   : > { %v2110_v21 = vcombine.low %v3866_v9, %v1124_v12  ;;  %v1765_v22 = vcombine.low %v1757_v7, %v1764_v13  ;;  %v3889_v23 = vcombine.high %v3874_v14, %v3874_v14  ;;  %v3893_v24 = vcombine.high %v3877_v15, %v3877_v15 }
  0x26   : > { %v1782_v25 = vcombine.low %v1774_v11, %v1781_v20  ;;  %v3899_v27 = vrot.slane %v3781_v36, %v3763_v16  ;;  %v3903_v28 = vcombine.high %v3793_v43, %v3793_v43  ;;  %v1783_v32 = vcombine.low %v3806_v48, %v3828_v55 }
  0x27   : > { %v3317_v29 = vpack.i.bf16 %v2110_v21, %v2109_v18  ;;  %v1117_v30 = vcombine.low %v3874_v14, %v3889_v23  ;;  %v1133_v31 = vcombine.low %v3877_v15, %v3893_v24  ;;  %v3912_v35 = vrot.slane %v461_v26, %v3763_v16 }
  0x28   : > { %v3312_v34 = vpack.i.bf16 %v1782_v25, %v1765_v22  ;;  %v3916_v36 = vcombine.high %v3899_v27, %v3899_v27  ;;  %v1784_v44 = vcombine.low %v3793_v43, %v3903_v28  ;;  %v1791_v53 = vrot.slane %v1783_v32, %v3763_v16 }
  0x29   : > { %3318 = vrot.lane.b32.xlu1 %v3317_v29, %s3688_s28  ;;  %v3921_v40 = vrot.slane %v1117_v30, %v3763_v16  ;;  %v3924_v42 = vrot.slane %v1133_v31, %v3763_v16  ;;  %v1800_v60 = vcombine.low %v3836_v58, %v3874_v14  ;;  %v3937_v61 = vcombine.high %v3912_v35, %v3912_v35 }
  0x2a   : > { %3313 = vrot.lane.b32.xlu0 %v3312_v34, %s3689_s29  ;;  %v1134_v57 = vcombine.low %v3916_v36, %v3912_v35  ;;  %v1798_v0 = vrot.slane %v1784_v44, %v3763_v16  ;;  %v2301_v2 = vcombine.low %v1781_v20, %v1791_v53  ;;  %v1801_v5 = vcombine.low %v3889_v23, %v3877_v15 }
  0x2b   : > { %v3940_v62 = vcombine.low %v1124_v12, %v3921_v40  ;;  %v1808_v10 = vrot.slane %v1800_v60, %v3763_v16  ;;  %v1817_v11 = vcombine.low %v3893_v24, %v3899_v27  ;;  %v1818_v13 = vcombine.low %v3912_v35, %v3937_v61 }
  0x2c   : > { %v1148_v7 = vrot.slane %v1134_v57, %v3763_v16  ;;  %v1815_v12 = vrot.slane %v1801_v5, %v3763_v16  ;;  %v332_v18 = vmax.f32 %v3779_v33, 0.0  ;;  %v2111_v20 = vcombine.low %v3921_v40, %v3924_v42 }
  0x2d   : > { %5627 = vst [vmem:[#allocation10_spill] sm:$0xff] %v3940_v62  ;;  %v1799_v21 = vcombine.low %v1791_v53, %v1798_v0  ;;  %v2302_v25 = vcombine.low %v1798_v0, %v1808_v10  ;;  %v1825_v26 = vrot.slane %v1817_v11, %v3763_v16  ;;  %v1832_v29 = vrot.slane %v1818_v13, %v3763_v16 }
  0x2e   : > { %v3958_v22 = vcombine.low %v3924_v42, %v1148_v7  ;;  %v1816_v30 = vcombine.low %v1808_v10, %v1815_v12  ;;  %v3963_v31 = vrot.slane %v332_v18, %v3763_v16  ;;  %v333_v32 = vmax.f32 %v3784_v37, 0.0 }
  0x2f   : > { %v478_v34 = vcombine.high %v332_v18, %v332_v18  ;;  %v3322_v42 = vpack.i.bf16 %v2302_v25, %v2301_v2  ;;  %v3973_v44 = vcombine.low %v1825_v26, %v1832_v29  ;;  %v2303_v53 = vcombine.low %v1815_v12, %v1825_v26 }
  0x30   : > { %5628 = vst [vmem:[#allocation11_spill] sm:$0xff] %v3958_v22  ;;  %v3327_v40 = vpack.i.bf16 %v3958_v22, %v3940_v62  ;;  %v1150_v57 = vcombine.low %v3937_v61, %v3963_v31  ;;  %v3337_v60 = vpack.i.bf16 %v1816_v30, %v1799_v21  ;;  %v3979_v37 = vcombine.high %v3963_v31, %v3963_v31  ;;  %v245_v22 = vld [vmem:[%s3747_s25 + $0x40] sm:$0xff] }
  0x31   : > { %v3982_v0 = vrot.slane %v478_v34, %v3763_v16  ;;  %3323 = vrot.lane.b32.xlu0 %v3322_v42, %s3691_s6  ;;  %v3332_v2 = vpack.i.bf16 %v3973_v44, %v1816_v30  ;;  %v495_v5 = vcombine.high %v333_v32, %v333_v32  ;;  %v3988_v10 = vrot.slane %v333_v32, %v3763_v16 }
  0x32   : > { %3328 = vrot.lane.b32.xlu1 %v3327_v40, %s3690_s30  ;;  %v3191_v13 = vrot.slane %v3796_v45, 9  ;;  %v1158_v12 = vrot.slane %v1150_v57, %v3763_v16  ;;  %v1834_v18 = vcombine.low %v3963_v31, %v3979_v37  ;;  %v801_v25 = vrot.slane %v3820_v52, 7 }
  0x33   : > { %v1151_v21 = vcombine.low %v3979_v37, %v3982_v0  ;;  %v4005_v26 = vrot.slane %v495_v5, %v3763_v16  ;;  %v4009_v30 = vcombine.high %v3988_v10, %v3988_v10  ;;  %v804_v32 = vrot.slane %v3816_v51, 7 }
  0x34   : > { %v807_v34 = vrot.slane %v3840_v59, 7  ;;  %v2112_v33 = vcombine.low %v1148_v7, %v1158_v12  ;;  %v4014_v40 = vrot.slane %v1834_v18, %v3763_v16  ;;  %v802_v57 = vsel %vm3993_vm6, %v3191_v13, %v801_v25 }
  0x35   : > { %v4017_v42 = vrot.slane %v1151_v21, %v3763_v16  ;;  %v4024_v5 = vcombine.high %v4005_v26, %v4005_v26  ;;  %v1167_v7 = vcombine.low %v3988_v10, %v4009_v30  ;;  %v803_v17 = vrot.slane %v801_v25, 2 }
  0x36   : > { %3333 = vrot.lane.b32.xlu1 %v3332_v2, %s3692_s7  ;;  %v806_v18 = vrot.slane %v804_v32, 2  ;;  %v3342_v19 = vpack.i.bf16 %v2112_v33, %v2111_v20  ;;  %v2304_v21 = vcombine.low %v1832_v29, %v4014_v40  ;;  %v809_v56 = vrot.slane %v807_v34, 2 }
  0x37   : > { %v4030_v38 = vcombine.low %v1158_v12, %v4017_v42  ;;  %v1168_v13 = vcombine.low %v4005_v26, %v4024_v5  ;;  %v4035_v2 = vrot.slane %v1167_v7, %v3763_v16  ;;  %v805_v4 = vsel %vm3993_vm6, %v803_v17, %v804_v32 }
  0x38   : > { %v808_v25 = vsel %vm3993_vm6, %v806_v18, %v807_v34  ;;  %3343 = vrot.lane.b32.xlu0 %v3342_v19, %s3688_s28  ;;  %v3347_v20 = vpack.i.bf16 %v2304_v21, %v2303_v53  ;;  %v810_v29 = vrot.slane %v3787_v39, 7  ;;  %v813_v12 = vrot.slane %v3803_v47, 7 }
  0x39   : > { %5633 = vst [vmem:[#allocation12_spill] sm:$0xff] %v4030_v38  ;;  %v816_v33 = vrot.slane %v3799_v46, 7  ;;  %v4048_v7 = vrot.slane %v1168_v13, %v3763_v16  ;;  %v820_v17 = vrot.slane %v3790_v41, 7  ;;  %v823_v32 = vrot.slane %v3810_v49, 7 }
  0x3a   : > { %3338 = vrot.lane.b32.xlu1 %v3337_v60, %s3689_s29  ;;  %v1389_v34 = vcombine.low %v802_v57, %v805_v4  ;;  %v811_v19 = vsel %vm3993_vm6, %v809_v56, %v810_v29  ;;  %v812_v53 = vrot.slane %v810_v29, 2  ;;  %v815_v18 = vrot.slane %v813_v12, 2 }
  0x3b   : > { %v277_v39 = vmul.f32 %v3741_v3, %v245_v22  ;;  %v4057_v46 = vcombine.low %v4035_v2, %v4048_v7  ;;  %v5635_v47 = vrot.slane %v3824_v54, 9  ;;  %v822_v41 = vrot.slane %v820_v17, 2 }
  0x3c   : > { %v1390_v21 = vcombine.low %v808_v25, %v811_v19  ;;  %3348 = vrot.lane.b32.xlu0 %v3347_v20, %s3691_s6  ;;  %v814_v4 = vsel %vm3993_vm6, %v812_v53, %v813_v12  ;;  %v817_v56 = vsel %vm3993_vm6, %v815_v18, %v816_v33  ;;  %v1397_v22 = vrot.slane %v1389_v34, %v3763_v16 }
  0x3d   : > { %5634 = vst [vmem:[#allocation13_spill] sm:$0xff] %v4057_v46  ;;  %v821_v60 = vsel %vm3993_vm6, %v5635_v47, %v820_v17  ;;  %v309_v57 = vadd.f32 %v3752_v6, %v277_v39  ;;  %v3352_v54 = vpack.i.bf16 %v4057_v46, %v4030_v38  ;;  %v824_v13 = vsel %vm3993_vm6, %v822_v41, %v823_v32 }
  0x3e   : > { %v1404_v25 = vrot.slane %v1390_v21, %v3763_v16  ;;  %v1406_v20 = vcombine.low %v814_v4, %v817_v56  ;;  %v1407_v29 = vcombine.low %v821_v60, %v824_v13  ;;  %v4081_v33 = vcombine.high %v3982_v0, %v3982_v0 }
  0x3f   : > { %v4077_v12 = vmax.f32 %v309_v57, 0.0  ;;  %v1851_v17 = vcombine.low %v4009_v30, %v4005_v26  ;;  %3353 = vrot.lane.b32.xlu1 %v3352_v54, %s3690_s30  ;;  %v3193_v53 = vrot.slane %v3813_v50, 9  ;;  %v839_v18 = vrot.slane %v3836_v58, 7 }
  0x40   : > { %v1405_v34 = vcombine.low %v1397_v22, %v1404_v25  ;;  %v1414_v19 = vrot.slane %v1406_v20, %v3763_v16  ;;  %v4090_v39 = vrot.slane %v1407_v29, %v3763_v16  ;;  %v1835_v60 = vcombine.low %v3982_v0, %v4081_v33 }
  0x41   : > { %v4094_v47 = vrot.slane %v4077_v12, %v3763_v16  ;;  %v4099_v41 = vrot.slane %v1851_v17, %v3763_v16  ;;  %v873_v21 = vrot.slane %v4081_v33, 7  ;;  %v840_v50 = vsel %vm3993_vm6, %v3193_v53, %v839_v18 }
  0x42   : > { %v841_v4 = vrot.slane %v839_v18, 2  ;;  %v842_v58 = vrot.slane %v3874_v14, 7  ;;  %v1422_v56 = vcombine.low %v1414_v19, %v4090_v39  ;;  %v4107_v22 = vrot.slane %v1835_v60, %v3763_v16 }
  0x43   : > { %v1852_v57 = vcombine.low %v4024_v5, %v4094_v47  ;;  %v845_v54 = vrot.slane %v3889_v23, 7  ;;  %v848_v20 = vrot.slane %v3877_v15, 7  ;;  %v851_v29 = vrot.slane %v3893_v24, 7 }
  0x44   : > { %v843_v13 = vsel %vm3993_vm6, %v841_v4, %v842_v58  ;;  %v844_v25 = vrot.slane %v842_v58, 2  ;;  %v3362_v17 = vpack.i.bf16 %v1422_v56, %v1405_v34  ;;  %v4118_v14 = vcombine.low %v4014_v40, %v4107_v22 }
  0x45   : > { %v4121_v19 = vrot.slane %v1852_v57, %v3763_v16  ;;  %v847_v53 = vrot.slane %v845_v54, 2  ;;  %v850_v18 = vrot.slane %v848_v20, 2  ;;  %v853_v60 = vrot.slane %v851_v29, 2 }
  0x46   : > { %v846_v23 = vsel %vm3993_vm6, %v844_v25, %v845_v54  ;;  %v854_v4 = vrot.slane %v3899_v27, 7  ;;  %3363 = vrot.lane.b32.xlu0 %v3362_v17, %s3693_s8  ;;  %v858_v40 = vrot.slane %v3912_v35, 7  ;;  %v861_v34 = vrot.slane %v3937_v61, 7 }
  0x47   : > { %v4129_v15 = vcombine.low %v4099_v41, %v4121_v19  ;;  %v849_v24 = vsel %vm3993_vm6, %v847_v53, %v848_v20  ;;  %v852_v58 = vsel %vm3993_vm6, %v850_v18, %v851_v29  ;;  %v1440_v56 = vcombine.low %v840_v50, %v843_v13 }
  0x48   : > { %v855_v27 = vsel %vm3993_vm6, %v853_v60, %v854_v4  ;;  %v1441_v57 = vcombine.low %v846_v23, %v849_v24  ;;  %v5636_v25 = vrot.slane %v3916_v36, 9  ;;  %v860_v17 = vrot.slane %v858_v40, 2 }
  0x49   : > { %v3357_v54 = vpack.i.bf16 %v4129_v15, %v4118_v14  ;;  %v1457_v35 = vcombine.low %v852_v58, %v855_v27  ;;  %v1448_v61 = vrot.slane %v1440_v56, %v3763_v16  ;;  %v825_v29 = vrot.slane %v823_v32, 2 }
  0x4a   : > { %v859_v20 = vsel %vm3993_vm6, %v5636_v25, %v858_v40  ;;  %v4147_v53 = vrot.slane %v1441_v57, %v3763_v16  ;;  %v826_v50 = vrot.slane %v3806_v48, 7  ;;  %v862_v36 = vsel %vm3993_vm6, %v860_v17, %v861_v34 }
  0x4b   : > { %3358 = vrot.lane.b32.xlu1 %v3357_v54, %s3692_s7  ;;  %v1465_v13 = vrot.slane %v1457_v35, %v3763_v16  ;;  %v829_v23 = vrot.slane %v3828_v55, 7  ;;  %v832_v18 = vrot.slane %v3793_v43, 7  ;;  %v1458_v4 = vcombine.low %v859_v20, %v862_v36 }
  0x4c   : > { %v1456_v60 = vcombine.low %v1448_v61, %v4147_v53  ;;  %v827_v49 = vsel %vm3993_vm6, %v825_v29, %v826_v50  ;;  %v828_v32 = vrot.slane %v826_v50, 2  ;;  %v863_v40 = vrot.slane %v861_v34, 2 }
  0x4d   : > { %v831_v24 = vrot.slane %v829_v23, 2  ;;  %v834_v48 = vrot.slane %v832_v18, 2  ;;  %v864_v58 = vrot.slane %v3963_v31, 7  ;;  %v1472_v27 = vrot.slane %v1458_v4, %v3763_v16 }
  0x4e   : > { %v830_v56 = vsel %vm3993_vm6, %v828_v32, %v829_v23  ;;  %v867_v55 = vrot.slane %v3979_v37, 7  ;;  %v2207_v43 = vcombine.low %v4147_v53, %v1465_v13  ;;  %v5637_v54 = vrot.slane %v3903_v28, 7 }
  0x4f   : > { %v833_v57 = vsel %vm3993_vm6, %v831_v24, %v832_v18  ;;  %v1423_v34 = vcombine.low %v827_v49, %v830_v56  ;;  %v865_v31 = vsel %vm3993_vm6, %v863_v40, %v864_v58  ;;  %v4175_v20 = vcombine.low %v1465_v13, %v1472_v27 }
  0x50   : > { %v836_v25 = vsel %vm3993_vm6, %v834_v48, %v5637_v54  ;;  %v866_v35 = vrot.slane %v864_v58, 2  ;;  %v869_v29 = vrot.slane %v867_v55, 2  ;;  %v870_v53 = vrot.slane %v3982_v0, 7 }
  0x51   : > { %v1424_v17 = vcombine.low %v833_v57, %v836_v25  ;;  %v1431_v37 = vrot.slane %v1423_v34, %v3763_v16  ;;  %v3195_v50 = vrot.slane %v3988_v10, 9  ;;  %v877_v28 = vrot.slane %v4009_v30, 7 }
  0x52   : > { %v3372_v36 = vpack.i.bf16 %v4175_v20, %v1456_v60  ;;  %v868_v18 = vsel %vm3993_vm6, %v866_v35, %v867_v55  ;;  %v880_v13 = vrot.slane %v4005_v26, 7  ;;  %v871_v32 = vsel %vm3993_vm6, %v869_v29, %v870_v53 }
  0x53   : > { %v1438_v23 = vrot.slane %v1424_v17, %v3763_v16  ;;  %v2205_v4 = vcombine.low %v4090_v39, %v1431_v37  ;;  %v1474_v49 = vcombine.low %v865_v31, %v868_v18  ;;  %v872_v0 = vrot.slane %v870_v53, 2  ;;  %v247_v53 = vld [vmem:[%s3747_s25 + $0x50] sm:$0xff] }
  0x54   : > { %3373 = vrot.lane.b32.xlu0 %v3372_v36, %s3694_s9  ;;  %v878_v24 = vsel %vm3993_vm6, %v3195_v50, %v877_v28  ;;  %v879_v48 = vrot.slane %v877_v28, 2  ;;  %v882_v39 = vrot.slane %v880_v13, 2  ;;  %v883_v58 = vrot.slane %v4024_v5, 7 }
  0x55   : > { %v2206_v10 = vcombine.low %v1438_v23, %v1448_v61  ;;  %v1439_v30 = vcombine.low %v1431_v37, %v1438_v23  ;;  %v1482_v40 = vrot.slane %v1474_v49, %v3763_v16  ;;  %v874_v26 = vsel %vm3993_vm6, %v872_v0, %v873_v21 }
  0x56   : > { %v881_v61 = vsel %vm3993_vm6, %v879_v48, %v880_v13  ;;  %v886_v57 = vrot.slane %v4094_v47, 7  ;;  %v884_v25 = vsel %vm3993_vm6, %v882_v39, %v883_v58  ;;  %v885_v33 = vrot.slane %v883_v58, 2  ;;  %v248_v48 = vld [vmem:[%s3747_s25 + $0x58] sm:$0xff] }
  0x57   : > { %v3367_v56 = vpack.i.bf16 %v2206_v10, %v2205_v4  ;;  %v3377_v55 = vpack.i.bf16 %v1456_v60, %v1439_v30  ;;  %v2208_v54 = vcombine.low %v1472_v27, %v1482_v40  ;;  %v1475_v34 = vcombine.low %v871_v32, %v874_v26  ;;  %v246_v27 = vld [vmem:[%s3747_s25 + $0x48] sm:$0xff] }
  0x58   : > { %v1491_v5 = vcombine.low %v878_v24, %v881_v61  ;;  %v3397_v21 = vpack.i.bf16 %v4118_v14, %v3973_v44  ;;  %v512_v60 = vcombine.high %v4077_v12, %v4077_v12  ;;  %v888_v31 = vrot.slane %v886_v57, 2 }
  0x59   : > { %3368 = vrot.lane.b32.xlu1 %v3367_v56, %s3695_s10  ;;  %3378 = vrot.lane.b32.xlu0 %v3377_v55, %s3693_s8  ;;  %v3382_v17 = vpack.i.bf16 %v2208_v54, %v2207_v43  ;;  %v887_v35 = vsel %vm3993_vm6, %v885_v33, %v886_v57  ;;  %v1489_v29 = vrot.slane %v1475_v34, %v3763_v16  ;;  %v249_v57 = vld [vmem:[%s3747_s25 + $0x60] sm:$0xff]  ;;  %v250_v54 = vld [vmem:[%s3747_s25 + $0x68] sm:$0xff] }
  0x5a   : > { %v527_v37 = vcombine.high %v4094_v47, %v4094_v47  ;;  %v1492_v50 = vcombine.low %v884_v25, %v887_v35  ;;  %v1499_v28 = vrot.slane %v1491_v5, %v3763_v16  ;;  %v526_v44 = vrot.slane %v512_v60, %v3763_v16 }
  0x5b   : > { %v2113_v12 = vcombine.low %v4017_v42, %v4035_v2  ;;  %v1490_v14 = vcombine.low %v1482_v40, %v1489_v29  ;;  %v278_v23 = vmul.f32 %v3741_v3, %v246_v27  ;;  %v279_v49 = vmul.f32 %v3741_v3, %v247_v53 }
  0x5c   : > { %v889_v36 = vrot.slane %v527_v37, 7  ;;  %v1184_v43 = vcombine.low %v4094_v47, %v527_v37  ;;  %v1506_v18 = vrot.slane %v1492_v50, %v3763_v16  ;;  %v892_v13 = vrot.slane %v526_v44, 7 }
  0x5d   : > { %3383 = vrot.lane.b32.xlu1 %v3382_v17, %s3695_s10  ;;  %v2209_v4 = vcombine.low %v1489_v29, %v1499_v28  ;;  %v3392_v32 = vpack.i.bf16 %v1490_v14, %v4175_v20  ;;  %v310_v10 = vadd.f32 %v3752_v6, %v278_v23  ;;  %v311_v30 = vadd.f32 %v3752_v6, %v279_v49 }
  0x5e   : > { %v890_v42 = vsel %vm3993_vm6, %v888_v31, %v889_v36  ;;  %v891_v2 = vrot.slane %v889_v36, 2  ;;  %v1192_v0 = vrot.slane %v1184_v43, %v3763_v16  ;;  %v4229_v47 = vcombine.low %v1499_v28, %v1506_v18 }
  0x5f   : > { %v528_v24 = vcombine.high %v526_v44, %v526_v44  ;;  %v1868_v26 = vcombine.low %v527_v37, %v526_v44  ;;  %v2305_v39 = vcombine.low %v4107_v22, %v4099_v41  ;;  %v335_v55 = vmax.f32 %v310_v10, 0.0 }
  0x60   : > { %v893_v40 = vsel %vm3993_vm6, %v891_v2, %v892_v13  ;;  %v2114_v20 = vcombine.low %v4048_v7, %v1192_v0  ;;  %v3387_v58 = vpack.i.bf16 %v4229_v47, %v1490_v14  ;;  %v4241_v61 = vmax.f32 %v311_v30, 0.0 }
  0x61   : > { %3398 = vrot.lane.b32.xlu1 %v3397_v21, %s3689_s29  ;;  %v1508_v56 = vcombine.low %v890_v42, %v893_v40  ;;  %v3196_v33 = vrot.slane %v528_v24, 9  ;;  %v1876_v34 = vrot.slane %v1868_v26, %v3763_v16  ;;  %v280_v7 = vmul.f32 %v3741_v3, %v248_v48 }
  0x62   : > { %v3402_v25 = vpack.i.bf16 %v2114_v20, %v2113_v12  ;;  %3388 = vrot.lane.b32.xlu0 %v3387_v58, %s3694_s9  ;;  %v529_v22 = vcombine.high %v335_v55, %v335_v55  ;;  %v536_v5 = vrot.slane %v335_v55, %v3763_v16  ;;  %v553_v21 = vrot.slane %v4241_v61, %v3763_v16 }
  0x63   : > { %v4249_v41 = vrot.slane %v1508_v56, %v3763_v16  ;;  %v2306_v60 = vcombine.low %v4121_v19, %v1876_v34  ;;  %v281_v31 = vmul.f32 %v3741_v3, %v249_v57  ;;  %v282_v27 = vmul.f32 %v3741_v3, %v250_v54 }
  0x64   : > { %v312_v17 = vadd.f32 %v3752_v6, %v280_v7  ;;  %v543_v29 = vrot.slane %v529_v22, %v3763_v16  ;;  %v544_v37 = vcombine.high %v536_v5, %v536_v5  ;;  %v1185_v53 = vcombine.low %v528_v24, %v536_v5 }
  0x65   : > { %v2210_v35 = vcombine.low %v1506_v18, %v4249_v41  ;;  %v3412_v50 = vpack.i.bf16 %v2306_v60, %v2305_v39  ;;  %v561_v28 = vcombine.high %v553_v21, %v553_v21  ;;  %v896_v44 = vrot.slane %v536_v5, 7 }
  0x66   : > { %v908_v12 = vrot.slane %v553_v21, 7  ;;  %3393 = vrot.lane.b32.xlu0 %v3392_v32, %s3693_s8  ;;  %v545_v19 = vcombine.high %v543_v29, %v543_v29  ;;  %v4262_v36 = vrot.slane %v1185_v53, %v3763_v16  ;;  %v1201_v43 = vcombine.low %v544_v37, %v543_v29 }
  0x67   : > { %v3407_v14 = vpack.i.bf16 %v2210_v35, %v2209_v4  ;;  %v911_v23 = vrot.slane %v561_v28, 7  ;;  %v1869_v13 = vcombine.low %v536_v5, %v544_v37  ;;  %v1886_v49 = vcombine.low %v553_v21, %v561_v28 }
  0x68   : > { %v897_v18 = vsel %vm3993_vm6, %v3196_v33, %v896_v44  ;;  %v4268_v42 = vcombine.low %v1192_v0, %v4262_v36  ;;  %v1202_v2 = vcombine.low %v545_v19, %v553_v21  ;;  %v4271_v32 = vrot.slane %v1201_v43, %v3763_v16  ;;  %v251_v21 = vld [vmem:[%s3747_s25 + $0x70] sm:$0xff] }
  0x69   : > { %3408 = vrot.lane.b32.xlu1 %v3407_v14, %s3695_s10  ;;  %v1885_v4 = vcombine.low %v543_v29, %v545_v19  ;;  %v4274_v10 = vrot.slane %v1869_v13, %v3763_v16  ;;  %v4277_v30 = vrot.slane %v1886_v49, %v3763_v16  ;;  %v898_v24 = vrot.slane %v896_v44, 2  ;;  %v252_v14 = vld [vmem:[%s3747_s25 + $0x78] sm:$0xff] }
  0x6a   : > { %5638 = vst [vmem:[#allocation14_spill] sm:$0xff] %v4268_v42  ;;  %v899_v48 = vrot.slane %v544_v37, 7  ;;  %3403 = vrot.lane.b32.xlu0 %v3402_v25, %s3688_s28  ;;  %v4281_v40 = vrot.slane %v1202_v2, %v3763_v16  ;;  %v902_v20 = vrot.slane %v543_v29, 7  ;;  %v905_v26 = vrot.slane %v545_v19, 7 }
  0x6b   : > { %v4284_v0 = vrot.slane %v1885_v4, %v3763_v16  ;;  %v4287_v39 = vcombine.low %v1876_v34, %v4274_v10  ;;  %v910_v55 = vrot.slane %v908_v12, 2  ;;  %v313_v5 = vadd.f32 %v3752_v6, %v281_v31 }
  0x6c   : > { %v900_v58 = vsel %vm3993_vm6, %v898_v24, %v899_v48  ;;  %v901_v56 = vrot.slane %v899_v48, 2  ;;  %v4293_v57 = vcombine.low %v4271_v32, %v4281_v40  ;;  %v904_v25 = vrot.slane %v902_v20, 2 }
  0x6d   : > { %v4297_v54 = vcombine.low %v4284_v0, %v4277_v30  ;;  %v907_v33 = vrot.slane %v905_v26, 2  ;;  %v912_v7 = vsel %vm3993_vm6, %v910_v55, %v911_v23  ;;  %v1509_v22 = vcombine.low %v897_v18, %v900_v58 }
  0x6e   : > { %5639 = vst [vmem:[#allocation15_spill] sm:$0xff] %v4293_v57  ;;  %v903_v34 = vsel %vm3993_vm6, %v901_v56, %v902_v20  ;;  %v3417_v60 = vpack.i.bf16 %v4293_v57, %v4268_v42  ;;  %3413 = vrot.lane.b32.xlu0 %v3412_v50, %s3691_s6  ;;  %v906_v29 = vsel %vm3993_vm6, %v904_v25, %v905_v26  ;;  %v4320_v50 = vmax.f32 %v312_v17, 0.0 }
  0x6f   : > { %v3427_v35 = vpack.i.bf16 %v4297_v54, %v4287_v39  ;;  %v909_v37 = vsel %vm3993_vm6, %v907_v33, %v908_v12  ;;  %v4315_v53 = vrot.slane %v1509_v22, %v3763_v16  ;;  %v1525_v28 = vcombine.low %v903_v34, %v906_v29 }
  0x70   : > { %v1526_v31 = vcombine.low %v909_v37, %v912_v7  ;;  %v314_v44 = vadd.f32 %v3752_v6, %v282_v27  ;;  %3418 = vrot.lane.b32.xlu1 %v3417_v60, %s3690_s30  ;;  %v338_v19 = vmax.f32 %v313_v5, 0.0  ;;  %v4325_v23 = vmul.f32 %v3741_v3, %v251_v21 }
  0x71   : > { %v1524_v12 = vcombine.low %v4249_v41, %v4315_v53  ;;  %v4330_v13 = vrot.slane %v1525_v28, %v3763_v16  ;;  %v563_v17 = vcombine.high %v4320_v50, %v4320_v50  ;;  %v284_v4 = vmul.f32 %v3741_v3, %v252_v14 }
  0x72   : > { %v4333_v27 = vrot.slane %v1526_v31, %v3763_v16  ;;  %v339_v49 = vmax.f32 %v314_v44, 0.0  ;;  %v580_v18 = vcombine.high %v338_v19, %v338_v19  ;;  %v587_v2 = vrot.slane %v338_v19, %v3763_v16 }
  0x73   : > { %v3432_v20 = vpack.i.bf16 %v1524_v12, %v4229_v47  ;;  %v4349_v26 = vrot.slane %v563_v17, %v3763_v16 }
  0x74   : > { %v4341_v24 = vcombine.low %v4330_v13, %v4333_v27  ;;  %v597_v41 = vcombine.high %v339_v49, %v339_v49  ;;  %v4344_v48 = vrot.slane %v339_v49, %v3763_v16  ;;  %3428 = vrot.lane.b32.xlu1 %v3427_v35, %s3692_s7  ;;  %v4352_v58 = vrot.slane %v580_v18, %v3763_v16 }
  0x75   : > { %v4354_v56 = vcombine.high %v587_v2, %v587_v2  ;;  %v930_v3 = vrot.slane %v587_v2, 7  ;;  %v4363_v34 = vcombine.high %v4349_v26, %v4349_v26  ;;  %v5598_v22 = vrot.slane %v4349_v26, 7 }
  0x76   : > { %v3422_v55 = vpack.i.bf16 %v4341_v24, %v1524_v12  ;;  %v611_v25 = vrot.slane %v597_v41, %v3763_v16  ;;  %v612_v33 = vcombine.high %v4344_v48, %v4344_v48  ;;  %v940_v47 = vrot.slane %v4344_v48, 7 }
  0x77   : > { %v4367_v7 = vcombine.high %v4352_v58, %v4352_v58  ;;  %v3198_v5 = vrot.slane %v4354_v56, 9  ;;  %v934_v60 = vrot.slane %v4352_v58, 7  ;;  %v926_v37 = vrot.slane %v5598_v22, 2 }
  0x78   : > { %3423 = vrot.lane.b32.xlu0 %v3422_v55, %s3694_s9  ;;  %v613_v21 = vcombine.high %v611_v25, %v611_v25  ;;  %v942_v35 = vrot.slane %v940_v47, 2  ;;  %v943_v29 = vrot.slane %v612_v33, 7  ;;  %v927_v28 = vrot.slane %v4363_v34, 7 }
  0x79   : > { %v937_v31 = vrot.slane %v4367_v7, 7  ;;  %v946_v44 = vrot.slane %v611_v25, 7  ;;  %v935_v14 = vsel %vm3993_vm6, %v3198_v5, %v934_v60  ;;  %v936_v19 = vrot.slane %v934_v60, 2 }
  0x7a   : > { %v944_v12 = vsel %vm3993_vm6, %v942_v35, %v943_v29  ;;  %v945_v49 = vrot.slane %v943_v29, 2  ;;  %v928_v17 = vsel %vm3993_vm6, %v926_v37, %v927_v28  ;;  %v929_v18 = vrot.slane %v927_v28, 2 }
  0x7b   : > { %v939_v41 = vrot.slane %v937_v31, 2  ;;  %v948_v55 = vrot.slane %v946_v44, 2  ;;  %v938_v22 = vsel %vm3993_vm6, %v936_v19, %v937_v31  ;;  %v949_v57 = vrot.slane %v613_v21, 7 }
  0x7c   : > { %v947_v43 = vsel %vm3993_vm6, %v945_v49, %v946_v44  ;;  %3433 = vrot.lane.b32.xlu0 %v3432_v20, %s3693_s8  ;;  %v1919_v5 = vcombine.low %v4363_v34, %v587_v2  ;;  %v931_v60 = vsel %vm3993_vm6, %v929_v18, %v930_v3  ;;  %v1560_v29 = vcombine.low %v935_v14, %v938_v22 }
  0x7d   : > { %v941_v35 = vsel %vm3993_vm6, %v939_v41, %v940_v47  ;;  %v1920_v37 = vcombine.low %v4352_v58, %v4367_v7  ;;  %v950_v28 = vsel %vm3993_vm6, %v948_v55, %v949_v57  ;;  %v1559_v31 = vcombine.low %v928_v17, %v931_v60 }
  0x7e   : > { %v1576_v44 = vcombine.low %v941_v35, %v944_v12  ;;  %v4398_v19 = vrot.slane %v1919_v5, %v3763_v16  ;;  %v4401_v2 = vrot.slane %v1560_v29, %v3763_v16  ;;  %v1577_v20 = vcombine.low %v947_v43, %v950_v28 }
  0x7f   : > { %v4404_v3 = vrot.slane %v1920_v37, %v3763_v16  ;;  %v1936_v47 = vcombine.low %v4344_v48, %v612_v33  ;;  %v4408_v22 = vrot.slane %v1559_v31, %v3763_v16  ;;  %v1937_v57 = vcombine.low %v611_v25, %v613_v21 }
  0x80   : > { %v4411_v14 = vrot.slane %v1576_v44, %v3763_v16  ;;  %v5640_v12 = vpack.i.bf16 %v4287_v39, %v4129_v15  ;;  %v315_v43 = vadd.f32 %v3752_v6, %v4325_v23  ;;  %v4420_v49 = vrot.slane %v1577_v20, %v3763_v16 }
  0x81   : > { %v4424_v17 = vcombine.low %v4398_v19, %v4404_v3  ;;  %v4427_v18 = vrot.slane %v1936_v47, %v3763_v16  ;;  %v316_v21 = vadd.f32 %v3752_v6, %v284_v4  ;;  %v4432_v41 = vcombine.low %v4408_v22, %v4401_v2 }
  0x82   : > { %3443 = vrot.lane.b32.xlu0 %v5640_v12, %s3689_s29  ;;  %v4435_v15 = vrot.slane %v1937_v57, %v3763_v16  ;;  %v340_v39 = vmax.f32 %v315_v43, 0.0  ;;  %v1253_v23 = vcombine.low %v612_v33, %v611_v25  ;;  %v4439_v55 = vcombine.low %v4411_v14, %v4420_v49 }
  0x83   : > { %v341_v5 = vmax.f32 %v316_v21, 0.0  ;;  %v546_v60 = vcombine.high %v4241_v61, %v4241_v61  ;;  %v2115_v6 = vcombine.low %v4262_v36, %v4271_v32 }
  0x84   : > { %5641 = vst [vmem:[#allocation16_spill] sm:$0xff] %v4439_v55  ;;  %v4447_v4 = vcombine.low %v4427_v18, %v4435_v15  ;;  %v614_v35 = vcombine.high %v340_v39, %v340_v39  ;;  %v621_v29 = vrot.slane %v340_v39, %v3763_v16  ;;  %v4451_v25 = vrot.slane %v1253_v23, %v3763_v16 }
  0x85   : > { %v3437_v33 = vpack.i.bf16 %v4439_v55, %v4432_v41  ;;  %v4456_v37 = vrot.slane %v341_v5, %v3763_v16  ;;  %v560_v61 = vrot.slane %v546_v60, %v3763_v16  ;;  %v631_v28 = vcombine.high %v341_v5, %v341_v5 }
  0x86   : > { %5642 = vst [vmem:[#allocation17_spill] sm:$0xff] %v4447_v4  ;;  %v3447_v36 = vpack.i.bf16 %v4447_v4, %v4424_v17  ;;  %v4462_v32 = vrot.slane %v614_v35, %v3763_v16  ;;  %v629_v31 = vcombine.high %v621_v29, %v621_v29  ;;  %v3199_v44 = vrot.slane %v621_v29, 9 }
  0x87   : > { %3438 = vrot.lane.b32.xlu1 %v3437_v33, %s3693_s8  ;;  %v4467_v20 = vcombine.high %v4456_v37, %v4456_v37  ;;  %v4469_v47 = vcombine.high %v560_v61, %v560_v61  ;;  %v4472_v57 = vrot.slane %v631_v28, %v3763_v16  ;;  %v962_v12 = vrot.slane %v4456_v37, 7 }
  0x88   : > { %v630_v43 = vcombine.high %v4462_v32, %v4462_v32  ;;  %v1269_v21 = vcombine.low %v621_v29, %v629_v31  ;;  %v953_v39 = vrot.slane %v629_v31, 7  ;;  %v956_v23 = vrot.slane %v4462_v32, 7 }
  0x89   : > { %v1286_v5 = vcombine.low %v4456_v37, %v4467_v20  ;;  %v1218_v60 = vcombine.low %v560_v61, %v4469_v47  ;;  %v964_v35 = vrot.slane %v962_v12, 2  ;;  %v965_v33 = vrot.slane %v4467_v20, 7 }
  0x8a   : > { %v1270_v28 = vcombine.low %v4462_v32, %v630_v43  ;;  %v4484_v46 = vrot.slane %v1269_v21, %v3763_v16  ;;  %v954_v42 = vsel %vm3993_vm6, %v3199_v44, %v953_v39  ;;  %v955_v29 = vrot.slane %v953_v39, 2 }
  0x8b   : > { %3448 = vrot.lane.b32.xlu1 %v3447_v36, %s3689_s29  ;;  %v4490_v38 = vrot.slane %v1286_v5, %v3763_v16  ;;  %v4493_v9 = vrot.slane %v1218_v60, %v3763_v16  ;;  %v958_v1 = vrot.slane %v956_v23, 2  ;;  %v959_v62 = vrot.slane %v630_v43, 7 }
  0x8c   : > { %v4496_v8 = vrot.slane %v1270_v28, %v3763_v16  ;;  %v2119_v21 = vcombine.low %v4451_v25, %v4484_v46  ;;  %v957_v44 = vsel %vm3993_vm6, %v955_v29, %v956_v23  ;;  %v966_v36 = vsel %vm3993_vm6, %v964_v35, %v965_v33 }
  0x8d   : > { %v2116_v39 = vcombine.low %v4281_v40, %v4493_v9  ;;  %v960_v5 = vsel %vm3993_vm6, %v958_v1, %v959_v62  ;;  %v961_v60 = vrot.slane %v959_v62, 2  ;;  %v967_v63 = vrot.slane %v965_v33, 2 }
  0x8e   : > { %v2120_v28 = vcombine.low %v4496_v8, %v4490_v38  ;;  %v968_v51 = vrot.slane %v4472_v57, 7  ;;  %v1593_v59 = vcombine.low %v954_v42, %v957_v44  ;;  %v4513_v23 = vrot.slane %v4320_v50, %v3763_v16 }
  0x8f   : > { %v3452_v29 = vpack.i.bf16 %v2116_v39, %v2115_v6  ;;  %v963_v35 = vsel %vm3993_vm6, %v961_v60, %v962_v12  ;;  %v3197_v40 = vrot.slane %v560_v61, 9  ;;  %v915_v1 = vrot.slane %v4469_v47, 7 }
  0x90   : > { %v3457_v62 = vpack.i.bf16 %v2120_v28, %v2119_v21  ;;  %v969_v33 = vsel %vm3993_vm6, %v967_v63, %v968_v51  ;;  %v1594_v45 = vcombine.low %v960_v5, %v963_v35  ;;  %v4521_v52 = vrot.slane %v1593_v59, %v3763_v16  ;;  %v253_v21 = vld [vmem:[%s3747_s25 + $0x80] sm:$0xff]  ;;  %v254_v5 = vld [vmem:[%s3747_s25 + $0x88] sm:$0xff] }
  0x91   : > { %3453 = vrot.lane.b32.xlu0 %v3452_v29, %s3688_s28  ;;  %v1610_v42 = vcombine.low %v966_v36, %v969_v33  ;;  %v916_v50 = vsel %vm3993_vm6, %v3197_v40, %v915_v1  ;;  %v917_v6 = vrot.slane %v915_v1, 2  ;;  %v918_v61 = vrot.slane %v4513_v23, 7  ;;  %v4581_v40 = vld [vmem:[%s5593_s2] ss:$0 sm:$0xff] }
  0x92   : > { %3458 = vrot.lane.b32.xlu1 %v3457_v62, %s3688_s28  ;;  %v4529_v12 = vrot.slane %v1594_v45, %v3763_v16  ;;  %v2215_v51 = vcombine.low %v4420_v49, %v4521_v52  ;;  %v2211_v59 = vcombine.low %v4315_v53, %v4330_v13  ;;  %v1953_v63 = vcombine.low %v629_v31, %v4462_v32 }
  0x93   : > { %v4538_v44 = vrot.slane %v1610_v42, %v3763_v16  ;;  %v919_v36 = vsel %vm3993_vm6, %v917_v6, %v918_v61  ;;  %v1954_v39 = vcombine.low %v630_v43, %v4456_v37  ;;  %v1970_v45 = vcombine.low %v4467_v20, %v4472_v57  ;;  %v4564_v20 = vld [vmem:[%s5592_s1] ss:$0 sm:$0xff] }
  0x94   : > { %v1542_v60 = vcombine.low %v916_v50, %v919_v36  ;;  %v4547_v49 = vrot.slane %v1953_v63, %v3763_v16  ;;  %v1902_v53 = vcombine.low %v4469_v47, %v4513_v23  ;;  %v2307_v13 = vcombine.low %v4274_v10, %v4284_v0 }
  0x95   : > { %v2216_v32 = vcombine.low %v4529_v12, %v4538_v44  ;;  %v4556_v31 = vrot.slane %v1954_v39, %v3763_v16  ;;  %v4559_v37 = vrot.slane %v1970_v45, %v3763_v16  ;;  %v285_v43 = vmul.f32 %v4564_v20, %v253_v21 }
  0x96   : > { %v4568_v47 = vrot.slane %v1542_v60, %v3763_v16  ;;  %v2311_v10 = vcombine.low %v4435_v15, %v4547_v49  ;;  %v4573_v0 = vrot.slane %v1902_v53, %v3763_v16  ;;  %v286_v28 = vmul.f32 %v4564_v20, %v254_v5 }
  0x97   : > { %v3467_v29 = vpack.i.bf16 %v2216_v32, %v2215_v51  ;;  %v2312_v35 = vcombine.low %v4556_v31, %v4559_v37  ;;  %v317_v1 = vadd.f32 %v4581_v40, %v285_v43  ;;  %v647_v62 = vcombine.high %v4472_v57, %v4472_v57 }
  0x98   : > { %v2212_v15 = vcombine.low %v4333_v27, %v4568_v47  ;;  %v2308_v33 = vcombine.low %v4277_v30, %v4573_v0  ;;  %v318_v42 = vadd.f32 %v4581_v40, %v286_v28  ;;  %v4593_v50 = vcombine.high %v4513_v23, %v4513_v23 }
  0x99   : > { %3468 = vrot.lane.b32.xlu1 %v3467_v29, %s3695_s10  ;;  %v3477_v6 = vpack.i.bf16 %v2312_v35, %v2311_v10  ;;  %v342_v51 = vmax.f32 %v317_v1, 0.0  ;;  %v3200_v63 = vrot.slane %v647_v62, 9  ;;  %v1235_v57 = vcombine.low %v4349_v26, %v4363_v34 }
  0x9a   : > { %v3462_v21 = vpack.i.bf16 %v2212_v15, %v2211_v59  ;;  %v3472_v36 = vpack.i.bf16 %v2308_v33, %v2307_v13  ;;  %v4598_v27 = vmax.f32 %v318_v42, 0.0  ;;  %v1219_v30 = vcombine.low %v4513_v23, %v4593_v50 }
  0x9b   : > { %v648_v39 = vcombine.high %v342_v51, %v342_v51  ;;  %v655_v45 = vrot.slane %v342_v51, %v3763_v16  ;;  %v1236_v5 = vcombine.low %v4354_v56, %v4352_v58  ;;  %v4606_v60 = vrot.slane %v1235_v57, %v3763_v16 }
  0x9c   : > { %3463 = vrot.lane.b32.xlu0 %v3462_v21, %s3695_s10  ;;  %v672_v34 = vrot.slane %v4598_v27, %v3763_v16  ;;  %v4612_v59 = vrot.slane %v1219_v30, %v3763_v16  ;;  %v920_v53 = vrot.slane %v918_v61, 2  ;;  %v921_v23 = vrot.slane %v4593_v50, 7 }
  0x9d   : > { %3478 = vrot.lane.b32.xlu1 %v3477_v6, %s3691_s6  ;;  %v662_v13 = vrot.slane %v648_v39, %v3763_v16  ;;  %v663_v32 = vcombine.high %v655_v45, %v655_v45  ;;  %v1287_v58 = vcombine.low %v647_v62, %v655_v45  ;;  %v4618_v56 = vrot.slane %v1236_v5, %v3763_v16 }
  0x9e   : > { %v4622_v43 = vcombine.low %v4493_v9, %v4612_v59  ;;  %v680_v10 = vcombine.high %v672_v34, %v672_v34  ;;  %v972_v28 = vrot.slane %v655_v45, 7  ;;  %v984_v29 = vrot.slane %v672_v34, 7 }
  0x9f   : > { %v664_v35 = vcombine.high %v662_v13, %v662_v13  ;;  %v4625_v61 = vrot.slane %v1287_v58, %v3763_v16  ;;  %v1303_v1 = vcombine.low %v663_v32, %v662_v13  ;;  %v4629_v15 = vcombine.low %v4606_v60, %v4618_v56 }
  0xa0   : > { %5643 = vst [vmem:[#allocation18_spill] sm:$0xff] %v4622_v43  ;;  %3473 = vrot.lane.b32.xlu0 %v3472_v36, %s3691_s6  ;;  %v973_v62 = vsel %vm3993_vm6, %v3200_v63, %v972_v28  ;;  %v974_v33 = vrot.slane %v972_v28, 2  ;;  %v975_v9 = vrot.slane %v663_v32, 7  ;;  %v978_v42 = vrot.slane %v662_v13, 7 }
  0xa1   : > { %5644 = vst [vmem:[#allocation19_spill] sm:$0xff] %v4629_v15  ;;  %v4636_v6 = vcombine.low %v4490_v38, %v4625_v61  ;;  %v1304_v51 = vcombine.low %v664_v35, %v672_v34  ;;  %v4639_v57 = vrot.slane %v1303_v1, %v3763_v16  ;;  %v3482_v21 = vpack.i.bf16 %v4629_v15, %v4622_v43 }
  0xa2   : > { %v976_v36 = vsel %vm3993_vm6, %v974_v33, %v975_v9  ;;  %v977_v30 = vrot.slane %v975_v9, 2  ;;  %v980_v39 = vrot.slane %v978_v42, 2  ;;  %v981_v63 = vrot.slane %v664_v35, 7 }
  0xa3   : > { %v4646_v5 = vrot.slane %v1304_v51, %v3763_v16  ;;  %v986_v58 = vrot.slane %v984_v29, 2  ;;  %v987_v28 = vrot.slane %v680_v10, 7  ;;  %v1611_v38 = vcombine.low %v973_v62, %v976_v36 }
  0xa4   : > { %3483 = vrot.lane.b32.xlu0 %v3482_v21, %s3690_s30  ;;  %v979_v1 = vsel %vm3993_vm6, %v977_v30, %v978_v42  ;;  %v982_v43 = vsel %vm3993_vm6, %v980_v39, %v981_v63  ;;  %v983_v15 = vrot.slane %v981_v63, 2  ;;  %v922_v33 = vsel %vm3993_vm6, %v920_v53, %v921_v23 }
  0xa5   : > { %v4657_v9 = vcombine.low %v4639_v57, %v4646_v5  ;;  %v988_v51 = vsel %vm3993_vm6, %v986_v58, %v987_v28  ;;  %v4662_v62 = vrot.slane %v1611_v38, %v3763_v16  ;;  %v1627_v21 = vcombine.low %v979_v1, %v982_v43 }
  0xa6   : > { %v985_v42 = vsel %vm3993_vm6, %v983_v15, %v984_v29  ;;  %v923_v36 = vrot.slane %v921_v23, 2  ;;  %v1971_v30 = vcombine.low %v655_v45, %v663_v32  ;;  %v1987_v39 = vcombine.low %v662_v13, %v664_v35 }
  0xa7   : > { %v3487_v53 = vpack.i.bf16 %v4657_v9, %v4636_v6  ;;  %v1628_v63 = vcombine.low %v985_v42, %v988_v51  ;;  %v4669_v4 = vrot.slane %v1627_v21, %v3763_v16  ;;  %v5645_v55 = vrot.slane %v4349_v26, 7 }
  0xa8   : > { %v4676_v43 = vrot.slane %v1971_v30, %v3763_v16  ;;  %v1988_v29 = vcombine.low %v672_v34, %v680_v10  ;;  %v4679_v45 = vrot.slane %v1987_v39, %v3763_v16  ;;  %v1626_v23 = vcombine.low %v4538_v44, %v4662_v62 }
  0xa9   : > { %v925_v58 = vsel %vm3993_vm6, %v923_v36, %v5645_v55  ;;  %3488 = vrot.lane.b32.xlu1 %v3487_v53, %s3690_s30  ;;  %v4685_v13 = vrot.slane %v1628_v63, %v3763_v16  ;;  %v1903_v55 = vcombine.low %v4593_v50, %v4349_v26  ;;  %v4694_v34 = vcombine.low %v4521_v52, %v4529_v12  ;;  %v255_v12 = vld [vmem:[%s3747_s25 + $0x90] sm:$0xff] }
  0xaa   : > { %v1543_v32 = vcombine.low %v922_v33, %v925_v58  ;;  %v4690_v35 = vrot.slane %v1988_v29, %v3763_v16  ;;  %v4698_v10 = vcombine.low %v4547_v49, %v4556_v31  ;;  %v665_v44 = vcombine.high %v4598_v27, %v4598_v27  ;;  %v256_v29 = vld [vmem:[%s3747_s25 + $0x98] sm:$0xff] }
  0xab   : > { %v4704_v15 = vcombine.low %v4669_v4, %v4685_v13  ;;  %v4709_v50 = vcombine.low %v4559_v37, %v4676_v43  ;;  %v4712_v52 = vrot.slane %v1903_v55, %v3763_v16  ;;  %v1252_v37 = vcombine.low %v4367_v7, %v4344_v48 }
  0xac   : > { %v1557_v26 = vrot.slane %v1543_v32, %v3763_v16  ;;  %v4717_v49 = vcombine.low %v4679_v45, %v4690_v35  ;;  %v679_v31 = vrot.slane %v665_v44, %v3763_v16  ;;  %v3517_v1 = vpack.i.bf16 %v1626_v23, %v4694_v34 }
  0xad   : > { %v3497_v27 = vpack.i.bf16 %v4704_v15, %v1626_v23  ;;  %v4724_v38 = vcombine.low %v4573_v0, %v4712_v52  ;;  %v3527_v33 = vpack.i.bf16 %v4709_v50, %v4698_v10  ;;  %v287_v21 = vmul.f32 %v4564_v20, %v255_v12 }
  0xae   : > { %v1558_v28 = vcombine.low %v4568_v47, %v1557_v26  ;;  %v681_v51 = vcombine.high %v679_v31, %v679_v31  ;;  %v3507_v47 = vpack.i.bf16 %v4717_v49, %v4709_v50  ;;  %v2121_v0 = vcombine.low %v4625_v61, %v4639_v57 }
  0xaf   : > { %3498 = vrot.lane.b32.xlu1 %v3497_v27, %s3694_s9  ;;  %v2117_v48 = vcombine.low %v4612_v59, %v4606_v60  ;;  %v1260_v36 = vrot.slane %v1252_v37, %v3763_v16  ;;  %v319_v30 = vadd.f32 %v4581_v40, %v287_v21  ;;  %v3201_v39 = vrot.slane %v679_v31, 9 }
  0xb0   : > { %v3492_v42 = vpack.i.bf16 %v4432_v41, %v1558_v28  ;;  %v1320_v7 = vcombine.low %v679_v31, %v681_v51  ;;  %v3502_v41 = vpack.i.bf16 %v4424_v17, %v4724_v38  ;;  %v991_v53 = vrot.slane %v681_v51, 7 }
  0xb1   : > { %v2213_v63 = vcombine.low %v1557_v26, %v4408_v22  ;;  %v2214_v61 = vcombine.low %v4401_v2, %v4411_v14  ;;  %v3512_v57 = vpack.i.bf16 %v1558_v28, %v4341_v24  ;;  %v2118_v59 = vcombine.low %v4618_v56, %v1260_v36  ;;  %v4783_v28 = vpop.permute.xlu0 %3313 }
  0xb2   : > { %3493 = vrot.lane.b32.xlu0 %v3492_v42, %s3694_s9  ;;  %v1328_v60 = vrot.slane %v1320_v7, %v3763_v16  ;;  %v344_v58 = vmax.f32 %v319_v30, 0.0  ;;  %v3522_v23 = vpack.i.bf16 %v4724_v38, %v4297_v54  ;;  %v992_v17 = vsel %vm3993_vm6, %v3201_v39, %v991_v53 }
  0xb3   : > { %3508 = vrot.lane.b32.xlu1 %v3507_v47, %s3692_s7  ;;  %v2217_v22 = vcombine.low %v4662_v62, %v4669_v4  ;;  %v2313_v24 = vcombine.low %v4676_v43, %v4679_v45  ;;  %v993_v56 = vrot.slane %v991_v53, 2  ;;  %v4763_v32 = vpack.i.bf16 %v2214_v61, %v2213_v63  ;;  %v4769_v4 = vpop.permute.xlu1 %3318 }
  0xb4   : > { %v2122_v2 = vcombine.low %v4646_v5, %v1328_v60  ;;  %v689_v14 = vrot.slane %v344_v58, %v3763_v16  ;;  %v3532_v55 = vpack.i.bf16 %v2118_v59, %v2117_v48  ;;  %v2309_v54 = vcombine.low %v4712_v52, %v4398_v19 }
  0xb5   : > { %v288_v44 = vmul.f32 %v4564_v20, %v256_v29  ;;  %v682_v26 = vcombine.high %v344_v58, %v344_v58  ;;  %v2310_v5 = vcombine.low %v4404_v3, %v4427_v18  ;;  %v4774_v12 = vcombine.low %v1260_v36, %v4451_v25  ;;  %v4811_v59 = vpop.permute.xlu0 %3323 }
  0xb6   : > { %3503 = vrot.lane.b32.xlu0 %v3502_v41, %s3692_s7  ;;  %v994_v62 = vrot.slane %v689_v14, 7  ;;  %v2004_v50 = vcombine.low %v681_v51, %v689_v14  ;;  %v697_v19 = vcombine.high %v689_v14, %v689_v14  ;;  %v4781_v52 = vcombine.low %v4484_v46, %v4496_v8 }
  0xb7   : > { %3518 = vrot.lane.b32.xlu1 %v3517_v1, %s3693_s8  ;;  %v320_v31 = vadd.f32 %v4581_v40, %v288_v44  ;;  %v696_v27 = vrot.slane %v682_v26, %v3763_v16  ;;  %v3537_v38 = vpack.i.bf16 %v2122_v2, %v2121_v0  ;;  %v4793_v46 = vpack.i.bf16 %v2310_v5, %v2309_v54  ;;  %v4801_v30 = vpop.permute.xlu1 %3328 }
  0xb8   : > { %v995_v3 = vsel %vm3993_vm6, %v993_v56, %v994_v62  ;;  %v4788_v18 = vrot.slane %v2004_v50, %v3763_v16  ;;  %v996_v25 = vrot.slane %v994_v62, 2  ;;  %v1321_v21 = vcombine.low %v689_v14, %v697_v19 }
  0xb9   : > { %v1644_v37 = vcombine.low %v992_v17, %v995_v3  ;;  %v345_v1 = vmax.f32 %v320_v31, 0.0  ;;  %v698_v51 = vcombine.high %v696_v27, %v696_v27  ;;  %v997_v42 = vrot.slane %v697_v19, 7 }
  0xba   : > { %3513 = vrot.lane.b32.xlu0 %v3512_v57, %s3693_s8  ;;  %v2314_v8 = vcombine.low %v4690_v35, %v4788_v18  ;;  %v1000_v47 = vrot.slane %v696_v27, 7  ;;  %v4799_v36 = vrot.slane %v1321_v21, %v3763_v16  ;;  %v2005_v53 = vcombine.low %v697_v19, %v696_v27  ;;  %v4848_v21 = vpop.permute.xlu0 %3343 }
  0xbb   : > { %3528 = vrot.lane.b32.xlu1 %v3527_v33, %s3689_s29  ;;  %v1652_v0 = vrot.slane %v1644_v37, %v3763_v16  ;;  %v699_v48 = vcombine.high %v345_v1, %v345_v1  ;;  %v706_v7 = vrot.slane %v345_v1, %v3763_v16  ;;  %v1337_v39 = vcombine.low %v696_v27, %v698_v51  ;;  %v4831_v31 = vpop.permute.xlu1 %3333 }
  0xbc   : > { %v998_v35 = vsel %vm3993_vm6, %v996_v25, %v997_v42  ;;  %v999_v41 = vrot.slane %v997_v42, 2  ;;  %v4809_v57 = vcombine.low %v1328_v60, %v4799_v36  ;;  %v1002_v17 = vrot.slane %v1000_v47, 2 }
  0xbd   : > { %v2218_v33 = vcombine.low %v4685_v13, %v1652_v0  ;;  %v713_v63 = vrot.slane %v699_v48, %v3763_v16  ;;  %v714_v61 = vcombine.high %v706_v7, %v706_v7  ;;  %v4814_v58 = vrot.slane %v1337_v39, %v3763_v16  ;;  %v257_v39 = vld [vmem:[%s3747_s25 + $0xa0] sm:$0xff] }
  0xbe   : > { %3523 = vrot.lane.b32.xlu0 %v3522_v23, %s3689_s29  ;;  %v1001_v29 = vsel %vm3993_vm6, %v999_v41, %v1000_v47  ;;  %v1003_v2 = vrot.slane %v698_v51, 7  ;;  %v1006_v44 = vrot.slane %v706_v7, 7  ;;  %v2021_v3 = vcombine.low %v698_v51, %v706_v7 }
  0xbf   : > { %3538 = vrot.lane.b32.xlu1 %v3537_v38, %s3688_s28  ;;  %v3547_v23 = vpack.i.bf16 %v2218_v33, %v2217_v22  ;;  %v3202_v13 = vrot.slane %v714_v61, 9  ;;  %v1338_v14 = vcombine.low %v714_v61, %v713_v63  ;;  %v4819_v56 = vcombine.high %v713_v63, %v713_v63 }
  0xc0   : > { %v1004_v60 = vsel %vm3993_vm6, %v1002_v17, %v1003_v2  ;;  %v1005_v54 = vrot.slane %v1003_v2, 2  ;;  %v1010_v26 = vrot.slane %v713_v63, 7  ;;  %v1645_v5 = vcombine.low %v998_v35, %v1001_v29 }
  0xc1   : > { %v4825_v62 = vrot.slane %v1338_v14, %v3763_v16  ;;  %v1013_v50 = vrot.slane %v4819_v56, 7  ;;  %v4829_v22 = vrot.slane %v2005_v53, %v3763_v16  ;;  %v3562_v51 = vpack.i.bf16 %v4781_v52, %v4774_v12  ;;  %v5647_v53 = vld [vmem:[#allocation17_spill] sm:$0xff] }
  0xc2   : > { %3533 = vrot.lane.b32.xlu0 %v3532_v55, %s3688_s28  ;;  %v1007_v27 = vsel %vm3993_vm6, %v1005_v54, %v1006_v44  ;;  %v1011_v19 = vsel %vm3993_vm6, %v3202_v13, %v1010_v26  ;;  %v1012_v38 = vrot.slane %v1010_v26, 2  ;;  %v3557_v55 = vpack.i.bf16 %v2314_v8, %v2313_v24  ;;  %v5646_v8 = vld [vmem:[#allocation16_spill] sm:$0xff]  ;;  %v258_v13 = vld [vmem:[%s3747_s25 + $0xa8] sm:$0xff]  ;;  %v4908_v26 = vpop.permute.xlu0 %3348 }
  0xc3   : > { %3548 = vrot.lane.b32.xlu1 %v3547_v23, %s3695_s10  ;;  %v4843_v25 = vcombine.low %v4814_v58, %v4825_v62  ;;  %v4846_v37 = vrot.slane %v1645_v5, %v3763_v16  ;;  %v1661_v1 = vcombine.low %v1004_v60, %v1007_v27  ;;  %v2022_v47 = vcombine.low %v713_v63, %v4819_v56 }
  0xc4   : > { %v1014_v42 = vsel %vm3993_vm6, %v1012_v38, %v1013_v50  ;;  %v4856_v43 = vrot.slane %v2021_v3, %v3763_v16  ;;  %v3572_v48 = vpack.i.bf16 %v4694_v34, %v5646_v8  ;;  %v4867_v7 = vcombine.low %v4788_v18, %v4829_v22  ;;  %v259_v38 = vld [vmem:[%s3747_s25 + $0xb0] sm:$0xff] }
  0xc5   : > { %v1662_v45 = vcombine.low %v1011_v19, %v1014_v42  ;;  %v4861_v24 = vrot.slane %v1661_v1, %v3763_v16  ;;  %v3567_v35 = vpack.i.bf16 %v4843_v25, %v4809_v57  ;;  %v4873_v41 = vcombine.low %v1652_v0, %v4846_v37  ;;  %v4888_v0 = vpop.permute.xlu1 %3338 }
  0xc6   : > { %3543 = vrot.lane.b32.xlu0 %v4763_v32, %s3695_s10  ;;  %v4876_v32 = vrot.slane %v2022_v47, %v3763_v16  ;;  %v3582_v33 = vpack.i.bf16 %v4698_v10, %v5647_v53  ;;  %v3597_v18 = vpack.i.bf16 %v4867_v7, %v4717_v49  ;;  %v289_v23 = vmul.f32 %v4564_v20, %v257_v39 }
  0xc7   : > { %3558 = vrot.lane.b32.xlu1 %v3557_v55, %s3691_s6  ;;  %v4882_v34 = vrot.slane %v1662_v45, %v3763_v16  ;;  %v3592_v17 = vpack.i.bf16 %v4873_v41, %v4704_v15  ;;  %v2123_v54 = vcombine.low %v4799_v36, %v4814_v58  ;;  %v1015_v44 = vrot.slane %v1013_v50, 2 }
  0xc8   : > { %v4892_v29 = vcombine.low %v4856_v43, %v4876_v32  ;;  %v321_v5 = vadd.f32 %v4581_v40, %v289_v23  ;;  %v290_v1 = vmul.f32 %v4564_v20, %v258_v13  ;;  %v2315_v45 = vcombine.low %v4829_v22, %v4856_v43  ;;  %v3672_v13 = vld [vmem:[%s5594_s3] sm:$0xff]   ;;  %v4943_v23 = vpop.permute.xlu0 %3363  ;;  %v3675_v22 = vld [vmem:[%s5594_s3 + $0x18] sm:$0xff]  }
  0xc9   : > { %v4903_v14 = vcombine.low %v4861_v24, %v4882_v34  ;;  %v291_v19 = vmul.f32 %v4564_v20, %v259_v38  ;;  %v5648_v43 = vcombine.low %v4846_v37, %v4861_v24 }
  0xca   : > { %3553 = vrot.lane.b32.xlu0 %v4793_v46, %s3691_s6  ;;  %v3587_v50 = vpack.i.bf16 %v4892_v29, %v4867_v7  ;;  %v346_v42 = vmax.f32 %v321_v5, 0.0  ;;  %v322_v39 = vadd.f32 %v4581_v40, %v290_v1  ;;  %v4935_v5 = vpop.permute.xlu1 %3353 }
  0xcb   : > { %3568 = vrot.lane.b32.xlu1 %v3567_v35, %s3690_s30  ;;  %v3577_v3 = vpack.i.bf16 %v4903_v14, %v4873_v41  ;;  %v323_v35 = vadd.f32 %v4581_v40, %v291_v19 }
  0xcc   : > { %v723_v46 = vrot.slane %v346_v42, %v3763_v16  ;;  %v716_v55 = vcombine.high %v346_v42, %v346_v42  ;;  %v347_v1 = vmax.f32 %v322_v39, 0.0  ;;  %v5617_v42 = vmov 0.0  }
  0xcd   : > { %3235 = vmatprep.subr.bf16.mxu0 %v5617_v42  ;;  %3281 = vmatprep.subr.bf16.mxu1 %v5617_v42  ;;  %v4955_v39 = vmax.f32 %v323_v35, 0.0 }
  0xce   : > { %3563 = vrot.lane.b32.xlu0 %v3562_v51, %s3690_s30  ;;  %v1354_v47 = vcombine.low %v4819_v56, %v723_v46  ;;  %v731_v63 = vcombine.high %v723_v46, %v723_v46  ;;  %v1016_v61 = vrot.slane %v723_v46, 7  ;;  %v4947_v60 = vrot.slane %v716_v55, %v3763_v16  ;;  %3236 = vmatpush3.bf16.msra.mxu0 %v3672_v13 }
  0xcf   : > { %3578 = vrot.lane.b32.xlu1 %v3577_v3, %s3694_s9  ;;  %v733_v3 = vcombine.high %v347_v1, %v347_v1  ;;  %v4953_v19 = vrot.slane %v347_v1, %v3763_v16  ;;  %3237 = vmatprep.subr.bf16.mxu0 %v5617_v42 }
  0xd0   : > { %v1362_v8 = vrot.slane %v1354_v47, %v3763_v16  ;;  %v1017_v55 = vsel %vm3993_vm6, %v1015_v44, %v1016_v61  ;;  %v1018_v38 = vrot.slane %v1016_v61, 2  ;;  %v1019_v51 = vrot.slane %v731_v63, 7  ;;  %3286 = vmatpush3.bf16.msra.mxu1 %v3672_v13  ;;  %v4974_v44 = vpop.permute.xlu1 %3358 }
  0xd1   : > { %v2038_v35 = vcombine.low %v723_v46, %v731_v63  ;;  %v4967_v1 = vrot.slane %v733_v3, %v3763_v16  ;;  %v4971_v47 = vcombine.high %v4953_v19, %v4953_v19  ;;  %v1355_v61 = vcombine.low %v731_v63, %v4947_v60  ;;  %3282 = vmatprep.subr.bf16.mxu1 %v5617_v42  ;;  %v5002_v3 = vpop.permute.xlu0 %3373 }
  0xd2   : > { %3573 = vrot.lane.b32.xlu0 %v3572_v48, %s3694_s9  ;;  %v3673_v48 = vld [vmem:[%s5594_s3 + $0x8] sm:$0xff]   ;;  %v2124_v56 = vcombine.low %v4825_v62, %v1362_v8  ;;  %v1020_v2 = vsel %vm3993_vm6, %v1018_v38, %v1019_v51  ;;  %v4985_v46 = vrot.slane %v4955_v39, %v3763_v16  ;;  %v1021_v53 = vrot.slane %v1019_v51, 2 }
  0xd3   : > { %3588 = vrot.lane.b32.xlu1 %v3587_v50, %s3692_s7  ;;  %v4981_v50 = vcombine.high %v4947_v60, %v4947_v60  ;;  %v1678_v63 = vcombine.low %v1017_v55, %v1020_v2  ;;  %v4993_v62 = vrot.slane %v2038_v35, %v3763_v16  ;;  %v4997_v13 = vcombine.high %v4967_v1, %v4967_v1  ;;  %v3674_v2 = vld [vmem:[%s5594_s3 + $0x10] sm:$0xff]  }
  0xd4   : > { %v5000_v38 = vrot.slane %v1355_v61, %v3763_v16  ;;  %v3602_v27 = vpack.i.bf16 %v2124_v56, %v2123_v54  ;;  %v2125_v10 = vcombine.low %v4953_v19, %v4971_v47  ;;  %3238 = vmatpush3.bf16.msra.mxu0 %v3673_v48  ;;  %3287 = vmatpush3.bf16.msra.mxu1 %v3673_v48  ;;  %v5045_v35 = vpop.permute.xlu1 %3368  ;;  %v1032_v15 = vrot.slane %v4967_v1, 7 }
  0xd5   : > { %v1686_v36 = vrot.slane %v1678_v63, %v3763_v16  ;;  %v2316_v58 = vcombine.low %v4876_v32, %v4993_v62  ;;  %v2134_v51 = vcombine.low %v4967_v1, %v4997_v13  ;;  %v1025_v49 = vrot.slane %v4981_v50, 7  ;;  %3239 = vmatprep.subr.bf16.mxu0 %v5617_v42  ;;  %3283 = vmatprep.subr.bf16.mxu1 %v5617_v42 }
  0xd6   : > { %3583 = vrot.lane.b32.xlu0 %v3582_v33, %s3692_s7  ;;  %v1022_v33 = vrot.slane %v4947_v60, 7  ;;  %v5021_v54 = vcombine.low %v1362_v8, %v5000_v38  ;;  %v5026_v56 = vrot.slane %v2125_v10, %v3763_v16  ;;  %v3203_v8 = vrot.slane %v4953_v19, 9  ;;  %v5061_v10 = vpop.permute.xlu0 %3378 }
  0xd7   : > { %3598 = vrot.lane.b32.xlu1 %v3597_v18, %s3689_s29  ;;  %v2220_v7 = vcombine.low %v4882_v34, %v1686_v36  ;;  %v3612_v32 = vpack.i.bf16 %v2316_v58, %v2315_v45  ;;  %v5042_v18 = vrot.slane %v2134_v51, %v3763_v16  ;;  %v1029_v63 = vrot.slane %v4971_v47, 7 }
  0xd8   : > { %v1023_v55 = vsel %vm3993_vm6, %v1021_v53, %v1022_v33  ;;  %v1024_v48 = vrot.slane %v1022_v33, 2  ;;  %v1035_v41 = vrot.slane %v4997_v13, 7  ;;  %3240 = vmatpush3.bf16.msra.mxu0 %v3674_v2  ;;  %3288 = vmatpush3.bf16.msra.mxu1 %v3674_v2  ;;  %v1038_v45 = vrot.slane %v4985_v46, 7 }
  0xd9   : > { %v3607_v34 = vpack.i.bf16 %v2220_v7, %v5648_v43  ;;  %3241 = vmatprep.subr.bf16.mxu0 %v5617_v42  ;;  %3284 = vmatprep.subr.bf16.mxu1 %v5617_v42  ;;  %v1030_v53 = vsel %vm3993_vm6, %v3203_v8, %v1029_v63  ;;  %v1031_v33 = vrot.slane %v1029_v63, 2  ;;  %v1034_v2 = vrot.slane %v1032_v15, 2  ;;  %v5649_v43 = vld [vmem:[#allocation4_spill] sm:$0xff] }
  0xda   : > { %3593 = vrot.lane.b32.xlu0 %v3592_v17, %s3693_s8  ;;  %v1026_v61 = vsel %vm3993_vm6, %v1024_v48, %v1025_v49  ;;  %v2397_v17 = vcombine.low %v5026_v56, %v5042_v18  ;;  %v1037_v58 = vrot.slane %v1035_v41, 2  ;;  %v2039_v51 = vcombine.low %v4947_v60, %v4981_v50  ;;  %v5088_v50 = vpop.permute.xlu1 %3383 }
  0xdb   : > { %v1679_v19 = vcombine.low %v1023_v55, %v1026_v61  ;;  %3608 = vrot.lane.b32.xlu1 %v3607_v34, %s3695_s10  ;;  %v3350_v55 = vunpack.i.l.bf16 %v4908_v26  ;;  %v1033_v48 = vsel %vm3993_vm6, %v1031_v33, %v1032_v15  ;;  %v1036_v49 = vsel %vm3993_vm6, %v1034_v2, %v1035_v41  ;;  %v5651_v34 = vld [vmem:[#allocation5_spill] sm:$0xff] }
  0xdc   : > { %v3617_v37 = vpack.i.bf16 %v2397_v17, %v5021_v54  ;;  %v2317_v7 = vcombine.low %v4971_v47, %v4967_v1  ;;  %3242 = vmatpush3.bf16.msra.mxu0 %v3675_v22  ;;  %v2221_v8 = vcombine.low %v1030_v53, %v1033_v48  ;;  %v5085_v63 = vrot.slane %v2039_v51, %v3763_v16  ;;  %v5650_v1 = vld [vmem:[#allocation2_spill] sm:$0xff]  ;;  %v5652_v17 = vld [vmem:[#allocation3_spill] sm:$0xff] }
  0xdd   : > { %v5071_v24 = vrot.slane %v1679_v19, %v3763_v16  ;;  %v3356_v60 = vunpack.i.h.bf16 %v4935_v5  ;;  %3243 = vmatprep.subr.bf16.mxu0 %v5617_v42  ;;  %v2326_v41 = vcombine.low %v4997_v13, %v4985_v46  ;;  %v1065_v47 = vcombine.low %v5650_v1, %v5649_v43  ;;  %3289 = vmatpush3.bf16.msra.mxu1 %v3675_v22  ;;  %v5109_v13 = vpop.permute.xlu0 %3388 }
  0xde   : > { %3603 = vrot.lane.b32.xlu0 %v3602_v27, %s3688_s28  ;;  %v1039_v27 = vsel %vm3993_vm6, %v1037_v58, %v1038_v45  ;;  %v5092_v15 = vrot.slane %v2317_v7, %v3763_v16  ;;  %v1066_v19 = vcombine.low %v5652_v17, %v5651_v34  ;;  %v5104_v33 = vrot.slane %v2221_v8, %v3763_v16 }
  0xdf   : > { %v2230_v61 = vcombine.low %v1036_v49, %v1039_v27  ;;  %3618 = vrot.lane.b32.xlu1 %v3617_v37, %s3690_s30  ;;  %v1694_v53 = vcombine.low %v1686_v36, %v5071_v24  ;;  %v2054_v58 = vcombine.low %v4993_v62, %v5085_v63  ;;  %v5114_v22 = vrot.slane %v2326_v41, %v3763_v16  ;;  %v5654_v41 = vld [vmem:[#allocation8_spill] sm:$0xff] }
  0xe0   : > { %v1080_v37 = vrot.slane %v1066_v19, %v3763_v16  ;;  %3285 = vmatprep.subr.bf16.mxu1 %v5617_v42  ;;  %v3355_v51 = vunpack.i.l.bf16 %v4935_v5  ;;  %v3366_v48 = vunpack.i.h.bf16 %v4943_v23  ;;  %v3365_v49 = vunpack.i.l.bf16 %v4943_v23  ;;  %v5134_v23 = vpop.permute.xlu1 %3398 }
  0xe1   : > { %v5107_v2 = vrot.slane %v2230_v61, %v3763_v16  ;;  %v2559_v62 = vcombine.low %v5092_v15, %v5114_v22  ;;  %v765_v7 = vcombine.high %v4985_v46, %v4985_v46  ;;  %v5653_v61 = vld [vmem:[#allocation6_spill] sm:$0xff]  ;;  %v1040_v34 = vrot.slane %v1038_v45, 2 }
  0xe2   : > { %3613 = vrot.lane.b32.xlu0 %v3612_v32, %s3691_s6  ;;  %v1073_v32 = vrot.slane %v1065_v47, %v3763_v16  ;;  %v5655_v43 = vcombine.low %v5653_v61, %v5654_v41  ;;  %v750_v47 = vcombine.high %v4955_v39, %v4955_v39  ;;  %v3632_v19 = vpack.i.bf16 %v1694_v53, %v4903_v14  ;;  %v260_v61 = vld [vmem:[%s3747_s25 + $0xb8] sm:$0xff]  ;;  %v5145_v41 = vpop.permute.xlu0 %3393 }
  0xe3   : > { %v2478_v36 = vcombine.low %v5104_v33, %v5107_v2  ;;  %v3627_v17 = vpack.i.bf16 %v2559_v62, %v2054_v58  ;;  %v1041_v45 = vrot.slane %v765_v7, 7  ;;  %v5656_v14 = vunpack.i.h.bf16 %v4783_v28 }
  0xe4   : > { %v1081_v27 = vcombine.low %v1073_v32, %v1080_v37  ;;  %v2642_v1 = vsel %vm2640_vm7, %v5655_v43, %v3366_v48  ;;  %v2135_v37 = vcombine.low %v4985_v46, %v765_v7  ;;  %v2133_v48 = vcombine.low %v5000_v38, %v5026_v56  ;;  %v261_v56 = vld [vmem:[%s3747_s25 + $0xc0] sm:$0xf] }
  0xe5   : > { %v3622_v8 = vpack.i.bf16 %v2478_v36, %v1694_v53  ;;  %v3637_v36 = vpack.i.bf16 %v2054_v58, %v4892_v29  ;;  %v764_v39 = vrot.slane %v750_v47, %v3763_v16  ;;  %3628 = vrot.lane.b32.xlu1 %v3627_v17, %s3692_s7  ;;  %v2661_v53 = vsel %vm2659_vm8, %v2642_v1, %v5656_v14  ;;  %v5173_v17 = vpop.permute.xlu1 %3408 }
  0xe6   : > { %v2641_v32 = vsel %vm2640_vm7, %v1081_v27, %v3365_v49  ;;  %v5657_v46 = vunpack.i.l.bf16 %v4783_v28  ;;  %v5155_v29 = vrot.slane %v2135_v37, %v3763_v16  ;;  %v2229_v38 = vcombine.low %v5071_v24, %v5104_v33 }
  0xe7   : > { %3623 = vrot.lane.b32.xlu0 %v3622_v8, %s3694_s9  ;;  %v1042_v58 = vsel %vm3993_vm6, %v1040_v34, %v1041_v45  ;;  %v1043_v62 = vrot.slane %v1041_v45, 2  ;;  %v1044_v27 = vrot.slane %v764_v39, 7  ;;  %v2327_v1 = vcombine.low %v765_v7, %v764_v39 }
  0xe8   : > { %v2660_v49 = vsel %vm2659_vm8, %v2641_v32, %v5657_v46  ;;  %v2150_v43 = vcombine.low %v5042_v18, %v5155_v29  ;;  %v292_v47 = vmul.f32 %v4564_v20, %v260_v61  ;;  %v2325_v33 = vcombine.low %v5085_v63, %v5092_v15 }
  0xe9   : > { %v1045_v24 = vsel %vm3993_vm6, %v1043_v62, %v1044_v27  ;;  %v293_v34 = vmul.f32 %v4564_v20, %v261_v56  ;;  %3638 = vrot.lane.b32.xlu1 %v3637_v36, %s3689_s29  ;;  %v5177_v7 = vrot.slane %v2327_v1, %v3763_v16  ;;  %v766_v15 = vcombine.high %v764_v39, %v764_v39  ;;  %v5183_v20 = vpop.permute.xlu0 %3403 }
  0xea   : > { %v3642_v18 = vpack.i.bf16 %v2150_v43, %v2133_v48  ;;  %v2231_v32 = vcombine.low %v1042_v58, %v1045_v24  ;;  %v3371_v46 = vunpack.i.h.bf16 %v5045_v35  ;;  %v3370_v56 = vunpack.i.l.bf16 %v5045_v35  ;;  %v5204_v24 = vpop.permute.xlu1 %3418 }
  0xeb   : > { %3633 = vrot.lane.b32.xlu0 %v3632_v19, %s3693_s8  ;;  %v324_v19 = vadd.f32 %v4581_v40, %v292_v47  ;;  %v325_v63 = vadd.f32 %v4581_v40, %v293_v34  ;;  %v2342_v36 = vcombine.low %v5114_v22, %v5177_v7  ;;  %v5658_v40 = vunpack.i.l.bf16 %v4769_v4 }
  0xec   : > { %v5186_v61 = vrot.slane %v2231_v32, %v3763_v16  ;;  %v5659_v43 = vunpack.i.h.bf16 %v4769_v4  ;;  %v3381_v35 = vunpack.i.h.bf16 %v5061_v10  ;;  %v5660_v4 = vld [vmem:[#allocation10_spill] sm:$0xff]  ;;  %v5673_v5 = vunpack.i.l.bf16 %v5002_v3 }
  0xed   : > { %v349_v48 = vmax.f32 %v324_v19, 0.0  ;;  %v350_v14 = vmax.f32 %v325_v63, 0.0  ;;  %v2679_v39 = vsel %vm2678_vm9, %v2660_v49, %v5658_v40  ;;  %v3652_v62 = vpack.i.bf16 %v2342_v36, %v2325_v33  ;;  %v5213_v63 = vpop.permute.xlu0 %3413 }
  0xee   : > { %v2246_v58 = vcombine.low %v5107_v2, %v5186_v61  ;;  %v2680_v1 = vsel %vm2678_vm9, %v2661_v53, %v5659_v43  ;;  %v2698_v47 = vsel %vm2697_vm10, %v2679_v39, %v3370_v56  ;;  %v2644_v53 = vsel %vm2640_vm7, %v5660_v4, %v3381_v35 }
  0xef   : > { %3643 = vrot.lane.b32.xlu0 %v3642_v18, %s3688_s28  ;;  %v767_v27 = vcombine.high %v349_v48, %v349_v48  ;;  %v774_v22 = vrot.slane %v349_v48, %v3763_v16  ;;  %v790_v33 = vrot.slane %v350_v14, %v3763_v16  ;;  %v2699_v32 = vsel %vm2697_vm10, %v2680_v1, %v3371_v46 }
  0xf0   : > { %v3647_v34 = vpack.i.bf16 %v2246_v58, %v2229_v38  ;;  %v3380_v19 = vunpack.i.l.bf16 %v5061_v10  ;;  %v3204_v56 = vrot.slane %v766_v15, 9  ;;  %v5661_v40 = vunpack.i.l.bf16 %v4811_v59 }
  0xf1   : > { %v781_v49 = vrot.slane %v767_v27, %v3763_v16  ;;  %v782_v18 = vcombine.high %v774_v22, %v774_v22  ;;  %v2398_v2 = vcombine.low %v766_v15, %v774_v22  ;;  %v5662_v46 = vunpack.i.h.bf16 %v4811_v59  ;;  %v5665_v27 = vld [vmem:[#allocation9_spill] sm:$0xff] }
  0xf2   : > { %3648 = vrot.lane.b32.xlu1 %v3647_v34, %s3695_s10  ;;  %v2717_v14 = vsel %vm2716_vm11, %v2698_v47, %v5661_v40  ;;  %v5663_v58 = vunpack.i.h.bf16 %v4888_v0  ;;  %v5667_v47 = vunpack.i.l.bf16 %v4888_v0  ;;  %v5240_v0 = vpop.permute.xlu0 %3423 }
  0xf3   : > { %3653 = vrot.lane.b32.xlu0 %v3652_v62, %s3691_s6  ;;  %v783_v38 = vcombine.high %v781_v49, %v781_v49  ;;  %v2405_v36 = vrot.slane %v2398_v2, %v3763_v16  ;;  %v2407_v48 = vcombine.low %v782_v18, %v781_v49  ;;  %v2718_v39 = vsel %vm2716_vm11, %v2699_v32, %v5662_v46  ;;  %v5664_v62 = vld [vmem:[#allocation7_spill] sm:$0xff]  ;;  %s3188_s6 = sshll.u32 %s5688_s19, 1 }
  0xf4   : > { %v2663_v10 = vsel %vm2659_vm8, %v2644_v53, %v5663_v58  ;;  %v5666_v43 = vcombine.low %v5664_v62, %v5665_v27  ;;  %v791_v2 = vcombine.high %v790_v33, %v790_v33  ;;  %v1048_v32 = vrot.slane %v774_v22, 7  ;;  %v5235_v53 = vpop.permute.xlu1 %3428 }
  0xf5   : > { %v2406_v35 = vcombine.low %v5155_v29, %v2405_v36  ;;  %v2408_v15 = vcombine.low %v783_v38, %v790_v33  ;;  %v2415_v34 = vrot.slane %v2407_v48, %v3763_v16  ;;  %v1051_v4 = vrot.slane %v782_v18, 7 }
  0xf6   : > { %v2643_v1 = vsel %vm2640_vm7, %v5666_v43, %v3380_v19  ;;  %v1054_v40 = vrot.slane %v781_v49, 7  ;;  %v1057_v58 = vrot.slane %v783_v38, 7  ;;  %v1060_v19 = vrot.slane %v790_v33, 7 }
  0xf7   : > { %v2662_v59 = vsel %vm2659_vm8, %v2643_v1, %v5667_v47  ;;  %v2422_v46 = vrot.slane %v2408_v15, %v3763_v16  ;;  %v2560_v62 = vcombine.low %v774_v22, %v782_v18  ;;  %v1049_v29 = vsel %vm3993_vm6, %v3204_v56, %v1048_v32 }
  0xf8   : > { %v1050_v36 = vrot.slane %v1048_v32, 2  ;;  %v1053_v48 = vrot.slane %v1051_v4, 2  ;;  %v1056_v27 = vrot.slane %v1054_v40, 2  ;;  %v1059_v1 = vrot.slane %v1057_v58, 2 }
  0xf9   : > { %v2423_v43 = vcombine.low %v2415_v34, %v2422_v46  ;;  %v1062_v47 = vrot.slane %v1060_v19, 2  ;;  %v1063_v8 = vrot.slane %v791_v2, 7  ;;  %v2567_v18 = vrot.slane %v2560_v62, %v3763_v16  ;;  %v5254_v45 = vpop.permute.xlu1 %3438 }
  0xfa   : > { %v1052_v28 = vsel %vm3993_vm6, %v1050_v36, %v1051_v4  ;;  %v1055_v15 = vsel %vm3993_vm6, %v1053_v48, %v1054_v40  ;;  %v1058_v22 = vsel %vm3993_vm6, %v1056_v27, %v1057_v58  ;;  %v1061_v32 = vsel %vm3993_vm6, %v1059_v1, %v1060_v19 }
  0xfb   : > { %v3657_v56 = vpack.i.bf16 %v2423_v43, %v2406_v35  ;;  %v1064_v34 = vsel %vm3993_vm6, %v1062_v47, %v1063_v8  ;;  %v2479_v46 = vcombine.low %v1049_v29, %v1052_v28  ;;  %v2488_v42 = vcombine.low %v1055_v15, %v1058_v22 }
  0xfc   : > { %v2489_v37 = vcombine.low %v1061_v32, %v1064_v34  ;;  %v2568_v4 = vcombine.low %v5177_v7, %v2567_v18  ;;  %v2569_v36 = vcombine.low %v781_v49, %v783_v38  ;;  %v2570_v58 = vcombine.low %v790_v33, %v791_v2  ;;  %v5266_v38 = vpop.permute.xlu0 %3433 }
  0xfd   : > { %3658 = vrot.lane.b32.xlu1 %v3657_v56, %s3690_s30  ;;  %v2486_v40 = vrot.slane %v2479_v46, %v3763_v16  ;;  %v3386_v35 = vunpack.i.h.bf16 %v5088_v50  ;;  %v3385_v19 = vunpack.i.l.bf16 %v5088_v50  ;;  %v2496_v11 = vrot.slane %v2488_v42, %v3763_v16  ;;  %v5292_v22 = vpop.permute.xlu1 %3448  ;;  %s5509_s30 = scalar_lea.vmem %s5595_s4, %s3292_s27 }
  0xfe   : > { %v2503_v8 = vrot.slane %v2489_v37, %v3763_v16  ;;  %v2577_v28 = vrot.slane %v2569_v36, %v3763_v16  ;;  %v5668_v7 = vunpack.i.l.bf16 %v4848_v21  ;;  %v2584_v33 = vrot.slane %v2570_v58, %v3763_v16  ;;  %v3676_v37 = vld [vmem:[%s5594_s3 + $0x20] ss:$0 sps:$4 sm:$0xff]   ;;  %v5676_v36 = vld [vmem:[#allocation11_spill] sm:$0xff] }
  0xff   : > { %v2487_v62 = vcombine.low %v5186_v61, %v2486_v40  ;;  %v5669_v2 = vunpack.i.h.bf16 %v4848_v21  ;;  %v5670_v29 = vunpack.i.l.bf16 %v4801_v30  ;;  %v5671_v21 = vunpack.i.h.bf16 %v4801_v30 }
 0x100   : > { %v2681_v49 = vsel %vm2678_vm9, %v2662_v59, %v5668_v7  ;;  %v2504_v48 = vcombine.low %v2496_v11, %v2503_v8  ;;  %v5672_v43 = vunpack.i.h.bf16 %v4908_v26  ;;  %v3390_v15 = vunpack.i.l.bf16 %v5109_v13  ;;  %v5305_v34 = vpop.permute.xlu0 %3443 }
 0x101   : > { %v2682_v50 = vsel %vm2678_vm9, %v2663_v10, %v5669_v2  ;;  %v2700_v42 = vsel %vm2697_vm10, %v2681_v49, %v3385_v19  ;;  %v2736_v59 = vsel %vm2735_vm12, %v2717_v14, %v5670_v29  ;;  %v2737_v61 = vsel %vm2735_vm12, %v2718_v39, %v5671_v21 }
 0x102   : > { %v2701_v27 = vsel %vm2697_vm10, %v2682_v50, %v3386_v35  ;;  %v2719_v16 = vsel %vm2716_vm11, %v2700_v42, %v3350_v55  ;;  %v2585_v10 = vcombine.low %v2577_v28, %v2584_v33  ;;  %v3662_v47 = vpack.i.bf16 %v2504_v48, %v2487_v62 }
 0x103   : > { %v2720_v1 = vsel %vm2716_vm11, %v2701_v27, %v5672_v43  ;;  %v3391_v14 = vunpack.i.h.bf16 %v5109_v13  ;;  %v2738_v30 = vsel %vm2735_vm12, %v2719_v16, %v3355_v51  ;;  %v2867_v55 = vsel %vm2865_vm14, %v3676_v37, 0 }
 0x104   : > { %v3667_v18 = vpack.i.bf16 %v2585_v10, %v2568_v4  ;;  %v2739_v26 = vsel %vm2735_vm12, %v2720_v1, %v3356_v60  ;;  %3663 = vrot.lane.b32.xlu0 %v3662_v47, %s3694_s9  ;;  %3244 = vmatpush3.bf16.msra.mxu0 %v2867_v55  ;;  %v3401_v39 = vunpack.i.h.bf16 %v5134_v23  ;;  %v3400_v13 = vunpack.i.l.bf16 %v5134_v23  ;;  %v5675_v4 = vld [vmem:[#allocation12_spill] sm:$0xff]  ;;  %v3454_v48 = vpop.permute.xlu0 %3453  ;;  %s235_s9 = scalar_lea.vmem %s5596_s5, %s3188_s6 }
 0x105   : > { %v3396_v56 = vunpack.i.h.bf16 %v5145_v41  ;;  %v3395_v32 = vunpack.i.l.bf16 %v5145_v41  ;;  %v2755_v60 = vsel %vm2754_vm13, %v2736_v59, %v5673_v5  ;;  %v5674_v51 = vunpack.i.h.bf16 %v5002_v3  ;;  %3290 = vmatpush3.bf16.msra.mxu1 %v2867_v55 }
 0x106   : > { %3668 = vrot.lane.b32.xlu1 %v3667_v18, %s3692_s7  ;;  %v5677_v40 = vmov 0.0   ;;  %v5678_v58 = vunpack.i.l.bf16 %v4831_v31  ;;  %v5679_v3 = vunpack.i.h.bf16 %v4831_v31  ;;  %v3411_v8 = vunpack.i.h.bf16 %v5173_v17  ;;  %v5334_v31 = vpop.permute.xlu1 %3458 }
 0x107   : > { %v2756_v46 = vsel %vm2754_vm13, %v2737_v61, %v5674_v51  ;;  %v2646_v23 = vsel %vm2640_vm7, %v5675_v4, %v3396_v56  ;;  %v2645_v41 = vsel %vm2640_vm7, %v5676_v36, %v3395_v32  ;;  %3245 = vmatprep.mubr.msk.bf16.mxu0 %vm3697_vm1, %v5677_v40  ;;  %v3410_v28 = vunpack.i.l.bf16 %v5173_v17  ;;  %3265 = vmatprep.mubr.msk.bf16.mxu1 %vm3697_vm1, %v5677_v40 }
 0x108   : > { %v2774_v35 = vsel %vm2773_vm15, %v2755_v60, %v5678_v58  ;;  %v2775_v19 = vsel %vm2773_vm15, %v2756_v46, %v5679_v3  ;;  %v2757_v7 = vsel %vm2754_vm13, %v2738_v30, %v3390_v15  ;;  %v2758_v49 = vsel %vm2754_vm13, %v2739_v26, %v3391_v14 }
 0x109   : > { %v2792_v11 = vpack.c.bf16 %v2775_v19, %v2774_v35  ;;  %v3406_v62 = vunpack.i.h.bf16 %v5183_v20  ;;  %v3405_v33 = vunpack.i.l.bf16 %v5183_v20  ;;  %v2664_v2 = vsel %vm2659_vm8, %v2645_v41, %v3400_v13 }
 0x10a   : > { %v2665_v50 = vsel %vm2659_vm8, %v2646_v23, %v3401_v39  ;;  %v3416_v17 = vunpack.i.h.bf16 %v5213_v63  ;;  %v3415_v42 = vunpack.i.l.bf16 %v5213_v63  ;;  %v3421_v59 = vunpack.i.h.bf16 %v5204_v24 }
 0x10b   : > { %3246 = vmatmul.mubr.msk.bf16.vlgmr.msra.gmra.mrb[0].mxu0 %vm2837_vm2, %v2792_v11  ;;  %v2683_v37 = vsel %vm2678_vm9, %v2664_v2, %v3405_v33  ;;  %v2684_v29 = vsel %vm2678_vm9, %v2665_v50, %v3406_v62  ;;  %v3420_v20 = vunpack.i.l.bf16 %v5204_v24  ;;  %v5680_v21 = vunpack.i.l.bf16 %v4974_v44  ;;  %v3469_v26 = vpop.permute.xlu1 %3468 }
 0x10c   : > { %3249 = vmatprep.mubr.msk.bf16.mxu0 %vm3697_vm1, %v5677_v40  ;;  %v2702_v27 = vsel %vm2697_vm10, %v2683_v37, %v3410_v28  ;;  %v2703_v16 = vsel %vm2697_vm10, %v2684_v29, %v3411_v8  ;;  %v5681_v43 = vunpack.i.h.bf16 %v4974_v44  ;;  %v3426_v1 = vunpack.i.h.bf16 %v5240_v0  ;;  %v5683_v8 = vld [vmem:[#allocation14_spill] sm:$0xff]  ;;  %v5684_v28 = vld [vmem:[#allocation13_spill] sm:$0xff] }
 0x10d   : > { %v2776_v63 = vsel %vm2773_vm15, %v2757_v7, %v5680_v21  ;;  %v2721_v61 = vsel %vm2716_vm11, %v2702_v27, %v3415_v42  ;;  %v2722_v10 = vsel %vm2716_vm11, %v2703_v16, %v3416_v17  ;;  %v3425_v47 = vunpack.i.l.bf16 %v5240_v0 }
 0x10e   : > { %v2777_v24 = vsel %vm2773_vm15, %v2758_v49, %v5681_v43  ;;  %v3431_v14 = vunpack.i.h.bf16 %v5235_v53  ;;  %v3430_v15 = vunpack.i.l.bf16 %v5235_v53  ;;  %v2740_v18 = vsel %vm2735_vm12, %v2721_v61, %v3420_v20  ;;  %v3464_v13 = vpop.permute.xlu0 %3463 }
 0x10f   : > { %v2741_v30 = vsel %vm2735_vm12, %v2722_v10, %v3421_v59  ;;  %v2793_v55 = vpack.c.bf16 %v2777_v24, %v2776_v63  ;;  %v2759_v39 = vsel %vm2754_vm13, %v2740_v18, %v3425_v47  ;;  %v3479_v56 = vpop.permute.xlu1 %3478  ;;  %v3441_v60 = vunpack.i.h.bf16 %v5254_v45 }
 0x110   : > { %v2760_v44 = vsel %vm2754_vm13, %v2741_v30, %v3426_v1  ;;  %v2778_v0 = vsel %vm2773_vm15, %v2759_v39, %v3430_v15  ;;  %v3440_v51 = vunpack.i.l.bf16 %v5254_v45  ;;  %v3436_v46 = vunpack.i.h.bf16 %v5266_v38 }
 0x111   : > { %v2779_v53 = vsel %vm2773_vm15, %v2760_v44, %v3431_v14  ;;  %v3435_v4 = vunpack.i.l.bf16 %v5266_v38  ;;  %v3451_v23 = vunpack.i.h.bf16 %v5292_v22  ;;  %v3450_v36 = vunpack.i.l.bf16 %v5292_v22  ;;  %v5682_v38 = vld [vmem:[#allocation19_spill] sm:$0xff] }
 0x112   : > { %v2794_v32 = vpack.c.bf16 %v2779_v53, %v2778_v0  ;;  %v3474_v5 = vpop.permute.xlu0 %3473  ;;  %v3446_v41 = vunpack.i.h.bf16 %v5305_v34  ;;  %v3445_v58 = vunpack.i.l.bf16 %v5305_v34  ;;  %v3461_v35 = vunpack.i.h.bf16 %v5334_v31 }
 0x113   : > { %3250 = vmatmul.mubr.msk.bf16.gmra.mrb[4].mxu0 %vm2837_vm2, %v2793_v55  ;;  %v3460_v3 = vunpack.i.l.bf16 %v5334_v31  ;;  %v2652_v45 = vsel %vm2640_vm7, %v4774_v12, %v3441_v60  ;;  %v2651_v11 = vsel %vm2640_vm7, %v5682_v38, %v3440_v51  ;;  %v2648_v22 = vsel %vm2640_vm7, %v5683_v8, %v3436_v46 }
 0x114   : > { %3253 = vmatprep.mubr.msk.bf16.mxu0 %vm3697_vm1, %v5677_v40  ;;  %v2647_v34 = vsel %vm2640_vm7, %v5684_v28, %v3435_v4  ;;  %v3456_v7 = vunpack.i.h.bf16 %v3454_v48  ;;  %v3455_v49 = vunpack.i.l.bf16 %v3454_v48  ;;  %v2670_v33 = vsel %vm2659_vm8, %v2651_v11, %v3450_v36 }
 0x115   : > { %v2671_v31 = vsel %vm2659_vm8, %v2652_v45, %v3451_v23  ;;  %v3471_v2 = vunpack.i.h.bf16 %v3469_v26  ;;  %v3470_v50 = vunpack.i.l.bf16 %v3469_v26  ;;  %v2666_v12 = vsel %vm2659_vm8, %v2647_v34, %v3445_v58 }
 0x116   : > { %v3484_v62 = vpop.permute.xlu0 %3483  ;;  %v2667_v17 = vsel %vm2659_vm8, %v2648_v22, %v3446_v41  ;;  %v2689_v42 = vsel %vm2678_vm9, %v2670_v33, %v3460_v3  ;;  %v2690_v37 = vsel %vm2678_vm9, %v2671_v31, %v3461_v35  ;;  %v3466_v29 = vunpack.i.h.bf16 %v3464_v13 }
 0x117   : > { %v3465_v59 = vunpack.i.l.bf16 %v3464_v13  ;;  %v3481_v20 = vunpack.i.h.bf16 %v3479_v56  ;;  %v3480_v27 = vunpack.i.l.bf16 %v3479_v56  ;;  %v2685_v48 = vsel %vm2678_vm9, %v2666_v12, %v3455_v49 }
 0x118   : > { %v2686_v16 = vsel %vm2678_vm9, %v2667_v17, %v3456_v7  ;;  %v3476_v21 = vunpack.i.h.bf16 %v3474_v5  ;;  %v3475_v63 = vunpack.i.l.bf16 %v3474_v5  ;;  %v2708_v10 = vsel %vm2697_vm10, %v2689_v42, %v3470_v50 }
 0x119   : > { %v2709_v43 = vsel %vm2697_vm10, %v2690_v37, %v3471_v2  ;;  %v3486_v47 = vunpack.i.h.bf16 %v3484_v62  ;;  %v3485_v14 = vunpack.i.l.bf16 %v3484_v62  ;;  %v2704_v26 = vsel %vm2697_vm10, %v2685_v48, %v3465_v59 }
 0x11a   : > { %v2705_v55 = vsel %vm2697_vm10, %v2686_v16, %v3466_v29  ;;  %v2727_v39 = vsel %vm2716_vm11, %v2708_v10, %v3480_v27  ;;  %v2728_v44 = vsel %vm2716_vm11, %v2709_v43, %v3481_v20  ;;  %v2723_v13 = vsel %vm2716_vm11, %v2704_v26, %v3475_v63 }
 0x11b   : > { %3254 = vmatmul.mubr.msk.bf16.gmra.mrb[8].mxu0 %vm2837_vm2, %v2794_v32  ;;  %v3489_v19 = vpop.permute.xlu1 %3488  ;;  %v2724_v0 = vsel %vm2716_vm11, %v2705_v55, %v3476_v21  ;;  %v2742_v4 = vsel %vm2735_vm12, %v2723_v13, %v3485_v14 }
 0x11c   : > { %3257 = vmatprep.mubr.msk.bf16.mxu0 %vm3697_vm1, %v5677_v40  ;;  %v3491_v24 = vunpack.i.h.bf16 %v3489_v19  ;;  %v3490_v1 = vunpack.i.l.bf16 %v3489_v19  ;;  %v2743_v23 = vsel %vm2735_vm12, %v2724_v0, %v3486_v47  ;;  %v5686_v47 = vld [vmem:[#allocation15_spill] sm:$0xff] }
 0x11e   : > { %v2746_v5 = vsel %vm2735_vm12, %v2727_v39, %v3490_v1  ;;  %v2747_v60 = vsel %vm2735_vm12, %v2728_v44, %v3491_v24  ;;  %v5685_v24 = vld [vmem:[#allocation18_spill] sm:$0xff] }
 0x121   : > { %v3499_v61 = vpop.permute.xlu1 %3498 }
 0x122   : > { %v3501_v15 = vunpack.i.h.bf16 %v3499_v61  ;;  %v3500_v18 = vunpack.i.l.bf16 %v3499_v61 }
 0x124   : > { %v3494_v30 = vpop.permute.xlu0 %3493  ;;  %v2765_v36 = vsel %vm2754_vm13, %v2746_v5, %v3500_v18  ;;  %v2766_v41 = vsel %vm2754_vm13, %v2747_v60, %v3501_v15 }
 0x125   : > { %v3496_v53 = vunpack.i.h.bf16 %v3494_v30  ;;  %v3495_v56 = vunpack.i.l.bf16 %v3494_v30  ;;  %v3509_v32 = vpop.permute.xlu1 %3508 }
 0x126   : > { %v3511_v51 = vunpack.i.h.bf16 %v3509_v32  ;;  %v3510_v46 = vunpack.i.l.bf16 %v3509_v32 }
 0x127   : > { %v2761_v38 = vsel %vm2754_vm13, %v2742_v4, %v3495_v56  ;;  %v2762_v11 = vsel %vm2754_vm13, %v2743_v23, %v3496_v53 }
 0x128   : > { %v3504_v58 = vpop.permute.xlu0 %3503  ;;  %v2784_v35 = vsel %vm2773_vm15, %v2765_v36, %v3510_v46  ;;  %v2785_v3 = vsel %vm2773_vm15, %v2766_v41, %v3511_v51 }
 0x129   : > { %v3506_v19 = vunpack.i.h.bf16 %v3504_v58  ;;  %v3505_v45 = vunpack.i.l.bf16 %v3504_v58  ;;  %v2797_v8 = vpack.c.bf16 %v2785_v3, %v2784_v35  ;;  %v3519_v22 = vpop.permute.xlu1 %3518 }
 0x12a   : > { %v3521_v17 = vunpack.i.h.bf16 %v3519_v22  ;;  %v3520_v42 = vunpack.i.l.bf16 %v3519_v22 }
 0x12b   : > { %v2780_v28 = vsel %vm2773_vm15, %v2761_v38, %v3505_v45  ;;  %v2781_v34 = vsel %vm2773_vm15, %v2762_v11, %v3506_v19  ;;  %3266 = vmatmul.mubr.msk.bf16.vlgmr.msra.gmra.mrb[0].mxu1 %vm2837_vm2, %v2797_v8 }
 0x12c   : > { %v2795_v7 = vpack.c.bf16 %v2781_v34, %v2780_v28  ;;  %v3514_v49 = vpop.permute.xlu0 %3513  ;;  %3269 = vmatprep.mubr.msk.bf16.mxu1 %vm3697_vm1, %v5677_v40  ;;  %v2654_v10 = vsel %vm2640_vm7, %v4636_v6, %v3521_v17  ;;  %v2653_v43 = vsel %vm2640_vm7, %v4781_v52, %v3520_v42 }
 0x12d   : > { %v3529_v62 = vpop.permute.xlu1 %3528  ;;  %v3516_v37 = vunpack.i.h.bf16 %v3514_v49  ;;  %v3515_v29 = vunpack.i.l.bf16 %v3514_v49 }
 0x12e   : > { %3258 = vmatmul.mubr.msk.bf16.gmra.mrb[12].mxu0 %vm2837_vm2, %v2795_v7  ;;  %v3531_v20 = vunpack.i.h.bf16 %v3529_v62  ;;  %v3530_v27 = vunpack.i.l.bf16 %v3529_v62 }
 0x12f   : > { %3261 = vmatprep.mubr.msk.bf16.mxu0 %vm3697_vm1, %v5677_v40  ;;  %v2650_v1 = vsel %vm2640_vm7, %v5685_v24, %v3516_v37  ;;  %v2649_v14 = vsel %vm2640_vm7, %v5686_v47, %v3515_v29 }
 0x130   : > { %v3524_v33 = vpop.permute.xlu0 %3523  ;;  %v2672_v26 = vsel %vm2659_vm8, %v2653_v43, %v3530_v27  ;;  %v2673_v55 = vsel %vm2659_vm8, %v2654_v10, %v3531_v20 }
 0x131   : > { %v3539_v31 = vpop.permute.xlu1 %3538  ;;  %v3526_v48 = vunpack.i.h.bf16 %v3524_v33  ;;  %v3525_v16 = vunpack.i.l.bf16 %v3524_v33 }
 0x132   : > { %v3541_v21 = vunpack.i.h.bf16 %v3539_v31  ;;  %v3540_v63 = vunpack.i.l.bf16 %v3539_v31 }
 0x133   : > { %v2668_v6 = vsel %vm2659_vm8, %v2649_v14, %v3525_v16  ;;  %v2669_v13 = vsel %vm2659_vm8, %v2650_v1, %v3526_v48 }
 0x134   : > { %v3534_v2 = vpop.permute.xlu0 %3533  ;;  %v2691_v52 = vsel %vm2678_vm9, %v2672_v26, %v3540_v63  ;;  %v2692_v0 = vsel %vm2678_vm9, %v2673_v55, %v3541_v21 }
 0x135   : > { %v3549_v50 = vpop.permute.xlu1 %3548  ;;  %v3536_v15 = vunpack.i.h.bf16 %v3534_v2  ;;  %v3535_v18 = vunpack.i.l.bf16 %v3534_v2 }
 0x136   : > { %v3551_v39 = vunpack.i.h.bf16 %v3549_v50  ;;  %v3550_v44 = vunpack.i.l.bf16 %v3549_v50 }
 0x137   : > { %v2687_v51 = vsel %vm2678_vm9, %v2668_v6, %v3535_v18  ;;  %v2688_v46 = vsel %vm2678_vm9, %v2669_v13, %v3536_v15 }
 0x138   : > { %v3544_v12 = vpop.permute.xlu0 %3543  ;;  %v2710_v41 = vsel %vm2697_vm10, %v2691_v52, %v3550_v44  ;;  %v2711_v58 = vsel %vm2697_vm10, %v2692_v0, %v3551_v39 }
 0x139   : > { %v3559_v59 = vpop.permute.xlu1 %3558  ;;  %v3546_v56 = vunpack.i.h.bf16 %v3544_v12  ;;  %v3545_v32 = vunpack.i.l.bf16 %v3544_v12 }
 0x13a   : > { %v3561_v5 = vunpack.i.h.bf16 %v3559_v59  ;;  %v3560_v60 = vunpack.i.l.bf16 %v3559_v59 }
 0x13b   : > { %v2706_v22 = vsel %vm2697_vm10, %v2687_v51, %v3545_v32  ;;  %v2707_v28 = vsel %vm2697_vm10, %v2688_v46, %v3546_v56 }
 0x13c   : > { %v3554_v61 = vpop.permute.xlu0 %3553  ;;  %v2729_v34 = vsel %vm2716_vm11, %v2710_v41, %v3560_v60  ;;  %v2730_v7 = vsel %vm2716_vm11, %v2711_v58, %v3561_v5 }
 0x13d   : > { %v3569_v30 = vpop.permute.xlu1 %3568  ;;  %v3556_v4 = vunpack.i.h.bf16 %v3554_v61  ;;  %v3555_v23 = vunpack.i.l.bf16 %v3554_v61 }
 0x13e   : > { %v3571_v35 = vunpack.i.h.bf16 %v3569_v30  ;;  %v3570_v3 = vunpack.i.l.bf16 %v3569_v30 }
 0x13f   : > { %v2725_v49 = vsel %vm2716_vm11, %v2706_v22, %v3555_v23  ;;  %v2726_v62 = vsel %vm2716_vm11, %v2707_v28, %v3556_v4 }
 0x140   : > { %v3564_v53 = vpop.permute.xlu0 %3563  ;;  %v2748_v50 = vsel %vm2735_vm12, %v2729_v34, %v3570_v3  ;;  %v2749_v12 = vsel %vm2735_vm12, %v2730_v7, %v3571_v35 }
 0x141   : > { %v3579_v36 = vpop.permute.xlu1 %3578  ;;  %v3566_v19 = vunpack.i.h.bf16 %v3564_v53  ;;  %v3565_v45 = vunpack.i.l.bf16 %v3564_v53 }
 0x142   : > { %v3581_v38 = vunpack.i.h.bf16 %v3579_v36  ;;  %v3580_v11 = vunpack.i.l.bf16 %v3579_v36 }
 0x143   : > { %v2744_v37 = vsel %vm2735_vm12, %v2725_v49, %v3565_v45  ;;  %v2745_v29 = vsel %vm2735_vm12, %v2726_v62, %v3566_v19 }
 0x144   : > { %v3574_v8 = vpop.permute.xlu0 %3573  ;;  %v2767_v59 = vsel %vm2754_vm13, %v2748_v50, %v3580_v11  ;;  %v2768_v20 = vsel %vm2754_vm13, %v2749_v12, %v3581_v38 }
 0x145   : > { %v3576_v33 = vunpack.i.h.bf16 %v3574_v8  ;;  %v3575_v31 = vunpack.i.l.bf16 %v3574_v8  ;;  %v3589_v2 = vpop.permute.xlu1 %3588 }
 0x146   : > { %v3591_v17 = vunpack.i.h.bf16 %v3589_v2  ;;  %v3590_v42 = vunpack.i.l.bf16 %v3589_v2 }
 0x147   : > { %v2763_v61 = vsel %vm2754_vm13, %v2744_v37, %v3575_v31  ;;  %v2764_v10 = vsel %vm2754_vm13, %v2745_v29, %v3576_v33 }
 0x148   : > { %v3584_v27 = vpop.permute.xlu0 %3583  ;;  %v2786_v48 = vsel %vm2773_vm15, %v2767_v59, %v3590_v42  ;;  %v2787_v16 = vsel %vm2773_vm15, %v2768_v20, %v3591_v17 }
 0x149   : > { %v3586_v21 = vunpack.i.h.bf16 %v3584_v27  ;;  %v3585_v63 = vunpack.i.l.bf16 %v3584_v27  ;;  %v2798_v43 = vpack.c.bf16 %v2787_v16, %v2786_v48  ;;  %v3599_v24 = vpop.permute.xlu1 %3598 }
 0x14a   : > { %v3601_v26 = vunpack.i.h.bf16 %v3599_v24  ;;  %v3600_v55 = vunpack.i.l.bf16 %v3599_v24 }
 0x14b   : > { %v2782_v1 = vsel %vm2773_vm15, %v2763_v61, %v3585_v63  ;;  %v2783_v47 = vsel %vm2773_vm15, %v2764_v10, %v3586_v21  ;;  %3270 = vmatmul.mubr.msk.bf16.gmra.mrb[4].mxu1 %vm2837_vm2, %v2798_v43 }
 0x14c   : > { %v2796_v14 = vpack.c.bf16 %v2783_v47, %v2782_v1  ;;  %v3594_v15 = vpop.permute.xlu0 %3593  ;;  %3273 = vmatprep.mubr.msk.bf16.mxu1 %vm3697_vm1, %v5677_v40 }
 0x14d   : > { %v3596_v18 = vunpack.i.h.bf16 %v3594_v15  ;;  %v3595_v30 = vunpack.i.l.bf16 %v3594_v15  ;;  %v3609_v44 = vpop.permute.xlu1 %3608 }
 0x14e   : > { %3262 = vmatmul.mubr.msk.bf16.gmra.mrb[16].mxu0 %vm2837_vm2, %v2796_v14  ;;  %v3611_v32 = vunpack.i.h.bf16 %v3609_v44  ;;  %v3610_v5 = vunpack.i.l.bf16 %v3609_v44 }
 0x14f   : > { %v2656_v6 = vsel %vm2640_vm7, %v4809_v57, %v3596_v18  ;;  %v2655_v13 = vsel %vm2640_vm7, %v4657_v9, %v3595_v30 }
 0x150   : > { %v3604_v39 = vpop.permute.xlu0 %3603  ;;  %v2674_v53 = vsel %vm2659_vm8, %v2655_v13, %v3600_v55  ;;  %v2675_v56 = vsel %vm2659_vm8, %v2656_v6, %v3601_v26 }
 0x151   : > { %v3606_v52 = vunpack.i.h.bf16 %v3604_v39  ;;  %v3605_v0 = vunpack.i.l.bf16 %v3604_v39  ;;  %v3619_v36 = vpop.permute.xlu1 %3618 }
 0x152   : > { %v3621_v41 = vunpack.i.h.bf16 %v3619_v36  ;;  %v3620_v58 = vunpack.i.l.bf16 %v3619_v36 }
 0x153   : > { %v2693_v51 = vsel %vm2678_vm9, %v2674_v53, %v3605_v0  ;;  %v2694_v46 = vsel %vm2678_vm9, %v2675_v56, %v3606_v52 }
 0x154   : > { %v3614_v60 = vpop.permute.xlu0 %3613  ;;  %v2712_v57 = vsel %vm2697_vm10, %v2693_v51, %v3610_v5  ;;  %v2713_v9 = vsel %vm2697_vm10, %v2694_v46, %v3611_v32 }
 0x155   : > { %v3616_v4 = vunpack.i.h.bf16 %v3614_v60  ;;  %v3615_v23 = vunpack.i.l.bf16 %v3614_v60 }
 0x157   : > { %v2731_v35 = vsel %vm2716_vm11, %v2712_v57, %v3615_v23  ;;  %v2732_v3 = vsel %vm2716_vm11, %v2713_v9, %v3616_v4  ;;  %v3629_v11 = vpop.permute.xlu1 %3628 }
 0x158   : > { %v2750_v8 = vsel %vm2735_vm12, %v2731_v35, %v3620_v58  ;;  %v2751_v22 = vsel %vm2735_vm12, %v2732_v3, %v3621_v41  ;;  %v3631_v28 = vunpack.i.h.bf16 %v3629_v11  ;;  %v3630_v34 = vunpack.i.l.bf16 %v3629_v11 }
 0x159   : > { %v3624_v19 = vpop.permute.xlu0 %3623 }
 0x15a   : > { %v3626_v45 = vunpack.i.h.bf16 %v3624_v19  ;;  %v3625_v38 = vunpack.i.l.bf16 %v3624_v19 }
 0x15b   : > { %v3639_v50 = vpop.permute.xlu1 %3638 }
 0x15c   : > { %v2769_v7 = vsel %vm2754_vm13, %v2750_v8, %v3625_v38  ;;  %v2770_v49 = vsel %vm2754_vm13, %v2751_v22, %v3626_v45  ;;  %v3641_v29 = vunpack.i.h.bf16 %v3639_v50  ;;  %v3640_v59 = vunpack.i.l.bf16 %v3639_v50 }
 0x15d   : > { %v2788_v62 = vsel %vm2773_vm15, %v2769_v7, %v3630_v34  ;;  %v2789_v33 = vsel %vm2773_vm15, %v2770_v49, %v3631_v28  ;;  %v3634_v2 = vpop.permute.xlu0 %3633 }
 0x15e   : > { %v2799_v31 = vpack.c.bf16 %v2789_v33, %v2788_v62  ;;  %v3636_v17 = vunpack.i.h.bf16 %v3634_v2  ;;  %v3635_v42 = vunpack.i.l.bf16 %v3634_v2 }
 0x160   : > { %3274 = vmatmul.mubr.msk.bf16.gmra.mrb[8].mxu1 %vm2837_vm2, %v2799_v31  ;;  %v2658_v20 = vsel %vm2640_vm7, %v5021_v54, %v3636_v17  ;;  %v2657_v27 = vsel %vm2640_vm7, %v4843_v25, %v3635_v42 }
 0x161   : > { %3277 = vmatprep.mubr.msk.bf16.mxu1 %vm3697_vm1, %v5677_v40  ;;  %v3644_v12 = vpop.permute.xlu0 %3643  ;;  %v2676_v63 = vsel %vm2659_vm8, %v2657_v27, %v3640_v59  ;;  %v2677_v40 = vsel %vm2659_vm8, %v2658_v20, %v3641_v29 }
 0x162   : > { %v3646_v48 = vunpack.i.h.bf16 %v3644_v12  ;;  %v3645_v16 = vunpack.i.l.bf16 %v3644_v12 }
 0x164   : > { %v3649_v37 = vpop.permute.xlu1 %3648  ;;  %v2695_v43 = vsel %vm2678_vm9, %v2676_v63, %v3645_v16  ;;  %v2696_v24 = vsel %vm2678_vm9, %v2677_v40, %v3646_v48 }
 0x165   : > { %v3654_v21 = vpop.permute.xlu0 %3653  ;;  %v3651_v61 = vunpack.i.h.bf16 %v3649_v37  ;;  %v3650_v10 = vunpack.i.l.bf16 %v3649_v37 }
 0x166   : > { %v3656_v1 = vunpack.i.h.bf16 %v3654_v21  ;;  %v3655_v47 = vunpack.i.l.bf16 %v3654_v21 }
 0x167   : > { %v2714_v54 = vsel %vm2697_vm10, %v2695_v43, %v3650_v10  ;;  %v2715_v25 = vsel %vm2697_vm10, %v2696_v24, %v3651_v61 }
 0x168   : > { %v2733_v30 = vsel %vm2716_vm11, %v2714_v54, %v3655_v47  ;;  %v2734_v26 = vsel %vm2716_vm11, %v2715_v25, %v3656_v1 }
 0x16f   : > { %v3659_v14 = vpop.permute.xlu1 %3658 }
 0x170   : > { %v3661_v15 = vunpack.i.h.bf16 %v3659_v14  ;;  %v3660_v18 = vunpack.i.l.bf16 %v3659_v14 }
 0x172   : > { %v2752_v13 = vsel %vm2735_vm12, %v2733_v30, %v3660_v18  ;;  %v2753_v52 = vsel %vm2735_vm12, %v2734_v26, %v3661_v15 }
 0x176   : > { %v3664_v55 = vpop.permute.xlu0 %3663 }
 0x177   : > { %v3666_v39 = vunpack.i.h.bf16 %v3664_v55  ;;  %v3665_v44 = vunpack.i.l.bf16 %v3664_v55 }
 0x178   : > { %v3669_v6 = vpop.permute.xlu1 %3668 }
 0x179   : > { %v3671_v0 = vunpack.i.h.bf16 %v3669_v6  ;;  %v3670_v53 = vunpack.i.l.bf16 %v3669_v6  ;;  %v2771_v56 = vsel %vm2754_vm13, %v2752_v13, %v3665_v44  ;;  %v2772_v32 = vsel %vm2754_vm13, %v2753_v52, %v3666_v39 }
 0x17b   : > { %v2790_v5 = vsel %vm2773_vm15, %v2771_v56, %v3670_v53  ;;  %v2791_v60 = vsel %vm2773_vm15, %v2772_v32, %v3671_v0 }
 0x17c   : > { %v2800_v51 = vpack.c.bf16 %v2791_v60, %v2790_v5 }
 0x17e   : > { %3278 = vmatmul.mubr.msk.bf16.gmra.mrb[12].mxu1 %vm2837_vm2, %v2800_v51 }
 0x1de   : > { %v2903_v46 = vpop.f32.mrb[0].mxu0 }
 0x1df   : > { %2974 = vst.msk [vmem:[%s5509_s30] sm:$0xff] %vm2640_vm7, %v2903_v46  ;;  %v3033_v4 = vmul.f32 %v2903_v46, %v2903_v46  ;;  %v3247_v23 = vpop.f32.mrb[1].mxu0  ;;  %v2992_v57 = vsel %vm2640_vm7, %v2903_v46, 0.0 }
 0x1e0   : > { %v2906_v36 = vpop.f32.mrb[2].mxu0 }
 0x1e1   : > { %2975 = vst.msk [vmem:[%s5509_s30 + $0x8] sm:$0xff] %vm2640_vm7, %v2906_v36  ;;  %v2993_v9 = vsel %vm2640_vm7, %v2906_v36, 0.0  ;;  %v3034_v41 = vmul.f32 %v2906_v36, %v2906_v36  ;;  %v3248_v58 = vpop.f32.mrb[3].mxu0  ;;  %v3051_v3 = vsel %vm2640_vm7, %v3033_v4, 0.0 }
 0x1e2   : > { %v2994_v35 = vadd.f32 %v2993_v9, %v2992_v57 }
 0x1e3   : > { %v3052_v19 = vsel %vm2640_vm7, %v3034_v41, 0.0 }
 0x1e4   : > { %v3053_v45 = vadd.f32 %v3052_v19, %v3051_v3 }
 0x1e6   : > { %v2911_v38 = vpop.f32.mrb[4].mxu0 }
 0x1e7   : > { %2976 = vst.msk [vmem:[%s5509_s30 + $0x10] sm:$0xff] %vm2640_vm7, %v2911_v38  ;;  %v2995_v11 = vsel %vm2640_vm7, %v2911_v38, 0.0  ;;  %v3035_v8 = vmul.f32 %v2911_v38, %v2911_v38  ;;  %v3251_v22 = vpop.f32.mrb[5].mxu0 }
 0x1e8   : > { %v2996_v28 = vadd.f32 %v2995_v11, %v2994_v35  ;;  %v2914_v34 = vpop.f32.mrb[6].mxu0 }
 0x1e9   : > { %v3054_v7 = vsel %vm2640_vm7, %v3035_v8, 0.0  ;;  %2977 = vst.msk [vmem:[%s5509_s30 + $0x18] sm:$0xff] %vm2640_vm7, %v2914_v34  ;;  %v2997_v49 = vsel %vm2640_vm7, %v2914_v34, 0.0  ;;  %v3036_v62 = vmul.f32 %v2914_v34, %v2914_v34  ;;  %v3252_v33 = vpop.f32.mrb[7].mxu0 }
 0x1ea   : > { %v3055_v31 = vadd.f32 %v3054_v7, %v3053_v45  ;;  %v2998_v2 = vadd.f32 %v2997_v49, %v2996_v28 }
 0x1eb   : > { %v3056_v50 = vsel %vm2640_vm7, %v3036_v62, 0.0 }
 0x1ec   : > { %v3057_v12 = vadd.f32 %v3056_v50, %v3055_v31 }
 0x1ee   : > { %v2919_v17 = vpop.f32.mrb[8].mxu0 }
 0x1ef   : > { %2978 = vst.msk [vmem:[%s5509_s30 + $0x20] sm:$0xff] %vm2640_vm7, %v2919_v17  ;;  %v2999_v42 = vsel %vm2640_vm7, %v2919_v17, 0.0  ;;  %v3037_v37 = vmul.f32 %v2919_v17, %v2919_v17  ;;  %v3255_v29 = vpop.f32.mrb[9].mxu0 }
 0x1f0   : > { %v3000_v59 = vadd.f32 %v2999_v42, %v2998_v2  ;;  %v2922_v20 = vpop.f32.mrb[10].mxu0 }
 0x1f1   : > { %v3058_v27 = vsel %vm2640_vm7, %v3037_v37, 0.0  ;;  %2979 = vst.msk [vmem:[%s5509_s30 + $0x28] sm:$0xff] %vm2640_vm7, %v2922_v20  ;;  %v3001_v48 = vsel %vm2640_vm7, %v2922_v20, 0.0  ;;  %v3038_v16 = vmul.f32 %v2922_v20, %v2922_v20  ;;  %v3256_v21 = vpop.f32.mrb[11].mxu0 }
 0x1f2   : > { %v3059_v63 = vadd.f32 %v3058_v27, %v3057_v12  ;;  %v3002_v40 = vadd.f32 %v3001_v48, %v3000_v59 }
 0x1f3   : > { %v3060_v61 = vsel %vm2640_vm7, %v3038_v16, 0.0 }
 0x1f4   : > { %v3061_v10 = vadd.f32 %v3060_v61, %v3059_v63 }
 0x1fe   : > { %v2943_v43 = vpop.f32.mrb[0].mxu1 }
 0x1ff   : > { %2984 = vst.msk [vmem:[%s5509_s30 + $0x50] sm:$0xff] %vm2640_vm7, %v2943_v43  ;;  %v3267_v24 = vpop.f32.mrb[1].mxu1  ;;  %v3043_v57 = vmul.f32 %v2943_v43, %v2943_v43  ;;  %v3011_v45 = vsel %vm2640_vm7, %v2943_v43, 0.0 }
 0x200   : > { %v2946_v47 = vpop.f32.mrb[2].mxu1 }
 0x201   : > { %v2927_v1 = vpop.f32.mrb[12].mxu0  ;;  %2985 = vst.msk [vmem:[%s5509_s30 + $0x58] sm:$0xff] %vm2640_vm7, %v2946_v47  ;;  %v3268_v15 = vpop.f32.mrb[3].mxu1  ;;  %v3044_v38 = vmul.f32 %v2946_v47, %v2946_v47  ;;  %v3070_v28 = vsel %vm2640_vm7, %v3043_v57, 0.0  ;;  %v3013_v34 = vsel %vm2640_vm7, %v2946_v47, 0.0 }
 0x202   : > { %2980 = vst.msk [vmem:[%s5509_s30 + $0x30] sm:$0xff] %vm2640_vm7, %v2927_v1  ;;  %v3003_v14 = vsel %vm2640_vm7, %v2927_v1, 0.0  ;;  %v3039_v54 = vmul.f32 %v2927_v1, %v2927_v1  ;;  %v3259_v25 = vpop.f32.mrb[13].mxu0 }
 0x203   : > { %v3004_v18 = vadd.f32 %v3003_v14, %v3002_v40  ;;  %v2930_v30 = vpop.f32.mrb[14].mxu0  ;;  %v3072_v33 = vsel %vm2640_vm7, %v3044_v38, 0.0 }
 0x204   : > { %v3062_v26 = vsel %vm2640_vm7, %v3039_v54, 0.0  ;;  %2981 = vst.msk [vmem:[%s5509_s30 + $0x38] sm:$0xff] %vm2640_vm7, %v2930_v30  ;;  %v3005_v55 = vsel %vm2640_vm7, %v2930_v30, 0.0  ;;  %v3040_v39 = vmul.f32 %v2930_v30, %v2930_v30  ;;  %v3260_v44 = vpop.f32.mrb[15].mxu0 }
 0x205   : > { %v3063_v6 = vadd.f32 %v3062_v26, %v3061_v10  ;;  %v3006_v13 = vadd.f32 %v3005_v55, %v3004_v18 }
 0x206   : > { %v3064_v52 = vsel %vm2640_vm7, %v3040_v39, 0.0 }
 0x207   : > { %v3065_v0 = vadd.f32 %v3064_v52, %v3063_v6 }
 0x21e   : > { %v2951_v53 = vpop.f32.mrb[4].mxu1 }
 0x21f   : > { %2986 = vst.msk [vmem:[%s5509_s30 + $0x60] sm:$0xff] %vm2640_vm7, %v2951_v53  ;;  %v3271_v56 = vpop.f32.mrb[5].mxu1  ;;  %v3045_v7 = vmul.f32 %v2951_v53, %v2951_v53  ;;  %v3015_v31 = vsel %vm2640_vm7, %v2951_v53, 0.0 }
 0x220   : > { %v2954_v5 = vpop.f32.mrb[6].mxu1 }
 0x221   : > { %v2935_v32 = vpop.f32.mrb[16].mxu0  ;;  %2987 = vst.msk [vmem:[%s5509_s30 + $0x68] sm:$0xff] %vm2640_vm7, %v2954_v5  ;;  %v3272_v4 = vpop.f32.mrb[7].mxu1  ;;  %v3046_v2 = vmul.f32 %v2954_v5, %v2954_v5  ;;  %v3074_v17 = vsel %vm2640_vm7, %v3045_v7, 0.0  ;;  %v3017_v42 = vsel %vm2640_vm7, %v2954_v5, 0.0 }
 0x222   : > { %2982 = vst.msk [vmem:[%s5509_s30 + $0x40] sm:$0xff] %vm2640_vm7, %v2935_v32  ;;  %v3007_v60 = vsel %vm2640_vm7, %v2935_v32, 0.0  ;;  %v3041_v51 = vmul.f32 %v2935_v32, %v2935_v32  ;;  %v3263_v46 = vpop.f32.mrb[17].mxu0 }
 0x223   : > { %v3008_v23 = vadd.f32 %v3007_v60, %v3006_v13  ;;  %v2938_v36 = vpop.f32.mrb[18].mxu0  ;;  %v3076_v59 = vsel %vm2640_vm7, %v3046_v2, 0.0 }
 0x224   : > { %v3066_v9 = vsel %vm2640_vm7, %v3041_v51, 0.0  ;;  %2983 = vst.msk [vmem:[%s5509_s30 + $0x48] sm:$0xff] %vm2640_vm7, %v2938_v36  ;;  %v3009_v41 = vsel %vm2640_vm7, %v2938_v36, 0.0  ;;  %v3042_v58 = vmul.f32 %v2938_v36, %v2938_v36  ;;  %v3264_v35 = vpop.f32.mrb[19].mxu0 }
 0x225   : > { %v3067_v3 = vadd.f32 %v3066_v9, %v3065_v0  ;;  %v3010_v19 = vadd.f32 %v3009_v41, %v3008_v23 }
 0x226   : > { %v3068_v11 = vsel %vm2640_vm7, %v3042_v58, 0.0 }
 0x227   : > { %v3012_v8 = vadd.f32 %v3011_v45, %v3010_v19  ;;  %v3069_v22 = vadd.f32 %v3068_v11, %v3067_v3 }
 0x229   : > { %v3071_v49 = vadd.f32 %v3070_v28, %v3069_v22  ;;  %v3014_v62 = vadd.f32 %v3013_v34, %v3012_v8 }
 0x22b   : > { %v3016_v50 = vadd.f32 %v3015_v31, %v3014_v62  ;;  %v3073_v12 = vadd.f32 %v3072_v33, %v3071_v49 }
 0x22d   : > { %v3018_v37 = vadd.f32 %v3017_v42, %v3016_v50  ;;  %v3075_v29 = vadd.f32 %v3074_v17, %v3073_v12 }
 0x22f   : > { %v3077_v20 = vadd.f32 %v3076_v59, %v3075_v29 }
 0x233   : > { %v2959_v27 = vpop.f32.mrb[8].mxu1 }
 0x234   : > { %2988 = vst.msk [vmem:[%s5509_s30 + $0x70] sm:$0xff] %vm2640_vm7, %v2959_v27  ;;  %v3019_v48 = vsel %vm2640_vm7, %v2959_v27, 0.0  ;;  %v3047_v16 = vmul.f32 %v2959_v27, %v2959_v27  ;;  %v3275_v21 = vpop.f32.mrb[9].mxu1 }
 0x235   : > { %v3020_v63 = vadd.f32 %v3019_v48, %v3018_v37  ;;  %v2962_v40 = vpop.f32.mrb[10].mxu1 }
 0x236   : > { %v3078_v61 = vsel %vm2640_vm7, %v3047_v16, 0.0  ;;  %2989 = vst.msk [vmem:[%s5509_s30 + $0x78] sm:$0xff] %vm2640_vm7, %v2962_v40  ;;  %v3021_v10 = vsel %vm2640_vm7, %v2962_v40, 0.0  ;;  %v3048_v43 = vmul.f32 %v2962_v40, %v2962_v40  ;;  %v3276_v24 = vpop.f32.mrb[11].mxu1 }
 0x237   : > { %v3079_v1 = vadd.f32 %v3078_v61, %v3077_v20  ;;  %v3022_v47 = vadd.f32 %v3021_v10, %v3020_v63 }
 0x238   : > { %v3080_v14 = vsel %vm2640_vm7, %v3048_v43, 0.0 }
 0x239   : > { %v3081_v54 = vadd.f32 %v3080_v14, %v3079_v1 }
 0x251   : > { %v2967_v25 = vpop.f32.mrb[12].mxu1 }
 0x252   : > { %2990 = vst.msk [vmem:[%s5509_s30 + $0x80] sm:$0xff] %vm2640_vm7, %v2967_v25  ;;  %v3023_v15 = vsel %vm2640_vm7, %v2967_v25, 0.0  ;;  %v3049_v18 = vmul.f32 %v2967_v25, %v2967_v25  ;;  %v3279_v30 = vpop.f32.mrb[13].mxu1 }
 0x253   : > { %v3024_v26 = vadd.f32 %v3023_v15, %v3022_v47  ;;  %v2970_v55 = vpop.f32.mrb[14].mxu1 }
 0x254   : > { %v3082_v39 = vsel %vm2640_vm7, %v3049_v18, 0.0  ;;  %2991 = vst.msk [vmem:[%s5509_s30 + $0x88] sm:$0xff] %vm2640_vm7, %v2970_v55  ;;  %v3025_v44 = vsel %vm2640_vm7, %v2970_v55, 0.0  ;;  %v3050_v6 = vmul.f32 %v2970_v55, %v2970_v55  ;;  %v3280_v13 = vpop.f32.mrb[15].mxu1 }
 0x255   : > { %v3083_v52 = vadd.f32 %v3082_v39, %v3081_v54  ;;  %v3026_v0 = vadd.f32 %v3025_v44, %v3024_v26 }
 0x256   : > { %v3084_v53 = vsel %vm2640_vm7, %v3050_v6, 0.0 }
 0x257   : > { %v3027_v56 = vrot.slane %v3026_v0, 4  ;;  %v3085_v32 = vadd.f32 %v3084_v53, %v3083_v52 }
 0x259   : > { %v3028_v5 = vadd.f32 %v3027_v56, %v3026_v0  ;;  %v3086_v60 = vrot.slane %v3085_v32, 4 }
 0x25b   : > { %v3029_v51 = vrot.slane %v3028_v5, 2  ;;  %v3087_v46 = vadd.f32 %v3086_v60, %v3085_v32 }
 0x25d   : > { %v3030_v4 = vadd.f32 %v3029_v51, %v3028_v5  ;;  %v3088_v23 = vrot.slane %v3087_v46, 2 }
 0x25f   : > { %v3031_v36 = vrot.slane %v3030_v4, 1  ;;  %v3089_v57 = vadd.f32 %v3088_v23, %v3087_v46 }
 0x261   : > { %v3090_v9 = vrot.slane %v3089_v57, 1  ;;  %v3032_v41 = vadd.f32 %v3031_v36, %v3030_v4 }
 0x263   : > { %v3091_v58 = vadd.f32 %v3090_v9, %v3089_v57 }
 0x265   : > { %v3092_v35 = vsel %vm792_vm0, %v3032_v41, %v3091_v58 }
 0x266   : > { %3094 = vst.msk [vmem:[%s235_s9] sm:$0x3] %vm3093_vm3, %v3092_v35 }
 0x267 PF: > { %s16_s18 = sadd.s32 1, %s3685_s18  }
 0x268   : > { %p13_p4 = scmp.ge.s32.totalorder %s16_s18, 4  }
 0x26a   :  { %15 = sbr.rel (!%p13_p4) target bundleno = 1 (0x1), region = 78 }

// kernel: decoder_block.3
= control target key start
LH: loop header
LB: loop body
LE: loop exit
PB: predicated region body
PF: predicated region fallthrough
CT: control target
= control target key end

     0   :  { %s5315_s12 = smov 0   ;;  %s8538_s0 = inlined_call_operand.vmem [shape: f32[2,16,16,4], index: 0, kind: input, shape index: {}]   ;;  %s8539_s1 = inlined_call_operand.vmem [shape: bf16[36,8], index: 1, kind: input, shape index: {}]   ;;  %s8540_s2 = inlined_call_operand.vmem [shape: f32[2,196,8], index: 2, kind: output, shape index: {0}]   ;;  %s8541_s3 = inlined_call_operand.vmem [shape: f32[2,2,8], index: 3, kind: output, shape index: {1}]  }
   0x1 LB: > { %s4602_s13 = sadd.s32 4294967295, %s5282_s12   ;;  %p4606_p0 = scmp.ge.s32.totalorder %s5282_s12, 1  ;;  %s5282_s12 = sphi %s5315_s12, %s14_s12  }
   0x2   : > { %p140_p1 = scmp.lt.s32.totalorder %s5282_s12, 3 }
   0x4   : > { %p141_p2 = pnand %p4606_p0, %p140_p1 }
   0x6   : > { %144 = sbr.rel (%p141_p2) target bundleno = 749 (0x2ed), region = 28 }
   0xd   : > { %p168_p3 = scmp.lt.s32.totalorder %s4602_s13, 1  ;;  %v247_v0 = vlaneseq  ;;  %v5284_v1 = vmov 1983009808   ;;  %vm719_vm0 = vcmask 1040384   ;;  %vm720_vm1 = vcmask 1042434   ;;  %s5285_s18 = smov 12  }
   0xe   : > { %v245_v2 = vunpack.c.l.s4 %v5284_v1  ;;  %vm722_vm2 = vcmask 1044484   ;;  %vm724_vm3 = vcmask 1046534   ;;  %vm5450_vm4 = vmor %vm719_vm0, %vm720_vm1  ;;  %s5286_s19 = smov 8   ;;  %s5287_s20 = smov 20   ;;  %vm3931_vm7 = vcmask 31744  }
   0xf   : > { %s9146_s13 = smov (!%p168_p3, %s4602_s13), 1  ;;  %v248_v3 = vshrl.u32 %v247_v0, 7  ;;  %vm723_vm5 = vmor %vm5450_vm4, %vm722_vm2  ;;  %s5288_s21 = smov 24   ;;  %vm3957_vm8 = vcmask 64512   ;;  %vm3983_vm9 = vcmask 97280   ;;  %vm4009_vm10 = vcmask 130048  }
  0x10   : > { %v246_v4 = vunpack.c.0.s8 %v245_v2  ;;  %s4660_s14 = sshll.u32 %s9146_s13, 8  ;;  %vm5514_vm6 = vmor %vm723_vm5, %vm724_vm3  ;;  %s5289_s22 = smov 4   ;;  %vm4035_vm11 = vcmask 162816   ;;  %vm4061_vm12 = vcmask 195584   ;;  %vm4087_vm13 = vcmask 228352  }
  0x11   : > { %s5329_s17 = scalar_lea.vmem %s8538_s0, %s4660_s14  ;;  %s5290_s23 = smov 28   ;;  %vm4113_vm14 = vcmask 261120   ;;  %vm4212_vm15 = vcmask 1041408   ;;  %vm5294_vm1 = vmmov 0   ;;  %vm4172_vm2 = vcmask 293888  }
  0x12   : > { %v5331_v5 = vsub.s32 %v246_v4, %v248_v3  ;;  %v185_v6 = vld [vmem:[%s5329_s17 + $0x10] sm:$0xff]  ;;  %v186_v7 = vld [vmem:[%s5329_s17 + $0x18] sm:$0xff]  ;;  %v187_v8 = vld [vmem:[%s5329_s17 + $0x20] sm:$0xff]  ;;  %s5291_s24 = smov 16   ;;  %s5292_s25 = smov 32   ;;  %vm4376_vm3 = vcmask 60416  }
  0x13   : > { %v276_v9 = vcombine.high %v185_v6, %v185_v6  ;;  %v293_v11 = vcombine.high %v186_v7, %v186_v7  ;;  %v183_v13 = vld [vmem:[%s5329_s17] sm:$0xff]  ;;  %v184_v14 = vld [vmem:[%s5329_s17 + $0x8] sm:$0xff]  ;;  %v309_v55 = vcombine.high %v187_v8, %v187_v8  ;;  %v189_v60 = vld [vmem:[%s5329_s17 + $0x30] sm:$0xff]  ;;  %s4741_s5 = smul.u32 200, %s9146_s13  ;;  %s4610_s9 = sshll.u32 %s9146_s13, 1  ;;  %vm4514_vm4 = vcmask 58368  }
  0x14   : > { %v5337_v10 = vrot.slane %v185_v6, %v5331_v5  ;;  %v5340_v12 = vrot.slane %v186_v7, %v5331_v5  ;;  %v5345_v15 = vrot.slane %v187_v8, %v5331_v5  ;;  %v243_v16 = vcombine.high %v183_v13, %v183_v13  ;;  %v188_v54 = vld [vmem:[%s5329_s17 + $0x28] sm:$0xff]  ;;  %s181_s14 = scalar_lea.vmem %s8541_s3, %s4610_s9 }
  0x15   : > { %v5348_v17 = vrot.slane %v183_v13, %v5331_v5  ;;  %v260_v18 = vcombine.high %v184_v14, %v184_v14  ;;  %v5351_v19 = vrot.slane %v276_v9, %v5331_v5  ;;  %v5358_v21 = vrot.slane %v293_v11, %v5331_v5  ;;  %s8424_s8 = scalar_lea.vmem %s8540_s2, %s4741_s5 }
  0x16   : > { %8754 = vst [vmem:[#allocation2_spill] sm:$0xff] %v5337_v10  ;;  %v5355_v20 = vcombine.high %v5337_v10, %v5337_v10  ;;  %v5362_v22 = vcombine.high %v5340_v12, %v5340_v12  ;;  %v5365_v23 = vrot.slane %v243_v16, %v5331_v5  ;;  %v5372_v25 = vrot.slane %v184_v14, %v5331_v5 }
  0x17   : > { %8755 = vst [vmem:[#allocation3_spill] sm:$0xff] %v5348_v17  ;;  %v5369_v24 = vcombine.high %v5348_v17, %v5348_v17  ;;  %v5375_v26 = vrot.slane %v260_v18, %v5331_v5  ;;  %v5379_v27 = vcombine.high %v5351_v19, %v5351_v19  ;;  %v2582_v30 = vcombine.low %v5358_v21, %v5345_v15 }
  0x18   : > { %8756 = vst [vmem:[#allocation4_spill] sm:$0xff] %v5365_v23  ;;  %8758 = vst [vmem:[#allocation6_spill] sm:$0xff] %v5372_v25  ;;  %v2117_v28 = vcombine.low %v5340_v12, %v5362_v22  ;;  %v2573_v29 = vcombine.low %v5337_v10, %v5355_v20  ;;  %v5389_v31 = vcombine.high %v5365_v23, %v5365_v23 }
  0x19   : > { %8757 = vst [vmem:[#allocation5_spill] sm:$0xff] %v5369_v24  ;;  %8759 = vst [vmem:[#allocation7_spill] sm:$0xff] %v5375_v26  ;;  %v5393_v32 = vcombine.high %v5372_v25, %v5372_v25  ;;  %v2082_v33 = vcombine.low %v5369_v24, %v5365_v23  ;;  %v4627_v34 = vcombine.high %v5375_v26, %v5337_v10 }
  0x1a   : > { %8760 = vst [vmem:[#allocation8_spill] sm:$0xff] %v5389_v31  ;;  %v2116_v35 = vcombine.low %v5351_v19, %v5379_v27  ;;  %v5402_v36 = vrot.slane %v2117_v28, %v5331_v5  ;;  %v2580_v37 = vrot.slane %v2573_v29, %v5331_v5  ;;  %v2589_v38 = vrot.slane %v2582_v30, %v5331_v5 }
  0x1b   : > { %8761 = vst [vmem:[#allocation9_spill] sm:$0xff] %v5393_v32  ;;  %v2083_v39 = vcombine.low %v5389_v31, %v5372_v25  ;;  %v2090_v40 = vrot.slane %v2082_v33, %v5331_v5  ;;  %v2099_v41 = vcombine.low %v5393_v32, %v5375_v26  ;;  %v2114_v42 = vrot.slane %v4627_v34, %v5331_v5 }
  0x1c   : > { %v5413_v43 = vrot.slane %v2116_v35, %v5331_v5  ;;  %v2590_v44 = vcombine.low %v5402_v36, %v2589_v38  ;;  %v1184_v45 = vcombine.low %v5355_v20, %v5351_v19  ;;  %v1185_v46 = vcombine.low %v5379_v27, %v5340_v12 }
  0x1d   : > { %v2097_v47 = vrot.slane %v2083_v39, %v5331_v5  ;;  %v2107_v48 = vrot.slane %v2099_v41, %v5331_v5  ;;  %v1201_v49 = vcombine.low %v5362_v22, %v5358_v21  ;;  %v4634_v50 = vcombine.high %v5358_v21, %v5345_v15 }
  0x1e   : > { %v2581_v51 = vcombine.low %v2580_v37, %v5413_v43  ;;  %v1192_v52 = vrot.slane %v1184_v45, %v5331_v5  ;;  %v1199_v53 = vrot.slane %v1185_v46, %v5331_v5  ;;  %v5438_v63 = vrot.slane %v309_v55, %v5331_v5 }
  0x1f   : > { %v2098_v56 = vcombine.low %v2090_v40, %v2097_v47  ;;  %v2115_v57 = vcombine.low %v2107_v48, %v2114_v42  ;;  %v5431_v58 = vrot.slane %v1201_v49, %v5331_v5  ;;  %v3306_v59 = vrot.slane %v4634_v50, %v5331_v5 }
  0x20   : > { %v4766_v61 = vpack.i.bf16 %v2590_v44, %v2581_v51  ;;  %v5435_v62 = vcombine.low %v1192_v52, %v1199_v53  ;;  %v5442_v0 = vcombine.high %v5345_v15, %v5345_v15  ;;  %v326_v3 = vcombine.high %v188_v54, %v188_v54 }
  0x21   : > { %8762 = vst [vmem:[#allocation10_spill] sm:$0xff] %v5431_v58  ;;  %v4761_v1 = vpack.i.bf16 %v2115_v57, %v2098_v56  ;;  %v3307_v2 = vcombine.low %v5431_v58, %v3306_v59  ;;  %v5446_v4 = vrot.slane %v188_v54, %v5331_v5  ;;  %v5457_v7 = vcombine.high %v5438_v63, %v5438_v63  ;;  %v190_v58 = vld [vmem:[%s5329_s17 + $0x38] sm:$0xff] }
  0x22   : > { %8763 = vst [vmem:[#allocation11_spill] sm:$0xff] %v5435_v62  ;;  %4767 = vrot.lane.b32.xlu1 %v4766_v61, %s5285_s18  ;;  %v342_v8 = vcombine.high %v189_v60, %v189_v60  ;;  %v5460_v9 = vrot.slane %v189_v60, %v5331_v5  ;;  %v1202_v11 = vcombine.low %v5345_v15, %v5442_v0  ;;  %v8542_v18 = vrot.slane %v5438_v63, 7 }
  0x23   : > { %4762 = vrot.lane.b32.xlu0 %v4761_v1, %s5286_s19  ;;  %v4771_v13 = vpack.i.bf16 %v3307_v2, %v5435_v62  ;;  %v5467_v14 = vrot.slane %v326_v3, %v5331_v5  ;;  %v5471_v16 = vcombine.high %v5446_v4, %v5446_v4  ;;  %v1218_v33 = vcombine.low %v5438_v63, %v5457_v7 }
  0x24   : > { %v5475_v28 = vrot.slane %v342_v8, %v5331_v5  ;;  %v5479_v29 = vcombine.high %v5460_v9, %v5460_v9  ;;  %v5482_v30 = vrot.slane %v1202_v11, %v5331_v5  ;;  %v777_v41 = vrot.slane %v8542_v18, 2 }
  0x25   : > { %v1219_v34 = vcombine.low %v5446_v4, %v5471_v16  ;;  %v1235_v35 = vcombine.low %v5467_v14, %v5460_v9  ;;  %v5495_v37 = vcombine.high %v5467_v14, %v5467_v14  ;;  %v5499_v38 = vrot.slane %v1218_v33, %v5331_v5 }
  0x26   : > { %8766 = vst [vmem:[#allocation12_spill] sm:$0xff] %v5475_v28  ;;  %8767 = vst [vmem:[#allocation13_spill] sm:$0xff] %v5482_v30  ;;  %4772 = vrot.lane.b32.xlu1 %v4771_v13, %s5287_s20  ;;  %v1236_v39 = vcombine.low %v5479_v29, %v5475_v28  ;;  %v778_v46 = vrot.slane %v5457_v7, 7  ;;  %v781_v47 = vrot.slane %v5446_v4, 7  ;;  %v5524_v49 = vcombine.high %v5475_v28, %v5475_v28 }
  0x27   : > { %8768 = vst [vmem:[#allocation14_spill] sm:$0xff] %v5495_v37  ;;  %8769 = vst [vmem:[#allocation15_spill] sm:$0xff] %v5499_v38  ;;  %v5508_v42 = vrot.slane %v1219_v34, %v5331_v5  ;;  %v5511_v44 = vrot.slane %v1235_v35, %v5331_v5  ;;  %v3516_v48 = vcombine.low %v5482_v30, %v5499_v38  ;;  %v784_v50 = vrot.slane %v5471_v16, 7 }
  0x28   : > { %v787_v51 = vrot.slane %v5467_v14, 7  ;;  %v5529_v52 = vrot.slane %v1236_v39, %v5331_v5  ;;  %v780_v54 = vrot.slane %v778_v46, 2  ;;  %v783_v55 = vrot.slane %v781_v47, 2 }
  0x29   : > { %8770 = vst [vmem:[#allocation16_spill] sm:$0xff] %v5508_v42  ;;  %8771 = vst [vmem:[#allocation17_spill] sm:$0xff] %v5511_v44  ;;  %v3517_v53 = vcombine.low %v5508_v42, %v5511_v44  ;;  %v5535_v56 = vsel %vm5514_vm6, %v777_v41, %v778_v46  ;;  %v786_v57 = vrot.slane %v784_v50, 2  ;;  %v790_v60 = vrot.slane %v5495_v37, 7 }
  0x2a   : > { %8774 = vst [vmem:[#allocation18_spill] sm:$0xff] %v5529_v52  ;;  %v789_v59 = vrot.slane %v787_v51, 2  ;;  %v5540_v1 = vsel %vm5514_vm6, %v780_v54, %v781_v47  ;;  %v5544_v2 = vsel %vm5514_vm6, %v783_v55, %v784_v50  ;;  %v4614_v3 = vrot.slane %v5460_v9, 9 }
  0x2b   : > { %v4776_v61 = vpack.i.bf16 %v3517_v53, %v3516_v48  ;;  %v5549_v6 = vsel %vm5514_vm6, %v786_v57, %v787_v51  ;;  %v794_v11 = vrot.slane %v5479_v29, 7  ;;  %v797_v13 = vrot.slane %v5475_v28, 7 }
  0x2c   : > { %v5553_v8 = vsel %vm5514_vm6, %v789_v59, %v790_v60  ;;  %v8543_v33 = vrot.slane %v5524_v49, 7  ;;  %v1659_v34 = vcombine.low %v5535_v56, %v5540_v1  ;;  %v1660_v35 = vcombine.low %v5544_v2, %v5549_v6 }
  0x2d   : > { %4777 = vrot.lane.b32.xlu0 %v4776_v61, %s5288_s21  ;;  %v705_v39 = vcombine.high %v5375_v26, %v5375_v26  ;;  %v5567_v41 = vsel %vm5514_vm6, %v4614_v3, %v794_v11  ;;  %v796_v46 = vrot.slane %v794_v11, 2  ;;  %v799_v47 = vrot.slane %v797_v13, 2 }
  0x2e   : > { %v4611_v48 = vrot.slane %v5348_v17, 9  ;;  %v5571_v50 = vrot.slane %v1659_v34, %v5331_v5  ;;  %v5574_v51 = vrot.slane %v1660_v35, %v5331_v5  ;;  %v1676_v53 = vcombine.low %v5553_v8, %v5567_v41 }
  0x2f   : > { %v728_v54 = vrot.slane %v5369_v24, 7  ;;  %v5581_v55 = vsel %vm5514_vm6, %v796_v46, %v797_v13  ;;  %v5587_v57 = vsel %vm5514_vm6, %v799_v47, %v8543_v33  ;;  %v731_v59 = vrot.slane %v5365_v23, 7 }
  0x30   : > { %8775 = vst [vmem:[#allocation19_spill] sm:$0xff] %v5587_v57  ;;  %v734_v60 = vrot.slane %v5389_v31, 7  ;;  %v1675_v61 = vcombine.low %v5571_v50, %v5574_v51  ;;  %v1677_v3 = vcombine.low %v5581_v55, %v5587_v57  ;;  %v5596_v11 = vrot.slane %v1676_v53, %v5331_v5  ;;  %v192_v31 = vld [vmem:[%s5329_s17 + $0x48] sm:$0xff] }
  0x31   : > { %v729_v13 = vsel %vm5514_vm6, %v4611_v48, %v728_v54  ;;  %v730_v34 = vrot.slane %v728_v54, 2  ;;  %v733_v35 = vrot.slane %v731_v59, 2  ;;  %v737_v47 = vrot.slane %v5372_v25, 7 }
  0x32   : > { %v736_v46 = vrot.slane %v734_v60, 2  ;;  %v5602_v40 = vrot.slane %v1677_v3, %v5331_v5  ;;  %v740_v18 = vrot.slane %v5393_v32, 7  ;;  %v743_v33 = vrot.slane %v5375_v26, 7 }
  0x33   : > { %v746_v62 = vrot.slane %v705_v39, 7  ;;  %v732_v53 = vsel %vm5514_vm6, %v730_v34, %v731_v59  ;;  %v735_v48 = vsel %vm5514_vm6, %v733_v35, %v734_v60  ;;  %v739_v30 = vrot.slane %v737_v47, 2  ;;  %v191_v35 = vld [vmem:[%s5329_s17 + $0x40] sm:$0xff] }
  0x34   : > { %8776 = vst [vmem:[#allocation20_spill] sm:$0xff] %v5602_v40  ;;  %v738_v54 = vsel %vm5514_vm6, %v736_v46, %v737_v47  ;;  %v1692_v3 = vcombine.low %v5596_v11, %v5602_v40  ;;  %v742_v25 = vrot.slane %v740_v18, 2  ;;  %v745_v32 = vrot.slane %v743_v33, 2 }
  0x35   : > { %v4612_v26 = vrot.slane %v5337_v10, 9  ;;  %v741_v39 = vsel %vm5514_vm6, %v739_v30, %v740_v18  ;;  %v750_v59 = vrot.slane %v5355_v20, 7  ;;  %v1591_v34 = vcombine.low %v729_v13, %v732_v53 }
  0x36   : > { %v1592_v60 = vcombine.low %v735_v48, %v738_v54  ;;  %v4791_v23 = vpack.i.bf16 %v1692_v3, %v1675_v61  ;;  %v744_v46 = vsel %vm5514_vm6, %v742_v25, %v743_v33  ;;  %v747_v47 = vsel %vm5514_vm6, %v745_v32, %v746_v62 }
  0x37   : > { %v359_v17 = vcombine.high %v190_v58, %v190_v58  ;;  %v5627_v10 = vsel %vm5514_vm6, %v4612_v26, %v750_v59  ;;  %v1599_v18 = vrot.slane %v1591_v34, %v5331_v5  ;;  %v1608_v30 = vcombine.low %v741_v39, %v744_v46 }
  0x38   : > { %v1606_v20 = vrot.slane %v1592_v60, %v5331_v5  ;;  %4792 = vrot.lane.b32.xlu1 %v4791_v23, %s5289_s22  ;;  %v1609_v61 = vcombine.low %v747_v47, %v5627_v10  ;;  %v5634_v25 = vrot.slane %v190_v58, %v5331_v5  ;;  %v375_v62 = vcombine.high %v191_v35, %v191_v35 }
  0x39   : > { %v5637_v32 = vrot.slane %v359_v17, %v5331_v5  ;;  %v1616_v26 = vrot.slane %v1608_v30, %v5331_v5  ;;  %v5641_v13 = vrot.slane %v191_v35, %v5331_v5  ;;  %v392_v53 = vcombine.high %v192_v31, %v192_v31 }
  0x3a   : > { %v1607_v33 = vcombine.low %v1599_v18, %v1606_v20  ;;  %v1623_v48 = vrot.slane %v1609_v61, %v5331_v5  ;;  %v5646_v23 = vcombine.high %v5634_v25, %v5634_v25  ;;  %v5649_v58 = vrot.slane %v375_v62, %v5331_v5 }
  0x3b   : > { %8777 = vst [vmem:[#allocation21_spill] sm:$0xff] %v5641_v13  ;;  %v5652_v17 = vrot.slane %v192_v31, %v5331_v5  ;;  %v5656_v54 = vcombine.high %v5641_v13, %v5641_v13  ;;  %v5659_v3 = vrot.slane %v392_v53, %v5331_v5  ;;  %v5663_v39 = vcombine.high %v5637_v32, %v5637_v32 }
  0x3c   : > { %8778 = vst [vmem:[#allocation22_spill] sm:$0xff] %v5649_v58  ;;  %v8783_v34 = vrot.slane %v5524_v49, 7  ;;  %v1624_v35 = vcombine.low %v1616_v26, %v1623_v48  ;;  %v5669_v46 = vcombine.high %v5649_v58, %v5649_v58  ;;  %v803_v31 = vrot.slane %v5634_v25, 7 }
  0x3d   : > { %8779 = vst [vmem:[#allocation23_spill] sm:$0xff] %v5652_v17  ;;  %8780 = vst [vmem:[#allocation24_spill] sm:$0xff] %v5656_v54  ;;  %v806_v47 = vrot.slane %v5646_v23, 7  ;;  %v809_v18 = vrot.slane %v5637_v32, 7  ;;  %v812_v20 = vrot.slane %v5663_v39, 7  ;;  %v4615_v30 = vrot.slane %v5641_v13, 9 }
  0x3e   : > { %8781 = vst [vmem:[#allocation25_spill] sm:$0xff] %v5659_v3  ;;  %8782 = vst [vmem:[#allocation26_spill] sm:$0xff] %v5663_v39  ;;  %v802_v60 = vrot.slane %v8783_v34, 2  ;;  %v816_v61 = vrot.slane %v5656_v54, 7  ;;  %v4781_v62 = vpack.i.bf16 %v1624_v35, %v1607_v33  ;;  %v805_v53 = vrot.slane %v803_v31, 2 }
  0x3f   : > { %8784 = vst [vmem:[#allocation27_spill] sm:$0xff] %v5669_v46  ;;  %v808_v48 = vrot.slane %v806_v47, 2  ;;  %v811_v34 = vrot.slane %v809_v18, 2  ;;  %v819_v57 = vrot.slane %v5649_v58, 7  ;;  %v8562_v35 = vrot.slane %v5652_v17, 7 }
  0x40   : > { %v5679_v26 = vsel %vm5514_vm6, %v802_v60, %v803_v31  ;;  %v5683_v24 = vsel %vm5514_vm6, %v4615_v30, %v816_v61  ;;  %v818_v44 = vrot.slane %v816_v61, 2  ;;  %4782 = vrot.lane.b32.xlu0 %v4781_v62, %s5289_s22  ;;  %v5689_v40 = vsel %vm5514_vm6, %v805_v53, %v806_v47 }
  0x41   : > { %8785 = vst [vmem:[#allocation28_spill] sm:$0xff] %v5679_v26  ;;  %8786 = vst [vmem:[#allocation29_spill] sm:$0xff] %v5683_v24  ;;  %v5693_v33 = vsel %vm5514_vm6, %v808_v48, %v809_v18  ;;  %v822_v60 = vrot.slane %v5669_v46, 7  ;;  %v5699_v31 = vsel %vm5514_vm6, %v811_v34, %v812_v20  ;;  %v821_v61 = vrot.slane %v819_v57, 2 }
  0x42   : > { %8787 = vst [vmem:[#allocation30_spill] sm:$0xff] %v5689_v40  ;;  %8788 = vst [vmem:[#allocation31_spill] sm:$0xff] %v5693_v33  ;;  %v5703_v30 = vsel %vm5514_vm6, %v818_v44, %v819_v57  ;;  %v1693_v47 = vcombine.low %v5679_v26, %v5689_v40  ;;  %v1694_v18 = vcombine.low %v5693_v33, %v5699_v31  ;;  %v752_v57 = vrot.slane %v750_v59, 2 }
  0x43   : > { %8789 = vst [vmem:[#allocation32_spill] sm:$0xff] %v5699_v31  ;;  %8790 = vst [vmem:[#allocation33_spill] sm:$0xff] %v5703_v30  ;;  %v824_v62 = vrot.slane %v822_v60, 2  ;;  %v1710_v53 = vcombine.low %v5683_v24, %v5703_v30  ;;  %v5713_v48 = vcombine.high %v5358_v21, %v5358_v21  ;;  %v5717_v20 = vsel %vm5514_vm6, %v821_v61, %v822_v60 }
  0x44   : > { %8791 = vst [vmem:[#allocation34_spill] sm:$0xff] %v5717_v20  ;;  %v5720_v44 = vrot.slane %v1693_v47, %v5331_v5  ;;  %v753_v34 = vrot.slane %v5351_v19, 7  ;;  %v5730_v30 = vrot.slane %v1694_v18, %v5331_v5  ;;  %v756_v60 = vrot.slane %v5379_v27, 7 }
  0x45   : > { %v5727_v31 = vsel %vm5514_vm6, %v824_v62, %v8562_v35  ;;  %v5733_v24 = vrot.slane %v1710_v53, %v5331_v5  ;;  %v759_v47 = vrot.slane %v5340_v12, 7  ;;  %v762_v35 = vrot.slane %v5362_v22, 7  ;;  %v194_v12 = vld [vmem:[%s5329_s17 + $0x58] sm:$0xff] }
  0x46   : > { %8792 = vst [vmem:[#allocation35_spill] sm:$0xff] %v5720_v44  ;;  %8793 = vst [vmem:[#allocation36_spill] sm:$0xff] %v5727_v31  ;;  %v1711_v59 = vcombine.low %v5717_v20, %v5727_v31  ;;  %v5740_v19 = vsel %vm5514_vm6, %v752_v57, %v753_v34  ;;  %v755_v61 = vrot.slane %v753_v34, 2  ;;  %v1709_v62 = vcombine.low %v5720_v44, %v5730_v30 }
  0x47   : > { %8794 = vst [vmem:[#allocation37_spill] sm:$0xff] %v5730_v30  ;;  %8795 = vst [vmem:[#allocation38_spill] sm:$0xff] %v5733_v24  ;;  %v758_v18 = vrot.slane %v756_v60, 2  ;;  %v765_v53 = vrot.slane %v5358_v21, 7  ;;  %v761_v57 = vrot.slane %v759_v47, 2  ;;  %v768_v34 = vrot.slane %v5713_v48, 7 }
  0x48   : > { %v5748_v27 = vrot.slane %v1711_v59, %v5331_v5  ;;  %v5752_v31 = vsel %vm5514_vm6, %v755_v61, %v756_v60  ;;  %v764_v40 = vrot.slane %v762_v35, 2  ;;  %v4613_v33 = vrot.slane %v5345_v15, 9 }
  0x49   : > { %v5758_v20 = vsel %vm5514_vm6, %v758_v18, %v759_v47  ;;  %v767_v22 = vrot.slane %v765_v53, 2  ;;  %v5765_v60 = vsel %vm5514_vm6, %v761_v57, %v762_v35  ;;  %v772_v61 = vrot.slane %v5442_v0, 7 }
  0x4a   : > { %8796 = vst [vmem:[#allocation39_spill] sm:$0xff] %v5748_v27  ;;  %v1726_v59 = vcombine.low %v5733_v24, %v5748_v27  ;;  %v1625_v26 = vcombine.low %v5740_v19, %v5752_v31  ;;  %v5772_v47 = vsel %vm5514_vm6, %v764_v40, %v765_v53  ;;  %v1626_v18 = vcombine.low %v5758_v20, %v5765_v60  ;;  %v195_v27 = vld [vmem:[%s5329_s17 + $0x60] sm:$0xff] }
  0x4b   : > { %v5776_v15 = vsel %vm5514_vm6, %v767_v22, %v768_v34  ;;  %v425_v30 = vcombine.high %v194_v12, %v194_v12  ;;  %v5783_v57 = vsel %vm5514_vm6, %v4613_v33, %v772_v61  ;;  %v774_v24 = vrot.slane %v772_v61, 2  ;;  %v196_v34 = vld [vmem:[%s5329_s17 + $0x68] sm:$0xff] }
  0x4c   : > { %v4796_v35 = vpack.i.bf16 %v1726_v59, %v1709_v62  ;;  %v1633_v44 = vrot.slane %v1625_v26, %v5331_v5  ;;  %v1640_v40 = vrot.slane %v1626_v18, %v5331_v5  ;;  %v1642_v53 = vcombine.low %v5772_v47, %v5776_v15 }
  0x4d   : > { %v5791_v22 = vrot.slane %v194_v12, %v5331_v5  ;;  %v5794_v39 = vrot.slane %v425_v30, %v5331_v5  ;;  %v8799_v33 = vrot.slane %v5438_v63, 7  ;;  %v441_v26 = vcombine.high %v195_v27, %v195_v27 }
  0x4e   : > { %4797 = vrot.lane.b32.xlu1 %v4796_v35, %s5289_s22  ;;  %v5804_v59 = vrot.slane %v195_v27, %v5331_v5  ;;  %v458_v61 = vcombine.high %v196_v34, %v196_v34  ;;  %v1641_v18 = vcombine.low %v1633_v44, %v1640_v40  ;;  %v1650_v30 = vrot.slane %v1642_v53, %v5331_v5 }
  0x4f   : > { %8797 = vst [vmem:[#allocation40_spill] sm:$0xff] %v5791_v22  ;;  %8798 = vst [vmem:[#allocation41_spill] sm:$0xff] %v5794_v39  ;;  %v5801_v62 = vsel %vm5514_vm6, %v774_v24, %v8799_v33  ;;  %v5811_v35 = vcombine.high %v5791_v22, %v5791_v22  ;;  %v5814_v28 = vrot.slane %v441_v26, %v5331_v5  ;;  %v853_v26 = vrot.slane %v5794_v39, 7 }
  0x50   : > { %8800 = vst [vmem:[#allocation42_spill] sm:$0xff] %v5804_v59  ;;  %v1643_v12 = vcombine.low %v5783_v57, %v5801_v62  ;;  %v5818_v24 = vcombine.high %v5804_v59, %v5804_v59  ;;  %v5821_v27 = vrot.slane %v196_v34, %v5331_v5  ;;  %v5824_v44 = vrot.slane %v458_v61, %v5331_v5 }
  0x51   : > { %8801 = vst [vmem:[#allocation43_spill] sm:$0xff] %v5811_v35  ;;  %8802 = vst [vmem:[#allocation44_spill] sm:$0xff] %v5814_v28  ;;  %v5831_v53 = vcombine.high %v5794_v39, %v5794_v39  ;;  %v8590_v33 = vrot.slane %v5811_v35, 7  ;;  %v5837_v52 = vcombine.high %v5814_v28, %v5814_v28  ;;  %v4617_v61 = vrot.slane %v5804_v59, 9 }
  0x52   : > { %8803 = vst [vmem:[#allocation45_spill] sm:$0xff] %v5818_v24  ;;  %8804 = vst [vmem:[#allocation46_spill] sm:$0xff] %v5821_v27  ;;  %v5827_v40 = vrot.slane %v1643_v12, %v5331_v5  ;;  %v5841_v34 = vcombine.high %v5821_v27, %v5821_v27  ;;  %v860_v12 = vrot.slane %v5818_v24, 7  ;;  %v855_v42 = vrot.slane %v853_v26, 2 }
  0x53   : > { %8805 = vst [vmem:[#allocation47_spill] sm:$0xff] %v5824_v44  ;;  %8806 = vst [vmem:[#allocation48_spill] sm:$0xff] %v5831_v53  ;;  %v852_v38 = vrot.slane %v8590_v33, 2  ;;  %v856_v39 = vrot.slane %v5831_v53, 7  ;;  %v863_v13 = vrot.slane %v5814_v28, 7  ;;  %v866_v59 = vrot.slane %v5837_v52, 7 }
  0x54   : > { %8807 = vst [vmem:[#allocation49_spill] sm:$0xff] %v5837_v52  ;;  %8808 = vst [vmem:[#allocation50_spill] sm:$0xff] %v5841_v34  ;;  %v1658_v37 = vcombine.low %v1650_v30, %v5827_v40  ;;  %v5851_v58 = vsel %vm5514_vm6, %v4617_v61, %v860_v12  ;;  %v862_v46 = vrot.slane %v860_v12, 2  ;;  %v869_v53 = vrot.slane %v5821_v27, 7 }
  0x55   : > { %8809 = vst [vmem:[#allocation51_spill] sm:$0xff] %v5851_v58  ;;  %v5857_v30 = vsel %vm5514_vm6, %v852_v38, %v853_v26  ;;  %v5861_v33 = vsel %vm5514_vm6, %v855_v42, %v856_v39  ;;  %v865_v12 = vrot.slane %v863_v13, 2  ;;  %v868_v24 = vrot.slane %v866_v59, 2  ;;  %v193_v39 = vld [vmem:[%s5329_s17 + $0x50] sm:$0xff] }
  0x56   : > { %v4786_v54 = vpack.i.bf16 %v1658_v37, %v1641_v18  ;;  %8810 = vst [vmem:[#allocation52_spill] sm:$0xff] %v5857_v30  ;;  %8811 = vst [vmem:[#allocation53_spill] sm:$0xff] %v5861_v33  ;;  %v5866_v61 = vsel %vm5514_vm6, %v862_v46, %v863_v13  ;;  %v872_v28 = vrot.slane %v5841_v34, 7  ;;  %v871_v37 = vrot.slane %v869_v53, 2 }
  0x57   : > { %8812 = vst [vmem:[#allocation54_spill] sm:$0xff] %v5866_v61  ;;  %v1761_v18 = vcombine.low %v5857_v30, %v5861_v33  ;;  %v1762_v42 = vcombine.low %v5851_v58, %v5866_v61  ;;  %v5878_v46 = vsel %vm5514_vm6, %v865_v12, %v866_v59  ;;  %v5882_v13 = vsel %vm5514_vm6, %v868_v24, %v869_v53 }
  0x58   : > { %4787 = vrot.lane.b32.xlu0 %v4786_v54, %s5289_s22  ;;  %8813 = vst [vmem:[#allocation55_spill] sm:$0xff] %v5878_v46  ;;  %8814 = vst [vmem:[#allocation56_spill] sm:$0xff] %v5882_v13  ;;  %v874_v26 = vrot.slane %v872_v28, 2  ;;  %v5886_v54 = vcombine.high %v5652_v17, %v5652_v17  ;;  %v5890_v38 = vsel %vm5514_vm6, %v871_v37, %v872_v28  ;;  %v8819_v24 = vrot.slane %v5824_v44, 7 }
  0x59   : > { %8816 = vst [vmem:[#allocation58_spill] sm:$0xff] %v5890_v38  ;;  %v5893_v34 = vrot.slane %v1761_v18, %v5331_v5  ;;  %v5896_v61 = vrot.slane %v1762_v42, %v5331_v5  ;;  %v1778_v59 = vcombine.low %v5878_v46, %v5882_v13  ;;  %v408_v12 = vcombine.high %v193_v39, %v193_v39 }
  0x5a   : > { %8815 = vst [vmem:[#allocation57_spill] sm:$0xff] %v5886_v54  ;;  %v5904_v53 = vsel %vm5514_vm6, %v874_v26, %v8819_v24  ;;  %v5907_v28 = vrot.slane %v193_v39, %v5331_v5  ;;  %v5911_v37 = vcombine.high %v5659_v3, %v5659_v3  ;;  %v8824_v26 = vrot.slane %v5652_v17, 7 }
  0x5b   : > { %8817 = vst [vmem:[#allocation59_spill] sm:$0xff] %v5893_v34  ;;  %8818 = vst [vmem:[#allocation60_spill] sm:$0xff] %v5896_v61  ;;  %v1777_v18 = vcombine.low %v5893_v34, %v5896_v61  ;;  %v1779_v42 = vcombine.low %v5890_v38, %v5904_v53  ;;  %v5918_v13 = vrot.slane %v1778_v59, %v5331_v5  ;;  %v828_v33 = vrot.slane %v5886_v54, 7  ;;  %v199_v38 = vld [vmem:[%s5329_s17 + $0x80] sm:$0xff] }
  0x5c   : > { %8820 = vst [vmem:[#allocation61_spill] sm:$0xff] %v5904_v53  ;;  %8821 = vst [vmem:[#allocation62_spill] sm:$0xff] %v5907_v28  ;;  %v827_v24 = vrot.slane %v8824_v26, 2  ;;  %v5923_v46 = vrot.slane %v408_v12, %v5331_v5  ;;  %v5927_v39 = vcombine.high %v5907_v28, %v5907_v28  ;;  %v831_v58 = vrot.slane %v5659_v3, 7 }
  0x5d   : > { %8822 = vst [vmem:[#allocation63_spill] sm:$0xff] %v5911_v37  ;;  %8823 = vst [vmem:[#allocation64_spill] sm:$0xff] %v5918_v13  ;;  %v5932_v30 = vrot.slane %v1779_v42, %v5331_v5  ;;  %v834_v59 = vrot.slane %v5911_v37, 7  ;;  %v4616_v53 = vrot.slane %v5907_v28, 9  ;;  %v847_v26 = vrot.slane %v5791_v22, 7 }
  0x5e   : > { %8825 = vst [vmem:[#allocation65_spill] sm:$0xff] %v5923_v46  ;;  %8826 = vst [vmem:[#allocation66_spill] sm:$0xff] %v5927_v39  ;;  %v5940_v12 = vcombine.high %v5923_v46, %v5923_v46  ;;  %v5944_v61 = vsel %vm5514_vm6, %v827_v24, %v828_v33  ;;  %v830_v34 = vrot.slane %v828_v33, 2  ;;  %v833_v27 = vrot.slane %v831_v58, 2 }
  0x5f   : > { %8827 = vst [vmem:[#allocation67_spill] sm:$0xff] %v5932_v30  ;;  %8829 = vst [vmem:[#allocation69_spill] sm:$0xff] %v5944_v61  ;;  %v1794_v42 = vcombine.low %v5918_v13, %v5932_v30  ;;  %v838_v37 = vrot.slane %v5927_v39, 7  ;;  %v841_v52 = vrot.slane %v5923_v46, 7  ;;  %v849_v22 = vrot.slane %v847_v26, 2 }
  0x60   : > { %8828 = vst [vmem:[#allocation68_spill] sm:$0xff] %v5940_v12  ;;  %v5952_v3 = vsel %vm5514_vm6, %v830_v34, %v831_v58  ;;  %v5956_v24 = vsel %vm5514_vm6, %v833_v27, %v834_v59  ;;  %v844_v33 = vrot.slane %v5940_v12, 7  ;;  %v507_v28 = vcombine.high %v199_v38, %v199_v38  ;;  %v5984_v59 = vld [vmem:[%s5329_s17 + $0x90] sm:$0xff] }
  0x61   : > { %8830 = vst [vmem:[#allocation70_spill] sm:$0xff] %v5952_v3  ;;  %8831 = vst [vmem:[#allocation71_spill] sm:$0xff] %v5956_v24  ;;  %v4806_v17 = vpack.i.bf16 %v1794_v42, %v1777_v18  ;;  %v5961_v30 = vsel %vm5514_vm6, %v4616_v53, %v838_v37  ;;  %v840_v13 = vrot.slane %v838_v37, 2  ;;  %v843_v39 = vrot.slane %v841_v52, 2  ;;  %v200_v18 = vld [vmem:[%s5329_s17 + $0x88] sm:$0xff] }
  0x62   : > { %8832 = vst [vmem:[#allocation72_spill] sm:$0xff] %v5961_v30  ;;  %v846_v46 = vrot.slane %v844_v33, 2  ;;  %v8833_v54 = vrot.slane %v5811_v35, 7  ;;  %v1727_v27 = vcombine.low %v5944_v61, %v5952_v3  ;;  %v1728_v34 = vcombine.low %v5956_v24, %v5961_v30  ;;  %8837 = vst [vmem:[#allocation76_spill] sm:$0xff] %v5984_v59 }
  0x63   : > { %4807 = vrot.lane.b32.xlu1 %v4806_v17, %s5289_s22  ;;  %v5977_v53 = vsel %vm5514_vm6, %v840_v13, %v841_v52  ;;  %v5981_v37 = vsel %vm5514_vm6, %v843_v39, %v844_v33  ;;  %v524_v39 = vcombine.high %v200_v18, %v200_v18 }
  0x64   : > { %v5967_v58 = vsel %vm5514_vm6, %v849_v22, %v8833_v54  ;;  %8835 = vst [vmem:[#allocation74_spill] sm:$0xff] %v5977_v53  ;;  %8836 = vst [vmem:[#allocation75_spill] sm:$0xff] %v5981_v37  ;;  %v5987_v22 = vrot.slane %v199_v38, %v5331_v5  ;;  %v5990_v54 = vrot.slane %v507_v28, %v5331_v5 }
  0x65   : > { %8834 = vst [vmem:[#allocation73_spill] sm:$0xff] %v5967_v58  ;;  %v5994_v42 = vsel %vm5514_vm6, %v846_v46, %v847_v26  ;;  %v5997_v17 = vrot.slane %v1727_v27, %v5331_v5  ;;  %v6000_v52 = vrot.slane %v1728_v34, %v5331_v5  ;;  %v1744_v13 = vcombine.low %v5977_v53, %v5981_v37 }
  0x66   : > { %8838 = vst [vmem:[#allocation77_spill] sm:$0xff] %v5987_v22  ;;  %8839 = vst [vmem:[#allocation78_spill] sm:$0xff] %v5990_v54  ;;  %v1745_v38 = vcombine.low %v5994_v42, %v5967_v58  ;;  %v6008_v28 = vcombine.high %v5987_v22, %v5987_v22  ;;  %v6012_v46 = vcombine.high %v5990_v54, %v5990_v54  ;;  %v4619_v37 = vrot.slane %v5987_v22, 9 }
  0x67   : > { %8840 = vst [vmem:[#allocation79_spill] sm:$0xff] %v5994_v42  ;;  %8841 = vst [vmem:[#allocation80_spill] sm:$0xff] %v6000_v52  ;;  %v1743_v26 = vcombine.low %v5997_v17, %v6000_v52  ;;  %v6017_v33 = vrot.slane %v1744_v13, %v5331_v5  ;;  %v6020_v27 = vrot.slane %v200_v18, %v5331_v5  ;;  %v197_v52 = vld [vmem:[%s5329_s17 + $0x70] sm:$0xff] }
  0x68   : > { %8842 = vst [vmem:[#allocation81_spill] sm:$0xff] %v6008_v28  ;;  %8843 = vst [vmem:[#allocation82_spill] sm:$0xff] %v6012_v46  ;;  %v6024_v34 = vrot.slane %v5984_v59, %v5331_v5  ;;  %v6027_v58 = vrot.slane %v1745_v38, %v5331_v5  ;;  %v6030_v35 = vrot.slane %v524_v39, %v5331_v5  ;;  %v904_v42 = vrot.slane %v6008_v28, 7 }
  0x69   : > { %8844 = vst [vmem:[#allocation83_spill] sm:$0xff] %v6020_v27  ;;  %v6036_v13 = vcombine.high %v6020_v27, %v6020_v27  ;;  %v907_v59 = vrot.slane %v5990_v54, 7  ;;  %v910_v38 = vrot.slane %v6012_v46, 7  ;;  %v913_v24 = vrot.slane %v6020_v27, 7 }
  0x6a   : > { %8845 = vst [vmem:[#allocation84_spill] sm:$0xff] %v6024_v34  ;;  %8846 = vst [vmem:[#allocation85_spill] sm:$0xff] %v6027_v58  ;;  %v6040_v18 = vcombine.high %v6024_v34, %v6024_v34  ;;  %v1760_v39 = vcombine.low %v6017_v33, %v6027_v58  ;;  %v6048_v22 = vcombine.high %v6030_v35, %v6030_v35  ;;  %v906_v30 = vrot.slane %v904_v42, 2 }
  0x6b   : > { %8847 = vst [vmem:[#allocation86_spill] sm:$0xff] %v6030_v35  ;;  %8848 = vst [vmem:[#allocation87_spill] sm:$0xff] %v6036_v13  ;;  %v6052_v28 = vsel %vm5514_vm6, %v4619_v37, %v904_v42  ;;  %v909_v53 = vrot.slane %v907_v59, 2  ;;  %v912_v3 = vrot.slane %v910_v38, 2  ;;  %v916_v54 = vrot.slane %v6036_v13, 7 }
  0x6c   : > { %8849 = vst [vmem:[#allocation88_spill] sm:$0xff] %v6048_v22  ;;  %8850 = vst [vmem:[#allocation89_spill] sm:$0xff] %v6052_v28  ;;  %v4801_v61 = vpack.i.bf16 %v1760_v39, %v1743_v26  ;;  %v6058_v46 = vsel %vm5514_vm6, %v906_v30, %v907_v59  ;;  %v919_v58 = vrot.slane %v6030_v35, 7  ;;  %v922_v12 = vrot.slane %v6048_v22, 7 }
  0x6d   : > { %8851 = vst [vmem:[#allocation90_spill] sm:$0xff] %v6058_v46  ;;  %v6065_v37 = vsel %vm5514_vm6, %v909_v53, %v910_v38  ;;  %v6069_v42 = vsel %vm5514_vm6, %v912_v3, %v913_v24  ;;  %v915_v13 = vrot.slane %v913_v24, 2  ;;  %v918_v26 = vrot.slane %v916_v54, 2 }
  0x6e   : > { %8852 = vst [vmem:[#allocation91_spill] sm:$0xff] %v6065_v37  ;;  %8853 = vst [vmem:[#allocation92_spill] sm:$0xff] %v6069_v42  ;;  %4802 = vrot.lane.b32.xlu0 %v4801_v61, %s5289_s22  ;;  %v921_v30 = vrot.slane %v919_v58, 2  ;;  %v4620_v59 = vrot.slane %v6024_v34, 9  ;;  %v8658_v39 = vrot.slane %v6040_v18, 7  ;;  %v1829_v22 = vcombine.low %v6052_v28, %v6058_v46  ;;  %v198_v61 = vld [vmem:[%s5329_s17 + $0x78] sm:$0xff] }
  0x6f   : > { %v6078_v53 = vsel %vm5514_vm6, %v915_v13, %v916_v54  ;;  %v6082_v3 = vsel %vm5514_vm6, %v918_v26, %v919_v58  ;;  %v1830_v24 = vcombine.low %v6065_v37, %v6069_v42  ;;  %v474_v38 = vcombine.high %v197_v52, %v197_v52 }
  0x70   : > { %8854 = vst [vmem:[#allocation93_spill] sm:$0xff] %v6078_v53  ;;  %8855 = vst [vmem:[#allocation94_spill] sm:$0xff] %v6082_v3  ;;  %v6089_v34 = vsel %vm5514_vm6, %v921_v30, %v922_v12  ;;  %v6095_v46 = vsel %vm5514_vm6, %v4620_v59, %v8658_v39  ;;  %v6098_v54 = vrot.slane %v1829_v22, %v5331_v5  ;;  %v8866_v42 = vrot.slane %v5824_v44, 7 }
  0x71   : > { %8856 = vst [vmem:[#allocation95_spill] sm:$0xff] %v6089_v34  ;;  %8857 = vst [vmem:[#allocation96_spill] sm:$0xff] %v6095_v46  ;;  %v1846_v58 = vcombine.low %v6078_v53, %v6082_v3  ;;  %v6103_v13 = vrot.slane %v1830_v24, %v5331_v5  ;;  %v1847_v26 = vcombine.low %v6089_v34, %v6095_v46 }
  0x72   : > { %8858 = vst [vmem:[#allocation97_spill] sm:$0xff] %v6098_v54  ;;  %v6108_v12 = vrot.slane %v197_v52, %v5331_v5  ;;  %v6111_v30 = vrot.slane %v474_v38, %v5331_v5  ;;  %v491_v22 = vcombine.high %v198_v61, %v198_v61  ;;  %v6117_v39 = vrot.slane %v198_v61, %v5331_v5 }
  0x73   : > { %8859 = vst [vmem:[#allocation98_spill] sm:$0xff] %v6103_v13  ;;  %v6114_v59 = vrot.slane %v1846_v58, %v5331_v5  ;;  %v6121_v24 = vcombine.high %v5824_v44, %v5824_v44  ;;  %v1845_v3 = vcombine.low %v6098_v54, %v6103_v13  ;;  %v6126_v52 = vrot.slane %v1847_v26, %v5331_v5 }
  0x74   : > { %8860 = vst [vmem:[#allocation99_spill] sm:$0xff] %v6108_v12  ;;  %8861 = vst [vmem:[#allocation100_spill] sm:$0xff] %v6111_v30  ;;  %v6130_v38 = vcombine.high %v6108_v12, %v6108_v12  ;;  %v6134_v58 = vcombine.high %v6111_v30, %v6111_v30  ;;  %v6137_v61 = vrot.slane %v491_v22, %v5331_v5  ;;  %v877_v53 = vrot.slane %v8866_v42, 2 }
  0x75   : > { %8862 = vst [vmem:[#allocation101_spill] sm:$0xff] %v6114_v59  ;;  %8863 = vst [vmem:[#allocation102_spill] sm:$0xff] %v6121_v24  ;;  %v6141_v34 = vcombine.high %v6117_v39, %v6117_v39  ;;  %v878_v26 = vrot.slane %v6121_v24, 7  ;;  %v1862_v37 = vcombine.low %v6114_v59, %v6126_v52  ;;  %v4618_v28 = vrot.slane %v6108_v12, 9 }
  0x76   : > { %8864 = vst [vmem:[#allocation103_spill] sm:$0xff] %v6126_v52  ;;  %8865 = vst [vmem:[#allocation104_spill] sm:$0xff] %v6130_v38  ;;  %v882_v13 = vrot.slane %v6130_v38, 7  ;;  %v885_v54 = vrot.slane %v6111_v30, 7  ;;  %v6153_v22 = vcombine.high %v6137_v61, %v6137_v61  ;;  %v888_v42 = vrot.slane %v6134_v58, 7 }
  0x77   : > { %v6157_v46 = vsel %vm5514_vm6, %v877_v53, %v878_v26  ;;  %v891_v24 = vrot.slane %v6117_v39, 7  ;;  %v4816_v44 = vpack.i.bf16 %v1862_v37, %v1845_v3  ;;  %v894_v35 = vrot.slane %v6141_v34, 7 }
  0x78   : > { %8867 = vst [vmem:[#allocation105_spill] sm:$0xff] %v6153_v22  ;;  %v6163_v52 = vsel %vm5514_vm6, %v4618_v28, %v882_v13  ;;  %v884_v59 = vrot.slane %v882_v13, 2  ;;  %v887_v38 = vrot.slane %v885_v54, 2  ;;  %v890_v30 = vrot.slane %v888_v42, 2 }
  0x79   : > { %v893_v12 = vrot.slane %v891_v24, 2  ;;  %v897_v27 = vrot.slane %v6137_v61, 7  ;;  %4817 = vrot.lane.b32.xlu1 %v4816_v44, %s5289_s22  ;;  %v900_v28 = vrot.slane %v6153_v22, 7  ;;  %v1795_v3 = vcombine.low %v6157_v46, %v6163_v52 }
  0x7a   : > { %v6170_v53 = vsel %vm5514_vm6, %v884_v59, %v885_v54  ;;  %v6174_v37 = vsel %vm5514_vm6, %v887_v38, %v888_v42  ;;  %v6181_v13 = vsel %vm5514_vm6, %v890_v30, %v891_v24  ;;  %v896_v26 = vrot.slane %v894_v35, 2 }
  0x7b   : > { %v6185_v44 = vsel %vm5514_vm6, %v893_v12, %v894_v35  ;;  %v899_v54 = vrot.slane %v897_v27, 2  ;;  %v1796_v59 = vcombine.low %v6170_v53, %v6174_v37  ;;  %v6190_v38 = vrot.slane %v1795_v3, %v5331_v5 }
  0x7c   : > { %v1812_v42 = vcombine.low %v6181_v13, %v6185_v44  ;;  %v3655_v22 = vcombine.low %v5827_v40, %v5571_v50  ;;  %v6198_v30 = vsel %vm5514_vm6, %v896_v26, %v897_v27  ;;  %v3656_v12 = vcombine.low %v5574_v51, %v5596_v11 }
  0x7d   : > { %v6202_v35 = vsel %vm5514_vm6, %v899_v54, %v900_v28  ;;  %v2808_v24 = vcombine.low %v5627_v10, %v5740_v19  ;;  %v6209_v3 = vrot.slane %v1796_v59, %v5331_v5  ;;  %v2809_v27 = vcombine.low %v5752_v31, %v5758_v20 }
  0x7e   : > { %8868 = vst [vmem:[#allocation106_spill] sm:$0xff] %v6202_v35  ;;  %v1813_v50 = vcombine.low %v6198_v30, %v6202_v35  ;;  %v6214_v40 = vrot.slane %v1812_v42, %v5331_v5  ;;  %v4831_v28 = vpack.i.bf16 %v3656_v12, %v3655_v22  ;;  %v2825_v51 = vcombine.low %v5765_v60, %v5772_v47  ;;  %v8943_v35 = vld [vmem:[#allocation76_spill] sm:$0xff] }
  0x7f   : > { %v2816_v26 = vrot.slane %v2808_v24, %v5331_v5  ;;  %v2826_v10 = vcombine.low %v5776_v15, %v5783_v57  ;;  %v1811_v11 = vcombine.low %v6190_v38, %v6209_v3  ;;  %v2823_v54 = vrot.slane %v2809_v27, %v5331_v5 }
  0x80   : > { %v6226_v19 = vrot.slane %v1813_v50, %v5331_v5  ;;  %v2132_v31 = vcombine.low %v5413_v43, %v5402_v36  ;;  %4832 = vrot.lane.b32.xlu1 %v4831_v28, %s5290_s23  ;;  %v2833_v20 = vrot.slane %v2825_v51, %v5331_v5  ;;  %v2133_v47 = vcombine.low %v5358_v21, %v5713_v48 }
  0x81   : > { %v2840_v60 = vrot.slane %v2826_v10, %v5331_v5  ;;  %v2134_v15 = vcombine.low %v5442_v0, %v5438_v63  ;;  %v2824_v22 = vcombine.low %v2816_v26, %v2823_v54  ;;  %v2150_v36 = vcombine.low %v5457_v7, %v5446_v4 }
  0x82   : > { %8869 = vst [vmem:[#allocation107_spill] sm:$0xff] %v6226_v19  ;;  %v1828_v57 = vcombine.low %v6214_v40, %v6226_v19  ;;  %v2151_v43 = vcombine.low %v5471_v16, %v5467_v14  ;;  %v2141_v42 = vrot.slane %v2133_v47, %v5331_v5  ;;  %v4628_v21 = vcombine.high %v5467_v14, %v5460_v9 }
  0x83   : > { %v2841_v59 = vcombine.low %v2833_v20, %v2840_v60  ;;  %v2148_v12 = vrot.slane %v2134_v15, %v5331_v5  ;;  %v6249_v63 = vrot.slane %v2150_v36, %v5331_v5  ;;  %v2842_v4 = vcombine.low %v5801_v62, %v5535_v56  ;;  %v8871_v20 = vld [vmem:[#allocation21_spill] sm:$0xff]  ;;  %v8872_v15 = vld [vmem:[#allocation27_spill] sm:$0xff] }
  0x84   : > { %v4811_v48 = vpack.i.bf16 %v1828_v57, %v1811_v11  ;;  %v6252_v0 = vrot.slane %v2151_v43, %v5331_v5  ;;  %v6257_v24 = vrot.slane %v4628_v21, %v5331_v5  ;;  %v2843_v50 = vcombine.low %v5540_v1, %v5544_v2  ;;  %v8873_v57 = vld [vmem:[#allocation22_spill] sm:$0xff] }
  0x85   : > { %v4821_v7 = vpack.i.bf16 %v2841_v59, %v2824_v22  ;;  %v2149_v16 = vcombine.low %v2141_v42, %v2148_v12  ;;  %v2591_v27 = vcombine.low %v2148_v12, %v6249_v63  ;;  %v2850_v28 = vrot.slane %v2842_v4, %v5331_v5  ;;  %v8875_v59 = vld [vmem:[#allocation16_spill] sm:$0xff]  ;;  %v8876_v42 = vld [vmem:[#allocation15_spill] sm:$0xff]  ;;  %v8878_v21 = vld [vmem:[#allocation14_spill] sm:$0xff] }
  0x86   : > { %4812 = vrot.lane.b32.xlu0 %v4811_v48, %s5289_s22  ;;  %v2859_v26 = vcombine.low %v5549_v6, %v5553_v8  ;;  %v2860_v56 = vcombine.low %v5567_v41, %v5581_v55  ;;  %v3810_v51 = vcombine.low %v6252_v0, %v6257_v24  ;;  %v2857_v10 = vrot.slane %v2843_v50, %v5331_v5 }
  0x87   : > { %v4836_v62 = vpack.i.bf16 %v2149_v16, %v2132_v31  ;;  %v2592_v1 = vcombine.low %v5460_v9, %v5479_v29  ;;  %v1252_v54 = vcombine.low %v5524_v49, %v5634_v25  ;;  %v1253_v6 = vcombine.low %v5646_v23, %v5637_v32  ;;  %v8870_v31 = vld [vmem:[#allocation24_spill] sm:$0xff]  ;;  %v8880_v16 = vld [vmem:[#allocation18_spill] sm:$0xff] }
  0x88   : > { %v2867_v2 = vrot.slane %v2859_v26, %v5331_v5  ;;  %v2874_v11 = vrot.slane %v2860_v56, %v5331_v5  ;;  %v4826_v8 = vpack.i.bf16 %v3810_v51, %v2591_v27  ;;  %v2858_v41 = vcombine.low %v2850_v28, %v2857_v10  ;;  %v8881_v28 = vld [vmem:[#allocation12_spill] sm:$0xff] }
  0x89   : > { %4837 = vrot.lane.b32.xlu1 %v4836_v62, %s5286_s19  ;;  %v2599_v55 = vrot.slane %v2592_v1, %v5331_v5  ;;  %v1269_v60 = vcombine.low %v8871_v20, %v8870_v31  ;;  %v1260_v29 = vrot.slane %v1252_v54, %v5331_v5  ;;  %v1267_v47 = vrot.slane %v1253_v6, %v5331_v5  ;;  %v8883_v6 = vld [vmem:[#allocation35_spill] sm:$0xff] }
  0x8a   : > { %4822 = vrot.lane.b32.xlu0 %v4821_v7, %s5291_s24  ;;  %v2875_v9 = vcombine.low %v2867_v2, %v2874_v11  ;;  %v1270_v22 = vcombine.low %v8873_v57, %v8872_v15  ;;  %v6294_v12 = vcombine.low %v8876_v42, %v8875_v59  ;;  %v3308_v48 = vcombine.low %v5467_v14, %v8878_v21  ;;  %v8882_v2 = vld [vmem:[#allocation26_spill] sm:$0xff]  ;;  %v8941_v14 = vld [vmem:[#allocation84_spill] sm:$0xff] }
  0x8b   : > { %v2600_v36 = vcombine.low %v6252_v0, %v2599_v55  ;;  %v6290_v43 = vrot.slane %v1269_v60, %v5331_v5  ;;  %v3518_v50 = vcombine.low %v8880_v16, %v1260_v29  ;;  %v2168_v26 = vcombine.low %v8881_v28, %v5524_v49  ;;  %v8885_v55 = vld [vmem:[#allocation38_spill] sm:$0xff]  ;;  %v8886_v60 = vld [vmem:[#allocation37_spill] sm:$0xff] }
  0x8c   : > { %8877 = vst [vmem:[#allocation21_spill] sm:$0xff] %v6294_v12  ;;  %v4846_v4 = vpack.i.bf16 %v2875_v9, %v2858_v41  ;;  %v6299_v7 = vrot.slane %v1270_v22, %v5331_v5  ;;  %v3315_v51 = vrot.slane %v3308_v48, %v5331_v5  ;;  %v2184_v10 = vcombine.low %v5634_v25, %v5646_v23 }
  0x8d   : > { %8874 = vst [vmem:[#allocation24_spill] sm:$0xff] %v6290_v43  ;;  %v4841_v56 = vpack.i.bf16 %v2600_v36, %v2591_v27  ;;  %v3519_v62 = vcombine.low %v1267_v47, %v6290_v43  ;;  %v2182_v1 = vrot.slane %v2168_v26, %v5331_v5  ;;  %v2185_v49 = vcombine.low %v5637_v32, %v8882_v2  ;;  %v8891_v2 = vld [vmem:[#allocation31_spill] sm:$0xff] }
  0x8e   : > { %8879 = vst [vmem:[#allocation27_spill] sm:$0xff] %v6299_v7  ;;  %4827 = vrot.lane.b32.xlu0 %v4826_v8, %s5292_s25  ;;  %4847 = vrot.lane.b32.xlu1 %v4846_v4, %s5291_s24  ;;  %v3316_v11 = vcombine.low %v3315_v51, %v8880_v16  ;;  %v6317_v54 = vrot.slane %v2184_v10, %v5331_v5  ;;  %v8884_v8 = vld [vmem:[#allocation20_spill] sm:$0xff]  ;;  %v8887_v4 = vrot.slane %v6040_v18, 7 }
  0x8f   : > { %v4856_v27 = vpack.i.bf16 %v3519_v62, %v3518_v50  ;;  %v2201_v25 = vcombine.low %v8870_v31, %v8873_v57  ;;  %v6322_v23 = vrot.slane %v2185_v49, %v5331_v5  ;;  %v3657_v41 = vcombine.low %v8884_v8, %v8883_v6  ;;  %v8893_v49 = vld [vmem:[#allocation29_spill] sm:$0xff] }
  0x90   : > { %v3658_v9 = vcombine.low %v8886_v60, %v8885_v55  ;;  %v2602_v22 = vcombine.low %v5637_v32, %v8871_v20  ;;  %v4851_v36 = vpack.i.bf16 %v3316_v11, %v6294_v12  ;;  %v2601_v42 = vcombine.low %v2182_v1, %v6317_v54  ;;  %v8896_v8 = vld [vmem:[#allocation33_spill] sm:$0xff]  ;;  %v8897_v60 = vld [vmem:[#allocation39_spill] sm:$0xff] }
  0x91   : > { %v6332_v59 = vrot.slane %v2201_v25, %v5331_v5  ;;  %v2166_v31 = vcombine.low %v6249_v63, %v6252_v0  ;;  %v2183_v48 = vcombine.low %v6257_v24, %v2182_v1  ;;  %v6343_v50 = vrot.slane %v8887_v4, 2  ;;  %v8889_v0 = vld [vmem:[#allocation28_spill] sm:$0xff]  ;;  %v8892_v24 = vld [vmem:[#allocation30_spill] sm:$0xff]  ;;  %v8899_v4 = vld [vmem:[#allocation57_spill] sm:$0xff] }
  0x92   : > { %4842 = vrot.lane.b32.xlu0 %v4841_v56, %s5285_s18  ;;  %4857 = vrot.lane.b32.xlu1 %v4856_v27, %s5288_s21  ;;  %v4861_v57 = vpack.i.bf16 %v3658_v9, %v3657_v41  ;;  %v2609_v21 = vrot.slane %v2602_v22, %v5331_v5  ;;  %v6347_v26 = vcombine.low %v1260_v29, %v1267_v47  ;;  %v8890_v56 = vld [vmem:[#allocation19_spill] sm:$0xff]  ;;  %v8894_v27 = vld [vmem:[#allocation32_spill] sm:$0xff]  ;;  %v8895_v47 = vld [vmem:[#allocation34_spill] sm:$0xff] }
  0x93   : > { %v3811_v28 = vcombine.low %v6322_v23, %v6332_v59  ;;  %v4635_v63 = vcombine.high %v5637_v32, %v8871_v20  ;;  %v2876_v62 = vcombine.low %v8890_v56, %v8889_v0  ;;  %v4871_v10 = vpack.i.bf16 %v2183_v48, %v2166_v31  ;;  %v8902_v0 = vld [vmem:[#allocation25_spill] sm:$0xff] }
  0x94   : > { %8888 = vst [vmem:[#allocation22_spill] sm:$0xff] %v6347_v26  ;;  %v2610_v51 = vcombine.low %v2609_v21, %v6332_v59  ;;  %v2877_v1 = vcombine.low %v8892_v24, %v8891_v2  ;;  %v2893_v11 = vcombine.low %v8894_v27, %v8893_v49  ;;  %v2894_v32 = vcombine.low %v8896_v8, %v8895_v47  ;;  %v8898_v21 = vld [vmem:[#allocation80_spill] sm:$0xff] }
  0x95   : > { %v4866_v25 = vpack.i.bf16 %v3811_v28, %v2601_v42  ;;  %v3324_v6 = vrot.slane %v4635_v63, %v5331_v5  ;;  %v2884_v29 = vrot.slane %v2876_v62, %v5331_v5  ;;  %v3659_v9 = vcombine.low %v8897_v60, %v5997_v17  ;;  %v8900_v28 = vld [vmem:[#allocation23_spill] sm:$0xff]  ;;  %v8901_v63 = vld [vmem:[#allocation62_spill] sm:$0xff]  ;;  %v8903_v62 = vld [vmem:[#allocation65_spill] sm:$0xff] }
  0x96   : > { %4852 = vrot.lane.b32.xlu0 %v4851_v36, %s5287_s20  ;;  %v4876_v20 = vpack.i.bf16 %v2610_v51, %v2601_v42  ;;  %v2891_v41 = vrot.slane %v2877_v1, %v5331_v5  ;;  %v2901_v55 = vrot.slane %v2893_v11, %v5331_v5  ;;  %v2908_v31 = vrot.slane %v2894_v32, %v5331_v5  ;;  %v8904_v51 = vld [vmem:[#allocation66_spill] sm:$0xff]  ;;  %v8908_v60 = vld [vmem:[#allocation69_spill] sm:$0xff] }
  0x97   : > { %4867 = vrot.lane.b32.xlu1 %v4866_v25, %s5292_s25  ;;  %v3325_v22 = vcombine.low %v3324_v6, %v6299_v7  ;;  %v3660_v48 = vcombine.low %v8898_v21, %v6017_v33  ;;  %v1286_v36 = vcombine.low %v8900_v28, %v8899_v4  ;;  %v1287_v56 = vcombine.low %v8902_v0, %v8901_v63  ;;  %v8911_v21 = vld [vmem:[#allocation70_spill] sm:$0xff] }
  0x98   : > { %v2892_v42 = vcombine.low %v2884_v29, %v2891_v41  ;;  %v1303_v2 = vcombine.low %v8904_v51, %v8903_v62  ;;  %v2200_v17 = vcombine.low %v6317_v54, %v6322_v23  ;;  %v2909_v1 = vcombine.low %v2901_v55, %v2908_v31  ;;  %v8907_v29 = vld [vmem:[#allocation68_spill] sm:$0xff]  ;;  %v8910_v31 = vld [vmem:[#allocation71_spill] sm:$0xff] }
  0x99   : > { %v4886_v24 = vpack.i.bf16 %v3325_v22, %v6347_v26  ;;  %v4896_v49 = vpack.i.bf16 %v3660_v48, %v3659_v9  ;;  %v6382_v27 = vrot.slane %v1286_v36, %v5331_v5  ;;  %v6386_v33 = vrot.slane %v1287_v56, %v5331_v5  ;;  %v8909_v9 = vld [vmem:[#allocation36_spill] sm:$0xff] }
  0x9a   : > { %4862 = vrot.lane.b32.xlu0 %v4861_v57, %s5290_s23  ;;  %v1311_v11 = vrot.slane %v1303_v2, %v5331_v5  ;;  %v2202_v25 = vcombine.low %v8872_v15, %v8900_v28  ;;  %v2218_v54 = vcombine.low %v8899_v4, %v8902_v0  ;;  %v4881_v23 = vpack.i.bf16 %v2909_v1, %v2892_v42  ;;  %v8912_v42 = vld [vmem:[#allocation74_spill] sm:$0xff]  ;;  %v8913_v56 = vld [vmem:[#allocation72_spill] sm:$0xff] }
  0x9b   : > { %8905 = vst [vmem:[#allocation16_spill] sm:$0xff] %v6382_v27  ;;  %8906 = vst [vmem:[#allocation15_spill] sm:$0xff] %v6386_v33  ;;  %4877 = vrot.lane.b32.xlu1 %v4876_v20, %s5285_s18  ;;  %v3520_v6 = vcombine.low %v6299_v7, %v6382_v27  ;;  %v4629_v57 = vcombine.high %v8902_v0, %v8901_v63  ;;  %v2235_v47 = vcombine.low %v8903_v62, %v8907_v29 }
  0x9c   : > { %v3521_v15 = vcombine.low %v6386_v33, %v1311_v11  ;;  %v2216_v32 = vrot.slane %v2202_v25, %v5331_v5  ;;  %v6405_v41 = vrot.slane %v2218_v54, %v5331_v5  ;;  %v2910_v22 = vcombine.low %v8909_v9, %v8908_v60  ;;  %v8914_v54 = vld [vmem:[#allocation79_spill] sm:$0xff] }
  0x9d   : > { %v6408_v20 = vrot.slane %v4629_v57, %v5331_v5  ;;  %v6411_v55 = vrot.slane %v2235_v47, %v5331_v5  ;;  %v2911_v48 = vcombine.low %v8911_v21, %v8910_v31  ;;  %v2927_v62 = vcombine.low %v8913_v56, %v8912_v42  ;;  %v8915_v57 = vld [vmem:[#allocation75_spill] sm:$0xff]  ;;  %v8917_v31 = vld [vmem:[#allocation41_spill] sm:$0xff]  ;;  %v8920_v42 = vld [vmem:[#allocation42_spill] sm:$0xff] }
  0x9e   : > { %4872 = vrot.lane.b32.xlu0 %v4871_v10, %s5286_s19  ;;  %v4891_v4 = vpack.i.bf16 %v3521_v15, %v3520_v6  ;;  %v2217_v28 = vcombine.low %v6332_v59, %v2216_v32  ;;  %v2611_v36 = vcombine.low %v2216_v32, %v6405_v41  ;;  %v2918_v1 = vrot.slane %v2910_v22, %v5331_v5  ;;  %v8916_v15 = vld [vmem:[#allocation40_spill] sm:$0xff]  ;;  %v8918_v22 = vld [vmem:[#allocation43_spill] sm:$0xff] }
  0x9f   : > { %4887 = vrot.lane.b32.xlu1 %v4886_v24, %s5287_s20  ;;  %v3812_v2 = vcombine.low %v6408_v20, %v6411_v55  ;;  %v2925_v25 = vrot.slane %v2911_v48, %v5331_v5  ;;  %v2928_v10 = vcombine.low %v8915_v57, %v8914_v54  ;;  %v2935_v59 = vrot.slane %v2927_v62, %v5331_v5 }
  0xa0   : > { %v4906_v6 = vpack.i.bf16 %v2217_v28, %v2200_v17  ;;  %v2612_v47 = vcombine.low %v8901_v63, %v8904_v51  ;;  %v1304_v32 = vcombine.low %v8907_v29, %v8916_v15  ;;  %v1320_v21 = vcombine.low %v8918_v22, %v8917_v31  ;;  %v8919_v28 = vld [vmem:[#allocation45_spill] sm:$0xff]  ;;  %v8922_v51 = vld [vmem:[#allocation44_spill] sm:$0xff] }
  0xa1   : > { %v4901_v24 = vpack.i.bf16 %v3812_v2, %v2611_v36  ;;  %v2926_v60 = vcombine.low %v2918_v1, %v2925_v25  ;;  %v2942_v9 = vrot.slane %v2928_v10, %v5331_v5  ;;  %v1321_v56 = vcombine.low %v8920_v42, %v8919_v28  ;;  %v8921_v63 = vld [vmem:[#allocation49_spill] sm:$0xff]  ;;  %v8924_v1 = vld [vmem:[#allocation63_spill] sm:$0xff] }
  0xa2   : > { %4882 = vrot.lane.b32.xlu0 %v4881_v23, %s5291_s24  ;;  %v2619_v48 = vrot.slane %v2612_v47, %v5331_v5  ;;  %v1318_v17 = vrot.slane %v1304_v32, %v5331_v5  ;;  %v1337_v62 = vcombine.low %v8922_v51, %v8921_v63  ;;  %v6446_v2 = vrot.slane %v1320_v21, %v5331_v5 }
  0xa3   : > { %4897 = vrot.lane.b32.xlu1 %v4896_v49, %s5290_s23  ;;  %v2943_v29 = vcombine.low %v2935_v59, %v2942_v9  ;;  %v3326_v25 = vcombine.low %v8902_v0, %v8924_v1  ;;  %v2236_v23 = vcombine.low %v8916_v15, %v8918_v22  ;;  %v6454_v57 = vrot.slane %v1321_v56, %v5331_v5  ;;  %v8930_v56 = vld [vmem:[#allocation85_spill] sm:$0xff] }
  0xa4   : > { %8923 = vst [vmem:[#allocation14_spill] sm:$0xff] %v6446_v2  ;;  %v2620_v54 = vcombine.low %v2619_v48, %v6411_v55  ;;  %v6457_v10 = vrot.slane %v1337_v62, %v5331_v5  ;;  %v6459_v47 = vcombine.low %v1311_v11, %v1318_v17  ;;  %v3522_v59 = vcombine.low %v1318_v17, %v6446_v2  ;;  %v8927_v11 = vld [vmem:[#allocation48_spill] sm:$0xff]  ;;  %v8928_v17 = vld [vmem:[#allocation46_spill] sm:$0xff] }
  0xa5   : > { %8925 = vst [vmem:[#allocation12_spill] sm:$0xff] %v6454_v57  ;;  %v4916_v49 = vpack.i.bf16 %v2943_v29, %v2926_v60  ;;  %v3333_v32 = vrot.slane %v3326_v25, %v5331_v5  ;;  %v6464_v0 = vrot.slane %v2236_v23, %v5331_v5  ;;  %v2252_v60 = vcombine.low %v8917_v31, %v8927_v11  ;;  %v8931_v25 = vld [vmem:[#allocation64_spill] sm:$0xff]  ;;  %v8933_v11 = vld [vmem:[#allocation78_spill] sm:$0xff] }
  0xa6   : > { %8926 = vst [vmem:[#allocation26_spill] sm:$0xff] %v6459_v47  ;;  %4892 = vrot.lane.b32.xlu0 %v4891_v4, %s5288_s21  ;;  %v4911_v15 = vpack.i.bf16 %v2620_v54, %v2611_v36  ;;  %v3523_v22 = vcombine.low %v6454_v57, %v6457_v10  ;;  %v2253_v48 = vcombine.low %v8919_v28, %v8922_v51  ;;  %v8929_v36 = vld [vmem:[#allocation59_spill] sm:$0xff]  ;;  %v8932_v23 = vld [vmem:[#allocation60_spill] sm:$0xff] }
  0xa7   : > { %4907 = vrot.lane.b32.xlu1 %v4906_v6, %s5286_s19  ;;  %v3334_v21 = vcombine.low %v6382_v27, %v3333_v32  ;;  %v2269_v4 = vcombine.low %v8921_v63, %v8928_v17  ;;  %v3661_v62 = vcombine.low %v8930_v56, %v8929_v36  ;;  %v6482_v1 = vrot.slane %v2252_v60, %v5331_v5  ;;  %v8934_v6 = vld [vmem:[#allocation81_spill] sm:$0xff]  ;;  %v8935_v51 = vld [vmem:[#allocation83_spill] sm:$0xff] }
  0xa8   : > { %v4926_v29 = vpack.i.bf16 %v3523_v22, %v3522_v59  ;;  %v3662_v54 = vcombine.low %v8932_v23, %v8931_v25  ;;  %v2320_v8 = vcombine.low %v8934_v6, %v8933_v11  ;;  %v6490_v28 = vrot.slane %v2253_v48, %v5331_v5  ;;  %v8936_v59 = vld [vmem:[#allocation82_spill] sm:$0xff]  ;;  %v202_v60 = vld [vmem:[%s5329_s17 + $0x98] sm:$0xff]  ;;  %v8939_v23 = vld [vmem:[#allocation87_spill] sm:$0xff] }
  0xa9   : > { %v4921_v32 = vpack.i.bf16 %v6459_v47, %v3334_v21  ;;  %v6493_v63 = vrot.slane %v2269_v4, %v5331_v5  ;;  %v2321_v22 = vcombine.low %v8936_v59, %v8935_v51  ;;  %v3813_v36 = vcombine.low %v6464_v0, %v6482_v1  ;;  %v8938_v21 = vld [vmem:[#allocation86_spill] sm:$0xff]  ;;  %v8952_v51 = vld [vmem:[#allocation55_spill] sm:$0xff] }
  0xaa   : > { %4902 = vrot.lane.b32.xlu0 %v4901_v24, %s5292_s25  ;;  %v4931_v56 = vpack.i.bf16 %v3662_v54, %v3661_v62  ;;  %v6502_v25 = vrot.slane %v2320_v8, %v5331_v5  ;;  %v2337_v48 = vcombine.low %v8939_v23, %v8938_v21  ;;  %v4631_v24 = vcombine.high %v8938_v21, %v8941_v14  ;;  %v6517_v54 = vld [vmem:[%s5329_s17 + $0xa0] sm:$0xff] }
  0xab   : > { %4917 = vrot.lane.b32.xlu1 %v4916_v49, %s5291_s24  ;;  %v2630_v4 = vcombine.low %v6490_v28, %v6493_v63  ;;  %v6510_v9 = vrot.slane %v2321_v22, %v5331_v5  ;;  %v2234_v62 = vcombine.low %v6405_v41, %v6408_v20  ;;  %v2251_v49 = vcombine.low %v6411_v55, %v6464_v0  ;;  %v8953_v23 = vld [vmem:[#allocation54_spill] sm:$0xff] }
  0xac   : > { %8937 = vst [vmem:[#allocation35_spill] sm:$0xff] %v6502_v25  ;;  %v6520_v8 = vrot.slane %v2337_v48, %v5331_v5  ;;  %v540_v33 = vcombine.high %v8943_v35, %v8943_v35  ;;  %v557_v27 = vcombine.high %v202_v60, %v202_v60  ;;  %v6529_v21 = vrot.slane %v4631_v24, %v5331_v5 }
  0xad   : > { %8940 = vst [vmem:[#allocation20_spill] sm:$0xff] %v6510_v9  ;;  %v4936_v22 = vpack.i.bf16 %v2630_v4, %v3813_v36  ;;  %v2336_v47 = vcombine.low %v6502_v25, %v6510_v9  ;;  %v6532_v41 = vrot.slane %v202_v60, %v5331_v5  ;;  %v4941_v20 = vpack.i.bf16 %v2251_v49, %v2234_v62 }
  0xae   : > { %8942 = vst [vmem:[#allocation38_spill] sm:$0xff] %v6520_v8  ;;  %8944 = vst [vmem:[#allocation37_spill] sm:$0xff] %v6529_v21  ;;  %4912 = vrot.lane.b32.xlu0 %v4911_v15, %s5285_s18  ;;  %v6536_v48 = vrot.slane %v540_v33, %v5331_v5  ;;  %v6539_v55 = vrot.slane %v557_v27, %v5331_v5  ;;  %v6543_v35 = vrot.slane %v6517_v54, %v5331_v5 }
  0xaf   : > { %4927 = vrot.lane.b32.xlu1 %v4926_v29, %s5288_s21  ;;  %v2353_v36 = vcombine.low %v6520_v8, %v6529_v21  ;;  %v6550_v60 = vcombine.high %v6532_v41, %v6532_v41  ;;  %v2651_v33 = vcombine.low %v8941_v14, %v6040_v18  ;;  %v2621_v27 = vcombine.low %v8917_v31, %v8920_v42 }
  0xb0   : > { %v6558_v15 = vcombine.high %v6536_v48, %v6536_v48  ;;  %v2660_v29 = vcombine.low %v6539_v55, %v6543_v35  ;;  %v6564_v24 = vcombine.high %v6543_v35, %v6543_v35  ;;  %v6568_v62 = vcombine.high %v6539_v55, %v6539_v55 }
  0xb1   : > { %v4946_v49 = vpack.i.bf16 %v2353_v36, %v2336_v47  ;;  %v2355_v21 = vcombine.low %v6532_v41, %v6550_v60  ;;  %v2658_v14 = vrot.slane %v2651_v33, %v5331_v5  ;;  %v2628_v57 = vrot.slane %v2621_v27, %v5331_v5 }
  0xb2   : > { %4922 = vrot.lane.b32.xlu0 %v4921_v32, %s5287_s20  ;;  %v2354_v26 = vcombine.low %v6536_v48, %v6558_v15  ;;  %v2667_v7 = vrot.slane %v2660_v29, %v5331_v5  ;;  %v929_v43 = vrot.slane %v6536_v48, 7  ;;  %v932_v25 = vrot.slane %v6558_v15, 7 }
  0xb3   : > { %4937 = vrot.lane.b32.xlu1 %v4936_v22, %s5292_s25  ;;  %v6582_v47 = vrot.slane %v2355_v21, %v5331_v5  ;;  %v2629_v36 = vcombine.low %v6464_v0, %v2628_v57  ;;  %v935_v33 = vrot.slane %v6532_v41, 7  ;;  %v938_v32 = vrot.slane %v6550_v60, 7 }
  0xb4   : > { %v6588_v27 = vrot.slane %v2354_v26, %v5331_v5  ;;  %v6593_v29 = vsel %vm5514_vm6, %v6343_v50, %v929_v43  ;;  %v931_v12 = vrot.slane %v929_v43, 2  ;;  %v934_v9 = vrot.slane %v932_v25, 2 }
  0xb5   : > { %8945 = vst [vmem:[#allocation28_spill] sm:$0xff] %v6582_v47  ;;  %v2668_v22 = vcombine.low %v6582_v47, %v2667_v7  ;;  %v4951_v21 = vpack.i.bf16 %v2630_v4, %v2629_v36  ;;  %v937_v8 = vrot.slane %v935_v33, 2  ;;  %v940_v19 = vrot.slane %v938_v32, 2  ;;  %v8947_v4 = vld [vmem:[#allocation96_spill] sm:$0xff] }
  0xb6   : > { %8946 = vst [vmem:[#allocation19_spill] sm:$0xff] %v6588_v27  ;;  %4932 = vrot.lane.b32.xlu0 %v4931_v56, %s5290_s23  ;;  %v2659_v57 = vcombine.low %v2658_v14, %v6588_v27  ;;  %v6600_v26 = vsel %vm5514_vm6, %v931_v12, %v932_v25  ;;  %v6604_v0 = vsel %vm5514_vm6, %v934_v9, %v935_v33  ;;  %v941_v43 = vrot.slane %v6539_v55, 7 }
  0xb7   : > { %4947 = vrot.lane.b32.xlu1 %v4946_v49, %s5286_s19  ;;  %v6610_v7 = vsel %vm5514_vm6, %v937_v8, %v938_v32  ;;  %v944_v50 = vrot.slane %v6568_v62, 7  ;;  %v4621_v14 = vrot.slane %v6543_v35, 9  ;;  %v8701_v56 = vrot.slane %v6564_v24, 7  ;;  %v8948_v32 = vld [vmem:[#allocation52_spill] sm:$0xff] }
  0xb8   : > { %v4956_v12 = vpack.i.bf16 %v2668_v22, %v2659_v57  ;;  %v6617_v25 = vsel %vm5514_vm6, %v940_v19, %v941_v43  ;;  %v943_v9 = vrot.slane %v941_v43, 2  ;;  %v3046_v36 = vcombine.low %v8947_v4, %v6593_v29  ;;  %v8949_v22 = vld [vmem:[#allocation73_spill] sm:$0xff]  ;;  %v8950_v4 = vld [vmem:[#allocation51_spill] sm:$0xff] }
  0xb9   : > { %v6625_v8 = vsel %vm5514_vm6, %v4621_v14, %v8701_v56  ;;  %v3047_v49 = vcombine.low %v6600_v26, %v6604_v0  ;;  %v3063_v33 = vcombine.low %v6610_v7, %v6617_v25  ;;  %v2944_v19 = vcombine.low %v8949_v22, %v8948_v32  ;;  %v8951_v14 = vld [vmem:[#allocation53_spill] sm:$0xff]  ;;  %v8955_v22 = vld [vmem:[#allocation56_spill] sm:$0xff] }
  0xba   : > { %4942 = vrot.lane.b32.xlu0 %v4941_v20, %s5286_s19  ;;  %v6636_v57 = vsel %vm5514_vm6, %v943_v9, %v944_v50  ;;  %v3054_v43 = vrot.slane %v3046_v36, %v5331_v5  ;;  %v2945_v56 = vcombine.low %v8951_v14, %v8950_v4  ;;  %v2961_v11 = vcombine.low %v8953_v23, %v8952_v51  ;;  %v8954_v36 = vld [vmem:[#allocation58_spill] sm:$0xff] }
  0xbb   : > { %4957 = vrot.lane.b32.xlu1 %v4956_v12, %s5285_s18  ;;  %v3061_v59 = vrot.slane %v3047_v49, %v5331_v5  ;;  %v3064_v32 = vcombine.low %v6636_v57, %v6625_v8  ;;  %v3071_v20 = vrot.slane %v3063_v33, %v5331_v5  ;;  %v2952_v50 = vrot.slane %v2944_v19, %v5331_v5 }
  0xbc   : > { %v2959_v9 = vrot.slane %v2945_v56, %v5331_v5  ;;  %v2962_v4 = vcombine.low %v8955_v22, %v8954_v36  ;;  %v2969_v14 = vrot.slane %v2961_v11, %v5331_v5  ;;  %v1422_v51 = vcombine.low %v6040_v18, %v6536_v48 }
  0xbd   : > { %v3062_v23 = vcombine.low %v3054_v43, %v3061_v59  ;;  %v3078_v12 = vrot.slane %v3064_v32, %v5331_v5  ;;  %v1423_v49 = vcombine.low %v6558_v15, %v6532_v41  ;;  %v1439_v33 = vcombine.low %v6550_v60, %v6539_v55  ;;  %v204_v59 = vld [vmem:[%s5329_s17 + $0xa8] sm:$0xff]  ;;  %v8959_v60 = vld [vmem:[#allocation50_spill] sm:$0xff] }
  0xbe   : > { %4952 = vrot.lane.b32.xlu0 %v4951_v21, %s5285_s18  ;;  %v2960_v56 = vcombine.low %v2952_v50, %v2959_v9  ;;  %v2976_v19 = vrot.slane %v2962_v4, %v5331_v5  ;;  %v6663_v11 = vrot.slane %v1422_v51, %v5331_v5  ;;  %v4638_v18 = vcombine.high %v6539_v55, %v6543_v35  ;;  %v205_v4 = vld [vmem:[%s5329_s17 + $0xb0] sm:$0xff] }
  0xbf   : > { %v3079_v48 = vcombine.low %v3071_v20, %v3078_v12  ;;  %v6669_v43 = vrot.slane %v1423_v49, %v5331_v5  ;;  %v6672_v41 = vrot.slane %v1439_v33, %v5331_v5  ;;  %v1338_v15 = vcombine.low %v8928_v17, %v8959_v60 }
  0xc0   : > { %8956 = vst [vmem:[#allocation31_spill] sm:$0xff] %v6663_v11  ;;  %v2977_v21 = vcombine.low %v2969_v14, %v2976_v19  ;;  %v3378_v32 = vrot.slane %v4638_v18, %v5331_v5  ;;  %v4636_v50 = vcombine.high %v8917_v31, %v8920_v42  ;;  %v573_v9 = vcombine.high %v6517_v54, %v6517_v54 }
  0xc1   : > { %8957 = vst [vmem:[#allocation30_spill] sm:$0xff] %v6669_v43  ;;  %8958 = vst [vmem:[#allocation29_spill] sm:$0xff] %v6672_v41  ;;  %v4966_v36 = vpack.i.bf16 %v3079_v48, %v3062_v23  ;;  %v6683_v20 = vcombine.low %v6663_v11, %v6669_v43  ;;  %v1352_v22 = vrot.slane %v1338_v15, %v5331_v5  ;;  %v8963_v15 = vld [vmem:[#allocation99_spill] sm:$0xff] }
  0xc2   : > { %v590_v51 = vcombine.high %v204_v59, %v204_v59  ;;  %v4961_v12 = vpack.i.bf16 %v2977_v21, %v2960_v56  ;;  %v3379_v17 = vcombine.low %v6672_v41, %v3378_v32  ;;  %v3342_v14 = vrot.slane %v4636_v50, %v5331_v5  ;;  %v8964_v21 = vld [vmem:[#allocation47_spill] sm:$0xff] }
  0xc3   : > { %8960 = vst [vmem:[#allocation32_spill] sm:$0xff] %v6683_v20  ;;  %v6690_v49 = vrot.slane %v573_v9, %v5331_v5  ;;  %4967 = vrot.lane.b32.xlu1 %v4966_v36, %s5291_s24  ;;  %v6694_v31 = vcombine.low %v6457_v10, %v1352_v22  ;;  %v6697_v42 = vrot.slane %v204_v59, %v5331_v5 }
  0xc4   : > { %v6700_v54 = vrot.slane %v590_v51, %v5331_v5  ;;  %v606_v23 = vcombine.high %v205_v4, %v205_v4  ;;  %4962 = vrot.lane.b32.xlu0 %v4961_v12, %s5291_s24  ;;  %v4976_v33 = vpack.i.bf16 %v3379_v17, %v6683_v20  ;;  %v3343_v56 = vcombine.low %v6446_v2, %v3342_v14  ;;  %v8966_v12 = vld [vmem:[#allocation100_spill] sm:$0xff] }
  0xc5   : > { %8961 = vst [vmem:[#allocation34_spill] sm:$0xff] %v6694_v31  ;;  %v6707_v19 = vcombine.high %v6690_v49, %v6690_v49  ;;  %v6710_v10 = vrot.slane %v205_v4, %v5331_v5  ;;  %v6714_v18 = vcombine.high %v6697_v42, %v6697_v42  ;;  %v1440_v48 = vcombine.low %v6543_v35, %v6564_v24  ;;  %v8967_v17 = vld [vmem:[#allocation104_spill] sm:$0xff] }
  0xc6   : > { %v6717_v59 = vrot.slane %v606_v23, %v5331_v5  ;;  %v1354_v32 = vcombine.low %v8964_v21, %v8963_v15  ;;  %v4971_v50 = vpack.i.bf16 %v6694_v31, %v3343_v56  ;;  %v1355_v14 = vcombine.low %v8967_v17, %v8966_v12 }
  0xc7   : > { %v6726_v9 = vcombine.high %v6710_v10, %v6710_v10  ;;  %v1456_v36 = vcombine.low %v6690_v49, %v6707_v19  ;;  %v1473_v4 = vcombine.low %v6700_v54, %v6710_v10  ;;  %4977 = vrot.lane.b32.xlu1 %v4976_v33, %s5287_s20  ;;  %v6734_v51 = vrot.slane %v1440_v48, %v5331_v5 }
  0xc8   : > { %8962 = vst [vmem:[#allocation33_spill] sm:$0xff] %v6717_v59  ;;  %v1457_v35 = vcombine.low %v6697_v42, %v6714_v18  ;;  %v6741_v23 = vrot.slane %v1354_v32, %v5331_v5  ;;  %4972 = vrot.lane.b32.xlu0 %v4971_v50, %s5287_s20  ;;  %v1371_v20 = vcombine.low %v6134_v58, %v6117_v39  ;;  %v951_v2 = vrot.slane %v6690_v49, 7 }
  0xc9   : > { %8965 = vst [vmem:[#allocation39_spill] sm:$0xff] %v6734_v51  ;;  %v6745_v56 = vrot.slane %v1456_v36, %v5331_v5  ;;  %v1474_v33 = vcombine.low %v6726_v9, %v6717_v59  ;;  %v6750_v48 = vrot.slane %v1473_v4, %v5331_v5  ;;  %v6760_v50 = vrot.slane %v1355_v14, %v5331_v5 }
  0xca   : > { %8968 = vst [vmem:[#allocation80_spill] sm:$0xff] %v6741_v23  ;;  %v6757_v32 = vrot.slane %v1457_v35, %v5331_v5  ;;  %v3524_v36 = vcombine.low %v1352_v22, %v6741_v23  ;;  %v6769_v11 = vrot.slane %v1371_v20, %v5331_v5  ;;  %v6773_v43 = vcombine.high %v6700_v54, %v6700_v54 }
  0xcb   : > { %8969 = vst [vmem:[#allocation57_spill] sm:$0xff] %v6745_v56  ;;  %8970 = vst [vmem:[#allocation23_spill] sm:$0xff] %v6750_v48  ;;  %v6764_v41 = vrot.slane %v1474_v33, %v5331_v5  ;;  %v3530_v4 = vcombine.low %v6734_v51, %v6745_v56  ;;  %v8974_v22 = vrot.slane %v6564_v24, 7  ;;  %v954_v16 = vrot.slane %v6707_v19, 7 }
  0xcc   : > { %8972 = vst [vmem:[#allocation62_spill] sm:$0xff] %v6757_v32  ;;  %v3531_v35 = vcombine.low %v6757_v32, %v6750_v48  ;;  %v3525_v20 = vcombine.low %v6760_v50, %v6769_v11  ;;  %v957_v31 = vrot.slane %v6697_v42, 7  ;;  %v953_v14 = vrot.slane %v951_v2, 2 }
  0xcd   : > { %8973 = vst [vmem:[#allocation25_spill] sm:$0xff] %v6764_v41  ;;  %v950_v33 = vrot.slane %v8974_v22, 2  ;;  %v960_v22 = vrot.slane %v6714_v18, 7  ;;  %v956_v6 = vrot.slane %v954_v16, 2  ;;  %v963_v51 = vrot.slane %v6700_v54, 7 }
  0xce   : > { %v4986_v56 = vpack.i.bf16 %v3531_v35, %v3530_v4  ;;  %v4981_v23 = vpack.i.bf16 %v3525_v20, %v3524_v36  ;;  %v959_v59 = vrot.slane %v957_v31, 2  ;;  %v6797_v48 = vsel %vm5514_vm6, %v953_v14, %v954_v16  ;;  %v6821_v20 = vpop.permute.xlu1 %4767 }
  0xcf   : > { %v6790_v32 = vsel %vm5514_vm6, %v950_v33, %v951_v2  ;;  %v962_v41 = vrot.slane %v960_v22, 2  ;;  %v966_v4 = vrot.slane %v6773_v43, 7  ;;  %v4622_v35 = vrot.slane %v6710_v10, 9 }
  0xd0   : > { %4987 = vrot.lane.b32.xlu1 %v4986_v56, %s5288_s21  ;;  %4982 = vrot.lane.b32.xlu0 %v4981_v23, %s5288_s21  ;;  %v6804_v2 = vsel %vm5514_vm6, %v956_v6, %v957_v31  ;;  %v6808_v36 = vsel %vm5514_vm6, %v959_v59, %v960_v22  ;;  %v965_v56 = vrot.slane %v963_v51, 2  ;;  %v8719_v33 = vrot.slane %v6726_v9, 7  ;;  %v8975_v6 = vld [vmem:[#allocation67_spill] sm:$0xff] }
  0xd1   : > { %v6813_v16 = vsel %vm5514_vm6, %v962_v41, %v963_v51  ;;  %v1881_v14 = vcombine.low %v6625_v8, %v6790_v32  ;;  %v1897_v23 = vcombine.low %v6797_v48, %v6804_v2  ;;  %v3663_v31 = vcombine.low %v8975_v6, %v6190_v38 }
  0xd2   : > { %v6825_v59 = vsel %vm5514_vm6, %v965_v56, %v966_v4  ;;  %v6831_v41 = vsel %vm5514_vm6, %v4622_v35, %v8719_v33  ;;  %v1898_v8 = vcombine.low %v6808_v36, %v6813_v16  ;;  %v3664_v51 = vcombine.low %v6209_v3, %v6214_v40 }
  0xd3   : > { %v6838_v38 = vrot.slane %v1881_v14, %v5331_v5  ;;  %v6841_v22 = vrot.slane %v1897_v23, %v5331_v5  ;;  %v1914_v4 = vcombine.low %v6825_v59, %v6831_v41  ;;  %v2372_v56 = vcombine.low %v6564_v24, %v6690_v49 }
  0xd4   : > { %v6848_v35 = vrot.slane %v1898_v8, %v5331_v5  ;;  %v4991_v6 = vpack.i.bf16 %v3664_v51, %v3663_v31  ;;  %v2388_v33 = vcombine.low %v6707_v19, %v6697_v42  ;;  %v2389_v3 = vcombine.low %v6714_v18, %v6700_v54 }
  0xd5   : > { %v6855_v40 = vrot.slane %v1914_v4, %v5331_v5  ;;  %v3669_v14 = vcombine.low %v6838_v38, %v6841_v22  ;;  %v6860_v23 = vrot.slane %v2372_v56, %v5331_v5  ;;  %v4632_v24 = vcombine.high %v6700_v54, %v6710_v10  ;;  %v6884_v4 = vpop.permute.xlu1 %4772 }
  0xd6   : > { %4992 = vrot.lane.b32.xlu0 %v4991_v6, %s5290_s23  ;;  %v6866_v49 = vrot.slane %v2388_v33, %v5331_v5  ;;  %v6869_v42 = vrot.slane %v2389_v3, %v5331_v5  ;;  %v2270_v19 = vcombine.low %v8959_v60, %v8964_v21  ;;  %v4630_v18 = vcombine.high %v8964_v21, %v8963_v15 }
  0xd7   : > { %v3670_v31 = vcombine.low %v6848_v35, %v6855_v40  ;;  %v6878_v8 = vrot.slane %v4632_v24, %v5331_v5  ;;  %v2287_v51 = vcombine.low %v8966_v12, %v6134_v58  ;;  %v2303_v33 = vcombine.low %v6117_v39, %v6141_v34 }
  0xd8   : > { %8976 = vst [vmem:[#allocation65_spill] sm:$0xff] %v6866_v49  ;;  %v6888_v60 = vcombine.low %v6860_v23, %v6866_v49  ;;  %v2284_v56 = vrot.slane %v2270_v19, %v5331_v5  ;;  %v6892_v6 = vrot.slane %v4630_v18, %v5331_v5  ;;  %v2268_v3 = vcombine.low %v6482_v1, %v6490_v28  ;;  %v6910_v28 = vpop.permute.xlu0 %4762 }
  0xd9   : > { %v4996_v24 = vpack.i.bf16 %v3670_v31, %v3669_v14  ;;  %v3818_v58 = vcombine.low %v6869_v42, %v6878_v8  ;;  %v6899_v39 = vrot.slane %v2287_v51, %v5331_v5  ;;  %v6902_v12 = vrot.slane %v2303_v33, %v5331_v5 }
  0xda   : > { %v3814_v49 = vcombine.low %v2284_v56, %v6892_v6  ;;  %v2285_v19 = vcombine.low %v6493_v63, %v2284_v56  ;;  %v1863_v18 = vcombine.low %v6593_v29, %v6600_v26  ;;  %v1864_v1 = vcombine.low %v6604_v0, %v6610_v7 }
  0xdb   : > { %4997 = vrot.lane.b32.xlu1 %v4996_v24, %s5290_s23  ;;  %v5006_v14 = vpack.i.bf16 %v3818_v58, %v6888_v60  ;;  %v2640_v31 = vcombine.low %v6899_v39, %v6902_v12  ;;  %v1880_v51 = vcombine.low %v6617_v25, %v6636_v57  ;;  %v2631_v63 = vcombine.low %v8963_v15, %v8967_v17  ;;  %v6934_v57 = vpop.permute.xlu1 %4792  ;;  %v8980_v17 = vld [vmem:[#allocation61_spill] sm:$0xff] }
  0xdc   : > { %v5016_v33 = vpack.i.bf16 %v2285_v19, %v2268_v3  ;;  %v6921_v29 = vrot.slane %v1863_v18, %v5331_v5  ;;  %v6924_v26 = vrot.slane %v1864_v1, %v5331_v5  ;;  %v2370_v0 = vcombine.low %v6588_v27, %v6582_v47 }
  0xdd   : > { %v5001_v7 = vpack.i.bf16 %v2640_v31, %v3814_v49  ;;  %v6929_v24 = vrot.slane %v1880_v51, %v5331_v5  ;;  %v2638_v58 = vrot.slane %v2631_v63, %v5331_v5  ;;  %v2371_v25 = vcombine.low %v6539_v55, %v6568_v62 }
  0xde   : > { %8977 = vst [vmem:[#allocation66_spill] sm:$0xff] %v6921_v29  ;;  %8978 = vst [vmem:[#allocation68_spill] sm:$0xff] %v6924_v26  ;;  %v1879_v15 = vcombine.low %v6921_v29, %v6924_v26  ;;  %v2978_v3 = vcombine.low %v8980_v17, %v6157_v46  ;;  %v2979_v19 = vcombine.low %v6163_v52, %v6170_v53  ;;  %v8982_v1 = vrot.slane %v6726_v9, 7  ;;  %v8984_v17 = vld [vmem:[#allocation102_spill] sm:$0xff]  ;;  %v9021_v26 = vld [vmem:[#allocation21_spill] sm:$0xff] }
  0xdf   : > { %8979 = vst [vmem:[#allocation69_spill] sm:$0xff] %v6929_v24  ;;  %v2995_v49 = vcombine.low %v6174_v37, %v6181_v13  ;;  %5007 = vrot.lane.b32.xlu1 %v5006_v14, %s5292_s25  ;;  %5002 = vrot.lane.b32.xlu0 %v5001_v7, %s5292_s25  ;;  %v1896_v55 = vcombine.low %v6929_v24, %v6838_v38  ;;  %v6958_v13 = vpop.permute.xlu0 %4777 }
  0xe0   : > { %v2639_v62 = vcombine.low %v2284_v56, %v2638_v58  ;;  %v6949_v18 = vrot.slane %v2371_v25, %v5331_v5  ;;  %v972_v46 = vrot.slane %v8982_v1, 2  ;;  %v2986_v51 = vrot.slane %v2978_v3, %v5331_v5  ;;  %8983 = vst [vmem:[#allocation71_spill] sm:$0xff] %v6958_v13  ;;  %v9030_v13 = vld [vmem:[#allocation27_spill] sm:$0xff] }
  0xe1   : > { %v2993_v52 = vrot.slane %v2979_v19, %v5331_v5  ;;  %v2996_v53 = vcombine.low %v6185_v44, %v6198_v30  ;;  %v3003_v37 = vrot.slane %v2995_v49, %v5331_v5  ;;  %v5011_v14 = vpack.i.bf16 %v1896_v55, %v1879_v15 }
  0xe2   : > { %8981 = vst [vmem:[#allocation36_spill] sm:$0xff] %v6949_v18  ;;  %v5026_v38 = vpack.i.bf16 %v2640_v31, %v2639_v62  ;;  %v2387_v56 = vcombine.low %v6949_v18, %v6860_v23  ;;  %v2670_v63 = vcombine.low %v6710_v10, %v6726_v9  ;;  %v1372_v25 = vcombine.low %v6141_v34, %v6137_v61  ;;  %v8985_v23 = vld [vmem:[#allocation33_spill] sm:$0xff]  ;;  %v6975_v9 = vpop.permute.xlu1 %4797  ;;  %v9019_v18 = vld [vmem:[#allocation20_spill] sm:$0xff] }
  0xe3   : > { %v2994_v7 = vcombine.low %v2986_v51, %v2993_v52  ;;  %v3010_v58 = vrot.slane %v2996_v53, %v5331_v5  ;;  %v3344_v44 = vcombine.low %v8964_v21, %v8984_v17  ;;  %5017 = vrot.lane.b32.xlu1 %v5016_v33, %s5286_s19  ;;  %5012 = vrot.lane.b32.xlu0 %v5011_v14, %s5289_s22  ;;  %v8721_v15 = vrot.slane %v8985_v23, 7  ;;  %v8986_v14 = vld [vmem:[#allocation81_spill] sm:$0xff]  ;;  %v8992_v17 = vld [vmem:[#allocation83_spill] sm:$0xff] }
  0xe4   : > { %v5021_v30 = vpack.i.bf16 %v2387_v56, %v2370_v0  ;;  %v2677_v31 = vrot.slane %v2670_v63, %v5331_v5  ;;  %v3080_v10 = vcombine.low %v6790_v32, %v6797_v48  ;;  %v1386_v34 = vrot.slane %v1372_v25, %v5331_v5  ;;  %v8988_v56 = vld [vmem:[#allocation82_spill] sm:$0xff]  ;;  %v8991_v25 = vld [vmem:[#allocation87_spill] sm:$0xff] }
  0xe5   : > { %v3011_v3 = vcombine.low %v3003_v37, %v3010_v58  ;;  %v3351_v19 = vrot.slane %v3344_v44, %v5331_v5  ;;  %v3081_v21 = vcombine.low %v6804_v2, %v6808_v36  ;;  %v6986_v0 = vsel %vm5514_vm6, %v972_v46, %v8721_v15  ;;  %v6996_v36 = vpop.permute.xlu0 %4782  ;;  %v8989_v63 = vld [vmem:[#allocation78_spill] sm:$0xff] }
  0xe6   : > { %v2678_v33 = vcombine.low %v6869_v42, %v2677_v31  ;;  %v3088_v48 = vrot.slane %v3080_v10, %v5331_v5  ;;  %v3097_v32 = vcombine.low %v6813_v16, %v6825_v59  ;;  %v6992_v55 = vcombine.low %v6769_v11, %v1386_v34  ;;  %v8994_v31 = vld [vmem:[#allocation57_spill] sm:$0xff] }
  0xe7   : > { %v5036_v49 = vpack.i.bf16 %v3011_v3, %v2994_v7  ;;  %v3352_v62 = vcombine.low %v3351_v19, %v6760_v50  ;;  %v3095_v2 = vrot.slane %v3081_v21, %v5331_v5  ;;  %5027 = vrot.lane.b32.xlu1 %v5026_v38, %s5285_s18  ;;  %5022 = vrot.lane.b32.xlu0 %v5021_v30, %s5286_s19  ;;  %v8987_v38 = vld [vmem:[#allocation77_spill] sm:$0xff]  ;;  %v7013_v7 = vpop.permute.xlu1 %4807  ;;  %v8993_v30 = vld [vmem:[#allocation62_spill] sm:$0xff] }
  0xe8   : > { %v5031_v1 = vpack.i.bf16 %v2678_v33, %v6888_v60  ;;  %v3098_v46 = vcombine.low %v6831_v41, %v6986_v0  ;;  %v3105_v16 = vrot.slane %v3097_v32, %v5331_v5  ;;  %v1388_v60 = vcombine.low %v8987_v38, %v8986_v14  ;;  %8990 = vst [vmem:[#allocation70_spill] sm:$0xff] %v7013_v7  ;;  %v8997_v14 = vld [vmem:[#allocation107_spill] sm:$0xff] }
  0xe9   : > { %v5046_v11 = vpack.i.bf16 %v6992_v55, %v3352_v62  ;;  %v3096_v59 = vcombine.low %v3088_v48, %v3095_v2  ;;  %v1389_v41 = vcombine.low %v8989_v63, %v8988_v56  ;;  %v1405_v44 = vcombine.low %v8992_v17, %v8991_v25  ;;  %v7040_v2 = vpop.permute.xlu0 %4787  ;;  %v207_v56 = vld [vmem:[%s5329_s17 + $0xc0] sm:$0xff]  ;;  %v8999_v17 = vld [vmem:[#allocation101_spill] sm:$0xff] }
  0xea   : > { %v3112_v53 = vrot.slane %v3098_v46, %v5331_v5  ;;  %v7020_v10 = vcombine.low %v8994_v31, %v8993_v30  ;;  %v3380_v3 = vcombine.low %v6700_v54, %v6773_v43  ;;  %v7027_v21 = vrot.slane %v1388_v60, %v5331_v5  ;;  %v9002_v54 = vld [vmem:[#allocation18_spill] sm:$0xff]  ;;  %v9005_v48 = vld [vmem:[#allocation5_spill] sm:$0xff]  ;;  %v9006_v43 = vld [vmem:[#allocation3_spill] sm:$0xff] }
  0xeb   : > { %5037 = vrot.lane.b32.xlu1 %v5036_v49, %s5291_s24  ;;  %5032 = vrot.lane.b32.xlu0 %v5031_v1, %s5285_s18  ;;  %v7030_v33 = vrot.slane %v1389_v41, %v5331_v5  ;;  %v7034_v32 = vrot.slane %v1405_v44, %v5331_v5  ;;  %v206_v49 = vld [vmem:[%s5329_s17 + $0xb8] sm:$0xff]  ;;  %v9000_v44 = vld [vmem:[#allocation98_spill] sm:$0xff]  ;;  %v1150_v51 = vcombine.low %v9006_v43, %v9005_v48  ;;  %v9008_v43 = vld [vmem:[#allocation8_spill] sm:$0xff] }
  0xec   : > { %8995 = vst [vmem:[#allocation74_spill] sm:$0xff] %v7020_v10  ;;  %v3113_v19 = vcombine.low %v3105_v16, %v3112_v53  ;;  %v3387_v62 = vrot.slane %v3380_v3, %v5331_v5  ;;  %v3526_v16 = vcombine.low %v1386_v34, %v7027_v21  ;;  %v8996_v53 = vld [vmem:[#allocation97_spill] sm:$0xff]  ;;  %v3666_v30 = vcombine.low %v9000_v44, %v8999_v17 }
  0xed   : > { %v3665_v60 = vcombine.low %v8997_v14, %v8996_v53  ;;  %v3527_v63 = vcombine.low %v7030_v33, %v7034_v32  ;;  %v8998_v41 = vld [vmem:[#allocation25_spill] sm:$0xff]  ;;  %v623_v34 = vcombine.high %v206_v49, %v206_v49  ;;  %v7060_v31 = vrot.slane %v206_v49, %v5331_v5  ;;  %v7063_v53 = vpop.permute.xlu1 %4817  ;;  %v7094_v52 = vpop.permute.xlu0 %4802 }
  0xee   : > { %v5041_v1 = vpack.i.bf16 %v3113_v19, %v3096_v59  ;;  %v3388_v25 = vcombine.low %v3387_v62, %v8998_v41  ;;  %v7055_v59 = vcombine.high %v8985_v23, %v8985_v23  ;;  %v639_v3 = vcombine.high %v207_v56, %v207_v56  ;;  %v9011_v46 = vld [vmem:[#allocation9_spill] sm:$0xff] }
  0xef   : > { %5047 = vrot.lane.b32.xlu1 %v5046_v11, %s5287_s20  ;;  %v4795_v19 = vunpack.i.h.bf16 %v6934_v57  ;;  %v5056_v62 = vpack.i.bf16 %v3527_v63, %v3526_v16  ;;  %v7068_v44 = vrot.slane %v207_v56, %v5331_v5  ;;  %v7071_v11 = vrot.slane %v623_v34, %v5331_v5  ;;  %v9001_v56 = vld [vmem:[#allocation17_spill] sm:$0xff] }
  0xf0   : > { %5042 = vrot.lane.b32.xlu0 %v5041_v1, %s5291_s24  ;;  %v5051_v14 = vpack.i.bf16 %v3388_v25, %v7020_v10  ;;  %v7075_v49 = vcombine.high %v7060_v31, %v7060_v31  ;;  %v7078_v1 = vrot.slane %v639_v3, %v5331_v5  ;;  %v1490_v16 = vcombine.low %v7055_v59, %v7060_v31 }
  0xf1   : > { %v5066_v63 = vpack.i.bf16 %v3666_v30, %v3665_v60  ;;  %v7084_v25 = vcombine.high %v7068_v44, %v7068_v44  ;;  %v9003_v17 = vcombine.low %v9001_v56, %v9002_v54  ;;  %v4794_v3 = vunpack.i.l.bf16 %v6934_v57  ;;  %v9012_v57 = vld [vmem:[#allocation6_spill] sm:$0xff] }
  0xf2   : > { %v7100_v60 = vcombine.high %v7078_v1, %v7078_v1  ;;  %v1491_v30 = vcombine.low %v7075_v49, %v7071_v11  ;;  %v7105_v54 = vrot.slane %v1490_v16, %v5331_v5  ;;  %v1167_v37 = vcombine.low %v9012_v57, %v9011_v46  ;;  %v7122_v58 = vpop.permute.xlu1 %4832  ;;  %v9017_v57 = vld [vmem:[#allocation105_spill] sm:$0xff] }
  0xf3   : > { %v7090_v34 = vsel %vm3931_vm7, %v9003_v17, %v4795_v19  ;;  %5057 = vrot.lane.b32.xlu1 %v5056_v62, %s5288_s21  ;;  %v1507_v48 = vcombine.low %v7068_v44, %v7084_v25  ;;  %v9009_v19 = vld [vmem:[#allocation4_spill] sm:$0xff]  ;;  %v4785_v10 = vunpack.i.h.bf16 %v6996_v36  ;;  %v4784_v46 = vunpack.i.l.bf16 %v6996_v36 }
  0xf4   : > { %9004 = vst [vmem:[#allocation72_spill] sm:$0xff] %v7090_v34  ;;  %5052 = vrot.lane.b32.xlu0 %v5051_v14, %s5287_s20  ;;  %9007 = vst [vmem:[#allocation79_spill] sm:$0xff] %v7105_v54  ;;  %v1151_v62 = vcombine.low %v9009_v19, %v9008_v43  ;;  %v1158_v14 = vrot.slane %v1150_v51, %v5331_v5  ;;  %v7114_v17 = vrot.slane %v1491_v30, %v5331_v5  ;;  %v9014_v43 = vld [vmem:[#allocation2_spill] sm:$0xff]  ;;  %v9015_v19 = vld [vmem:[#allocation7_spill] sm:$0xff] }
  0xf5   : > { %v1508_v56 = vcombine.low %v7078_v1, %v7100_v60  ;;  %v3532_v16 = vcombine.low %v8998_v41, %v7105_v54  ;;  %v7125_v15 = vrot.slane %v1507_v48, %v5331_v5  ;;  %v1168_v30 = vcombine.low %v9015_v19, %v9014_v43  ;;  %v9018_v19 = vld [vmem:[#allocation38_spill] sm:$0xff] }
  0xf6   : > { %9010 = vst [vmem:[#allocation75_spill] sm:$0xff] %v7114_v17  ;;  %v1165_v51 = vrot.slane %v1151_v62, %v5331_v5  ;;  %v1175_v41 = vrot.slane %v1167_v37, %v5331_v5  ;;  %v2304_v48 = vcombine.low %v6137_v61, %v9017_v57  ;;  %v7144_v27 = vcombine.low %v9019_v18, %v9018_v19  ;;  %v9023_v37 = vld [vmem:[#allocation35_spill] sm:$0xff] }
  0xf7   : > { %9013 = vst [vmem:[#allocation40_spill] sm:$0xff] %v7125_v15  ;;  %5067 = vrot.lane.b32.xlu1 %v5066_v63, %s5290_s23  ;;  %v7133_v34 = vrot.slane %v1508_v56, %v5331_v5  ;;  %v3533_v62 = vcombine.low %v7114_v17, %v7125_v15  ;;  %v1182_v43 = vrot.slane %v1168_v30, %v5331_v5  ;;  %v976_v19 = vrot.slane %v7055_v59, 7  ;;  %v9029_v17 = vld [vmem:[#allocation24_spill] sm:$0xff] }
  0xf8   : > { %v1166_v47 = vcombine.low %v1158_v14, %v1165_v51  ;;  %v7146_v63 = vpop.permute.xlu0 %4812  ;;  %v7151_v36 = vrot.slane %v2304_v48, %v5331_v5  ;;  %v7155_v56 = vcombine.high %v7071_v11, %v7071_v11  ;;  %v9020_v14 = vrot.slane %v8985_v23, 7 }
  0xf9   : > { %9016 = vst [vmem:[#allocation41_spill] sm:$0xff] %v7133_v34  ;;  %v5061_v30 = vpack.i.bf16 %v3533_v62, %v3532_v16  ;;  %v1183_v57 = vcombine.low %v1175_v41, %v1182_v43  ;;  %v7163_v24 = vsel %vm3931_vm7, %v9021_v26, %v4794_v3  ;;  %v979_v15 = vrot.slane %v7060_v31, 7 }
  0xfa   : > { %v975_v51 = vrot.slane %v9020_v14, 2  ;;  %v3932_v18 = vsel %vm3931_vm7, %v1166_v47, %v4784_v46  ;;  %9022 = vst [vmem:[#allocation43_spill] sm:$0xff] %v7163_v24  ;;  %v3815_v48 = vcombine.low %v7151_v36, %v9023_v37  ;;  %v982_v29 = vrot.slane %v7075_v49, 7 }
  0xfb   : > { %v7169_v34 = vpop.permute.xlu1 %4837  ;;  %5062 = vrot.lane.b32.xlu0 %v5061_v30, %s5288_s21  ;;  %v3933_v41 = vsel %vm3931_vm7, %v1183_v57, %v4785_v10  ;;  %v9025_v47 = vunpack.i.l.bf16 %v6910_v28  ;;  %v978_v26 = vrot.slane %v976_v19, 2  ;;  %v985_v3 = vrot.slane %v7071_v11, 7 }
  0xfc   : > { %9024 = vst [vmem:[#allocation45_spill] sm:$0xff] %v7169_v34  ;;  %v7179_v46 = vpop.permute.xlu0 %4822  ;;  %v5076_v62 = vpack.i.bf16 %v7144_v27, %v3815_v48  ;;  %v7184_v43 = vsel %vm5514_vm6, %v975_v51, %v976_v19  ;;  %v981_v14 = vrot.slane %v979_v15, 2  ;;  %v984_v30 = vrot.slane %v982_v29, 2 }
  0xfd   : > { %v7176_v16 = vsel %vm3957_vm8, %v3932_v18, %v9025_v47  ;;  %v7188_v10 = vsel %vm5514_vm6, %v978_v26, %v979_v15  ;;  %v987_v57 = vrot.slane %v985_v3, 2  ;;  %v988_v18 = vrot.slane %v7155_v56, 7 }
  0xfe   : > { %v4623_v47 = vrot.slane %v7068_v44, 9  ;;  %5077 = vrot.lane.b32.xlu1 %v5076_v62, %s5292_s25  ;;  %v7195_v48 = vsel %vm5514_vm6, %v981_v14, %v982_v29  ;;  %v7199_v51 = vsel %vm5514_vm6, %v984_v30, %v985_v3  ;;  %v992_v19 = vrot.slane %v7084_v25, 7 }
  0xff   : > { %v7205_v26 = vsel %vm5514_vm6, %v987_v57, %v988_v18  ;;  %v1915_v24 = vcombine.low %v6986_v0, %v7184_v43  ;;  %v1931_v62 = vcombine.low %v7188_v10, %v7195_v48  ;;  %v4800_v29 = vunpack.i.h.bf16 %v6975_v9 }
 0x100   : > { %v7212_v14 = vpop.permute.xlu0 %4827  ;;  %v7214_v3 = vpop.permute.xlu1 %4847  ;;  %v7218_v30 = vsel %vm5514_vm6, %v4623_v47, %v992_v19  ;;  %v994_v15 = vrot.slane %v992_v19, 2  ;;  %v1932_v57 = vcombine.low %v7199_v51, %v7205_v26  ;;  %v4799_v18 = vunpack.i.l.bf16 %v6975_v9 }
 0x101   : > { %9026 = vst [vmem:[#allocation42_spill] sm:$0xff] %v7212_v14  ;;  %9027 = vst [vmem:[#allocation49_spill] sm:$0xff] %v7214_v3  ;;  %v1929_v0 = vrot.slane %v1915_v24, %v5331_v5  ;;  %v7225_v54 = vrot.slane %v1931_v62, %v5331_v5  ;;  %v9031_v14 = vcombine.low %v9029_v17, %v9030_v13  ;;  %v4790_v47 = vunpack.i.h.bf16 %v7040_v2 }
 0x102   : > { %v9033_v19 = vunpack.i.h.bf16 %v6910_v28  ;;  %v9034_v9 = vrot.slane %v7078_v1, 7  ;;  %v7246_v62 = vrot.slane %v1932_v57, %v5331_v5  ;;  %v4789_v13 = vunpack.i.l.bf16 %v7040_v2  ;;  %v9036_v28 = vld [vmem:[#allocation22_spill] sm:$0xff] }
 0x103   : > { %9028 = vst [vmem:[#allocation44_spill] sm:$0xff] %v7225_v54  ;;  %v7231_v3 = vsel %vm3931_vm7, %v9031_v14, %v4800_v29  ;;  %v3671_v29 = vcombine.low %v1929_v0, %v7225_v54  ;;  %v1913_v14 = vcombine.low %v6841_v22, %v6848_v35  ;;  %v9038_v57 = vld [vmem:[#allocation10_spill] sm:$0xff]  ;;  %v2406_v54 = vcombine.low %v8985_v23, %v7055_v59  ;;  %v9041_v35 = vld [vmem:[#allocation11_spill] sm:$0xff] }
 0x104   : > { %9032 = vst [vmem:[#allocation63_spill] sm:$0xff] %v7231_v3  ;;  %v7237_v34 = vsel %vm3957_vm8, %v3933_v41, %v9033_v19  ;;  %v7243_v24 = vsel %vm5514_vm6, %v994_v15, %v9034_v9  ;;  %v7254_v41 = vsel %vm3931_vm7, %v9036_v28, %v4799_v18  ;;  %v7258_v19 = vpop.permute.xlu0 %4842  ;;  %v7260_v15 = vpop.permute.xlu1 %4857  ;;  %v9039_v9 = vld [vmem:[#allocation13_spill] sm:$0xff]  ;;  %v2422_v18 = vcombine.low %v7060_v31, %v7075_v49 }
 0x105   : > { %9035 = vst [vmem:[#allocation48_spill] sm:$0xff] %v7243_v24  ;;  %v1948_v17 = vcombine.low %v7218_v30, %v7243_v24  ;;  %9037 = vst [vmem:[#allocation46_spill] sm:$0xff] %v7254_v41  ;;  %v9040_v3 = vcombine.low %v9038_v57, %v9039_v9  ;;  %v1930_v24 = vcombine.low %v6855_v40, %v1929_v0  ;;  %v4809_v59 = vunpack.i.l.bf16 %v7013_v7  ;;  %v9047_v41 = vld [vmem:[#allocation26_spill] sm:$0xff] }
 0x106   : > { %v7278_v28 = vsel %vm3931_vm7, %v9041_v35, %v4789_v13  ;;  %v2423_v57 = vcombine.low %v7071_v11, %v7155_v56  ;;  %v2420_v0 = vrot.slane %v2406_v54, %v5331_v5  ;;  %v7286_v23 = vrot.slane %v2422_v18, %v5331_v5  ;;  %v9043_v13 = vld [vmem:[#allocation12_spill] sm:$0xff] }
 0x107   : > { %v7266_v2 = vsel %vm3931_vm7, %v9040_v3, %v4790_v47  ;;  %v7274_v22 = vrot.slane %v1948_v17, %v5331_v5  ;;  %v2439_v3 = vcombine.low %v7084_v25, %v7078_v1  ;;  %v5086_v40 = vpack.i.bf16 %v1930_v24, %v1913_v14  ;;  %v9042_v24 = vld [vmem:[#allocation14_spill] sm:$0xff] }
 0x108   : > { %v7292_v49 = vrot.slane %v2423_v57, %v5331_v5  ;;  %v7298_v25 = vpop.permute.xlu0 %4852  ;;  %v2679_v54 = vcombine.low %v2420_v0, %v7286_v23  ;;  %v9044_v17 = vcombine.low %v9042_v24, %v9043_v13  ;;  %v4805_v9 = vunpack.i.h.bf16 %v7094_v52  ;;  %v9050_v13 = vld [vmem:[#allocation15_spill] sm:$0xff] }
 0x109   : > { %v3672_v31 = vcombine.low %v7246_v62, %v7274_v22  ;;  %v7295_v47 = vrot.slane %v2439_v3, %v5331_v5  ;;  %5087 = vrot.lane.b32.xlu1 %v5086_v40, %s5289_s22  ;;  %v4804_v18 = vunpack.i.l.bf16 %v7094_v52  ;;  %v7310_v35 = vpop.permute.xlu1 %4867  ;;  %v9046_v40 = vld [vmem:[#allocation65_spill] sm:$0xff]  ;;  %v2421_v7 = vcombine.low %v6878_v8, %v2420_v0  ;;  %v9053_v0 = vld [vmem:[#allocation84_spill] sm:$0xff] }
 0x10a   : > { %v7306_v14 = vsel %vm3931_vm7, %v9044_v17, %v4809_v59  ;;  %v2404_v56 = vcombine.low %v9046_v40, %v6869_v42  ;;  %v7319_v24 = vsel %vm3931_vm7, %v9047_v41, %v4805_v9  ;;  %v9049_v59 = vld [vmem:[#allocation16_spill] sm:$0xff]  ;;  %v9054_v40 = vld [vmem:[#allocation86_spill] sm:$0xff]  ;;  %v4820_v9 = vunpack.i.h.bf16 %v7063_v53 }
 0x10b   : > { %9045 = vst [vmem:[#allocation59_spill] sm:$0xff] %v7306_v14  ;;  %v5071_v57 = vpack.i.bf16 %v3672_v31, %v3671_v29  ;;  %v3819_v3 = vcombine.low %v7292_v49, %v7295_v47  ;;  %9048 = vst [vmem:[#allocation85_spill] sm:$0xff] %v7319_v24  ;;  %v9051_v17 = vcombine.low %v9049_v59, %v9050_v13  ;;  %v9099_v14 = vld [vmem:[#allocation68_spill] sm:$0xff] }
 0x10c   : > { %v2302_v29 = vcombine.low %v6892_v6, %v6899_v39  ;;  %v2319_v31 = vcombine.low %v6902_v12, %v7151_v36  ;;  %v5096_v8 = vpack.i.bf16 %v2421_v7, %v2404_v56  ;;  %v1406_v41 = vcombine.low %v9054_v40, %v9053_v0  ;;  %v7338_v59 = vpop.permute.xlu0 %4862 }
 0x10d   : > { %v7325_v52 = vsel %vm3931_vm7, %v9051_v17, %v4804_v18  ;;  %5072 = vrot.lane.b32.xlu0 %v5071_v57, %s5290_s23  ;;  %v5081_v42 = vpack.i.bf16 %v3819_v3, %v2679_v54  ;;  %v5266_v18 = vld [vmem:[%s8539_s1] sm:$0xff]   ;;  %v4819_v6 = vunpack.i.l.bf16 %v7063_v53  ;;  %v4815_v39 = vunpack.i.h.bf16 %v7146_v63  ;;  %v7343_v36 = vpop.permute.xlu1 %4877  ;;  %v9058_v17 = vld [vmem:[#allocation80_spill] sm:$0xff] }
 0x10e   : > { %9052 = vst [vmem:[#allocation64_spill] sm:$0xff] %v7325_v52  ;;  %v5091_v13 = vpack.i.bf16 %v2319_v31, %v2302_v29  ;;  %v4814_v12 = vunpack.i.l.bf16 %v7146_v63  ;;  %5097 = vrot.lane.b32.xlu1 %v5096_v8, %s5286_s19  ;;  %v7347_v7 = vrot.slane %v1406_v41, %v5331_v5  ;;  %v2680_v56 = vcombine.low %v7071_v11, %v7068_v44 }
 0x10f   : > { %v2641_v57 = vcombine.low %v6137_v61, %v8987_v38  ;;  %v9055_v53 = vcombine.low %v7027_v21, %v7030_v33  ;;  %v7361_v63 = vsel %vm3931_vm7, %v6992_v55, %v4815_v39  ;;  %v9059_v29 = vcombine.low %v9058_v17, %v6760_v50 }
 0x110   : > { %9057 = vst [vmem:[#allocation76_spill] sm:$0xff] %v7361_v63  ;;  %v8743_v8 = vmov 0.0   ;;  %v1421_v21 = vcombine.low %v7034_v32, %v7347_v7  ;;  %v2687_v55 = vrot.slane %v2680_v56, %v5331_v5  ;;  %v4825_v39 = vunpack.i.h.bf16 %v7179_v46 }
 0x111   : > { %v7357_v3 = vsel %vm3931_vm7, %v9055_v53, %v4819_v6  ;;  %v7367_v31 = vsel %vm3931_vm7, %v9059_v29, %v4814_v12  ;;  %4677 = vmatprep.subr.bf16.mxu0 %v8743_v8  ;;  %4735 = vmatprep.subr.bf16.mxu1 %v8743_v8  ;;  %v2648_v41 = vrot.slane %v2641_v57, %v5331_v5  ;;  %v7378_v6 = vpop.permute.xlu0 %4872  ;;  %v4824_v53 = vunpack.i.l.bf16 %v7179_v46  ;;  %v7391_v17 = vpop.permute.xlu1 %4887 }
 0x112   : > { %9056 = vst [vmem:[#allocation60_spill] sm:$0xff] %v7357_v3  ;;  %9060 = vst [vmem:[#allocation96_spill] sm:$0xff] %v7367_v31  ;;  %5082 = vrot.lane.b32.xlu0 %v5081_v42, %s5292_s25  ;;  %4678 = vmatpush3.bf16.msra.mxu0 %v5266_v18  ;;  %v5267_v42 = vld [vmem:[%s8539_s1 + $0x8] sm:$0xff]   ;;  %v7386_v12 = vsel %vm3931_vm7, %v1421_v21, %v4820_v9  ;;  %v2688_v56 = vcombine.low %v2687_v55, %v7295_v47  ;;  %v9062_v29 = vunpack.i.l.bf16 %v6821_v20 }
 0x113   : > { %4679 = vmatprep.subr.bf16.mxu0 %v8743_v8  ;;  %4738 = vmatpush3.bf16.msra.mxu1 %v5266_v18  ;;  %9061 = vst [vmem:[#allocation52_spill] sm:$0xff] %v7386_v12  ;;  %v2649_v57 = vcombine.low %v2648_v41, %v9023_v37  ;;  %v9063_v18 = vunpack.i.h.bf16 %v6821_v20  ;;  %v9064_v21 = vrot.slane %v7078_v1, 7  ;;  %v998_v37 = vrot.slane %v7100_v60, 7 }
 0x114   : > { %4736 = vmatprep.subr.bf16.mxu1 %v8743_v8  ;;  %v3984_v0 = vsel %vm3983_vm9, %v7176_v16, %v9062_v29  ;;  %v5106_v46 = vpack.i.bf16 %v2688_v56, %v2679_v54  ;;  %v9065_v20 = vunpack.i.l.bf16 %v6884_v4  ;;  %v9066_v1 = vunpack.i.h.bf16 %v6884_v4 }
 0x115   : > { %v3985_v9 = vsel %vm3983_vm9, %v7237_v34, %v9063_v18  ;;  %v997_v55 = vrot.slane %v9064_v21, 2  ;;  %v5101_v41 = vpack.i.bf16 %v7144_v27, %v2649_v57  ;;  %v4010_v50 = vsel %vm4009_vm10, %v3984_v0, %v4824_v53  ;;  %v7409_v16 = vpop.permute.xlu0 %4882  ;;  %v9070_v53 = vld [vmem:[#allocation91_spill] sm:$0xff]  ;;  %v9071_v18 = vld [vmem:[#allocation90_spill] sm:$0xff] }
 0x116   : > { %5092 = vrot.lane.b32.xlu0 %v5091_v13, %s5286_s19  ;;  %v4011_v8 = vsel %vm4009_vm10, %v3985_v9, %v4825_v39  ;;  %v4036_v34 = vsel %vm4035_vm11, %v4010_v50, %v9065_v20  ;;  %v3114_v27 = vcombine.low %v7184_v43, %v7188_v10  ;;  %4680 = vmatpush3.bf16.msra.mxu0 %v5267_v42  ;;  %v9068_v50 = vld [vmem:[#allocation89_spill] sm:$0xff]  ;;  %v9069_v39 = vld [vmem:[#allocation106_spill] sm:$0xff]  ;;  %v9073_v9 = vld [vmem:[#allocation92_spill] sm:$0xff]  ;;  %v4869_v52 = vunpack.i.l.bf16 %v7310_v35 }
 0x117   : > { %v4037_v29 = vsel %vm4035_vm11, %v4011_v8, %v9066_v1  ;;  %v7421_v54 = vsel %vm5514_vm6, %v997_v55, %v998_v37  ;;  %5107 = vrot.lane.b32.xlu1 %v5106_v46, %s5285_s18  ;;  %v3115_v13 = vcombine.low %v7195_v48, %v7199_v51  ;;  %v3131_v4 = vcombine.low %v7205_v26, %v7218_v30  ;;  %v9067_v8 = vld [vmem:[#allocation48_spill] sm:$0xff]  ;;  %v9072_v10 = vld [vmem:[#allocation93_spill] sm:$0xff]  ;;  %v9074_v55 = vld [vmem:[#allocation95_spill] sm:$0xff] }
 0x118   : > { %v3132_v0 = vcombine.low %v9067_v8, %v7421_v54  ;;  %v3012_v56 = vcombine.low %v9069_v39, %v9068_v50  ;;  %v3122_v57 = vrot.slane %v3114_v27, %v5331_v5  ;;  %v3013_v43 = vcombine.low %v9071_v18, %v9070_v53  ;;  %v9075_v46 = vld [vmem:[#allocation94_spill] sm:$0xff]  ;;  %v7447_v27 = vpop.permute.xlu1 %4897  ;;  %v9077_v18 = vld [vmem:[#allocation45_spill] sm:$0xff]  ;;  %4739 = vmatpush3.bf16.msra.mxu1 %v5267_v42 }
 0x119   : > { %v3029_v21 = vcombine.low %v9073_v9, %v9072_v10  ;;  %v3030_v48 = vcombine.low %v9075_v46, %v9074_v55  ;;  %v9076_v51 = vmov 0.0   ;;  %v3129_v26 = vrot.slane %v3115_v13, %v5331_v5  ;;  %v7449_v8 = vpop.permute.xlu0 %4892  ;;  %v9078_v55 = vld [vmem:[#allocation42_spill] sm:$0xff] }
 0x11a   : > { %4681 = vmatprep.subr.bf16.mxu0 %v9076_v51  ;;  %5102 = vrot.lane.b32.xlu0 %v5101_v41, %s5285_s18  ;;  %v3139_v30 = vrot.slane %v3131_v4, %v5331_v5  ;;  %v3146_v20 = vrot.slane %v3132_v0, %v5331_v5  ;;  %v3020_v1 = vrot.slane %v3012_v56, %v5331_v5  ;;  %v4840_v41 = vunpack.i.h.bf16 %v9077_v18 }
 0x11b   : > { %v3027_v50 = vrot.slane %v3013_v43, %v5331_v5  ;;  %v3037_v39 = vrot.slane %v3029_v21, %v5331_v5  ;;  %v3044_v53 = vrot.slane %v3030_v48, %v5331_v5  ;;  %v3130_v13 = vcombine.low %v3122_v57, %v3129_v26  ;;  %4737 = vmatprep.subr.bf16.mxu1 %v9076_v51  ;;  %v9079_v26 = vld [vmem:[#allocation71_spill] sm:$0xff] }
 0x11c   : > { %v3147_v10 = vcombine.low %v3139_v30, %v3146_v20  ;;  %v4839_v4 = vunpack.i.l.bf16 %v9077_v18  ;;  %v3961_v9 = vsel %vm3957_vm8, %v7266_v2, %v4840_v41  ;;  %v4830_v42 = vunpack.i.h.bf16 %v9078_v55  ;;  %v9085_v41 = vld [vmem:[#allocation79_spill] sm:$0xff]  ;;  %4683 = vmatprep.mubr.msk.bf16.mxu0 %vm5294_vm1, %v9076_v51  ;;  %4711 = vmatprep.mubr.msk.bf16.mxu1 %vm5294_vm1, %v9076_v51 }
 0x11d   : > { %v3028_v0 = vcombine.low %v3020_v1, %v3027_v50  ;;  %v3045_v56 = vcombine.low %v3037_v39, %v3044_v53  ;;  %v7462_v57 = vpop.permute.xlu0 %4902  ;;  %v4829_v48 = vunpack.i.l.bf16 %v9078_v55  ;;  %v9080_v30 = vunpack.i.l.bf16 %v9079_v26 }
 0x11e   : > { %v5116_v43 = vpack.i.bf16 %v3147_v10, %v3130_v13  ;;  %v3960_v21 = vsel %vm3957_vm8, %v7278_v28, %v4839_v4  ;;  %v9081_v1 = vunpack.i.h.bf16 %v9079_v26  ;;  %v5268_v28 = vld [vmem:[%s8539_s1 + $0x10] ss:$0 sps:$4 sm:$0x33]   ;;  %v9082_v50 = vunpack.i.l.bf16 %v7122_v58  ;;  %v7487_v10 = vpop.permute.xlu1 %4907 }
 0x11f   : > { %v5111_v46 = vpack.i.bf16 %v3045_v56, %v3028_v0  ;;  %v4062_v20 = vsel %vm4061_vm12, %v4036_v34, %v9080_v30  ;;  %v9083_v53 = vunpack.i.h.bf16 %v7122_v58  ;;  %v9084_v34 = vld [vmem:[#allocation75_spill] sm:$0xff]  ;;  %v4637_v58 = vcombine.high %v6137_v61, %v8987_v38  ;;  %v9087_v56 = vld [vmem:[#allocation88_spill] sm:$0xff]  ;;  %v9089_v38 = vld [vmem:[#allocation41_spill] sm:$0xff] }
 0x120   : > { %v4063_v2 = vsel %vm4061_vm12, %v4037_v29, %v9081_v1  ;;  %5117 = vrot.lane.b32.xlu1 %v5116_v43, %s5291_s24  ;;  %v4088_v39 = vsel %vm4087_vm13, %v4062_v20, %v9082_v50  ;;  %v7483_v13 = vcombine.low %v9085_v41, %v9084_v34  ;;  %v4639_v29 = vcombine.high %v7071_v11, %v7068_v44  ;;  %v9088_v44 = vld [vmem:[#allocation49_spill] sm:$0xff]  ;;  %v208_v30 = vld [vmem:[%s5329_s17 + $0xc8] sm:$0xff]  ;;  %v209_v61 = vld [vmem:[%s5329_s17 + $0xd0] sm:$0xff] }
 0x121   : > { %v4089_v18 = vsel %vm4087_vm13, %v4063_v2, %v9083_v53  ;;  %5112 = vrot.lane.b32.xlu0 %v5111_v46, %s5291_s24  ;;  %v4114_v4 = vsel %vm4113_vm14, %v4088_v39, %v4829_v48  ;;  %v3362_v43 = vcombine.low %v9054_v40, %v9087_v56  ;;  %v4850_v11 = vunpack.i.h.bf16 %v9088_v44  ;;  %v7499_v20 = vpop.permute.xlu0 %4912  ;;  %v9090_v56 = vld [vmem:[#allocation31_spill] sm:$0xff] }
 0x122   : > { %9086 = vst [vmem:[#allocation73_spill] sm:$0xff] %v7483_v13  ;;  %v4115_v0 = vsel %vm4113_vm14, %v4089_v18, %v4830_v42  ;;  %v3396_v26 = vrot.slane %v4639_v29, %v5331_v5  ;;  %v3360_v46 = vrot.slane %v4637_v58, %v5331_v5  ;;  %v4214_v42 = vsel %vm4212_vm15, %v5268_v28, 0 }
 0x123   : > { %v4139_v55 = vpack.c.bf16 %v4115_v0, %v4114_v4  ;;  %v3369_v48 = vrot.slane %v3362_v43, %v5331_v5  ;;  %v4849_v1 = vunpack.i.l.bf16 %v9088_v44  ;;  %4682 = vmatpush3.bf16.msra.mxu0 %v4214_v42  ;;  %v4845_v40 = vunpack.i.h.bf16 %v7258_v19  ;;  %4740 = vmatpush3.bf16.msra.mxu1 %v4214_v42  ;;  %v7518_v4 = vpop.permute.xlu1 %4917  ;;  %v9092_v44 = vld [vmem:[#allocation30_spill] sm:$0xff] }
 0x124   : > { %v3397_v2 = vcombine.low %v3396_v26, %v9089_v38  ;;  %v4844_v50 = vunpack.i.l.bf16 %v7258_v19  ;;  %v3361_v39 = vcombine.low %v3360_v46, %v7030_v33  ;;  %v656_v28 = vcombine.high %v208_v30, %v208_v30  ;;  %v9091_v26 = vld [vmem:[#allocation29_spill] sm:$0xff] }
 0x125   : > { %v3370_v53 = vcombine.low %v7034_v32, %v3369_v48  ;;  %v7513_v18 = vrot.slane %v208_v30, %v5331_v5  ;;  %v3987_v29 = vsel %vm3983_vm9, %v3961_v9, %v4845_v40  ;;  %v672_v19 = vcombine.high %v209_v61, %v209_v61  ;;  %v7520_v33 = vpop.permute.xlu0 %4922 }
 0x126   : > { %v5126_v34 = vpack.i.bf16 %v3397_v2, %v7483_v13  ;;  %v3986_v41 = vsel %vm3983_vm9, %v3960_v21, %v4844_v50  ;;  %v7525_v0 = vrot.slane %v656_v28, %v5331_v5  ;;  %v7532_v21 = vrot.slane %v209_v61, %v5331_v5  ;;  %4684 = vmatmul.mubr.msk.bf16.vlgmr.msra.gmra.mrb[0].mxu0 %vm4172_vm2, %v4139_v55 }
 0x127   : > { %v5121_v32 = vpack.i.bf16 %v3370_v53, %v3361_v39  ;;  %v7529_v58 = vcombine.high %v7513_v18, %v7513_v18  ;;  %v7536_v9 = vrot.slane %v672_v19, %v5331_v5  ;;  %v3528_v43 = vcombine.low %v7347_v7, %v9090_v56  ;;  %4687 = vmatprep.mubr.msk.bf16.mxu0 %vm5294_vm1, %v9076_v51  ;;  %v7577_v56 = vpop.permute.xlu1 %4927 }
 0x128   : > { %5127 = vrot.lane.b32.xlu1 %v5126_v34, %s5287_s20  ;;  %v3529_v30 = vcombine.low %v9092_v44, %v9091_v26  ;;  %v7545_v46 = vcombine.high %v7532_v21, %v7532_v21  ;;  %v1525_v42 = vcombine.low %v7525_v0, %v7532_v21  ;;  %v4859_v2 = vunpack.i.l.bf16 %v7260_v15 }
 0x129   : > { %5122 = vrot.lane.b32.xlu0 %v5121_v32, %s5287_s20  ;;  %v1524_v48 = vcombine.low %v7513_v18, %v7529_v58  ;;  %v4855_v40 = vunpack.i.h.bf16 %v7298_v25  ;;  %v4854_v50 = vunpack.i.l.bf16 %v7298_v25  ;;  %v4012_v28 = vsel %vm4009_vm10, %v3986_v41, %v4849_v1 }
 0x12a   : > { %v5131_v61 = vpack.i.bf16 %v3529_v30, %v3528_v43  ;;  %v7562_v53 = vrot.slane %v1525_v42, %v5331_v5  ;;  %v1541_v55 = vcombine.low %v7545_v46, %v7536_v9  ;;  %v4013_v34 = vsel %vm4009_vm10, %v3987_v29, %v4850_v11  ;;  %v7579_v43 = vpop.permute.xlu0 %4932 }
 0x12b   : > { %v7559_v39 = vrot.slane %v1524_v48, %v5331_v5  ;;  %v4038_v19 = vsel %vm4035_vm11, %v4012_v28, %v4854_v50  ;;  %v7571_v25 = vcombine.high %v7536_v9, %v7536_v9  ;;  %v7575_v32 = vcombine.high %v7525_v0, %v7525_v0 }
 0x12c   : > { %9094 = vst [vmem:[#allocation53_spill] sm:$0xff] %v7562_v53  ;;  %v7584_v1 = vrot.slane %v1541_v55, %v5331_v5  ;;  %v4039_v41 = vsel %vm4035_vm11, %v4013_v34, %v4855_v40  ;;  %v1000_v29 = vrot.slane %v998_v37, 2  ;;  %v1001_v30 = vrot.slane %v7513_v18, 7 }
 0x12d   : > { %9093 = vst [vmem:[#allocation51_spill] sm:$0xff] %v7559_v39  ;;  %v3534_v11 = vcombine.low %v9089_v38, %v7559_v39  ;;  %5132 = vrot.lane.b32.xlu0 %v5131_v61, %s5288_s21  ;;  %v1004_v48 = vrot.slane %v7529_v58, 7  ;;  %v1007_v42 = vrot.slane %v7525_v0, 7  ;;  %v1010_v55 = vrot.slane %v7575_v32, 7 }
 0x12e   : > { %v3535_v50 = vcombine.low %v7562_v53, %v7584_v1  ;;  %v4624_v28 = vrot.slane %v7532_v21, 9  ;;  %v1014_v61 = vrot.slane %v7545_v46, 7  ;;  %v7602_v40 = vsel %vm5514_vm6, %v1000_v29, %v1001_v30 }
 0x12f   : > { %v1003_v37 = vrot.slane %v1001_v30, 2  ;;  %v1006_v34 = vrot.slane %v1004_v48, 2  ;;  %v1009_v44 = vrot.slane %v1007_v42, 2  ;;  %v1017_v53 = vrot.slane %v7536_v9, 7  ;;  %v7622_v30 = vpop.permute.xlu1 %4937 }
 0x130   : > { %v5136_v7 = vpack.i.bf16 %v3535_v50, %v3534_v11  ;;  %v7606_v13 = vsel %vm5514_vm6, %v4624_v28, %v1014_v61  ;;  %v1016_v38 = vrot.slane %v1014_v61, 2  ;;  %v7624_v50 = vpop.permute.xlu0 %4942  ;;  %v9096_v61 = vld [vmem:[#allocation66_spill] sm:$0xff]  ;;  %v9098_v11 = vld [vmem:[#allocation69_spill] sm:$0xff]  ;;  %v4870_v26 = vunpack.i.h.bf16 %v7310_v35 }
 0x131   : > { %v7611_v63 = vsel %vm5514_vm6, %v1003_v37, %v1004_v48  ;;  %v7615_v31 = vsel %vm5514_vm6, %v1006_v34, %v1007_v42  ;;  %v7619_v29 = vsel %vm5514_vm6, %v1009_v44, %v1010_v55  ;;  %9095 = vst [vmem:[#allocation55_spill] sm:$0xff] %v7624_v50  ;;  %v1019_v28 = vrot.slane %v1017_v53, 2  ;;  %v9097_v37 = vld [vmem:[#allocation103_spill] sm:$0xff] }
 0x132   : > { %5137 = vrot.lane.b32.xlu1 %v5136_v7, %s5288_s21  ;;  %v7629_v48 = vsel %vm5514_vm6, %v1016_v38, %v1017_v53  ;;  %v1949_v42 = vcombine.low %v7421_v54, %v7602_v40  ;;  %v1965_v44 = vcombine.low %v7611_v63, %v7615_v31  ;;  %v1966_v55 = vcombine.low %v7619_v29, %v7606_v13 }
 0x133   : > { %v3667_v34 = vcombine.low %v9097_v37, %v9096_v61  ;;  %v3668_v7 = vcombine.low %v9099_v14, %v9098_v11  ;;  %v9100_v38 = vrot.slane %v7571_v25, 7  ;;  %v4865_v37 = vunpack.i.h.bf16 %v7338_v59 }
 0x134   : > { %v1963_v54 = vrot.slane %v1949_v42, %v5331_v5  ;;  %v7650_v24 = vrot.slane %v1965_v44, %v5331_v5  ;;  %v7654_v61 = vrot.slane %v1966_v55, %v5331_v5  ;;  %v4064_v42 = vsel %vm4061_vm12, %v4038_v19, %v4859_v2  ;;  %v7676_v2 = vpop.permute.xlu0 %4952 }
 0x135   : > { %v7646_v53 = vsel %vm5514_vm6, %v1019_v28, %v9100_v38  ;;  %v5141_v11 = vpack.i.bf16 %v3668_v7, %v3667_v34  ;;  %v4864_v28 = vunpack.i.l.bf16 %v7338_v59  ;;  %v9101_v44 = vunpack.i.h.bf16 %v7260_v15  ;;  %v7674_v59 = vpop.permute.xlu1 %4947  ;;  %9103 = vst [vmem:[#allocation58_spill] sm:$0xff] %v7676_v2 }
 0x136   : > { %v1982_v14 = vcombine.low %v7629_v48, %v7646_v53  ;;  %v3673_v50 = vcombine.low %v1963_v54, %v7650_v24  ;;  %v2440_v34 = vcombine.low %v7100_v60, %v7513_v18  ;;  %v2456_v7 = vcombine.low %v7529_v58, %v7525_v0  ;;  %9102 = vst [vmem:[#allocation54_spill] sm:$0xff] %v7674_v59 }
 0x137   : > { %v4065_v38 = vsel %vm4061_vm12, %v4039_v41, %v9101_v44  ;;  %5142 = vrot.lane.b32.xlu0 %v5141_v11, %s5290_s23  ;;  %v4090_v15 = vsel %vm4087_vm13, %v4064_v42, %v4864_v28  ;;  %v4633_v19 = vcombine.high %v7525_v0, %v7532_v21  ;;  %v2473_v41 = vcombine.low %v7536_v9, %v7571_v25  ;;  %v9105_v11 = vld [vmem:[#allocation37_spill] sm:$0xff]  ;;  %v9106_v44 = vld [vmem:[#allocation36_spill] sm:$0xff] }
 0x138   : > { %v7666_v35 = vrot.slane %v1982_v14, %v5331_v5  ;;  %v4091_v55 = vsel %vm4087_vm13, %v4065_v38, %v4865_v37  ;;  %v9104_v14 = vld [vmem:[#allocation19_spill] sm:$0xff]  ;;  %v2454_v18 = vrot.slane %v2440_v34, %v5331_v5  ;;  %v7689_v58 = vrot.slane %v2456_v7, %v5331_v5  ;;  %v9107_v38 = vld [vmem:[#allocation28_spill] sm:$0xff] }
 0x139   : > { %v3816_v37 = vcombine.low %v9105_v11, %v9104_v14  ;;  %v3817_v28 = vcombine.low %v9107_v38, %v9106_v44  ;;  %v7694_v42 = vrot.slane %v4633_v19, %v5331_v5  ;;  %v7697_v2 = vrot.slane %v2473_v41, %v5331_v5  ;;  %v9108_v19 = vld [vmem:[#allocation44_spill] sm:$0xff] }
 0x13a   : > { %v3674_v60 = vcombine.low %v7654_v61, %v7666_v35  ;;  %v4880_v9 = vunpack.i.h.bf16 %v7343_v36  ;;  %v4879_v14 = vunpack.i.l.bf16 %v7343_v36  ;;  %v2689_v12 = vcombine.low %v2454_v18, %v7689_v58  ;;  %v9109_v36 = vld [vmem:[#allocation72_spill] sm:$0xff] }
 0x13b   : > { %v5151_v34 = vpack.i.bf16 %v3817_v28, %v3816_v37  ;;  %v4875_v7 = vunpack.i.h.bf16 %v7378_v6  ;;  %v3820_v3 = vcombine.low %v7694_v42, %v7697_v2  ;;  %v4874_v44 = vunpack.i.l.bf16 %v7378_v6  ;;  %v7717_v28 = vpop.permute.xlu1 %4957 }
 0x13c   : > { %v5146_v11 = vpack.i.bf16 %v3674_v60, %v3673_v50  ;;  %v1947_v38 = vcombine.low %v9108_v19, %v7246_v62  ;;  %v1964_v41 = vcombine.low %v7274_v22, %v1963_v54  ;;  %v2438_v37 = vcombine.low %v7286_v23, %v7292_v49  ;;  %v7719_v62 = vpop.permute.xlu0 %4962  ;;  %v9111_v54 = vld [vmem:[#allocation43_spill] sm:$0xff] }
 0x13d   : > { %5152 = vrot.lane.b32.xlu0 %v5151_v34, %s5292_s25  ;;  %v3963_v50 = vsel %vm3957_vm8, %v9109_v36, %v4875_v7  ;;  %v2455_v60 = vcombine.low %v7295_v47, %v2454_v18  ;;  %v4890_v6 = vunpack.i.h.bf16 %v7391_v17  ;;  %9110 = vst [vmem:[#allocation56_spill] sm:$0xff] %v7719_v62  ;;  %v5156_v22 = vpack.i.bf16 %v3820_v3, %v2689_v12  ;;  %v210_v47 = vld [vmem:[%s5329_s17 + $0xd8] sm:$0xff] }
 0x13e   : > { %5147 = vrot.lane.b32.xlu1 %v5146_v11, %s5290_s23  ;;  %v3962_v11 = vsel %vm3957_vm8, %v9111_v54, %v4874_v44  ;;  %v5161_v19 = vpack.i.bf16 %v1964_v41, %v1947_v38  ;;  %v4116_v34 = vsel %vm4113_vm14, %v4090_v15, %v4869_v52  ;;  %v4117_v7 = vsel %vm4113_vm14, %v4091_v55, %v4870_v26 }
 0x13f   : > { %v5166_v59 = vpack.i.bf16 %v2455_v60, %v2438_v37  ;;  %v4889_v23 = vunpack.i.l.bf16 %v7391_v17  ;;  %v4885_v49 = vunpack.i.h.bf16 %v7409_v16  ;;  %v4140_v18 = vpack.c.bf16 %v4117_v7, %v4116_v34 }
 0x140   : > { %v4884_v36 = vunpack.i.l.bf16 %v7409_v16  ;;  %v3988_v62 = vsel %vm3983_vm9, %v3962_v11, %v4879_v14  ;;  %v3989_v3 = vsel %vm3983_vm9, %v3963_v50, %v4880_v9  ;;  %v2690_v26 = vcombine.low %v7532_v21, %v7545_v46  ;;  %v7756_v50 = vpop.permute.xlu1 %4967 }
 0x141   : > { %5162 = vrot.lane.b32.xlu0 %v5161_v19, %s5289_s22  ;;  %v4015_v52 = vsel %vm4009_vm10, %v3989_v3, %v4885_v49  ;;  %v689_v17 = vcombine.high %v210_v47, %v210_v47  ;;  %v9112_v55 = vrot.slane %v7571_v25, 7  ;;  %4688 = vmatmul.mubr.msk.bf16.gmra.mrb[4].mxu0 %vm4172_vm2, %v4140_v18  ;;  %v7741_v14 = vrot.slane %v210_v47, %v5331_v5 }
 0x142   : > { %5157 = vrot.lane.b32.xlu1 %v5156_v22, %s5292_s25  ;;  %v4014_v16 = vsel %vm4009_vm10, %v3988_v62, %v4884_v36  ;;  %v3148_v9 = vcombine.low %v7602_v40, %v7611_v63  ;;  %v3149_v44 = vcombine.low %v7615_v31, %v7619_v29  ;;  %v2697_v38 = vrot.slane %v2690_v26, %v5331_v5  ;;  %v7758_v63 = vpop.permute.xlu0 %4972  ;;  %v211_v22 = vld [vmem:[%s5329_s17 + $0xe0] sm:$0xff] }
 0x143   : > { %v1022_v15 = vrot.slane %v9112_v55, 2  ;;  %v7749_v21 = vrot.slane %v689_v17, %v5331_v5  ;;  %v3165_v46 = vcombine.low %v7606_v13, %v7629_v48  ;;  %v4900_v41 = vunpack.i.h.bf16 %v7447_v27  ;;  %4691 = vmatprep.mubr.msk.bf16.mxu0 %vm5294_vm1, %v9076_v51 }
 0x144   : > { %v1023_v31 = vrot.slane %v7741_v14, 7  ;;  %v3156_v40 = vrot.slane %v3148_v9, %v5331_v5  ;;  %v3163_v29 = vrot.slane %v3149_v44, %v5331_v5  ;;  %v4899_v37 = vunpack.i.l.bf16 %v7447_v27 }
 0x145   : > { %v2698_v13 = vcombine.low %v2697_v38, %v7697_v2  ;;  %v3173_v48 = vrot.slane %v3165_v46, %v5331_v5  ;;  %v4895_v60 = vunpack.i.h.bf16 %v7449_v8  ;;  %v4894_v62 = vunpack.i.l.bf16 %v7449_v8 }
 0x146   : > { %5167 = vrot.lane.b32.xlu1 %v5166_v59, %s5286_s19  ;;  %v7772_v54 = vsel %vm5514_vm6, %v1022_v15, %v1023_v31  ;;  %v3164_v11 = vcombine.low %v3156_v40, %v3163_v29  ;;  %v4040_v19 = vsel %vm4035_vm11, %v4014_v16, %v4889_v23  ;;  %v4041_v27 = vsel %vm4035_vm11, %v4015_v52, %v4890_v6  ;;  %v7797_v3 = vpop.permute.xlu0 %4982  ;;  %v9114_v16 = vld [vmem:[#allocation63_spill] sm:$0xff] }
 0x147   : > { %v5171_v34 = vpack.i.bf16 %v2698_v13, %v2689_v12  ;;  %v3166_v59 = vcombine.low %v7646_v53, %v7772_v54  ;;  %v4066_v7 = vsel %vm4061_vm12, %v4040_v19, %v4894_v62  ;;  %v4067_v49 = vsel %vm4061_vm12, %v4041_v27, %v4895_v60 }
 0x148   : > { %v1542_v8 = vcombine.low %v7571_v25, %v7741_v14  ;;  %v3398_v47 = vcombine.low %v7525_v0, %v7575_v32  ;;  %v7786_v18 = vcombine.high %v7741_v14, %v7741_v14  ;;  %v1036_v23 = vcombine.high %v211_v22, %v211_v22  ;;  %v7795_v25 = vpop.permute.xlu1 %4977 }
 0x149   : > { %5172 = vrot.lane.b32.xlu0 %v5171_v34, %s5285_s18  ;;  %v3180_v12 = vrot.slane %v3166_v59, %v5331_v5  ;;  %v7791_v53 = vrot.slane %v211_v22, %v5331_v5  ;;  %v4910_v6 = vunpack.i.h.bf16 %v7487_v10  ;;  %v4909_v36 = vunpack.i.l.bf16 %v7487_v10  ;;  %v9113_v10 = vld [vmem:[#allocation46_spill] sm:$0xff]  ;;  %v212_v59 = vld [vmem:[%s5329_s17 + $0xe8] sm:$0xff] }
 0x14a   : > { %v1556_v0 = vrot.slane %v1542_v8, %v5331_v5  ;;  %v3405_v32 = vrot.slane %v3398_v47, %v5331_v5  ;;  %v7802_v52 = vrot.slane %v1036_v23, %v5331_v5  ;;  %v1558_v26 = vcombine.low %v7786_v18, %v7749_v21  ;;  %v7847_v47 = vpop.permute.xlu0 %4992 }
 0x14b   : > { %v3181_v17 = vcombine.low %v3173_v48, %v3180_v12  ;;  %v7808_v55 = vcombine.high %v7791_v53, %v7791_v53  ;;  %v7812_v15 = vsel %vm3957_vm8, %v9113_v10, %v4909_v36  ;;  %v7816_v9 = vsel %vm3957_vm8, %v9114_v16, %v4910_v6 }
 0x14c   : > { %v7819_v44 = vcombine.low %v7584_v1, %v1556_v0  ;;  %v3406_v38 = vcombine.low %v7559_v39, %v3405_v32  ;;  %v7824_v46 = vcombine.high %v7802_v52, %v7802_v52  ;;  %v7827_v40 = vrot.slane %v1558_v26, %v5331_v5  ;;  %v7845_v8 = vpop.permute.xlu1 %4987 }
 0x14d   : > { %v5176_v29 = vpack.i.bf16 %v3181_v17, %v3164_v11  ;;  %v3537_v13 = vcombine.low %v7791_v53, %v7808_v55  ;;  %v4905_v48 = vunpack.i.h.bf16 %v7462_v57  ;;  %v4904_v60 = vunpack.i.l.bf16 %v7462_v57 }
 0x14e   : > { %9115 = vst [vmem:[#allocation50_spill] sm:$0xff] %v7819_v44  ;;  %v5181_v1 = vpack.i.bf16 %v7819_v44, %v3406_v38  ;;  %v3416_v62 = vcombine.low %v7802_v52, %v7824_v46  ;;  %v3536_v22 = vcombine.low %v1556_v0, %v7827_v40  ;;  %v4092_v19 = vsel %vm4087_vm13, %v4066_v7, %v4899_v37 }
 0x14f   : > { %5177 = vrot.lane.b32.xlu1 %v5176_v29, %s5291_s24  ;;  %v3544_v11 = vrot.slane %v3537_v13, %v5331_v5  ;;  %v4093_v27 = vsel %vm4087_vm13, %v4067_v49, %v4900_v41  ;;  %v4118_v34 = vsel %vm4113_vm14, %v4092_v19, %v4904_v60  ;;  %v718_v57 = vcombine.high %v7749_v21, %v7749_v21 }
 0x150   : > { %5182 = vrot.lane.b32.xlu0 %v5181_v1, %s5287_s20  ;;  %v7851_v37 = vrot.slane %v3416_v62, %v5331_v5  ;;  %v4119_v7 = vsel %vm4113_vm14, %v4093_v27, %v4905_v48  ;;  %v1025_v23 = vrot.slane %v1023_v31, 2  ;;  %v1026_v41 = vrot.slane %v7786_v18, 7 }
 0x151   : > { %v4141_v49 = vpack.c.bf16 %v4119_v7, %v4118_v34  ;;  %v1029_v12 = vrot.slane %v7749_v21, 7  ;;  %v1032_v6 = vrot.slane %v718_v57, 7  ;;  %v1053_v36 = vcombine.high %v212_v59, %v212_v59  ;;  %v7889_v27 = vpop.permute.xlu0 %5002 }
 0x152   : > { %v3545_v0 = vcombine.low %v3544_v11, %v7851_v37  ;;  %v7859_v32 = vsel %vm5514_vm6, %v1025_v23, %v1026_v41  ;;  %v1028_v26 = vrot.slane %v1026_v41, 2  ;;  %v7862_v17 = vrot.slane %v212_v59, %v5331_v5  ;;  %v7887_v11 = vpop.permute.xlu1 %4997 }
 0x153   : > { %v1031_v10 = vrot.slane %v1029_v12, 2  ;;  %v7865_v31 = vrot.slane %v1053_v36, %v5331_v5  ;;  %v4625_v16 = vrot.slane %v7791_v53, 9  ;;  %v1072_v38 = vrot.slane %v7808_v55, 7  ;;  %4692 = vmatmul.mubr.msk.bf16.gmra.mrb[8].mxu0 %vm4172_vm2, %v4141_v49 }
 0x154   : > { %v5186_v29 = vpack.i.bf16 %v3545_v0, %v3536_v22  ;;  %v7872_v13 = vsel %vm5514_vm6, %v1028_v26, %v1029_v12  ;;  %v1075_v48 = vrot.slane %v7802_v52, 7  ;;  %v1078_v60 = vrot.slane %v7824_v46, 7  ;;  %4695 = vmatprep.mubr.msk.bf16.mxu0 %vm5294_vm1, %v9076_v51 }
 0x155   : > { %v7880_v1 = vsel %vm5514_vm6, %v1031_v10, %v1032_v6  ;;  %v7884_v62 = vsel %vm5514_vm6, %v4625_v16, %v1072_v38  ;;  %v1074_v22 = vrot.slane %v1072_v38, 2  ;;  %v1081_v19 = vrot.slane %v7862_v17, 7 }
 0x156   : > { %5187 = vrot.lane.b32.xlu1 %v5186_v29, %s5288_s21  ;;  %v1077_v34 = vrot.slane %v1075_v48, 2  ;;  %v1080_v59 = vrot.slane %v1078_v60, 2  ;;  %v1983_v7 = vcombine.low %v7772_v54, %v7859_v32  ;;  %v1999_v23 = vcombine.low %v7872_v13, %v7880_v1 }
 0x157   : > { %v7898_v41 = vsel %vm5514_vm6, %v1074_v22, %v1075_v48  ;;  %v2474_v49 = vcombine.low %v7741_v14, %v7786_v18  ;;  %v2490_v12 = vcombine.low %v7749_v21, %v718_v57  ;;  %v2708_v6 = vcombine.low %v7808_v55, %v7802_v52 }
 0x158   : > { %v1079_v36 = vsel %vm5514_vm6, %v1077_v34, %v1078_v60  ;;  %v7909_v54 = vsel %vm5514_vm6, %v1080_v59, %v1081_v19  ;;  %v1997_v0 = vrot.slane %v1983_v7, %v5331_v5  ;;  %v7913_v26 = vrot.slane %v1999_v23, %v5331_v5  ;;  %v7934_v34 = vpop.permute.xlu1 %5007  ;;  %v7936_v59 = vpop.permute.xlu0 %5012 }
 0x159   : > { %v3676_v14 = vcombine.low %v7884_v62, %v7898_v41  ;;  %v3677_v18 = vcombine.low %v1079_v36, %v7909_v54  ;;  %v7919_v57 = vrot.slane %v2474_v49, %v5331_v5  ;;  %v7922_v52 = vrot.slane %v2490_v12, %v5331_v5 }
 0x15a   : > { %v3675_v55 = vcombine.low %v1997_v0, %v7913_v26  ;;  %v2709_v10 = vcombine.low %v7824_v46, %v7862_v17  ;;  %v2716_v16 = vrot.slane %v2708_v6, %v5331_v5  ;;  %v4920_v38 = vunpack.i.h.bf16 %v7518_v4 }
 0x15b   : > { %v3684_v29 = vrot.slane %v3676_v14, %v5331_v5  ;;  %v3691_v48 = vrot.slane %v3677_v18, %v5331_v5  ;;  %v3821_v60 = vcombine.low %v7919_v57, %v7922_v52  ;;  %v4919_v22 = vunpack.i.l.bf16 %v7518_v4 }
 0x15c   : > { %v2723_v7 = vrot.slane %v2709_v10, %v5331_v5  ;;  %v4915_v46 = vunpack.i.h.bf16 %v7499_v20  ;;  %v4914_v23 = vunpack.i.l.bf16 %v7499_v20  ;;  %v1981_v49 = vcombine.low %v7650_v24, %v7654_v61 }
 0x15d   : > { %v3692_v12 = vcombine.low %v3684_v29, %v3691_v48  ;;  %v1998_v6 = vcombine.low %v7666_v35, %v1997_v0  ;;  %v2472_v14 = vcombine.low %v7689_v58, %v7694_v42  ;;  %v2489_v4 = vcombine.low %v7697_v2, %v7919_v57  ;;  %v7967_v29 = vpop.permute.xlu0 %5022 }
 0x15e   : > { %v2724_v18 = vcombine.low %v2716_v16, %v2723_v7  ;;  %v3991_v10 = vsel %vm3983_vm9, %v7816_v9, %v4915_v46  ;;  %v3990_v39 = vsel %vm3983_vm9, %v7812_v15, %v4914_v23  ;;  %v4930_v20 = vunpack.i.h.bf16 %v7577_v56 }
 0x15f   : > { %v5191_v44 = vpack.i.bf16 %v3692_v12, %v3675_v55  ;;  %v5201_v24 = vpack.i.bf16 %v1998_v6, %v1981_v49  ;;  %v5206_v61 = vpack.i.bf16 %v2489_v4, %v2472_v14  ;;  %v4929_v35 = vunpack.i.l.bf16 %v7577_v56  ;;  %v7965_v56 = vpop.permute.xlu1 %5017 }
 0x160   : > { %v5196_v0 = vpack.i.bf16 %v2724_v18, %v3821_v60  ;;  %v4925_v58 = vunpack.i.h.bf16 %v7520_v33  ;;  %v4924_v42 = vunpack.i.l.bf16 %v7520_v33  ;;  %v4016_v2 = vsel %vm4009_vm10, %v3990_v39, %v4919_v22 }
 0x161   : > { %5192 = vrot.lane.b32.xlu0 %v5191_v44, %s5290_s23  ;;  %v4017_v9 = vsel %vm4009_vm10, %v3991_v10, %v4920_v38  ;;  %v2699_v15 = vcombine.low %v7749_v21, %v7791_v53  ;;  %v7963_v55 = vcombine.high %v7862_v17, %v7862_v17  ;;  %v1083_v16 = vrot.slane %v1081_v19, 2 }
 0x162   : > { %5197 = vrot.lane.b32.xlu1 %v5196_v0, %s5292_s25  ;;  %v4042_v33 = vsel %vm4035_vm11, %v4016_v2, %v4924_v42  ;;  %v4043_v39 = vsel %vm4035_vm11, %v4017_v9, %v4925_v58  ;;  %v3182_v44 = vcombine.low %v7859_v32, %v7872_v13  ;;  %v3183_v38 = vcombine.low %v7880_v1, %v7884_v62  ;;  %v8011_v0 = vpop.permute.xlu0 %5032 }
 0x163   : > { %v2706_v48 = vrot.slane %v2699_v15, %v5331_v5  ;;  %v1084_v19 = vrot.slane %v7963_v55, 7  ;;  %v3199_v60 = vcombine.low %v7898_v41, %v1079_v36  ;;  %v4940_v22 = vunpack.i.h.bf16 %v7622_v30  ;;  %v213_v36 = vld [vmem:[%s5329_s17 + $0xf0] sm:$0xff] }
 0x164   : > { %v3190_v7 = vrot.slane %v3182_v44, %v5331_v5  ;;  %v3197_v46 = vrot.slane %v3183_v38, %v5331_v5  ;;  %v4939_v23 = vunpack.i.l.bf16 %v7622_v30  ;;  %v4935_v32 = vunpack.i.h.bf16 %v7579_v43  ;;  %v9117_v44 = vld [vmem:[#allocation60_spill] sm:$0xff] }
 0x165   : > { %5202 = vrot.lane.b32.xlu0 %v5201_v24, %s5289_s22  ;;  %v2707_v13 = vcombine.low %v7919_v57, %v2706_v48  ;;  %v7988_v1 = vsel %vm5514_vm6, %v1083_v16, %v1084_v19  ;;  %v3207_v62 = vrot.slane %v3199_v60, %v5331_v5  ;;  %v4934_v41 = vunpack.i.l.bf16 %v7579_v43  ;;  %v7999_v57 = vld [vmem:[%s5329_s17 + $0xf8] sm:$0xff]  ;;  %v9118_v48 = vld [vmem:[#allocation52_spill] sm:$0xff] }
 0x166   : > { %5207 = vrot.lane.b32.xlu1 %v5206_v61, %s5286_s19  ;;  %v3198_v49 = vcombine.low %v3190_v7, %v3197_v46  ;;  %v3200_v12 = vcombine.low %v7909_v54, %v7988_v1  ;;  %v4068_v6 = vsel %vm4061_vm12, %v4042_v33, %v4929_v35  ;;  %v4069_v14 = vsel %vm4061_vm12, %v4043_v39, %v4930_v20  ;;  %v8009_v61 = vpop.permute.xlu1 %5027 }
 0x167   : > { %v5211_v4 = vpack.i.bf16 %v2724_v18, %v2707_v13  ;;  %v8002_v10 = vsel %vm4087_vm13, %v4068_v6, %v4934_v41  ;;  %v8005_v24 = vsel %vm4087_vm13, %v4069_v14, %v4935_v32  ;;  %v4640_v43 = vcombine.high %v7749_v21, %v7791_v53  ;;  %v9116_v53 = vld [vmem:[#allocation54_spill] sm:$0xff] }
 0x168   : > { %v3214_v54 = vrot.slane %v3200_v12, %v5331_v5  ;;  %v3417_v20 = vcombine.low %v7862_v17, %v7963_v55  ;;  %v1094_v35 = vcombine.high %v213_v36, %v213_v36  ;;  %v8017_v18 = vrot.slane %v213_v36, %v5331_v5  ;;  %v9119_v36 = vld [vmem:[#allocation55_spill] sm:$0xff] }
 0x169   : > { %5212 = vrot.lane.b32.xlu0 %v5211_v4, %s5285_s18  ;;  %v3414_v58 = vrot.slane %v4640_v43, %v5331_v5  ;;  %v8023_v21 = vrot.slane %v7999_v57, %v5331_v5  ;;  %v4950_v42 = vunpack.i.h.bf16 %v9116_v53  ;;  %v4949_v2 = vunpack.i.l.bf16 %v9116_v53  ;;  %v8053_v4 = vpop.permute.xlu0 %5042 }
 0x16a   : > { %v3215_v9 = vcombine.low %v3207_v62, %v3214_v54  ;;  %v3431_v15 = vrot.slane %v3417_v20, %v5331_v5  ;;  %v8029_v17 = vrot.slane %v1094_v35, %v5331_v5  ;;  %v1109_v16 = vcombine.high %v8017_v18, %v8017_v18  ;;  %v8051_v14 = vpop.permute.xlu1 %5037 }
 0x16b   : > { %v3415_v33 = vcombine.low %v7827_v40, %v3414_v58  ;;  %v3546_v39 = vcombine.low %v7865_v31, %v8017_v18  ;;  %v8038_v38 = vsel %vm3957_vm8, %v9117_v44, %v4949_v2  ;;  %v8042_v60 = vsel %vm3957_vm8, %v9118_v48, %v4950_v42  ;;  %v9120_v58 = vld [vmem:[#allocation64_spill] sm:$0xff]  ;;  %v9121_v42 = vld [vmem:[#allocation85_spill] sm:$0xff] }
 0x16c   : > { %v5216_v7 = vpack.i.bf16 %v3215_v9, %v3198_v49  ;;  %v3432_v46 = vcombine.low %v7851_v37, %v3431_v15  ;;  %v1110_v32 = vcombine.high %v8029_v17, %v8029_v17  ;;  %v1130_v13 = vrot.slane %v1109_v16, 7 }
 0x16d   : > { %v3553_v62 = vrot.slane %v3546_v39, %v5331_v5  ;;  %v3555_v41 = vcombine.low %v1109_v16, %v8029_v17  ;;  %v4945_v12 = vunpack.i.h.bf16 %v9119_v36  ;;  %v4944_v6 = vunpack.i.l.bf16 %v9119_v36 }
 0x16e   : > { %5217 = vrot.lane.b32.xlu1 %v5216_v7, %s5291_s24  ;;  %v5221_v49 = vpack.i.bf16 %v3432_v46, %v3415_v33  ;;  %v3556_v37 = vcombine.low %v1110_v32, %v8023_v21  ;;  %v8059_v43 = vcombine.high %v7865_v31, %v7865_v31  ;;  %v1086_v54 = vrot.slane %v1084_v19, 2 }
 0x16f   : > { %v3554_v20 = vcombine.low %v3431_v15, %v3553_v62  ;;  %v3563_v35 = vrot.slane %v3555_v41, %v5331_v5  ;;  %v8064_v53 = vsel %vm3957_vm8, %v9120_v58, %v4944_v6  ;;  %v8068_v2 = vsel %vm3957_vm8, %v9121_v42, %v4945_v12  ;;  %v8091_v58 = vpop.permute.xlu0 %5052 }
 0x170   : > { %5222 = vrot.lane.b32.xlu0 %v5221_v49, %s5287_s20  ;;  %v3570_v9 = vrot.slane %v3556_v37, %v5331_v5  ;;  %v1087_v16 = vrot.slane %v7865_v31, 7  ;;  %v1090_v33 = vrot.slane %v8059_v43, 7  ;;  %v8076_v19 = vcombine.high %v8023_v21, %v8023_v21  ;;  %v8089_v37 = vpop.permute.xlu1 %5047 }
 0x171   : > { %v4626_v15 = vrot.slane %v8017_v18, 9  ;;  %v1132_v39 = vrot.slane %v1130_v13, 2  ;;  %v1133_v44 = vrot.slane %v8029_v17, 7  ;;  %v1136_v48 = vrot.slane %v1110_v32, 7 }
 0x172   : > { %v3571_v7 = vcombine.low %v3563_v35, %v3570_v9  ;;  %v8082_v46 = vsel %vm5514_vm6, %v1086_v54, %v1087_v16  ;;  %v1089_v62 = vrot.slane %v1087_v16, 2  ;;  %v1139_v41 = vrot.slane %v8023_v21, 7 }
 0x173   : > { %v1131_v36 = vsel %vm5514_vm6, %v4626_v15, %v1130_v13  ;;  %v1134_v12 = vsel %vm5514_vm6, %v1132_v39, %v1133_v44  ;;  %v1135_v6 = vrot.slane %v1133_v44, 2  ;;  %v1138_v49 = vrot.slane %v1136_v48, 2 }
 0x174   : > { %v5226_v35 = vpack.i.bf16 %v3571_v7, %v3554_v20  ;;  %v1091_v54 = vsel %vm5514_vm6, %v1089_v62, %v1090_v33  ;;  %v1141_v42 = vrot.slane %v1139_v41, 2  ;;  %v1142_v9 = vrot.slane %v8076_v19, 7 }
 0x175   : > { %v1137_v16 = vsel %vm5514_vm6, %v1135_v6, %v1136_v48  ;;  %v1140_v13 = vsel %vm5514_vm6, %v1138_v49, %v1139_v41  ;;  %v3693_v15 = vcombine.low %v7988_v1, %v8082_v46  ;;  %v3694_v39 = vcombine.low %v1091_v54, %v1131_v36 }
 0x176   : > { %5227 = vrot.lane.b32.xlu1 %v5226_v35, %s5288_s21  ;;  %v1143_v20 = vsel %vm5514_vm6, %v1141_v42, %v1142_v9  ;;  %v3710_v33 = vcombine.low %v1134_v12, %v1137_v16  ;;  %v2725_v44 = vcombine.low %v7963_v55, %v7865_v31  ;;  %v4641_v48 = vcombine.high %v7865_v31, %v8017_v18  ;;  %v8129_v42 = vpop.permute.xlu0 %5062 }
 0x177   : > { %v3701_v7 = vrot.slane %v3693_v15, %v5331_v5  ;;  %v3708_v62 = vrot.slane %v3694_v39, %v5331_v5  ;;  %v3711_v1 = vcombine.low %v1140_v13, %v1143_v20  ;;  %v3831_v41 = vcombine.low %v8029_v17, %v1110_v32  ;;  %v8127_v32 = vpop.permute.xlu1 %5057 }
 0x178   : > { %v3718_v36 = vrot.slane %v3710_v33, %v5331_v5  ;;  %v8116_v6 = vrot.slane %v2725_v44, %v5331_v5  ;;  %v3829_v12 = vrot.slane %v4641_v48, %v5331_v5  ;;  %v3832_v55 = vcombine.low %v8023_v21, %v8076_v19 }
 0x179   : > { %v3709_v49 = vcombine.low %v3701_v7, %v3708_v62  ;;  %v3725_v18 = vrot.slane %v3711_v1, %v5331_v5  ;;  %v3839_v35 = vrot.slane %v3831_v41, %v5331_v5  ;;  %v4120_v17 = vsel %vm4113_vm14, %v8002_v10, %v4939_v23  ;;  %v9122_v23 = vld [vmem:[#allocation58_spill] sm:$0xff] }
 0x17a   : > { %v3830_v16 = vcombine.low %v8116_v6, %v3829_v12  ;;  %v3846_v13 = vrot.slane %v3832_v55, %v5331_v5  ;;  %v4121_v21 = vsel %vm4113_vm14, %v8005_v24, %v4940_v22  ;;  %v4960_v15 = vunpack.i.h.bf16 %v7717_v28 }
 0x17b   : > { %v3726_v39 = vcombine.low %v3718_v36, %v3725_v18  ;;  %v4142_v20 = vpack.c.bf16 %v4121_v21, %v4120_v17  ;;  %v4959_v33 = vunpack.i.l.bf16 %v7717_v28  ;;  %v4955_v10 = vunpack.i.h.bf16 %v9122_v23  ;;  %v9123_v36 = vld [vmem:[#allocation56_spill] sm:$0xff] }
 0x17c   : > { %v3847_v44 = vcombine.low %v3839_v35, %v3846_v13  ;;  %v3999_v48 = vsel %vm3983_vm9, %v8042_v60, %v4960_v15  ;;  %v4954_v7 = vunpack.i.l.bf16 %v9122_v23  ;;  %v4970_v62 = vunpack.i.h.bf16 %v7756_v50 }
 0x17d   : > { %v5231_v30 = vpack.i.bf16 %v3726_v39, %v3709_v49  ;;  %4696 = vmatmul.mubr.msk.bf16.gmra.mrb[12].mxu0 %vm4172_vm2, %v4142_v20  ;;  %v3998_v22 = vsel %vm3983_vm9, %v8038_v38, %v4959_v33  ;;  %v3993_v24 = vsel %vm3983_vm9, %v8068_v2, %v4955_v10  ;;  %v4969_v28 = vunpack.i.l.bf16 %v7756_v50  ;;  %v8161_v49 = vpop.permute.xlu1 %5067 }
 0x17e   : > { %v5236_v1 = vpack.i.bf16 %v3847_v44, %v3830_v16  ;;  %v3992_v41 = vsel %vm3983_vm9, %v8064_v53, %v4954_v7  ;;  %v4025_v60 = vsel %vm4009_vm10, %v3999_v48, %v4970_v62  ;;  %v4965_v12 = vunpack.i.h.bf16 %v9123_v36  ;;  %4699 = vmatprep.mubr.msk.bf16.mxu0 %vm5294_vm1, %v9076_v51 }
 0x17f   : > { %5232 = vrot.lane.b32.xlu0 %v5231_v30, %s5290_s23  ;;  %v4024_v38 = vsel %vm4009_vm10, %v3998_v22, %v4969_v28  ;;  %v4964_v55 = vunpack.i.l.bf16 %v9123_v36  ;;  %v3216_v2 = vcombine.low %v8082_v46, %v1091_v54  ;;  %v4980_v50 = vunpack.i.h.bf16 %v7795_v25  ;;  %v8163_v53 = vpop.permute.xlu0 %5072 }
 0x180   : > { %5237 = vrot.lane.b32.xlu1 %v5236_v1, %s5292_s25  ;;  %v4019_v18 = vsel %vm4009_vm10, %v3993_v24, %v4965_v12  ;;  %v4979_v35 = vunpack.i.l.bf16 %v7795_v25  ;;  %v4975_v17 = vunpack.i.h.bf16 %v7758_v63  ;;  %v4974_v16 = vunpack.i.l.bf16 %v7758_v63 }
 0x181   : > { %v4018_v13 = vsel %vm4009_vm10, %v3992_v41, %v4964_v55  ;;  %v3223_v46 = vrot.slane %v3216_v2, %v5331_v5  ;;  %v4051_v54 = vsel %vm4035_vm11, %v4025_v60, %v4980_v50  ;;  %v3433_v21 = vcombine.low %v7865_v31, %v8059_v43  ;;  %v8197_v62 = vpop.permute.xlu1 %5077 }
 0x182   : > { %v4050_v15 = vsel %vm4035_vm11, %v4024_v38, %v4979_v35  ;;  %v4044_v39 = vsel %vm4035_vm11, %v4018_v13, %v4974_v16  ;;  %v4045_v20 = vsel %vm4035_vm11, %v4019_v18, %v4975_v17  ;;  %v1111_v25 = vcombine.high %v7999_v57, %v7999_v57 }
 0x183   : > { %2055 = vrot.lane.b32.xlu0 %v7913_v26, %s5289_s22  ;;  %v3440_v63 = vrot.slane %v3433_v21, %v5331_v5  ;;  %v4990_v33 = vunpack.i.h.bf16 %v7845_v8  ;;  %v4989_v23 = vunpack.i.l.bf16 %v7845_v8  ;;  %v4985_v31 = vunpack.i.h.bf16 %v7797_v3 }
 0x184   : > { %2546 = vrot.lane.b32.xlu1 %v7922_v52, %s5286_s19  ;;  %v1125_v43 = vrot.slane %v1111_v25, %v5331_v5  ;;  %v4984_v10 = vunpack.i.l.bf16 %v7797_v3  ;;  %v1144_v57 = vrot.slane %v1142_v9, 2  ;;  %v5000_v26 = vunpack.i.h.bf16 %v7887_v11  ;;  %v8199_v52 = vpop.permute.xlu0 %5082 }
 0x185   : > { %v4076_v44 = vsel %vm4061_vm12, %v4050_v15, %v4989_v23  ;;  %v4077_v48 = vsel %vm4061_vm12, %v4051_v54, %v4990_v33  ;;  %v4071_v8 = vsel %vm4061_vm12, %v4045_v20, %v4985_v31  ;;  %v4999_v7 = vunpack.i.l.bf16 %v7887_v11  ;;  %v9124_v15 = vld [vmem:[#allocation39_spill] sm:$0xff]  ;;  %v9126_v23 = vld [vmem:[#allocation70_spill] sm:$0xff] }
 0x186   : > { %v3572_v30 = vcombine.low %v8076_v19, %v1125_v43  ;;  %v4070_v3 = vsel %vm4061_vm12, %v4044_v39, %v4984_v10  ;;  %v1127_v22 = vcombine.high %v1125_v43, %v1125_v43  ;;  %v1145_v9 = vrot.slane %v1125_v43, 7  ;;  %v9125_v39 = vld [vmem:[#allocation29_spill] sm:$0xff] }
 0x187   : > { %2781 = vrot.lane.b32.xlu0 %v8116_v6, %s5285_s18  ;;  %v4102_v24 = vsel %vm4087_vm13, %v4076_v44, %v4999_v7  ;;  %v4103_v28 = vsel %vm4087_vm13, %v4077_v48, %v5000_v26  ;;  %v4995_v1 = vunpack.i.h.bf16 %v7847_v47  ;;  %v4994_v11 = vunpack.i.l.bf16 %v7847_v47  ;;  %v9129_v7 = vld [vmem:[#allocation59_spill] sm:$0xff] }
 0x188   : > { %3272 = vrot.lane.b32.xlu1 %v3223_v46, %s5291_s24  ;;  %v3579_v41 = vrot.slane %v3572_v30, %v5331_v5  ;;  %v1146_v19 = vsel %vm5514_vm6, %v1144_v57, %v1145_v9  ;;  %v1147_v60 = vrot.slane %v1145_v9, 2  ;;  %v1148_v36 = vrot.slane %v1127_v22, 7  ;;  %v8225_v46 = vpop.permute.xlu1 %5087  ;;  %v8227_v54 = vpop.permute.xlu0 %5092 }
 0x189   : > { %v3848_v12 = vcombine.low %v1125_v43, %v1127_v22  ;;  %v4096_v6 = vsel %vm4087_vm13, %v4070_v3, %v4994_v11  ;;  %v4097_v38 = vsel %vm4087_vm13, %v4071_v8, %v4995_v1  ;;  %v5010_v55 = vunpack.i.h.bf16 %v7934_v34  ;;  %v9128_v43 = vld [vmem:[#allocation34_spill] sm:$0xff]  ;;  %v9130_v3 = vld [vmem:[#allocation32_spill] sm:$0xff] }
 0x18a   : > { %v1149_v2 = vsel %vm5514_vm6, %v1147_v60, %v1148_v36  ;;  %v5009_v47 = vunpack.i.l.bf16 %v7934_v34  ;;  %v5005_v50 = vunpack.i.h.bf16 %v7889_v27  ;;  %v5004_v18 = vunpack.i.l.bf16 %v7889_v27 }
 0x18b   : > { %3489 = vrot.lane.b32.xlu0 %v3440_v63, %s5287_s20  ;;  %v3727_v35 = vcombine.low %v1146_v19, %v1149_v2  ;;  %v3855_v17 = vrot.slane %v3848_v12, %v5331_v5  ;;  %v4129_v16 = vsel %vm4113_vm14, %v4103_v28, %v5010_v55  ;;  %v5020_v13 = vunpack.i.h.bf16 %v7965_v56 }
 0x18c   : > { %3628 = vrot.lane.b32.xlu1 %v3579_v41, %s5288_s21  ;;  %v4128_v45 = vsel %vm4113_vm14, %v4102_v24, %v5009_v47  ;;  %v4122_v34 = vsel %vm4113_vm14, %v4096_v6, %v5004_v18  ;;  %v4123_v27 = vsel %vm4113_vm14, %v4097_v38, %v5005_v50  ;;  %v5019_v21 = vunpack.i.l.bf16 %v7965_v56  ;;  %v8264_v1 = vpop.permute.xlu1 %5097  ;;  %v8266_v11 = vpop.permute.xlu0 %5102 }
 0x18d   : > { %v1455_v20 = vcombine.low %v9125_v39, %v9124_v15  ;;  %v3734_v25 = vrot.slane %v3727_v35, %v5331_v5  ;;  %v4146_v63 = vpack.c.bf16 %v4129_v16, %v4128_v45  ;;  %v4143_v33 = vpack.c.bf16 %v4123_v27, %v4122_v34 }
 0x18e   : > { %v9127_v31 = vunpack.i.h.bf16 %v9126_v23  ;;  %v5015_v57 = vunpack.i.h.bf16 %v7936_v59  ;;  %v5014_v26 = vunpack.i.l.bf16 %v7936_v59  ;;  %v5030_v44 = vunpack.i.h.bf16 %v8009_v61 }
 0x18f   : > { %3783 = vrot.lane.b32.xlu0 %v3734_v25, %s5290_s23  ;;  %4700 = vmatmul.mubr.msk.bf16.gmra.mrb[16].mxu0 %vm4172_vm2, %v4143_v33  ;;  %v5029_v56 = vunpack.i.l.bf16 %v8009_v61  ;;  %v5025_v5 = vunpack.i.h.bf16 %v7967_v29  ;;  %v5024_v48 = vunpack.i.l.bf16 %v7967_v29  ;;  %v5040_v8 = vunpack.i.h.bf16 %v8051_v14 }
 0x190   : > { %v3943_v10 = vsel %vm3931_vm7, %v9128_v43, %v9127_v31  ;;  %3904 = vrot.lane.b32.xlu1 %v3855_v17, %s5292_s25  ;;  %v3968_v30 = vsel %vm3957_vm8, %v9129_v7, %v5019_v21  ;;  %v3948_v22 = vsel %vm3931_vm7, %v9130_v3, %v5014_v26  ;;  %4712 = vmatmul.mubr.msk.bf16.vlgmr.msra.gmra.mrb[0].mxu1 %vm4172_vm2, %v4146_v63  ;;  %v5039_v61 = vunpack.i.l.bf16 %v8051_v14  ;;  %v5108_v21 = vpop.permute.xlu1 %5107 }
 0x191   : > { %v3969_v59 = vsel %vm3957_vm8, %v3943_v10, %v5020_v13  ;;  %v3949_v9 = vsel %vm3931_vm7, %v1455_v20, %v5015_v57  ;;  %v3994_v29 = vsel %vm3983_vm9, %v3968_v30, %v5029_v56  ;;  %v3974_v28 = vsel %vm3957_vm8, %v3948_v22, %v5024_v48  ;;  %4703 = vmatprep.mubr.msk.bf16.mxu0 %vm5294_vm1, %v9076_v51 }
 0x192   : > { %v3995_v24 = vsel %vm3983_vm9, %v3969_v59, %v5030_v44  ;;  %v3975_v41 = vsel %vm3957_vm8, %v3949_v9, %v5025_v5  ;;  %v5035_v19 = vunpack.i.h.bf16 %v8011_v0  ;;  %v5034_v14 = vunpack.i.l.bf16 %v8011_v0  ;;  %4715 = vmatprep.mubr.msk.bf16.mxu1 %vm5294_vm1, %v9076_v51 }
 0x193   : > { %v5050_v60 = vunpack.i.h.bf16 %v8089_v37  ;;  %v4021_v36 = vsel %vm4009_vm10, %v3995_v24, %v5040_v8  ;;  %v5049_v12 = vunpack.i.l.bf16 %v8089_v37  ;;  %v5044_v6 = vunpack.i.l.bf16 %v8053_v4  ;;  %v8294_v15 = vpop.permute.xlu0 %5112 }
 0x194   : > { %v5060_v38 = vunpack.i.h.bf16 %v8127_v32  ;;  %v4020_v55 = vsel %vm4009_vm10, %v3994_v29, %v5039_v61  ;;  %v4000_v2 = vsel %vm3983_vm9, %v3974_v28, %v5034_v14  ;;  %v5045_v47 = vunpack.i.h.bf16 %v8053_v4  ;;  %v5118_v7 = vpop.permute.xlu1 %5117 }
 0x195   : > { %v5059_v0 = vunpack.i.l.bf16 %v8127_v32  ;;  %v4001_v50 = vsel %vm3983_vm9, %v3975_v41, %v5035_v19  ;;  %v4046_v18 = vsel %vm4035_vm11, %v4020_v55, %v5049_v12  ;;  %v4047_v35 = vsel %vm4035_vm11, %v4021_v36, %v5050_v60  ;;  %v9131_v41 = vld [vmem:[#allocation23_spill] sm:$0xff]  ;;  %v9132_v19 = vld [vmem:[#allocation25_spill] sm:$0xff]  ;;  %v9134_v36 = vld [vmem:[#allocation74_spill] sm:$0xff] }
 0x196   : > { %v4026_v37 = vsel %vm4009_vm10, %v4000_v2, %v5044_v6  ;;  %v4073_v17 = vsel %vm4061_vm12, %v4047_v35, %v5060_v38  ;;  %v5055_v16 = vunpack.i.h.bf16 %v8091_v58  ;;  %v5054_v13 = vunpack.i.l.bf16 %v8091_v58 }
 0x197   : > { %v5070_v45 = vunpack.i.h.bf16 %v8161_v49  ;;  %v5069_v4 = vunpack.i.l.bf16 %v8161_v49  ;;  %v5065_v32 = vunpack.i.h.bf16 %v8129_v42  ;;  %v5064_v34 = vunpack.i.l.bf16 %v8129_v42 }
 0x198   : > { %v5080_v27 = vunpack.i.h.bf16 %v8197_v62  ;;  %v4027_v39 = vsel %vm4009_vm10, %v4001_v50, %v5045_v47  ;;  %v4072_v20 = vsel %vm4061_vm12, %v4046_v18, %v5059_v0  ;;  %v5079_v58 = vunpack.i.l.bf16 %v8197_v62  ;;  %v9135_v47 = vld [vmem:[#allocation96_spill] sm:$0xff] }
 0x199   : > { %v4099_v25 = vsel %vm4087_vm13, %v4073_v17, %v5070_v45  ;;  %v4052_v63 = vsel %vm4035_vm11, %v4026_v37, %v5054_v13  ;;  %v4053_v49 = vsel %vm4035_vm11, %v4027_v39, %v5055_v16  ;;  %v4098_v33 = vsel %vm4087_vm13, %v4072_v20, %v5069_v4  ;;  %v9136_v50 = vld [vmem:[#allocation76_spill] sm:$0xff] }
 0x19a   : > { %v4125_v42 = vsel %vm4113_vm14, %v4099_v25, %v5080_v27  ;;  %v4078_v23 = vsel %vm4061_vm12, %v4052_v63, %v5064_v34  ;;  %v4124_v31 = vsel %vm4113_vm14, %v4098_v33, %v5079_v58  ;;  %v5075_v43 = vunpack.i.h.bf16 %v8163_v53 }
 0x19b   : > { %v5074_v10 = vunpack.i.l.bf16 %v8163_v53  ;;  %v4079_v57 = vsel %vm4061_vm12, %v4053_v49, %v5065_v32  ;;  %v4144_v26 = vpack.c.bf16 %v4125_v42, %v4124_v31  ;;  %v5085_v62 = vunpack.i.h.bf16 %v8199_v52  ;;  %v5123_v30 = vpop.permute.xlu0 %5122 }
 0x19c   : > { %v5084_v44 = vunpack.i.l.bf16 %v8199_v52  ;;  %v4105_v5 = vsel %vm4087_vm13, %v4079_v57, %v5075_v43  ;;  %v5128_v52 = vpop.permute.xlu1 %5127  ;;  %v5090_v3 = vunpack.i.h.bf16 %v8225_v46  ;;  %v5089_v22 = vunpack.i.l.bf16 %v8225_v46 }
 0x19d   : > { %v4104_v56 = vsel %vm4087_vm13, %v4078_v23, %v5074_v10  ;;  %v4131_v8 = vsel %vm4113_vm14, %v4105_v5, %v5085_v62  ;;  %4704 = vmatmul.mubr.msk.bf16.gmra.mrb[20].mxu0 %vm4172_vm2, %v4144_v26  ;;  %v5100_v61 = vunpack.i.h.bf16 %v8264_v1  ;;  %v5099_v9 = vunpack.i.l.bf16 %v8264_v1 }
 0x19e   : > { %v4130_v48 = vsel %vm4113_vm14, %v4104_v56, %v5084_v44  ;;  %4707 = vmatprep.mubr.msk.bf16.mxu0 %vm5294_vm1, %v9076_v51  ;;  %v5095_v29 = vunpack.i.h.bf16 %v8227_v54  ;;  %v5094_v24 = vunpack.i.l.bf16 %v8227_v54  ;;  %v5109_v28 = vunpack.i.l.bf16 %v5108_v21 }
 0x19f   : > { %v4147_v53 = vpack.c.bf16 %v4131_v8, %v4130_v48  ;;  %v5133_v59 = vpop.permute.xlu0 %5132  ;;  %v9133_v14 = vcombine.low %v9131_v41, %v9132_v19  ;;  %v3950_v12 = vsel %vm3931_vm7, %v9134_v36, %v5089_v22  ;;  %v5110_v6 = vunpack.i.h.bf16 %v5108_v21 }
 0x1a0   : > { %v5105_v46 = vunpack.i.h.bf16 %v8266_v11  ;;  %v3976_v38 = vsel %vm3957_vm8, %v3950_v12, %v5099_v9  ;;  %v5104_v55 = vunpack.i.l.bf16 %v8266_v11  ;;  %v3970_v0 = vsel %vm3957_vm8, %v9135_v47, %v5094_v24  ;;  %v9138_v47 = vld [vmem:[#allocation41_spill] sm:$0xff] }
 0x1a1   : > { %4716 = vmatmul.mubr.msk.bf16.gmra.mrb[4].mxu1 %vm4172_vm2, %v4147_v53  ;;  %v3951_v60 = vsel %vm3931_vm7, %v9133_v14, %v5090_v3  ;;  %v3971_v18 = vsel %vm3957_vm8, %v9136_v50, %v5095_v29  ;;  %v5115_v35 = vunpack.i.h.bf16 %v8294_v15  ;;  %v5114_v37 = vunpack.i.l.bf16 %v8294_v15 }
 0x1a2   : > { %4719 = vmatprep.mubr.msk.bf16.mxu1 %vm5294_vm1, %v9076_v51  ;;  %v3977_v1 = vsel %vm3957_vm8, %v3951_v60, %v5100_v61  ;;  %v4002_v17 = vsel %vm3983_vm9, %v3976_v38, %v5109_v28  ;;  %v5120_v16 = vunpack.i.h.bf16 %v5118_v7  ;;  %v5125_v13 = vunpack.i.h.bf16 %v5123_v30 }
 0x1a3   : > { %v5124_v45 = vunpack.i.l.bf16 %v5123_v30  ;;  %v4003_v4 = vsel %vm3983_vm9, %v3977_v1, %v5110_v6  ;;  %v3997_v11 = vsel %vm3983_vm9, %v3971_v18, %v5105_v46  ;;  %v5135_v32 = vunpack.i.h.bf16 %v5133_v59  ;;  %v9140_v18 = vld [vmem:[#allocation73_spill] sm:$0xff] }
 0x1a4   : > { %v5138_v2 = vpop.permute.xlu1 %5137  ;;  %v5134_v34 = vunpack.i.l.bf16 %v5133_v59  ;;  %v3996_v27 = vsel %vm3983_vm9, %v3970_v0, %v5104_v55  ;;  %v5119_v21 = vunpack.i.l.bf16 %v5118_v7  ;;  %v4023_v15 = vsel %vm4009_vm10, %v3997_v11, %v5115_v35 }
 0x1a5   : > { %v4022_v25 = vsel %vm4009_vm10, %v3996_v27, %v5114_v37  ;;  %v5130_v58 = vunpack.i.h.bf16 %v5128_v52  ;;  %v5129_v63 = vunpack.i.l.bf16 %v5128_v52  ;;  %v4049_v33 = vsel %vm4035_vm11, %v4023_v15, %v5125_v13 }
 0x1a6   : > { %v4048_v49 = vsel %vm4035_vm11, %v4022_v25, %v5124_v45  ;;  %v5140_v42 = vunpack.i.h.bf16 %v5138_v2  ;;  %v5139_v23 = vunpack.i.l.bf16 %v5138_v2  ;;  %v4075_v57 = vsel %vm4061_vm12, %v4049_v33, %v5135_v32 }
 0x1a7   : > { %v4074_v10 = vsel %vm4061_vm12, %v4048_v49, %v5134_v34  ;;  %v4028_v8 = vsel %vm4009_vm10, %v4002_v17, %v5119_v21  ;;  %v4029_v7 = vsel %vm4009_vm10, %v4003_v4, %v5120_v16 }
 0x1a8   : > { %v4054_v52 = vsel %vm4035_vm11, %v4028_v8, %v5129_v63  ;;  %v4055_v59 = vsel %vm4035_vm11, %v4029_v7, %v5130_v58 }
 0x1a9   : > { %v5143_v54 = vpop.permute.xlu0 %5142  ;;  %v4080_v61 = vsel %vm4061_vm12, %v4054_v52, %v5139_v23  ;;  %v4081_v9 = vsel %vm4061_vm12, %v4055_v59, %v5140_v42 }
 0x1aa   : > { %v5145_v39 = vunpack.i.h.bf16 %v5143_v54  ;;  %v5144_v20 = vunpack.i.l.bf16 %v5143_v54  ;;  %v9137_v54 = vld [vmem:[#allocation40_spill] sm:$0xff] }
 0x1ab   : > { %v9139_v0 = vcombine.low %v9137_v54, %v9138_v47 }
 0x1ac   : > { %v4100_v5 = vsel %vm4087_vm13, %v4074_v10, %v5144_v20  ;;  %v4101_v48 = vsel %vm4087_vm13, %v4075_v57, %v5145_v39 }
 0x1af   : > { %v5153_v43 = vpop.permute.xlu0 %5152 }
 0x1b0   : > { %v5148_v31 = vpop.permute.xlu1 %5147  ;;  %v5155_v26 = vunpack.i.h.bf16 %v5153_v43  ;;  %v5154_v62 = vunpack.i.l.bf16 %v5153_v43 }
 0x1b1   : > { %v5150_v44 = vunpack.i.h.bf16 %v5148_v31  ;;  %v5149_v56 = vunpack.i.l.bf16 %v5148_v31 }
 0x1b2   : > { %v4126_v30 = vsel %vm4113_vm14, %v4100_v5, %v5154_v62  ;;  %v4127_v53 = vsel %vm4113_vm14, %v4101_v48, %v5155_v26 }
 0x1b3   : > { %v4145_v22 = vpack.c.bf16 %v4127_v53, %v4126_v30  ;;  %v4106_v28 = vsel %vm4087_vm13, %v4080_v61, %v5149_v56  ;;  %v4107_v41 = vsel %vm4087_vm13, %v4081_v9, %v5150_v44  ;;  %v5163_v36 = vpop.permute.xlu0 %5162  ;;  %v9141_v61 = vld [vmem:[#allocation50_spill] sm:$0xff] }
 0x1b4   : > { %v5158_v3 = vpop.permute.xlu1 %5157  ;;  %v5165_v46 = vunpack.i.h.bf16 %v5163_v36  ;;  %v5164_v38 = vunpack.i.l.bf16 %v5163_v36 }
 0x1b5   : > { %v5160_v29 = vunpack.i.h.bf16 %v5158_v3  ;;  %v5159_v24 = vunpack.i.l.bf16 %v5158_v3  ;;  %4708 = vmatmul.mubr.msk.bf16.gmra.mrb[24].mxu0 %vm4172_vm2, %v4145_v22 }
 0x1b6   : > { %v3953_v50 = vsel %vm3931_vm7, %v9139_v0, %v5165_v46  ;;  %v3952_v35 = vsel %vm3931_vm7, %v9140_v18, %v5164_v38 }
 0x1b7   : > { %v4132_v19 = vsel %vm4113_vm14, %v4106_v28, %v5159_v24  ;;  %v4133_v14 = vsel %vm4113_vm14, %v4107_v41, %v5160_v29  ;;  %v9142_v29 = vld [vmem:[#allocation51_spill] sm:$0xff]  ;;  %v9143_v24 = vld [vmem:[#allocation53_spill] sm:$0xff] }
 0x1b8   : > { %v4148_v60 = vpack.c.bf16 %v4133_v14, %v4132_v19  ;;  %v5168_v12 = vpop.permute.xlu1 %5167  ;;  %v9144_v28 = vcombine.low %v9142_v29, %v9143_v24 }
 0x1b9   : > { %v5170_v55 = vunpack.i.h.bf16 %v5168_v12  ;;  %v5169_v2 = vunpack.i.l.bf16 %v5168_v12 }
 0x1ba   : > { %4720 = vmatmul.mubr.msk.bf16.gmra.mrb[8].mxu1 %vm4172_vm2, %v4148_v60 }
 0x1bb   : > { %4723 = vmatprep.mubr.msk.bf16.mxu1 %vm5294_vm1, %v9076_v51  ;;  %v5173_v6 = vpop.permute.xlu0 %5172  ;;  %v3978_v13 = vsel %vm3957_vm8, %v3952_v35, %v5169_v2  ;;  %v3979_v45 = vsel %vm3957_vm8, %v3953_v50, %v5170_v55 }
 0x1bc   : > { %v5175_v37 = vunpack.i.h.bf16 %v5173_v6  ;;  %v5174_v17 = vunpack.i.l.bf16 %v5173_v6 }
 0x1be   : > { %v4004_v32 = vsel %vm3983_vm9, %v3978_v13, %v5174_v17  ;;  %v4005_v34 = vsel %vm3983_vm9, %v3979_v45, %v5175_v37 }
 0x1c1   : > { %v5178_v1 = vpop.permute.xlu1 %5177 }
 0x1c2   : > { %v5183_v16 = vpop.permute.xlu0 %5182  ;;  %v5180_v4 = vunpack.i.h.bf16 %v5178_v1  ;;  %v5179_v11 = vunpack.i.l.bf16 %v5178_v1 }
 0x1c3   : > { %v5185_v27 = vunpack.i.h.bf16 %v5183_v16  ;;  %v5184_v21 = vunpack.i.l.bf16 %v5183_v16 }
 0x1c4   : > { %v4030_v20 = vsel %vm4009_vm10, %v4004_v32, %v5179_v11  ;;  %v4031_v25 = vsel %vm4009_vm10, %v4005_v34, %v5180_v4 }
 0x1c5   : > { %v4056_v63 = vsel %vm4035_vm11, %v4030_v20, %v5184_v21  ;;  %v4057_v49 = vsel %vm4035_vm11, %v4031_v25, %v5185_v27 }
 0x1c8   : > { %v5188_v39 = vpop.permute.xlu1 %5187 }
 0x1c9   : > { %v5190_v15 = vunpack.i.h.bf16 %v5188_v39  ;;  %v5189_v58 = vunpack.i.l.bf16 %v5188_v39 }
 0x1cb   : > { %v4082_v43 = vsel %vm4061_vm12, %v4056_v63, %v5189_v58  ;;  %v4083_v10 = vsel %vm4061_vm12, %v4057_v49, %v5190_v15 }
 0x1d3   : > { %v5193_v33 = vpop.permute.xlu0 %5192 }
 0x1d4   : > { %v5195_v42 = vunpack.i.h.bf16 %v5193_v33  ;;  %v5194_v23 = vunpack.i.l.bf16 %v5193_v33  ;;  %v5198_v31 = vpop.permute.xlu1 %5197 }
 0x1d5   : > { %v5200_v57 = vunpack.i.h.bf16 %v5198_v31  ;;  %v5199_v26 = vunpack.i.l.bf16 %v5198_v31 }
 0x1d6   : > { %v4108_v62 = vsel %vm4087_vm13, %v4082_v43, %v5194_v23  ;;  %v4109_v44 = vsel %vm4087_vm13, %v4083_v10, %v5195_v42 }
 0x1d7   : > { %v4134_v56 = vsel %vm4113_vm14, %v4108_v62, %v5199_v26  ;;  %v4135_v5 = vsel %vm4113_vm14, %v4109_v44, %v5200_v57  ;;  %v5203_v8 = vpop.permute.xlu0 %5202 }
 0x1d8   : > { %v4149_v48 = vpack.c.bf16 %v4135_v5, %v4134_v56  ;;  %v5208_v7 = vpop.permute.xlu1 %5207  ;;  %v5205_v53 = vunpack.i.h.bf16 %v5203_v8  ;;  %v5204_v52 = vunpack.i.l.bf16 %v5203_v8 }
 0x1d9   : > { %v5210_v3 = vunpack.i.h.bf16 %v5208_v7  ;;  %v5209_v22 = vunpack.i.l.bf16 %v5208_v7 }
 0x1da   : > { %4724 = vmatmul.mubr.msk.bf16.gmra.mrb[12].mxu1 %vm4172_vm2, %v4149_v48  ;;  %v3955_v9 = vsel %vm3931_vm7, %v9141_v61, %v5205_v53  ;;  %v3954_v41 = vsel %vm3931_vm7, %v9144_v28, %v5204_v52 }
 0x1db   : > { %4727 = vmatprep.mubr.msk.bf16.mxu1 %vm5294_vm1, %v9076_v51  ;;  %v5213_v30 = vpop.permute.xlu0 %5212  ;;  %v3980_v36 = vsel %vm3957_vm8, %v3954_v41, %v5209_v22  ;;  %v3981_v12 = vsel %vm3957_vm8, %v3955_v9, %v5210_v3 }
 0x1dc   : > { %v5215_v19 = vunpack.i.h.bf16 %v5213_v30  ;;  %v5214_v14 = vunpack.i.l.bf16 %v5213_v30 }
 0x1de   : > { %v4006_v38 = vsel %vm3983_vm9, %v3980_v36, %v5214_v14  ;;  %v4007_v1 = vsel %vm3983_vm9, %v3981_v12, %v5215_v19 }
 0x1e0   : > { %v5218_v59 = vpop.permute.xlu1 %5217 }
 0x1e1   : > { %v5220_v6 = vunpack.i.h.bf16 %v5218_v59  ;;  %v5219_v46 = vunpack.i.l.bf16 %v5218_v59 }
 0x1e2   : > { %v5223_v60 = vpop.permute.xlu0 %5222 }
 0x1e3   : > { %v5225_v55 = vunpack.i.h.bf16 %v5223_v60  ;;  %v5224_v2 = vunpack.i.l.bf16 %v5223_v60  ;;  %v4032_v47 = vsel %vm4009_vm10, %v4006_v38, %v5219_v46  ;;  %v4033_v0 = vsel %vm4009_vm10, %v4007_v1, %v5220_v6 }
 0x1e5   : > { %v4058_v35 = vsel %vm4035_vm11, %v4032_v47, %v5224_v2  ;;  %v4059_v37 = vsel %vm4035_vm11, %v4033_v0, %v5225_v55 }
 0x1e8   : > { %v5228_v54 = vpop.permute.xlu1 %5227 }
 0x1e9   : > { %v5230_v50 = vunpack.i.h.bf16 %v5228_v54  ;;  %v5229_v18 = vunpack.i.l.bf16 %v5228_v54 }
 0x1eb   : > { %v4084_v4 = vsel %vm4061_vm12, %v4058_v35, %v5229_v18  ;;  %v4085_v11 = vsel %vm4061_vm12, %v4059_v37, %v5230_v50 }
 0x1f1   : > { %v5233_v17 = vpop.permute.xlu0 %5232 }
 0x1f2   : > { %v5235_v16 = vunpack.i.h.bf16 %v5233_v17  ;;  %v5234_v13 = vunpack.i.l.bf16 %v5233_v17  ;;  %v5238_v45 = vpop.permute.xlu1 %5237 }
 0x1f3   : > { %v5240_v32 = vunpack.i.h.bf16 %v5238_v45  ;;  %v5239_v34 = vunpack.i.l.bf16 %v5238_v45 }
 0x1f4   : > { %v4110_v27 = vsel %vm4087_vm13, %v4084_v4, %v5234_v13  ;;  %v4111_v21 = vsel %vm4087_vm13, %v4085_v11, %v5235_v16 }
 0x1f5   : > { %v4136_v39 = vsel %vm4113_vm14, %v4110_v27, %v5239_v34  ;;  %v4137_v20 = vsel %vm4113_vm14, %v4111_v21, %v5240_v32  ;;  %v2056_v25 = vpop.permute.xlu0 %2055 }
 0x1f6   : > { %v4150_v15 = vpack.c.bf16 %v4137_v20, %v4136_v39  ;;  %v3956_v58 = vsel %vm3931_vm7, %v7827_v40, %v2056_v25  ;;  %v2547_v63 = vpop.permute.xlu1 %2546 }
 0x1f7   : > { %v3982_v49 = vsel %vm3957_vm8, %v3956_v58, %v2547_v63 }
 0x1f8   : > { %4728 = vmatmul.mubr.msk.bf16.gmra.mrb[16].mxu1 %vm4172_vm2, %v4150_v15 }
 0x1f9   : > { %v2782_v33 = vpop.permute.xlu0 %2781  ;;  %4731 = vmatprep.mubr.msk.bf16.mxu1 %vm5294_vm1, %v9076_v51  ;;  %v4250_v40 = vpop.f32.mrb[0].mxu0 }
 0x1fa   : > { %v4008_v42 = vsel %vm3983_vm9, %v3982_v49, %v2782_v33  ;;  %v3273_v23 = vpop.permute.xlu1 %3272  ;;  %4352 = vst.msk [vmem:[%s8424_s8] sm:$0xff] %vm3957_vm8, %v4250_v40  ;;  %v4433_v31 = vmul.f32 %v4250_v40, %v4250_v40  ;;  %v4685_v43 = vpop.f32.mrb[1].mxu0  ;;  %v4378_v44 = vsel %vm3957_vm8, %v4250_v40, 0.0 }
 0x1fb   : > { %v4034_v10 = vsel %vm4009_vm10, %v4008_v42, %v3273_v23  ;;  %v4253_v26 = vpop.f32.mrb[2].mxu0 }
 0x1fc   : > { %4353 = vst.msk [vmem:[%s8424_s8 + $0x8] sm:$0xff] %vm3957_vm8, %v4253_v26  ;;  %v4379_v56 = vsel %vm3957_vm8, %v4253_v26, 0.0  ;;  %v4434_v5 = vmul.f32 %v4253_v26, %v4253_v26  ;;  %v4686_v48 = vpop.f32.mrb[3].mxu0  ;;  %v4458_v7 = vsel %vm3957_vm8, %v4433_v31, 0.0 }
 0x1fd   : > { %v3490_v57 = vpop.permute.xlu0 %3489  ;;  %v4380_v8 = vadd.f32 %v4379_v56, %v4378_v44 }
 0x1fe   : > { %v4060_v51 = vsel %vm4035_vm11, %v4034_v10, %v3490_v57  ;;  %v3629_v62 = vpop.permute.xlu1 %3628  ;;  %v4459_v30 = vsel %vm3957_vm8, %v4434_v5, 0.0 }
 0x1ff   : > { %v4086_v53 = vsel %vm4061_vm12, %v4060_v51, %v3629_v62  ;;  %v4460_v59 = vadd.f32 %v4459_v30, %v4458_v7 }
 0x201   : > { %v3784_v52 = vpop.permute.xlu0 %3783 }
 0x202   : > { %v4112_v3 = vsel %vm4087_vm13, %v4086_v53, %v3784_v52  ;;  %v3905_v22 = vpop.permute.xlu1 %3904 }
 0x203   : > { %v4138_v61 = vsel %vm4113_vm14, %v4112_v3, %v3905_v22 }
 0x204   : > { %v4151_v9 = vpack.c.bf16 %v4138_v61, %v4138_v61 }
 0x206   : > { %4732 = vmatmul.mubr.msk.bf16.gmra.mrb[20].mxu1 %vm4172_vm2, %v4151_v9 }
 0x214   : > { %v4258_v29 = vpop.f32.mrb[4].mxu0 }
 0x215   : > { %4354 = vst.msk [vmem:[%s8424_s8 + $0x10] sm:$0xff] %vm3957_vm8, %v4258_v29  ;;  %v4381_v24 = vsel %vm3957_vm8, %v4258_v29, 0.0  ;;  %v4435_v28 = vmul.f32 %v4258_v29, %v4258_v29  ;;  %v4689_v41 = vpop.f32.mrb[5].mxu0 }
 0x216   : > { %v4382_v19 = vadd.f32 %v4381_v24, %v4380_v8  ;;  %v4261_v14 = vpop.f32.mrb[6].mxu0 }
 0x217   : > { %v4461_v60 = vsel %vm3957_vm8, %v4435_v28, 0.0  ;;  %4355 = vst.msk [vmem:[%s8424_s8 + $0x18] sm:$0xff] %vm3957_vm8, %v4261_v14  ;;  %v4383_v36 = vsel %vm3957_vm8, %v4261_v14, 0.0  ;;  %v4436_v12 = vmul.f32 %v4261_v14, %v4261_v14  ;;  %v4690_v6 = vpop.f32.mrb[7].mxu0 }
 0x218   : > { %v4462_v46 = vadd.f32 %v4461_v60, %v4460_v59  ;;  %v4384_v38 = vadd.f32 %v4383_v36, %v4382_v19 }
 0x219   : > { %v4463_v1 = vsel %vm3957_vm8, %v4436_v12, 0.0 }
 0x21a   : > { %v4464_v55 = vadd.f32 %v4463_v1, %v4462_v46 }
 0x226   : > { %v4266_v2 = vpop.f32.mrb[8].mxu0 }
 0x227   : > { %4356 = vst.msk [vmem:[%s8424_s8 + $0x20] sm:$0xff] %vm3957_vm8, %v4266_v2  ;;  %v4385_v54 = vsel %vm3957_vm8, %v4266_v2, 0.0  ;;  %v4437_v47 = vmul.f32 %v4266_v2, %v4266_v2  ;;  %v4693_v0 = vpop.f32.mrb[9].mxu0 }
 0x228   : > { %v4386_v50 = vadd.f32 %v4385_v54, %v4384_v38  ;;  %v4269_v18 = vpop.f32.mrb[10].mxu0 }
 0x229   : > { %v4465_v35 = vsel %vm3957_vm8, %v4437_v47, 0.0  ;;  %4357 = vst.msk [vmem:[%s8424_s8 + $0x28] sm:$0xff] %vm3957_vm8, %v4269_v18  ;;  %v4387_v37 = vsel %vm3957_vm8, %v4269_v18, 0.0  ;;  %v4438_v17 = vmul.f32 %v4269_v18, %v4269_v18  ;;  %v4694_v16 = vpop.f32.mrb[11].mxu0 }
 0x22a   : > { %v4466_v13 = vadd.f32 %v4465_v35, %v4464_v55  ;;  %v4388_v45 = vadd.f32 %v4387_v37, %v4386_v50 }
 0x22b   : > { %v4467_v4 = vsel %vm3957_vm8, %v4438_v17, 0.0 }
 0x22c   : > { %v4468_v11 = vadd.f32 %v4467_v4, %v4466_v13 }
 0x250   : > { %v4274_v32 = vpop.f32.mrb[12].mxu0 }
 0x251   : > { %4358 = vst.msk [vmem:[%s8424_s8 + $0x30] sm:$0xff] %vm3957_vm8, %v4274_v32  ;;  %v4389_v34 = vsel %vm3957_vm8, %v4274_v32, 0.0  ;;  %v4439_v27 = vmul.f32 %v4274_v32, %v4274_v32  ;;  %v4697_v21 = vpop.f32.mrb[13].mxu0 }
 0x252   : > { %v4390_v39 = vadd.f32 %v4389_v34, %v4388_v45  ;;  %v4277_v20 = vpop.f32.mrb[14].mxu0 }
 0x253   : > { %v4469_v25 = vsel %vm3957_vm8, %v4439_v27, 0.0  ;;  %4359 = vst.msk [vmem:[%s8424_s8 + $0x38] sm:$0xff] %vm3957_vm8, %v4277_v20  ;;  %v4391_v15 = vsel %vm3957_vm8, %v4277_v20, 0.0  ;;  %v4440_v58 = vmul.f32 %v4277_v20, %v4277_v20  ;;  %v4698_v63 = vpop.f32.mrb[15].mxu0 }
 0x254   : > { %v4470_v49 = vadd.f32 %v4469_v25, %v4468_v11  ;;  %v4392_v33 = vadd.f32 %v4391_v15, %v4390_v39 }
 0x255   : > { %v4471_v42 = vsel %vm3957_vm8, %v4440_v58, 0.0 }
 0x256   : > { %v4472_v23 = vadd.f32 %v4471_v42, %v4470_v49 }
 0x262   : > { %v4282_v40 = vpop.f32.mrb[16].mxu0 }
 0x263   : > { %4360 = vst.msk [vmem:[%s8424_s8 + $0x40] sm:$0xff] %vm3957_vm8, %v4282_v40  ;;  %v4393_v31 = vsel %vm3957_vm8, %v4282_v40, 0.0  ;;  %v4441_v43 = vmul.f32 %v4282_v40, %v4282_v40  ;;  %v4306_v10 = vpop.f32.mrb[0].mxu1  ;;  %v4701_v57 = vpop.f32.mrb[17].mxu0 }
 0x264   : > { %v4394_v26 = vadd.f32 %v4393_v31, %v4392_v33  ;;  %4366 = vst.msk [vmem:[%s8424_s8 + $0x70] sm:$0xff] %vm3957_vm8, %v4306_v10  ;;  %v4713_v51 = vpop.f32.mrb[1].mxu1  ;;  %v4285_v62 = vpop.f32.mrb[18].mxu0  ;;  %v4447_v35 = vmul.f32 %v4306_v10, %v4306_v10  ;;  %v4405_v32 = vsel %vm3957_vm8, %v4306_v10, 0.0 }
 0x265   : > { %v4473_v44 = vsel %vm3957_vm8, %v4441_v43, 0.0  ;;  %4361 = vst.msk [vmem:[%s8424_s8 + $0x48] sm:$0xff] %vm3957_vm8, %v4285_v62  ;;  %v4395_v56 = vsel %vm3957_vm8, %v4285_v62, 0.0  ;;  %v4442_v5 = vmul.f32 %v4285_v62, %v4285_v62  ;;  %v4309_v48 = vpop.f32.mrb[2].mxu1  ;;  %v4702_v8 = vpop.f32.mrb[19].mxu0 }
 0x266   : > { %v4474_v7 = vadd.f32 %v4473_v44, %v4472_v23  ;;  %v4396_v30 = vadd.f32 %v4395_v56, %v4394_v26  ;;  %4367 = vst.msk [vmem:[%s8424_s8 + $0x78] sm:$0xff] %vm3957_vm8, %v4309_v48  ;;  %v4714_v53 = vpop.f32.mrb[3].mxu1  ;;  %v4448_v34 = vmul.f32 %v4309_v48, %v4309_v48  ;;  %v4485_v15 = vsel %vm3957_vm8, %v4447_v35, 0.0 }
 0x267   : > { %v4475_v52 = vsel %vm3957_vm8, %v4442_v5, 0.0  ;;  %v4407_v58 = vsel %vm3957_vm8, %v4309_v48, 0.0 }
 0x268   : > { %v4476_v59 = vadd.f32 %v4475_v52, %v4474_v7  ;;  %v4487_v23 = vsel %vm3957_vm8, %v4448_v34, 0.0 }
 0x270   : > { %v4290_v3 = vpop.f32.mrb[20].mxu0 }
 0x271   : > { %4362 = vst.msk [vmem:[%s8424_s8 + $0x50] sm:$0xff] %vm3957_vm8, %v4290_v3  ;;  %v4397_v22 = vsel %vm3957_vm8, %v4290_v3, 0.0  ;;  %v4443_v61 = vmul.f32 %v4290_v3, %v4290_v3  ;;  %v4705_v9 = vpop.f32.mrb[21].mxu0 }
 0x272   : > { %v4398_v29 = vadd.f32 %v4397_v22, %v4396_v30  ;;  %v4293_v24 = vpop.f32.mrb[22].mxu0 }
 0x273   : > { %v4477_v28 = vsel %vm3957_vm8, %v4443_v61, 0.0  ;;  %4363 = vst.msk [vmem:[%s8424_s8 + $0x58] sm:$0xff] %vm3957_vm8, %v4293_v24  ;;  %v4399_v41 = vsel %vm3957_vm8, %v4293_v24, 0.0  ;;  %v4444_v19 = vmul.f32 %v4293_v24, %v4293_v24  ;;  %v4706_v14 = vpop.f32.mrb[23].mxu0 }
 0x274   : > { %v4314_v60 = vpop.f32.mrb[4].mxu1  ;;  %v4478_v36 = vadd.f32 %v4477_v28, %v4476_v59  ;;  %v4400_v12 = vadd.f32 %v4399_v41, %v4398_v29 }
 0x275   : > { %4368 = vst.msk [vmem:[%s8424_s8 + $0x80] sm:$0xff] %vm3957_vm8, %v4314_v60  ;;  %v4717_v6 = vpop.f32.mrb[5].mxu1  ;;  %v4479_v46 = vsel %vm3957_vm8, %v4444_v19, 0.0  ;;  %v4449_v63 = vmul.f32 %v4314_v60, %v4314_v60  ;;  %v4409_v40 = vsel %vm3957_vm8, %v4314_v60, 0.0 }
 0x276   : > { %v4317_v38 = vpop.f32.mrb[6].mxu1  ;;  %v4480_v1 = vadd.f32 %v4479_v46, %v4478_v36 }
 0x277   : > { %4369 = vst.msk [vmem:[%s8424_s8 + $0x88] sm:$0xff] %vm3957_vm8, %v4317_v38  ;;  %v4718_v55 = vpop.f32.mrb[7].mxu1  ;;  %v4450_v31 = vmul.f32 %v4317_v38, %v4317_v38  ;;  %v4489_v57 = vsel %vm3957_vm8, %v4449_v63, 0.0  ;;  %v4411_v26 = vsel %vm3957_vm8, %v4317_v38, 0.0 }
 0x279   : > { %v4491_v56 = vsel %vm3957_vm8, %v4450_v31, 0.0 }
 0x288   : > { %v4298_v2 = vpop.f32.mrb[24].mxu0 }
 0x289   : > { %4364 = vst.msk [vmem:[%s8424_s8 + $0x60] sm:$0xff] %vm3957_vm8, %v4298_v2  ;;  %v4401_v54 = vsel %vm3957_vm8, %v4298_v2, 0.0  ;;  %v4445_v47 = vmul.f32 %v4298_v2, %v4298_v2  ;;  %v4709_v0 = vpop.f32.mrb[25].mxu0 }
 0x28a   : > { %v4402_v50 = vadd.f32 %v4401_v54, %v4400_v12  ;;  %v4301_v18 = vpop.f32.mrb[26].mxu0 }
 0x28b   : > { %v4481_v37 = vsel %vm3957_vm8, %v4445_v47, 0.0  ;;  %4365 = vst.msk [vmem:[%s8424_s8 + $0x68] sm:$0xff] %vm3957_vm8, %v4301_v18  ;;  %v4403_v17 = vsel %vm3957_vm8, %v4301_v18, 0.0  ;;  %v4446_v16 = vmul.f32 %v4301_v18, %v4301_v18  ;;  %v4710_v13 = vpop.f32.mrb[27].mxu0 }
 0x28c   : > { %v4482_v45 = vadd.f32 %v4481_v37, %v4480_v1  ;;  %v4404_v11 = vadd.f32 %v4403_v17, %v4402_v50 }
 0x28d   : > { %v4322_v4 = vpop.f32.mrb[8].mxu1  ;;  %v4483_v21 = vsel %vm3957_vm8, %v4446_v16, 0.0 }
 0x28e   : > { %4370 = vst.msk [vmem:[%s8424_s8 + $0x90] sm:$0xff] %vm3957_vm8, %v4322_v4  ;;  %v4721_v27 = vpop.f32.mrb[9].mxu1  ;;  %v4406_v39 = vadd.f32 %v4405_v32, %v4404_v11  ;;  %v4484_v20 = vadd.f32 %v4483_v21, %v4482_v45  ;;  %v4451_v51 = vmul.f32 %v4322_v4, %v4322_v4  ;;  %v4413_v5 = vsel %vm3957_vm8, %v4322_v4, 0.0 }
 0x28f   : > { %v4325_v25 = vpop.f32.mrb[10].mxu1 }
 0x290   : > { %4371 = vst.msk [vmem:[%s8424_s8 + $0x98] sm:$0xff] %vm3957_vm8, %v4325_v25  ;;  %v4722_v49 = vpop.f32.mrb[11].mxu1  ;;  %v4408_v33 = vadd.f32 %v4407_v58, %v4406_v39  ;;  %v4486_v42 = vadd.f32 %v4485_v15, %v4484_v20  ;;  %v4452_v48 = vmul.f32 %v4325_v25, %v4325_v25  ;;  %v4493_v30 = vsel %vm3957_vm8, %v4451_v51, 0.0 }
 0x291   : > { %v4415_v53 = vsel %vm3957_vm8, %v4325_v25, 0.0 }
 0x292   : > { %v4488_v43 = vadd.f32 %v4487_v23, %v4486_v42  ;;  %v4410_v10 = vadd.f32 %v4409_v40, %v4408_v33  ;;  %v4495_v3 = vsel %vm3957_vm8, %v4452_v48, 0.0 }
 0x294   : > { %v4412_v62 = vadd.f32 %v4411_v26, %v4410_v10  ;;  %v4490_v44 = vadd.f32 %v4489_v57, %v4488_v43 }
 0x296   : > { %v4414_v8 = vadd.f32 %v4413_v5, %v4412_v62  ;;  %v4492_v7 = vadd.f32 %v4491_v56, %v4490_v44 }
 0x298   : > { %v4416_v52 = vadd.f32 %v4415_v53, %v4414_v8  ;;  %v4494_v59 = vadd.f32 %v4493_v30, %v4492_v7 }
 0x29a   : > { %v4496_v22 = vadd.f32 %v4495_v3, %v4494_v59 }
 0x2ad   : > { %v4330_v61 = vpop.f32.mrb[12].mxu1 }
 0x2ae   : > { %4372 = vst.msk [vmem:[%s8424_s8 + $0xa0] sm:$0xff] %vm3957_vm8, %v4330_v61  ;;  %v4417_v9 = vsel %vm3957_vm8, %v4330_v61, 0.0  ;;  %v4453_v29 = vmul.f32 %v4330_v61, %v4330_v61  ;;  %v4725_v24 = vpop.f32.mrb[13].mxu1 }
 0x2af   : > { %v4418_v28 = vadd.f32 %v4417_v9, %v4416_v52  ;;  %v4333_v41 = vpop.f32.mrb[14].mxu1 }
 0x2b0   : > { %v4497_v19 = vsel %vm3957_vm8, %v4453_v29, 0.0  ;;  %4373 = vst.msk [vmem:[%s8424_s8 + $0xa8] sm:$0xff] %vm3957_vm8, %v4333_v41  ;;  %v4419_v14 = vsel %vm3957_vm8, %v4333_v41, 0.0  ;;  %v4454_v60 = vmul.f32 %v4333_v41, %v4333_v41  ;;  %v4726_v36 = vpop.f32.mrb[15].mxu1 }
 0x2b1   : > { %v4498_v12 = vadd.f32 %v4497_v19, %v4496_v22  ;;  %v4420_v6 = vadd.f32 %v4419_v14, %v4418_v28 }
 0x2b2   : > { %v4499_v46 = vsel %vm3957_vm8, %v4454_v60, 0.0 }
 0x2b3   : > { %v4500_v38 = vadd.f32 %v4499_v46, %v4498_v12 }
 0x2cb   : > { %v4338_v1 = vpop.f32.mrb[16].mxu1 }
 0x2cc   : > { %4374 = vst.msk [vmem:[%s8424_s8 + $0xb0] sm:$0xff] %vm3957_vm8, %v4338_v1  ;;  %v4421_v55 = vsel %vm3957_vm8, %v4338_v1, 0.0  ;;  %v4455_v2 = vmul.f32 %v4338_v1, %v4338_v1  ;;  %v4729_v54 = vpop.f32.mrb[17].mxu1 }
 0x2cd   : > { %v4422_v47 = vadd.f32 %v4421_v55, %v4420_v6  ;;  %v4341_v0 = vpop.f32.mrb[18].mxu1 }
 0x2ce   : > { %v4501_v50 = vsel %vm3957_vm8, %v4455_v2, 0.0  ;;  %4375 = vst.msk [vmem:[%s8424_s8 + $0xb8] sm:$0xff] %vm3957_vm8, %v4341_v0  ;;  %v4423_v18 = vsel %vm3957_vm8, %v4341_v0, 0.0  ;;  %v4456_v35 = vmul.f32 %v4341_v0, %v4341_v0  ;;  %v4730_v37 = vpop.f32.mrb[19].mxu1 }
 0x2cf   : > { %v4502_v17 = vadd.f32 %v4501_v50, %v4500_v38  ;;  %v4424_v16 = vadd.f32 %v4423_v18, %v4422_v47 }
 0x2d0   : > { %v4503_v13 = vsel %vm3957_vm8, %v4456_v35, 0.0 }
 0x2d1   : > { %v4504_v45 = vadd.f32 %v4503_v13, %v4502_v17 }
 0x2d9   : > { %v4346_v4 = vpop.f32.mrb[20].mxu1 }
 0x2da   : > { %4377 = vst.msk [vmem:[%s8424_s8 + $0xc0] sm:$0xf] %vm4376_vm3, %v4346_v4  ;;  %v4425_v11 = vsel %vm4376_vm3, %v4346_v4, 0.0  ;;  %v4457_v32 = vmul.f32 %v4346_v4, %v4346_v4  ;;  %v4733_v34 = vpop.f32.mrb[21].mxu1 }
 0x2db   : > { %v4426_v27 = vadd.f32 %v4425_v11, %v4424_v16  ;;  %v4349_v21 = vpop.f32.mrb[22].mxu1 }
 0x2dc   : > { %v4505_v39 = vsel %vm4376_vm3, %v4457_v32, 0.0  ;;  %v4734_v20 = vpop.f32.mrb[23].mxu1 }
 0x2dd   : > { %v4427_v25 = vrot.slane %v4426_v27, 4  ;;  %v4506_v15 = vadd.f32 %v4505_v39, %v4504_v45 }
 0x2df   : > { %v4428_v58 = vadd.f32 %v4427_v25, %v4426_v27  ;;  %v4507_v63 = vrot.slane %v4506_v15, 4 }
 0x2e1   : > { %v4429_v49 = vrot.slane %v4428_v58, 2  ;;  %v4508_v33 = vadd.f32 %v4507_v63, %v4506_v15 }
 0x2e3   : > { %v4430_v42 = vadd.f32 %v4429_v49, %v4428_v58  ;;  %v4509_v23 = vrot.slane %v4508_v33, 2 }
 0x2e5   : > { %v4431_v40 = vrot.slane %v4430_v42, 1  ;;  %v4510_v31 = vadd.f32 %v4509_v23, %v4508_v33 }
 0x2e7   : > { %v4511_v43 = vrot.slane %v4510_v31, 1  ;;  %v4432_v10 = vadd.f32 %v4431_v40, %v4430_v42 }
 0x2e9   : > { %v4512_v57 = vadd.f32 %v4511_v43, %v4510_v31 }
 0x2eb   : > { %v4513_v26 = vsel %vm719_vm0, %v4432_v10, %v4512_v57 }
 0x2ec   : > { %4515 = vst.msk [vmem:[%s181_s14] sm:$0x3] %vm4514_vm4, %v4513_v26 }
 0x2ed PF: > { %s14_s12 = sadd.s32 1, %s5282_s12  }
 0x2ee   : > { %p11_p4 = scmp.ge.s32.totalorder %s14_s12, 4  }
 0x2f0   :  { %13 = sbr.rel (!%p11_p4) target bundleno = 1 (0x1), region = 70 }

</bundles_post_ra>
